<compile_context>
chip_gen: v6e
topology: v6e:2x2x1
jax: 0.10.0
libtpu: 0.0.40
codegen_flags: <defaults>
</compile_context>

<pallas_src>
import jax
import jax.numpy as jnp
from jax import lax
from jax.experimental import pallas as pl
from jax.experimental.pallas import tpu as pltpu


_LANE = 128   # batch lanes per grid step


def _round_up(n, m):
    return ((n + m - 1) // m) * m


def _conv_out(n, k, s, p):
    return (n + 2 * p - k) // s + 1


def _xavier_uniform(key, shape, fan_in, fan_out, dtype=jnp.float32):
    """torch.nn.init.xavier_uniform_ equivalent."""
    bound = (6.0 / (fan_in + fan_out)) ** 0.5
    return jax.random.uniform(key, shape, dtype=dtype, minval=-bound, maxval=bound)


# --------------------------------- Params ------------------------------------


def init_policy_params(key, state_shape, action_dim, hidden_units=(64, 64)):
    """Mirror CNNStateIndependentPolicy.init_weights: xavier_uniform_ weights,
    biases filled with 0.01, for every Conv2d / Linear layer."""
    c, h, w = state_shape
    k1, k2, k3, k4, k5 = jax.random.split(key, 5)

    # Assumed CNNHead (see TODO at top of file): (in_c, out_c, k, stride, pad).
    conv_defs = [(c, 32, 3, 2, 1), (32, 64, 3, 2, 1)]
    conv_params = []
    oh, ow = h, w
    last_oc = c
    for kkey, (ic, oc, ksz, stride, pad) in zip((k1, k2), conv_defs):
        fan_in = ic * ksz * ksz
        fan_out = oc * ksz * ksz
        wgt = _xavier_uniform(kkey, (oc, ic, ksz, ksz), fan_in, fan_out)
        bias = jnp.full((oc,), 0.01, dtype=jnp.float32)
        conv_params.append((wgt, bias, stride, pad))
        oh = _conv_out(oh, ksz, stride, pad)
        ow = _conv_out(ow, ksz, stride, pad)
        last_oc = oc
    feature_dim = last_oc * oh * ow

    hu1, hu2 = hidden_units
    w1 = _xavier_uniform(k3, (hu1, feature_dim), feature_dim, hu1)
    b1 = jnp.full((hu1,), 0.01, dtype=jnp.float32)
    w2 = _xavier_uniform(k4, (hu2, hu1), hu1, hu2)
    b2 = jnp.full((hu2,), 0.01, dtype=jnp.float32)
    w3 = _xavier_uniform(k5, (action_dim, hu2), hu2, action_dim)
    b3 = jnp.full((action_dim,), 0.01, dtype=jnp.float32)
    mlp_params = ((w1, b1), (w2, b2), (w3, b3))

    # log_stds is a module parameter but unused in forward(); kept for parity.
    log_stds = jnp.zeros((1, action_dim), dtype=jnp.float32)
    return (conv_params, mlp_params), log_stds


# ------------------------- Fused forward (Pallas) ----------------------------


def make_policy_forward(params, state_shape):
    """Returns a jitted forward(states) -> actions using one fused Pallas kernel."""
    conv_params, mlp_params = params
    (w1c, b1c, st1, pd1), (w2c, b2c, st2, pd2) = conv_params
    (w1m, b1m), (w2m, b2m), (w3m, b3m) = mlp_params

    c_in, h_in, w_in = state_shape
    oc1, _, kh1, kw1 = w1c.shape
    oc2, _, kh2, kw2 = w2c.shape
    oh1, ow1 = _conv_out(h_in, kh1, st1, pd1), _conv_out(w_in, kw1, st1, pd1)
    oh2, ow2 = _conv_out(oh1, kh2, st2, pd2), _conv_out(ow1, kw2, st2, pd2)
    n_pix1, n_pix2 = oh1 * ow1, oh2 * ow2
    k1 = c_in * kh1 * kw1
    k1p = _round_up(k1, 16)                 # bf16 sublane-packing alignment (36 -> 48)
    feat_dim = oc2 * n_pix2
    h1u, h2u = w1m.shape[0], w2m.shape[0]
    act_dim = w3m.shape[0]
    assert w1m.shape[1] == feat_dim

    # conv1 pixel-group size: pixels computed per block-diagonal matmul.
    grp = 8 if n_pix1 % 8 == 0 else (4 if n_pix1 % 4 == 0 else 1)
    n_grp = n_pix1 // grp

    # ---- one-time weight rearrangement + bf16 casts (resident in the kernel) ----
    w1_flat = jnp.pad(w1c.reshape(oc1, k1), ((0, 0), (0, k1p - k1)))
    w1_bd = jnp.kron(jnp.eye(grp, dtype=w1_flat.dtype), w1_flat).astype(jnp.bfloat16)
    b1_grp = jnp.tile(b1c, grp).reshape(grp * oc1, 1).astype(jnp.float32)

    # conv2 weight, columns ordered (tap-major, in-channel-minor) to match the
    # in-kernel tap concatenation.
    w2_r = jnp.transpose(w2c, (0, 2, 3, 1)).reshape(oc2, kh2 * kw2 * oc1)
    w2_r = w2_r.astype(jnp.bfloat16)
    b2_r = b2c.reshape(oc2, 1).astype(jnp.float32)

    # MLP layer-1 weight permuted from PyTorch's (channel-major, pixel-minor)
    # flatten order to the kernel's (pixel-major, channel-minor) feature order.
    w1m_p = jnp.transpose(w1m.reshape(h1u, oc2, n_pix2), (0, 2, 1)).reshape(h1u, feat_dim)
    w1m_p = w1m_p.astype(jnp.bfloat16)
    b1m_r = b1m.reshape(h1u, 1).astype(jnp.float32)
    w2m_b = w2m.astype(jnp.bfloat16)
    b2m_r = b2m.reshape(h2u, 1).astype(jnp.float32)
    w3m_b = w3m.astype(jnp.bfloat16)
    b3m_r = b3m.reshape(act_dim, 1).astype(jnp.float32)

    # --------------------------- fused kernel body ----------------------------
    def fused_kernel(x_ref, w1bd_ref, b1g_ref, w2r_ref, b2r_ref,
                     w1p_ref, b1m_ref, w2m_ref, b2m_ref, w3m_ref, b3m_ref,
                     o_ref):
        tb = x_ref.shape[-1]
        f32, bf16 = jnp.float32, jnp.bfloat16

        # conv1: block-diagonal matmul computes `grp` output pixels per dot.
        w1bd = w1bd_ref[...]
        b1g = b1g_ref[...]
        pix = []                                        # n_pix1 values [oc1, tb] bf16
        for g in range(n_grp):
            acc = jnp.dot(w1bd, x_ref[g], preferred_element_type=f32)
            yg = jnp.maximum(acc + b1g, 0.0).astype(bf16)       # [grp*oc1, tb]
            for i in range(grp):
                pix.append(yg[i * oc1:(i + 1) * oc1, :])

        # conv2 with in-kernel im2col: static tap selection + K-concat per pixel.
        zero_tap = jnp.zeros((oc1, tb), bf16)
        w2r = w2r_ref[...]
        b2r = b2r_ref[...]
        feats = []                                      # pixel-major feature pieces
        for y2 in range(oh2):
            for x2 in range(ow2):
                taps = []
                for ki in range(kh2):
                    for kj in range(kw2):
                        r = st2 * y2 + ki - pd2
                        s = st2 * x2 + kj - pd2
                        ok = (0 <= r < oh1) and (0 <= s < ow1)
                        taps.append(pix[r * ow1 + s] if ok else zero_tap)
                xcat = jnp.concatenate(taps, axis=0)            # [kh2*kw2*oc1, tb]
                acc2 = jnp.dot(w2r, xcat, preferred_element_type=f32)
                feats.append(jnp.maximum(acc2 + b2r, 0.0).astype(bf16))
        feat = jnp.concatenate(feats, axis=0)                   # [feat_dim, tb]

        # tanh MLP head (+ the module-level tanh on the output layer).
        h = jnp.tanh(jnp.dot(w1p_ref[...], feat,
                             preferred_element_type=f32) + b1m_ref[...])
        h = jnp.tanh(jnp.dot(w2m_ref[...], h.astype(bf16),
                             preferred_element_type=f32) + b2m_ref[...])
        o = jnp.tanh(jnp.dot(w3m_ref[...], h.astype(bf16),
                             preferred_element_type=f32) + b3m_ref[...])
        o_ref[...] = o.astype(o_ref.dtype)

    # ------------------------------- wrapper ----------------------------------
    def forward(states):
        bsz = states.shape[0]
        tb = _LANE
        b_pad = _round_up(max(bsz, 1), tb)

        # conv1 im2col, emitted directly in the [pixel-group, grp*K1p, batch]
        # bf16 layout the kernel consumes (no extra transpose pass).
        xp = jnp.pad(states, ((0, 0), (0, 0), (pd1, pd1), (pd1, pd1)))
        taps = []
        for ki in range(kh1):
            for kj in range(kw1):
                taps.append(xp[:, :, ki:ki + st1 * oh1:st1, kj:kj + st1 * ow1:st1])
        pat = jnp.stack(taps, axis=2).reshape(bsz, k1, n_pix1)   # K = c*kh*kw + tap
        pat = jnp.pad(pat, ((0, 0), (0, k1p - k1), (0, 0)))
        pat = jnp.transpose(pat, (2, 1, 0))                      # [P1, K1p, B]
        pat = jnp.pad(pat, ((0, 0), (0, 0), (0, b_pad - bsz)))
        pat = pat.reshape(n_grp, grp * k1p, b_pad).astype(jnp.bfloat16)

        cost = pl.CostEstimate(
            flops=int(2 * b_pad * (n_pix1 * oc1 * k1p * grp
                                   + n_pix2 * oc2 * kh2 * kw2 * oc1
                                   + h1u * feat_dim + h2u * h1u + act_dim * h2u)),
            transcendentals=int(b_pad * (h1u + h2u + act_dim)),
            bytes_accessed=int(pat.size * 2 + b_pad * act_dim * 4
                               + 2 * (w1_bd.size + w2_r.size + w1m_p.size
                                      + w2m_b.size + w3m_b.size)))

        res = lambda i: (0, 0)    # resident weights / biases (DMA'd once)
        out = pl.pallas_call(
            fused_kernel,
            out_shape=jax.ShapeDtypeStruct((act_dim, b_pad), jnp.float32),
            grid_spec=pltpu.PrefetchScalarGridSpec(
                num_scalar_prefetch=0,
                grid=(b_pad // tb,),
                in_specs=[
                    pl.BlockSpec((n_grp, grp * k1p, tb), lambda i: (0, 0, i)),
                    pl.BlockSpec(w1_bd.shape, res),
                    pl.BlockSpec(b1_grp.shape, res),
                    pl.BlockSpec(w2_r.shape, res),
                    pl.BlockSpec(b2_r.shape, res),
                    pl.BlockSpec(w1m_p.shape, res),
                    pl.BlockSpec(b1m_r.shape, res),
                    pl.BlockSpec(w2m_b.shape, res),
                    pl.BlockSpec(b2m_r.shape, res),
                    pl.BlockSpec(w3m_b.shape, res),
                    pl.BlockSpec(b3m_r.shape, res),
                ],
                out_specs=pl.BlockSpec((act_dim, tb), lambda i: (0, i)),
            ),
            compiler_params=pltpu.CompilerParams(
                dimension_semantics=("parallel",)),
            cost_estimate=cost,
        )(pat, w1_bd, b1_grp, w2_r, b2_r, w1m_p, b1m_r, w2m_b, b2m_r, w3m_b, b3m_r)
        return out[:, :bsz].T                                    # [B, action_dim]

    return jax.jit(forward)


# ---------------------------- Pure-JAX reference -----------------------------


def _reference_forward(states, params):
    """f32 end-to-end reference of the module semantics (XLA conv + dense MLP)."""
    conv_params, mlp_params = params
    x = states
    for (w, b, stride, pad) in conv_params:
        x = lax.conv_general_dilated(
            x, w, window_strides=(stride, stride),
            padding=[(pad, pad), (pad, pad)],
            dimension_numbers=("NCHW", "OIHW", "NCHW"))
        x = jnp.maximum(x + b.reshape(1, -1, 1, 1), 0.0)
    h = x.reshape(x.shape[0], -1)
    (w1, b1), (w2, b2), (w3, b3) = mlp_params
    h = jnp.tanh(h @ w1.T + b1)
    h = jnp.tanh(h @ w2.T + b2)
    return jnp.tanh(h @ w3.T + b3)


# ----------------------------------- Main -------------------------------------


if __name__ == "__main__":
    key = jax.random.PRNGKey(0)
    k_params, k_states = jax.random.split(key)

    batch = 2
    state_shape = (4, 16, 16)      # (C, H, W)
    action_dim = 8                 # action_shape = (8,)

    params, log_stds = init_policy_params(k_params, state_shape, action_dim)
    forward = make_policy_forward(params, state_shape)

    states = jax.random.normal(k_states, (batch,) + state_shape, dtype=jnp.float32)
    actions = jax.block_until_ready(forward(states))

    ref = _reference_forward(states, params)
    assert actions.shape == (batch, action_dim)
    assert bool(jnp.all(jnp.abs(actions) <= 1.0 + 1e-6))
    # bf16 matmul inputs with f32 accumulation -> relaxed tolerance vs f32 reference.
    max_err = float(jnp.max(jnp.abs(actions - ref)))
    assert jnp.allclose(actions, ref, atol=3e-2, rtol=3e-2), max_err

    print("KERNEL_OK")
</pallas_src>

<mosaic_0001>
module attributes {stable_mosaic.version = 11 : i64} {
  func.func @fused_kernel(%arg0: i32, %arg1: memref<8x384x128xbf16, #tpu.memory_space<vmem>>, %arg2: memref<256x384xbf16, #tpu.memory_space<vmem>>, %arg3: memref<256x1xf32, #tpu.memory_space<vmem>>, %arg4: memref<64x288xbf16, #tpu.memory_space<vmem>>, %arg5: memref<64x1xf32, #tpu.memory_space<vmem>>, %arg6: memref<64x1024xbf16, #tpu.memory_space<vmem>>, %arg7: memref<64x1xf32, #tpu.memory_space<vmem>>, %arg8: memref<64x64xbf16, #tpu.memory_space<vmem>>, %arg9: memref<64x1xf32, #tpu.memory_space<vmem>>, %arg10: memref<8x64xbf16, #tpu.memory_space<vmem>>, %arg11: memref<8x1xf32, #tpu.memory_space<vmem>>, %arg12: memref<8x128xf32, #tpu.memory_space<vmem>>) attributes {dimension_semantics = [#tpu.dimension_semantics<parallel>], iteration_bounds = array<i64: 1>, scalar_prefetch = 0 : i64, scratch_operands = 0 : i64, tpu.core_type = #tpu.core_type<tc>, window_params = [{transform_indices = @transform_0, window_bounds = array<i64: 8, 384, 128>}, {pipeline_mode = #tpu.pipeline_mode<synchronous>, transform_indices = @transform_1, window_bounds = array<i64: 256, 384>}, {pipeline_mode = #tpu.pipeline_mode<synchronous>, transform_indices = @transform_2, window_bounds = array<i64: 256, 1>}, {pipeline_mode = #tpu.pipeline_mode<synchronous>, transform_indices = @transform_3, window_bounds = array<i64: 64, 288>}, {pipeline_mode = #tpu.pipeline_mode<synchronous>, transform_indices = @transform_4, window_bounds = array<i64: 64, 1>}, {pipeline_mode = #tpu.pipeline_mode<synchronous>, transform_indices = @transform_5, window_bounds = array<i64: 64, 1024>}, {pipeline_mode = #tpu.pipeline_mode<synchronous>, transform_indices = @transform_6, window_bounds = array<i64: 64, 1>}, {pipeline_mode = #tpu.pipeline_mode<synchronous>, transform_indices = @transform_7, window_bounds = array<i64: 64, 64>}, {pipeline_mode = #tpu.pipeline_mode<synchronous>, transform_indices = @transform_8, window_bounds = array<i64: 64, 1>}, {pipeline_mode = #tpu.pipeline_mode<synchronous>, transform_indices = @transform_9, window_bounds = array<i64: 8, 64>}, {pipeline_mode = #tpu.pipeline_mode<synchronous>, transform_indices = @transform_10, window_bounds = array<i64: 8, 1>}, {transform_indices = @transform_11, window_bounds = array<i64: 8, 128>}]} {
    %c0 = arith.constant 0 : index
    %c0_0 = arith.constant 0 : index
    %0 = vector.load %arg2[%c0, %c0_0] : memref<256x384xbf16, #tpu.memory_space<vmem>>, vector<256x384xbf16>
    %c0_1 = arith.constant 0 : index
    %c0_2 = arith.constant 0 : index
    %1 = vector.load %arg3[%c0_1, %c0_2] : memref<256x1xf32, #tpu.memory_space<vmem>>, vector<256x1xf32>
    %c0_3 = arith.constant 0 : index
    %c0_4 = arith.constant 0 : index
    %c0_5 = arith.constant 0 : index
    %2 = vector.load %arg1[%c0_3, %c0_4, %c0_5] : memref<8x384x128xbf16, #tpu.memory_space<vmem>>, vector<1x384x128xbf16>
    %3 = vector.shape_cast %2 : vector<1x384x128xbf16> to vector<384x128xbf16>
    %cst = arith.constant dense<0.000000e+00> : vector<256x128xf32>
    %4 = tpu.matmul %0, %3, %cst {dimension_numbers = #tpu.dot_dimension_numbers<[1], [0], [0], [1], [0, 0, 1, 1], [], []>} : vector<256x384xbf16>, vector<384x128xbf16>, vector<256x128xf32> -> vector<256x128xf32>
    %5 = vector.broadcast %1 : vector<256x1xf32> to vector<256x128xf32>
    %6 = arith.addf %4, %5 : vector<256x128xf32>
    %cst_6 = arith.constant 0.000000e+00 : f32
    %7 = vector.broadcast %cst_6 : f32 to vector<256x128xf32>
    %8 = arith.maximumf %6, %7 : vector<256x128xf32>
    %9 = arith.truncf %8 : vector<256x128xf32> to vector<256x128xbf16>
    %10 = vector.extract_strided_slice %9 {offsets = [0, 0], sizes = [32, 128], strides = [1, 1]} : vector<256x128xbf16> to vector<32x128xbf16>
    %11 = vector.extract_strided_slice %9 {offsets = [32, 0], sizes = [32, 128], strides = [1, 1]} : vector<256x128xbf16> to vector<32x128xbf16>
    %12 = vector.extract_strided_slice %9 {offsets = [64, 0], sizes = [32, 128], strides = [1, 1]} : vector<256x128xbf16> to vector<32x128xbf16>
    %13 = vector.extract_strided_slice %9 {offsets = [96, 0], sizes = [32, 128], strides = [1, 1]} : vector<256x128xbf16> to vector<32x128xbf16>
    %14 = vector.extract_strided_slice %9 {offsets = [128, 0], sizes = [32, 128], strides = [1, 1]} : vector<256x128xbf16> to vector<32x128xbf16>
    %15 = vector.extract_strided_slice %9 {offsets = [160, 0], sizes = [32, 128], strides = [1, 1]} : vector<256x128xbf16> to vector<32x128xbf16>
    %16 = vector.extract_strided_slice %9 {offsets = [192, 0], sizes = [32, 128], strides = [1, 1]} : vector<256x128xbf16> to vector<32x128xbf16>
    %17 = vector.extract_strided_slice %9 {offsets = [224, 0], sizes = [32, 128], strides = [1, 1]} : vector<256x128xbf16> to vector<32x128xbf16>
    %c1 = arith.constant 1 : index
    %c0_7 = arith.constant 0 : index
    %c0_8 = arith.constant 0 : index
    %18 = vector.load %arg1[%c1, %c0_7, %c0_8] : memref<8x384x128xbf16, #tpu.memory_space<vmem>>, vector<1x384x128xbf16>
    %19 = vector.shape_cast %18 : vector<1x384x128xbf16> to vector<384x128xbf16>
    %cst_9 = arith.constant dense<0.000000e+00> : vector<256x128xf32>
    %20 = tpu.matmul %0, %19, %cst_9 {dimension_numbers = #tpu.dot_dimension_numbers<[1], [0], [0], [1], [0, 0, 1, 1], [], []>} : vector<256x384xbf16>, vector<384x128xbf16>, vector<256x128xf32> -> vector<256x128xf32>
    %21 = vector.broadcast %1 : vector<256x1xf32> to vector<256x128xf32>
    %22 = arith.addf %20, %21 : vector<256x128xf32>
    %cst_10 = arith.constant 0.000000e+00 : f32
    %23 = vector.broadcast %cst_10 : f32 to vector<256x128xf32>
    %24 = arith.maximumf %22, %23 : vector<256x128xf32>
    %25 = arith.truncf %24 : vector<256x128xf32> to vector<256x128xbf16>
    %26 = vector.extract_strided_slice %25 {offsets = [0, 0], sizes = [32, 128], strides = [1, 1]} : vector<256x128xbf16> to vector<32x128xbf16>
    %27 = vector.extract_strided_slice %25 {offsets = [32, 0], sizes = [32, 128], strides = [1, 1]} : vector<256x128xbf16> to vector<32x128xbf16>
    %28 = vector.extract_strided_slice %25 {offsets = [64, 0], sizes = [32, 128], strides = [1, 1]} : vector<256x128xbf16> to vector<32x128xbf16>
    %29 = vector.extract_strided_slice %25 {offsets = [96, 0], sizes = [32, 128], strides = [1, 1]} : vector<256x128xbf16> to vector<32x128xbf16>
    %30 = vector.extract_strided_slice %25 {offsets = [128, 0], sizes = [32, 128], strides = [1, 1]} : vector<256x128xbf16> to vector<32x128xbf16>
    %31 = vector.extract_strided_slice %25 {offsets = [160, 0], sizes = [32, 128], strides = [1, 1]} : vector<256x128xbf16> to vector<32x128xbf16>
    %32 = vector.extract_strided_slice %25 {offsets = [192, 0], sizes = [32, 128], strides = [1, 1]} : vector<256x128xbf16> to vector<32x128xbf16>
    %33 = vector.extract_strided_slice %25 {offsets = [224, 0], sizes = [32, 128], strides = [1, 1]} : vector<256x128xbf16> to vector<32x128xbf16>
    %c2 = arith.constant 2 : index
    %c0_11 = arith.constant 0 : index
    %c0_12 = arith.constant 0 : index
    %34 = vector.load %arg1[%c2, %c0_11, %c0_12] : memref<8x384x128xbf16, #tpu.memory_space<vmem>>, vector<1x384x128xbf16>
    %35 = vector.shape_cast %34 : vector<1x384x128xbf16> to vector<384x128xbf16>
    %cst_13 = arith.constant dense<0.000000e+00> : vector<256x128xf32>
    %36 = tpu.matmul %0, %35, %cst_13 {dimension_numbers = #tpu.dot_dimension_numbers<[1], [0], [0], [1], [0, 0, 1, 1], [], []>} : vector<256x384xbf16>, vector<384x128xbf16>, vector<256x128xf32> -> vector<256x128xf32>
    %37 = vector.broadcast %1 : vector<256x1xf32> to vector<256x128xf32>
    %38 = arith.addf %36, %37 : vector<256x128xf32>
    %cst_14 = arith.constant 0.000000e+00 : f32
    %39 = vector.broadcast %cst_14 : f32 to vector<256x128xf32>
    %40 = arith.maximumf %38, %39 : vector<256x128xf32>
    %41 = arith.truncf %40 : vector<256x128xf32> to vector<256x128xbf16>
    %42 = vector.extract_strided_slice %41 {offsets = [0, 0], sizes = [32, 128], strides = [1, 1]} : vector<256x128xbf16> to vector<32x128xbf16>
    %43 = vector.extract_strided_slice %41 {offsets = [32, 0], sizes = [32, 128], strides = [1, 1]} : vector<256x128xbf16> to vector<32x128xbf16>
    %44 = vector.extract_strided_slice %41 {offsets = [64, 0], sizes = [32, 128], strides = [1, 1]} : vector<256x128xbf16> to vector<32x128xbf16>
    %45 = vector.extract_strided_slice %41 {offsets = [96, 0], sizes = [32, 128], strides = [1, 1]} : vector<256x128xbf16> to vector<32x128xbf16>
    %46 = vector.extract_strided_slice %41 {offsets = [128, 0], sizes = [32, 128], strides = [1, 1]} : vector<256x128xbf16> to vector<32x128xbf16>
    %47 = vector.extract_strided_slice %41 {offsets = [160, 0], sizes = [32, 128], strides = [1, 1]} : vector<256x128xbf16> to vector<32x128xbf16>
    %48 = vector.extract_strided_slice %41 {offsets = [192, 0], sizes = [32, 128], strides = [1, 1]} : vector<256x128xbf16> to vector<32x128xbf16>
    %49 = vector.extract_strided_slice %41 {offsets = [224, 0], sizes = [32, 128], strides = [1, 1]} : vector<256x128xbf16> to vector<32x128xbf16>
    %c3 = arith.constant 3 : index
    %c0_15 = arith.constant 0 : index
    %c0_16 = arith.constant 0 : index
    %50 = vector.load %arg1[%c3, %c0_15, %c0_16] : memref<8x384x128xbf16, #tpu.memory_space<vmem>>, vector<1x384x128xbf16>
    %51 = vector.shape_cast %50 : vector<1x384x128xbf16> to vector<384x128xbf16>
    %cst_17 = arith.constant dense<0.000000e+00> : vector<256x128xf32>
    %52 = tpu.matmul %0, %51, %cst_17 {dimension_numbers = #tpu.dot_dimension_numbers<[1], [0], [0], [1], [0, 0, 1, 1], [], []>} : vector<256x384xbf16>, vector<384x128xbf16>, vector<256x128xf32> -> vector<256x128xf32>
    %53 = vector.broadcast %1 : vector<256x1xf32> to vector<256x128xf32>
    %54 = arith.addf %52, %53 : vector<256x128xf32>
    %cst_18 = arith.constant 0.000000e+00 : f32
    %55 = vector.broadcast %cst_18 : f32 to vector<256x128xf32>
    %56 = arith.maximumf %54, %55 : vector<256x128xf32>
    %57 = arith.truncf %56 : vector<256x128xf32> to vector<256x128xbf16>
    %58 = vector.extract_strided_slice %57 {offsets = [0, 0], sizes = [32, 128], strides = [1, 1]} : vector<256x128xbf16> to vector<32x128xbf16>
    %59 = vector.extract_strided_slice %57 {offsets = [32, 0], sizes = [32, 128], strides = [1, 1]} : vector<256x128xbf16> to vector<32x128xbf16>
    %60 = vector.extract_strided_slice %57 {offsets = [64, 0], sizes = [32, 128], strides = [1, 1]} : vector<256x128xbf16> to vector<32x128xbf16>
    %61 = vector.extract_strided_slice %57 {offsets = [96, 0], sizes = [32, 128], strides = [1, 1]} : vector<256x128xbf16> to vector<32x128xbf16>
    %62 = vector.extract_strided_slice %57 {offsets = [128, 0], sizes = [32, 128], strides = [1, 1]} : vector<256x128xbf16> to vector<32x128xbf16>
    %63 = vector.extract_strided_slice %57 {offsets = [160, 0], sizes = [32, 128], strides = [1, 1]} : vector<256x128xbf16> to vector<32x128xbf16>
    %64 = vector.extract_strided_slice %57 {offsets = [192, 0], sizes = [32, 128], strides = [1, 1]} : vector<256x128xbf16> to vector<32x128xbf16>
    %65 = vector.extract_strided_slice %57 {offsets = [224, 0], sizes = [32, 128], strides = [1, 1]} : vector<256x128xbf16> to vector<32x128xbf16>
    %c4 = arith.constant 4 : index
    %c0_19 = arith.constant 0 : index
    %c0_20 = arith.constant 0 : index
    %66 = vector.load %arg1[%c4, %c0_19, %c0_20] : memref<8x384x128xbf16, #tpu.memory_space<vmem>>, vector<1x384x128xbf16>
    %67 = vector.shape_cast %66 : vector<1x384x128xbf16> to vector<384x128xbf16>
    %cst_21 = arith.constant dense<0.000000e+00> : vector<256x128xf32>
    %68 = tpu.matmul %0, %67, %cst_21 {dimension_numbers = #tpu.dot_dimension_numbers<[1], [0], [0], [1], [0, 0, 1, 1], [], []>} : vector<256x384xbf16>, vector<384x128xbf16>, vector<256x128xf32> -> vector<256x128xf32>
    %69 = vector.broadcast %1 : vector<256x1xf32> to vector<256x128xf32>
    %70 = arith.addf %68, %69 : vector<256x128xf32>
    %cst_22 = arith.constant 0.000000e+00 : f32
    %71 = vector.broadcast %cst_22 : f32 to vector<256x128xf32>
    %72 = arith.maximumf %70, %71 : vector<256x128xf32>
    %73 = arith.truncf %72 : vector<256x128xf32> to vector<256x128xbf16>
    %74 = vector.extract_strided_slice %73 {offsets = [0, 0], sizes = [32, 128], strides = [1, 1]} : vector<256x128xbf16> to vector<32x128xbf16>
    %75 = vector.extract_strided_slice %73 {offsets = [32, 0], sizes = [32, 128], strides = [1, 1]} : vector<256x128xbf16> to vector<32x128xbf16>
    %76 = vector.extract_strided_slice %73 {offsets = [64, 0], sizes = [32, 128], strides = [1, 1]} : vector<256x128xbf16> to vector<32x128xbf16>
    %77 = vector.extract_strided_slice %73 {offsets = [96, 0], sizes = [32, 128], strides = [1, 1]} : vector<256x128xbf16> to vector<32x128xbf16>
    %78 = vector.extract_strided_slice %73 {offsets = [128, 0], sizes = [32, 128], strides = [1, 1]} : vector<256x128xbf16> to vector<32x128xbf16>
    %79 = vector.extract_strided_slice %73 {offsets = [160, 0], sizes = [32, 128], strides = [1, 1]} : vector<256x128xbf16> to vector<32x128xbf16>
    %80 = vector.extract_strided_slice %73 {offsets = [192, 0], sizes = [32, 128], strides = [1, 1]} : vector<256x128xbf16> to vector<32x128xbf16>
    %81 = vector.extract_strided_slice %73 {offsets = [224, 0], sizes = [32, 128], strides = [1, 1]} : vector<256x128xbf16> to vector<32x128xbf16>
    %c5 = arith.constant 5 : index
    %c0_23 = arith.constant 0 : index
    %c0_24 = arith.constant 0 : index
    %82 = vector.load %arg1[%c5, %c0_23, %c0_24] : memref<8x384x128xbf16, #tpu.memory_space<vmem>>, vector<1x384x128xbf16>
    %83 = vector.shape_cast %82 : vector<1x384x128xbf16> to vector<384x128xbf16>
    %cst_25 = arith.constant dense<0.000000e+00> : vector<256x128xf32>
    %84 = tpu.matmul %0, %83, %cst_25 {dimension_numbers = #tpu.dot_dimension_numbers<[1], [0], [0], [1], [0, 0, 1, 1], [], []>} : vector<256x384xbf16>, vector<384x128xbf16>, vector<256x128xf32> -> vector<256x128xf32>
    %85 = vector.broadcast %1 : vector<256x1xf32> to vector<256x128xf32>
    %86 = arith.addf %84, %85 : vector<256x128xf32>
    %cst_26 = arith.constant 0.000000e+00 : f32
    %87 = vector.broadcast %cst_26 : f32 to vector<256x128xf32>
    %88 = arith.maximumf %86, %87 : vector<256x128xf32>
    %89 = arith.truncf %88 : vector<256x128xf32> to vector<256x128xbf16>
    %90 = vector.extract_strided_slice %89 {offsets = [0, 0], sizes = [32, 128], strides = [1, 1]} : vector<256x128xbf16> to vector<32x128xbf16>
    %91 = vector.extract_strided_slice %89 {offsets = [32, 0], sizes = [32, 128], strides = [1, 1]} : vector<256x128xbf16> to vector<32x128xbf16>
    %92 = vector.extract_strided_slice %89 {offsets = [64, 0], sizes = [32, 128], strides = [1, 1]} : vector<256x128xbf16> to vector<32x128xbf16>
    %93 = vector.extract_strided_slice %89 {offsets = [96, 0], sizes = [32, 128], strides = [1, 1]} : vector<256x128xbf16> to vector<32x128xbf16>
    %94 = vector.extract_strided_slice %89 {offsets = [128, 0], sizes = [32, 128], strides = [1, 1]} : vector<256x128xbf16> to vector<32x128xbf16>
    %95 = vector.extract_strided_slice %89 {offsets = [160, 0], sizes = [32, 128], strides = [1, 1]} : vector<256x128xbf16> to vector<32x128xbf16>
    %96 = vector.extract_strided_slice %89 {offsets = [192, 0], sizes = [32, 128], strides = [1, 1]} : vector<256x128xbf16> to vector<32x128xbf16>
    %97 = vector.extract_strided_slice %89 {offsets = [224, 0], sizes = [32, 128], strides = [1, 1]} : vector<256x128xbf16> to vector<32x128xbf16>
    %c6 = arith.constant 6 : index
    %c0_27 = arith.constant 0 : index
    %c0_28 = arith.constant 0 : index
    %98 = vector.load %arg1[%c6, %c0_27, %c0_28] : memref<8x384x128xbf16, #tpu.memory_space<vmem>>, vector<1x384x128xbf16>
    %99 = vector.shape_cast %98 : vector<1x384x128xbf16> to vector<384x128xbf16>
    %cst_29 = arith.constant dense<0.000000e+00> : vector<256x128xf32>
    %100 = tpu.matmul %0, %99, %cst_29 {dimension_numbers = #tpu.dot_dimension_numbers<[1], [0], [0], [1], [0, 0, 1, 1], [], []>} : vector<256x384xbf16>, vector<384x128xbf16>, vector<256x128xf32> -> vector<256x128xf32>
    %101 = vector.broadcast %1 : vector<256x1xf32> to vector<256x128xf32>
    %102 = arith.addf %100, %101 : vector<256x128xf32>
    %cst_30 = arith.constant 0.000000e+00 : f32
    %103 = vector.broadcast %cst_30 : f32 to vector<256x128xf32>
    %104 = arith.maximumf %102, %103 : vector<256x128xf32>
    %105 = arith.truncf %104 : vector<256x128xf32> to vector<256x128xbf16>
    %106 = vector.extract_strided_slice %105 {offsets = [0, 0], sizes = [32, 128], strides = [1, 1]} : vector<256x128xbf16> to vector<32x128xbf16>
    %107 = vector.extract_strided_slice %105 {offsets = [32, 0], sizes = [32, 128], strides = [1, 1]} : vector<256x128xbf16> to vector<32x128xbf16>
    %108 = vector.extract_strided_slice %105 {offsets = [64, 0], sizes = [32, 128], strides = [1, 1]} : vector<256x128xbf16> to vector<32x128xbf16>
    %109 = vector.extract_strided_slice %105 {offsets = [96, 0], sizes = [32, 128], strides = [1, 1]} : vector<256x128xbf16> to vector<32x128xbf16>
    %110 = vector.extract_strided_slice %105 {offsets = [128, 0], sizes = [32, 128], strides = [1, 1]} : vector<256x128xbf16> to vector<32x128xbf16>
    %111 = vector.extract_strided_slice %105 {offsets = [160, 0], sizes = [32, 128], strides = [1, 1]} : vector<256x128xbf16> to vector<32x128xbf16>
    %112 = vector.extract_strided_slice %105 {offsets = [192, 0], sizes = [32, 128], strides = [1, 1]} : vector<256x128xbf16> to vector<32x128xbf16>
    %113 = vector.extract_strided_slice %105 {offsets = [224, 0], sizes = [32, 128], strides = [1, 1]} : vector<256x128xbf16> to vector<32x128xbf16>
    %c7 = arith.constant 7 : index
    %c0_31 = arith.constant 0 : index
    %c0_32 = arith.constant 0 : index
    %114 = vector.load %arg1[%c7, %c0_31, %c0_32] : memref<8x384x128xbf16, #tpu.memory_space<vmem>>, vector<1x384x128xbf16>
    %115 = vector.shape_cast %114 : vector<1x384x128xbf16> to vector<384x128xbf16>
    %cst_33 = arith.constant dense<0.000000e+00> : vector<256x128xf32>
    %116 = tpu.matmul %0, %115, %cst_33 {dimension_numbers = #tpu.dot_dimension_numbers<[1], [0], [0], [1], [0, 0, 1, 1], [], []>} : vector<256x384xbf16>, vector<384x128xbf16>, vector<256x128xf32> -> vector<256x128xf32>
    %117 = vector.broadcast %1 : vector<256x1xf32> to vector<256x128xf32>
    %118 = arith.addf %116, %117 : vector<256x128xf32>
    %cst_34 = arith.constant 0.000000e+00 : f32
    %119 = vector.broadcast %cst_34 : f32 to vector<256x128xf32>
    %120 = arith.maximumf %118, %119 : vector<256x128xf32>
    %121 = arith.truncf %120 : vector<256x128xf32> to vector<256x128xbf16>
    %122 = vector.extract_strided_slice %121 {offsets = [0, 0], sizes = [32, 128], strides = [1, 1]} : vector<256x128xbf16> to vector<32x128xbf16>
    %123 = vector.extract_strided_slice %121 {offsets = [32, 0], sizes = [32, 128], strides = [1, 1]} : vector<256x128xbf16> to vector<32x128xbf16>
    %124 = vector.extract_strided_slice %121 {offsets = [64, 0], sizes = [32, 128], strides = [1, 1]} : vector<256x128xbf16> to vector<32x128xbf16>
    %125 = vector.extract_strided_slice %121 {offsets = [96, 0], sizes = [32, 128], strides = [1, 1]} : vector<256x128xbf16> to vector<32x128xbf16>
    %126 = vector.extract_strided_slice %121 {offsets = [128, 0], sizes = [32, 128], strides = [1, 1]} : vector<256x128xbf16> to vector<32x128xbf16>
    %127 = vector.extract_strided_slice %121 {offsets = [160, 0], sizes = [32, 128], strides = [1, 1]} : vector<256x128xbf16> to vector<32x128xbf16>
    %128 = vector.extract_strided_slice %121 {offsets = [192, 0], sizes = [32, 128], strides = [1, 1]} : vector<256x128xbf16> to vector<32x128xbf16>
    %129 = vector.extract_strided_slice %121 {offsets = [224, 0], sizes = [32, 128], strides = [1, 1]} : vector<256x128xbf16> to vector<32x128xbf16>
    %cst_35 = arith.constant 0.000000e+00 : bf16
    %130 = vector.broadcast %cst_35 : bf16 to vector<32x128xbf16>
    %c0_36 = arith.constant 0 : index
    %c0_37 = arith.constant 0 : index
    %131 = vector.load %arg4[%c0_36, %c0_37] : memref<64x288xbf16, #tpu.memory_space<vmem>>, vector<64x288xbf16>
    %c0_38 = arith.constant 0 : index
    %c0_39 = arith.constant 0 : index
    %132 = vector.load %arg5[%c0_38, %c0_39] : memref<64x1xf32, #tpu.memory_space<vmem>>, vector<64x1xf32>
    %133 = tpu.concatenate %130, %130, %130, %130, %10, %11, %130, %26, %27 in 0 : vector<32x128xbf16>, vector<32x128xbf16>, vector<32x128xbf16>, vector<32x128xbf16>, vector<32x128xbf16>, vector<32x128xbf16>, vector<32x128xbf16>, vector<32x128xbf16>, vector<32x128xbf16> -> vector<288x128xbf16>
    %cst_40 = arith.constant dense<0.000000e+00> : vector<64x128xf32>
    %134 = tpu.matmul %131, %133, %cst_40 {dimension_numbers = #tpu.dot_dimension_numbers<[1], [0], [0], [1], [0, 0, 1, 1], [], []>} : vector<64x288xbf16>, vector<288x128xbf16>, vector<64x128xf32> -> vector<64x128xf32>
    %135 = vector.broadcast %132 : vector<64x1xf32> to vector<64x128xf32>
    %136 = arith.addf %134, %135 : vector<64x128xf32>
    %cst_41 = arith.constant 0.000000e+00 : f32
    %137 = vector.broadcast %cst_41 : f32 to vector<64x128xf32>
    %138 = arith.maximumf %136, %137 : vector<64x128xf32>
    %139 = arith.truncf %138 : vector<64x128xf32> to vector<64x128xbf16>
    %140 = tpu.concatenate %130, %130, %130, %11, %12, %13, %27, %28, %29 in 0 : vector<32x128xbf16>, vector<32x128xbf16>, vector<32x128xbf16>, vector<32x128xbf16>, vector<32x128xbf16>, vector<32x128xbf16>, vector<32x128xbf16>, vector<32x128xbf16>, vector<32x128xbf16> -> vector<288x128xbf16>
    %cst_42 = arith.constant dense<0.000000e+00> : vector<64x128xf32>
    %141 = tpu.matmul %131, %140, %cst_42 {dimension_numbers = #tpu.dot_dimension_numbers<[1], [0], [0], [1], [0, 0, 1, 1], [], []>} : vector<64x288xbf16>, vector<288x128xbf16>, vector<64x128xf32> -> vector<64x128xf32>
    %142 = vector.broadcast %132 : vector<64x1xf32> to vector<64x128xf32>
    %143 = arith.addf %141, %142 : vector<64x128xf32>
    %cst_43 = arith.constant 0.000000e+00 : f32
    %144 = vector.broadcast %cst_43 : f32 to vector<64x128xf32>
    %145 = arith.maximumf %143, %144 : vector<64x128xf32>
    %146 = arith.truncf %145 : vector<64x128xf32> to vector<64x128xbf16>
    %147 = tpu.concatenate %130, %130, %130, %13, %14, %15, %29, %30, %31 in 0 : vector<32x128xbf16>, vector<32x128xbf16>, vector<32x128xbf16>, vector<32x128xbf16>, vector<32x128xbf16>, vector<32x128xbf16>, vector<32x128xbf16>, vector<32x128xbf16>, vector<32x128xbf16> -> vector<288x128xbf16>
    %cst_44 = arith.constant dense<0.000000e+00> : vector<64x128xf32>
    %148 = tpu.matmul %131, %147, %cst_44 {dimension_numbers = #tpu.dot_dimension_numbers<[1], [0], [0], [1], [0, 0, 1, 1], [], []>} : vector<64x288xbf16>, vector<288x128xbf16>, vector<64x128xf32> -> vector<64x128xf32>
    %149 = vector.broadcast %132 : vector<64x1xf32> to vector<64x128xf32>
    %150 = arith.addf %148, %149 : vector<64x128xf32>
    %cst_45 = arith.constant 0.000000e+00 : f32
    %151 = vector.broadcast %cst_45 : f32 to vector<64x128xf32>
    %152 = arith.maximumf %150, %151 : vector<64x128xf32>
    %153 = arith.truncf %152 : vector<64x128xf32> to vector<64x128xbf16>
    %154 = tpu.concatenate %130, %130, %130, %15, %16, %17, %31, %32, %33 in 0 : vector<32x128xbf16>, vector<32x128xbf16>, vector<32x128xbf16>, vector<32x128xbf16>, vector<32x128xbf16>, vector<32x128xbf16>, vector<32x128xbf16>, vector<32x128xbf16>, vector<32x128xbf16> -> vector<288x128xbf16>
    %cst_46 = arith.constant dense<0.000000e+00> : vector<64x128xf32>
    %155 = tpu.matmul %131, %154, %cst_46 {dimension_numbers = #tpu.dot_dimension_numbers<[1], [0], [0], [1], [0, 0, 1, 1], [], []>} : vector<64x288xbf16>, vector<288x128xbf16>, vector<64x128xf32> -> vector<64x128xf32>
    %156 = vector.broadcast %132 : vector<64x1xf32> to vector<64x128xf32>
    %157 = arith.addf %155, %156 : vector<64x128xf32>
    %cst_47 = arith.constant 0.000000e+00 : f32
    %158 = vector.broadcast %cst_47 : f32 to vector<64x128xf32>
    %159 = arith.maximumf %157, %158 : vector<64x128xf32>
    %160 = arith.truncf %159 : vector<64x128xf32> to vector<64x128xbf16>
    %161 = tpu.concatenate %130, %26, %27, %130, %42, %43, %130, %58, %59 in 0 : vector<32x128xbf16>, vector<32x128xbf16>, vector<32x128xbf16>, vector<32x128xbf16>, vector<32x128xbf16>, vector<32x128xbf16>, vector<32x128xbf16>, vector<32x128xbf16>, vector<32x128xbf16> -> vector<288x128xbf16>
    %cst_48 = arith.constant dense<0.000000e+00> : vector<64x128xf32>
    %162 = tpu.matmul %131, %161, %cst_48 {dimension_numbers = #tpu.dot_dimension_numbers<[1], [0], [0], [1], [0, 0, 1, 1], [], []>} : vector<64x288xbf16>, vector<288x128xbf16>, vector<64x128xf32> -> vector<64x128xf32>
    %163 = vector.broadcast %132 : vector<64x1xf32> to vector<64x128xf32>
    %164 = arith.addf %162, %163 : vector<64x128xf32>
    %cst_49 = arith.constant 0.000000e+00 : f32
    %165 = vector.broadcast %cst_49 : f32 to vector<64x128xf32>
    %166 = arith.maximumf %164, %165 : vector<64x128xf32>
    %167 = arith.truncf %166 : vector<64x128xf32> to vector<64x128xbf16>
    %168 = tpu.concatenate %27, %28, %29, %43, %44, %45, %59, %60, %61 in 0 : vector<32x128xbf16>, vector<32x128xbf16>, vector<32x128xbf16>, vector<32x128xbf16>, vector<32x128xbf16>, vector<32x128xbf16>, vector<32x128xbf16>, vector<32x128xbf16>, vector<32x128xbf16> -> vector<288x128xbf16>
    %cst_50 = arith.constant dense<0.000000e+00> : vector<64x128xf32>
    %169 = tpu.matmul %131, %168, %cst_50 {dimension_numbers = #tpu.dot_dimension_numbers<[1], [0], [0], [1], [0, 0, 1, 1], [], []>} : vector<64x288xbf16>, vector<288x128xbf16>, vector<64x128xf32> -> vector<64x128xf32>
    %170 = vector.broadcast %132 : vector<64x1xf32> to vector<64x128xf32>
    %171 = arith.addf %169, %170 : vector<64x128xf32>
    %cst_51 = arith.constant 0.000000e+00 : f32
    %172 = vector.broadcast %cst_51 : f32 to vector<64x128xf32>
    %173 = arith.maximumf %171, %172 : vector<64x128xf32>
    %174 = arith.truncf %173 : vector<64x128xf32> to vector<64x128xbf16>
    %175 = tpu.concatenate %29, %30, %31, %45, %46, %47, %61, %62, %63 in 0 : vector<32x128xbf16>, vector<32x128xbf16>, vector<32x128xbf16>, vector<32x128xbf16>, vector<32x128xbf16>, vector<32x128xbf16>, vector<32x128xbf16>, vector<32x128xbf16>, vector<32x128xbf16> -> vector<288x128xbf16>
    %cst_52 = arith.constant dense<0.000000e+00> : vector<64x128xf32>
    %176 = tpu.matmul %131, %175, %cst_52 {dimension_numbers = #tpu.dot_dimension_numbers<[1], [0], [0], [1], [0, 0, 1, 1], [], []>} : vector<64x288xbf16>, vector<288x128xbf16>, vector<64x128xf32> -> vector<64x128xf32>
    %177 = vector.broadcast %132 : vector<64x1xf32> to vector<64x128xf32>
    %178 = arith.addf %176, %177 : vector<64x128xf32>
    %cst_53 = arith.constant 0.000000e+00 : f32
    %179 = vector.broadcast %cst_53 : f32 to vector<64x128xf32>
    %180 = arith.maximumf %178, %179 : vector<64x128xf32>
    %181 = arith.truncf %180 : vector<64x128xf32> to vector<64x128xbf16>
    %182 = tpu.concatenate %31, %32, %33, %47, %48, %49, %63, %64, %65 in 0 : vector<32x128xbf16>, vector<32x128xbf16>, vector<32x128xbf16>, vector<32x128xbf16>, vector<32x128xbf16>, vector<32x128xbf16>, vector<32x128xbf16>, vector<32x128xbf16>, vector<32x128xbf16> -> vector<288x128xbf16>
    %cst_54 = arith.constant dense<0.000000e+00> : vector<64x128xf32>
    %183 = tpu.matmul %131, %182, %cst_54 {dimension_numbers = #tpu.dot_dimension_numbers<[1], [0], [0], [1], [0, 0, 1, 1], [], []>} : vector<64x288xbf16>, vector<288x128xbf16>, vector<64x128xf32> -> vector<64x128xf32>
    %184 = vector.broadcast %132 : vector<64x1xf32> to vector<64x128xf32>
    %185 = arith.addf %183, %184 : vector<64x128xf32>
    %cst_55 = arith.constant 0.000000e+00 : f32
    %186 = vector.broadcast %cst_55 : f32 to vector<64x128xf32>
    %187 = arith.maximumf %185, %186 : vector<64x128xf32>
    %188 = arith.truncf %187 : vector<64x128xf32> to vector<64x128xbf16>
    %189 = tpu.concatenate %130, %58, %59, %130, %74, %75, %130, %90, %91 in 0 : vector<32x128xbf16>, vector<32x128xbf16>, vector<32x128xbf16>, vector<32x128xbf16>, vector<32x128xbf16>, vector<32x128xbf16>, vector<32x128xbf16>, vector<32x128xbf16>, vector<32x128xbf16> -> vector<288x128xbf16>
    %cst_56 = arith.constant dense<0.000000e+00> : vector<64x128xf32>
    %190 = tpu.matmul %131, %189, %cst_56 {dimension_numbers = #tpu.dot_dimension_numbers<[1], [0], [0], [1], [0, 0, 1, 1], [], []>} : vector<64x288xbf16>, vector<288x128xbf16>, vector<64x128xf32> -> vector<64x128xf32>
    %191 = vector.broadcast %132 : vector<64x1xf32> to vector<64x128xf32>
    %192 = arith.addf %190, %191 : vector<64x128xf32>
    %cst_57 = arith.constant 0.000000e+00 : f32
    %193 = vector.broadcast %cst_57 : f32 to vector<64x128xf32>
    %194 = arith.maximumf %192, %193 : vector<64x128xf32>
    %195 = arith.truncf %194 : vector<64x128xf32> to vector<64x128xbf16>
    %196 = tpu.concatenate %59, %60, %61, %75, %76, %77, %91, %92, %93 in 0 : vector<32x128xbf16>, vector<32x128xbf16>, vector<32x128xbf16>, vector<32x128xbf16>, vector<32x128xbf16>, vector<32x128xbf16>, vector<32x128xbf16>, vector<32x128xbf16>, vector<32x128xbf16> -> vector<288x128xbf16>
    %cst_58 = arith.constant dense<0.000000e+00> : vector<64x128xf32>
    %197 = tpu.matmul %131, %196, %cst_58 {dimension_numbers = #tpu.dot_dimension_numbers<[1], [0], [0], [1], [0, 0, 1, 1], [], []>} : vector<64x288xbf16>, vector<288x128xbf16>, vector<64x128xf32> -> vector<64x128xf32>
    %198 = vector.broadcast %132 : vector<64x1xf32> to vector<64x128xf32>
    %199 = arith.addf %197, %198 : vector<64x128xf32>
    %cst_59 = arith.constant 0.000000e+00 : f32
    %200 = vector.broadcast %cst_59 : f32 to vector<64x128xf32>
    %201 = arith.maximumf %199, %200 : vector<64x128xf32>
    %202 = arith.truncf %201 : vector<64x128xf32> to vector<64x128xbf16>
    %203 = tpu.concatenate %61, %62, %63, %77, %78, %79, %93, %94, %95 in 0 : vector<32x128xbf16>, vector<32x128xbf16>, vector<32x128xbf16>, vector<32x128xbf16>, vector<32x128xbf16>, vector<32x128xbf16>, vector<32x128xbf16>, vector<32x128xbf16>, vector<32x128xbf16> -> vector<288x128xbf16>
    %cst_60 = arith.constant dense<0.000000e+00> : vector<64x128xf32>
    %204 = tpu.matmul %131, %203, %cst_60 {dimension_numbers = #tpu.dot_dimension_numbers<[1], [0], [0], [1], [0, 0, 1, 1], [], []>} : vector<64x288xbf16>, vector<288x128xbf16>, vector<64x128xf32> -> vector<64x128xf32>
    %205 = vector.broadcast %132 : vector<64x1xf32> to vector<64x128xf32>
    %206 = arith.addf %204, %205 : vector<64x128xf32>
    %cst_61 = arith.constant 0.000000e+00 : f32
    %207 = vector.broadcast %cst_61 : f32 to vector<64x128xf32>
    %208 = arith.maximumf %206, %207 : vector<64x128xf32>
    %209 = arith.truncf %208 : vector<64x128xf32> to vector<64x128xbf16>
    %210 = tpu.concatenate %63, %64, %65, %79, %80, %81, %95, %96, %97 in 0 : vector<32x128xbf16>, vector<32x128xbf16>, vector<32x128xbf16>, vector<32x128xbf16>, vector<32x128xbf16>, vector<32x128xbf16>, vector<32x128xbf16>, vector<32x128xbf16>, vector<32x128xbf16> -> vector<288x128xbf16>
    %cst_62 = arith.constant dense<0.000000e+00> : vector<64x128xf32>
    %211 = tpu.matmul %131, %210, %cst_62 {dimension_numbers = #tpu.dot_dimension_numbers<[1], [0], [0], [1], [0, 0, 1, 1], [], []>} : vector<64x288xbf16>, vector<288x128xbf16>, vector<64x128xf32> -> vector<64x128xf32>
    %212 = vector.broadcast %132 : vector<64x1xf32> to vector<64x128xf32>
    %213 = arith.addf %211, %212 : vector<64x128xf32>
    %cst_63 = arith.constant 0.000000e+00 : f32
    %214 = vector.broadcast %cst_63 : f32 to vector<64x128xf32>
    %215 = arith.maximumf %213, %214 : vector<64x128xf32>
    %216 = arith.truncf %215 : vector<64x128xf32> to vector<64x128xbf16>
    %217 = tpu.concatenate %130, %90, %91, %130, %106, %107, %130, %122, %123 in 0 : vector<32x128xbf16>, vector<32x128xbf16>, vector<32x128xbf16>, vector<32x128xbf16>, vector<32x128xbf16>, vector<32x128xbf16>, vector<32x128xbf16>, vector<32x128xbf16>, vector<32x128xbf16> -> vector<288x128xbf16>
    %cst_64 = arith.constant dense<0.000000e+00> : vector<64x128xf32>
    %218 = tpu.matmul %131, %217, %cst_64 {dimension_numbers = #tpu.dot_dimension_numbers<[1], [0], [0], [1], [0, 0, 1, 1], [], []>} : vector<64x288xbf16>, vector<288x128xbf16>, vector<64x128xf32> -> vector<64x128xf32>
    %219 = vector.broadcast %132 : vector<64x1xf32> to vector<64x128xf32>
    %220 = arith.addf %218, %219 : vector<64x128xf32>
    %cst_65 = arith.constant 0.000000e+00 : f32
    %221 = vector.broadcast %cst_65 : f32 to vector<64x128xf32>
    %222 = arith.maximumf %220, %221 : vector<64x128xf32>
    %223 = arith.truncf %222 : vector<64x128xf32> to vector<64x128xbf16>
    %224 = tpu.concatenate %91, %92, %93, %107, %108, %109, %123, %124, %125 in 0 : vector<32x128xbf16>, vector<32x128xbf16>, vector<32x128xbf16>, vector<32x128xbf16>, vector<32x128xbf16>, vector<32x128xbf16>, vector<32x128xbf16>, vector<32x128xbf16>, vector<32x128xbf16> -> vector<288x128xbf16>
    %cst_66 = arith.constant dense<0.000000e+00> : vector<64x128xf32>
    %225 = tpu.matmul %131, %224, %cst_66 {dimension_numbers = #tpu.dot_dimension_numbers<[1], [0], [0], [1], [0, 0, 1, 1], [], []>} : vector<64x288xbf16>, vector<288x128xbf16>, vector<64x128xf32> -> vector<64x128xf32>
    %226 = vector.broadcast %132 : vector<64x1xf32> to vector<64x128xf32>
    %227 = arith.addf %225, %226 : vector<64x128xf32>
    %cst_67 = arith.constant 0.000000e+00 : f32
    %228 = vector.broadcast %cst_67 : f32 to vector<64x128xf32>
    %229 = arith.maximumf %227, %228 : vector<64x128xf32>
    %230 = arith.truncf %229 : vector<64x128xf32> to vector<64x128xbf16>
    %231 = tpu.concatenate %93, %94, %95, %109, %110, %111, %125, %126, %127 in 0 : vector<32x128xbf16>, vector<32x128xbf16>, vector<32x128xbf16>, vector<32x128xbf16>, vector<32x128xbf16>, vector<32x128xbf16>, vector<32x128xbf16>, vector<32x128xbf16>, vector<32x128xbf16> -> vector<288x128xbf16>
    %cst_68 = arith.constant dense<0.000000e+00> : vector<64x128xf32>
    %232 = tpu.matmul %131, %231, %cst_68 {dimension_numbers = #tpu.dot_dimension_numbers<[1], [0], [0], [1], [0, 0, 1, 1], [], []>} : vector<64x288xbf16>, vector<288x128xbf16>, vector<64x128xf32> -> vector<64x128xf32>
    %233 = vector.broadcast %132 : vector<64x1xf32> to vector<64x128xf32>
    %234 = arith.addf %232, %233 : vector<64x128xf32>
    %cst_69 = arith.constant 0.000000e+00 : f32
    %235 = vector.broadcast %cst_69 : f32 to vector<64x128xf32>
    %236 = arith.maximumf %234, %235 : vector<64x128xf32>
    %237 = arith.truncf %236 : vector<64x128xf32> to vector<64x128xbf16>
    %238 = tpu.concatenate %95, %96, %97, %111, %112, %113, %127, %128, %129 in 0 : vector<32x128xbf16>, vector<32x128xbf16>, vector<32x128xbf16>, vector<32x128xbf16>, vector<32x128xbf16>, vector<32x128xbf16>, vector<32x128xbf16>, vector<32x128xbf16>, vector<32x128xbf16> -> vector<288x128xbf16>
    %cst_70 = arith.constant dense<0.000000e+00> : vector<64x128xf32>
    %239 = tpu.matmul %131, %238, %cst_70 {dimension_numbers = #tpu.dot_dimension_numbers<[1], [0], [0], [1], [0, 0, 1, 1], [], []>} : vector<64x288xbf16>, vector<288x128xbf16>, vector<64x128xf32> -> vector<64x128xf32>
    %240 = vector.broadcast %132 : vector<64x1xf32> to vector<64x128xf32>
    %241 = arith.addf %239, %240 : vector<64x128xf32>
    %cst_71 = arith.constant 0.000000e+00 : f32
    %242 = vector.broadcast %cst_71 : f32 to vector<64x128xf32>
    %243 = arith.maximumf %241, %242 : vector<64x128xf32>
    %244 = arith.truncf %243 : vector<64x128xf32> to vector<64x128xbf16>
    %245 = tpu.concatenate %139, %146, %153, %160, %167, %174, %181, %188, %195, %202, %209, %216, %223, %230, %237, %244 in 0 : vector<64x128xbf16>, vector<64x128xbf16>, vector<64x128xbf16>, vector<64x128xbf16>, vector<64x128xbf16>, vector<64x128xbf16>, vector<64x128xbf16>, vector<64x128xbf16>, vector<64x128xbf16>, vector<64x128xbf16>, vector<64x128xbf16>, vector<64x128xbf16>, vector<64x128xbf16>, vector<64x128xbf16>, vector<64x128xbf16>, vector<64x128xbf16> -> vector<1024x128xbf16>
    %c0_72 = arith.constant 0 : index
    %c0_73 = arith.constant 0 : index
    %246 = vector.load %arg6[%c0_72, %c0_73] : memref<64x1024xbf16, #tpu.memory_space<vmem>>, vector<64x1024xbf16>
    %cst_74 = arith.constant dense<0.000000e+00> : vector<64x128xf32>
    %247 = tpu.matmul %246, %245, %cst_74 {dimension_numbers = #tpu.dot_dimension_numbers<[1], [0], [0], [1], [0, 0, 1, 1], [], []>} : vector<64x1024xbf16>, vector<1024x128xbf16>, vector<64x128xf32> -> vector<64x128xf32>
    %c0_75 = arith.constant 0 : index
    %c0_76 = arith.constant 0 : index
    %248 = vector.load %arg7[%c0_75, %c0_76] : memref<64x1xf32, #tpu.memory_space<vmem>>, vector<64x1xf32>
    %249 = vector.broadcast %248 : vector<64x1xf32> to vector<64x128xf32>
    %250 = arith.addf %247, %249 : vector<64x128xf32>
    %251 = math.tanh %250 : vector<64x128xf32>
    %c0_77 = arith.constant 0 : index
    %c0_78 = arith.constant 0 : index
    %252 = vector.load %arg8[%c0_77, %c0_78] : memref<64x64xbf16, #tpu.memory_space<vmem>>, vector<64x64xbf16>
    %253 = arith.truncf %251 : vector<64x128xf32> to vector<64x128xbf16>
    %cst_79 = arith.constant dense<0.000000e+00> : vector<64x128xf32>
    %254 = tpu.matmul %252, %253, %cst_79 {dimension_numbers = #tpu.dot_dimension_numbers<[1], [0], [0], [1], [0, 0, 1, 1], [], []>} : vector<64x64xbf16>, vector<64x128xbf16>, vector<64x128xf32> -> vector<64x128xf32>
    %c0_80 = arith.constant 0 : index
    %c0_81 = arith.constant 0 : index
    %255 = vector.load %arg9[%c0_80, %c0_81] : memref<64x1xf32, #tpu.memory_space<vmem>>, vector<64x1xf32>
    %256 = vector.broadcast %255 : vector<64x1xf32> to vector<64x128xf32>
    %257 = arith.addf %254, %256 : vector<64x128xf32>
    %258 = math.tanh %257 : vector<64x128xf32>
    %c0_82 = arith.constant 0 : index
    %c0_83 = arith.constant 0 : index
    %259 = vector.load %arg10[%c0_82, %c0_83] : memref<8x64xbf16, #tpu.memory_space<vmem>>, vector<8x64xbf16>
    %260 = arith.truncf %258 : vector<64x128xf32> to vector<64x128xbf16>
    %cst_84 = arith.constant dense<0.000000e+00> : vector<8x128xf32>
    %261 = tpu.matmul %259, %260, %cst_84 {dimension_numbers = #tpu.dot_dimension_numbers<[1], [0], [0], [1], [0, 0, 1, 1], [], []>} : vector<8x64xbf16>, vector<64x128xbf16>, vector<8x128xf32> -> vector<8x128xf32>
    %c0_85 = arith.constant 0 : index
    %c0_86 = arith.constant 0 : index
    %262 = vector.load %arg11[%c0_85, %c0_86] : memref<8x1xf32, #tpu.memory_space<vmem>>, vector<8x1xf32>
    %263 = vector.broadcast %262 : vector<8x1xf32> to vector<8x128xf32>
    %264 = arith.addf %261, %263 : vector<8x128xf32>
    %265 = math.tanh %264 : vector<8x128xf32>
    %c0_87 = arith.constant 0 : index
    %c0_88 = arith.constant 0 : index
    %266 = vector.load %arg12[%c0_87, %c0_88] : memref<8x128xf32, #tpu.memory_space<vmem>>, vector<8x128xf32>
    tpu.vector_store %arg12[%c0_87, %c0_88], %265 {strides = array<i32>} : memref<8x128xf32, #tpu.memory_space<vmem>>, vector<8x128xf32>,
    return
  }
  func.func @transform_0(%arg0: i32) -> (i32, i32, i32) {
    %c0_i32 = arith.constant 0 : i32
    %c0_i32_0 = arith.constant 0 : i32
    %c0_i32_1 = arith.constant 0 : i32
    return %c0_i32, %c0_i32_0, %arg0 : i32, i32, i32
  }
  func.func @transform_1(%arg0: i32) -> (i32, i32) {
    %c0_i32 = arith.constant 0 : i32
    %c0_i32_0 = arith.constant 0 : i32
    %c0_i32_1 = arith.constant 0 : i32
    return %c0_i32, %c0_i32_0 : i32, i32
  }
  func.func @transform_2(%arg0: i32) -> (i32, i32) {
    %c0_i32 = arith.constant 0 : i32
    %c0_i32_0 = arith.constant 0 : i32
    %c0_i32_1 = arith.constant 0 : i32
    return %c0_i32, %c0_i32_0 : i32, i32
  }
  func.func @transform_3(%arg0: i32) -> (i32, i32) {
    %c0_i32 = arith.constant 0 : i32
    %c0_i32_0 = arith.constant 0 : i32
    %c0_i32_1 = arith.constant 0 : i32
    return %c0_i32, %c0_i32_0 : i32, i32
  }
  func.func @transform_4(%arg0: i32) -> (i32, i32) {
    %c0_i32 = arith.constant 0 : i32
    %c0_i32_0 = arith.constant 0 : i32
    %c0_i32_1 = arith.constant 0 : i32
    return %c0_i32, %c0_i32_0 : i32, i32
  }
  func.func @transform_5(%arg0: i32) -> (i32, i32) {
    %c0_i32 = arith.constant 0 : i32
    %c0_i32_0 = arith.constant 0 : i32
    %c0_i32_1 = arith.constant 0 : i32
    return %c0_i32, %c0_i32_0 : i32, i32
  }
  func.func @transform_6(%arg0: i32) -> (i32, i32) {
    %c0_i32 = arith.constant 0 : i32
    %c0_i32_0 = arith.constant 0 : i32
    %c0_i32_1 = arith.constant 0 : i32
    return %c0_i32, %c0_i32_0 : i32, i32
  }
  func.func @transform_7(%arg0: i32) -> (i32, i32) {
    %c0_i32 = arith.constant 0 : i32
    %c0_i32_0 = arith.constant 0 : i32
    %c0_i32_1 = arith.constant 0 : i32
    return %c0_i32, %c0_i32_0 : i32, i32
  }
  func.func @transform_8(%arg0: i32) -> (i32, i32) {
    %c0_i32 = arith.constant 0 : i32
    %c0_i32_0 = arith.constant 0 : i32
    %c0_i32_1 = arith.constant 0 : i32
    return %c0_i32, %c0_i32_0 : i32, i32
  }
  func.func @transform_9(%arg0: i32) -> (i32, i32) {
    %c0_i32 = arith.constant 0 : i32
    %c0_i32_0 = arith.constant 0 : i32
    %c0_i32_1 = arith.constant 0 : i32
    return %c0_i32, %c0_i32_0 : i32, i32
  }
  func.func @transform_10(%arg0: i32) -> (i32, i32) {
    %c0_i32 = arith.constant 0 : i32
    %c0_i32_0 = arith.constant 0 : i32
    %c0_i32_1 = arith.constant 0 : i32
    return %c0_i32, %c0_i32_0 : i32, i32
  }
  func.func @transform_11(%arg0: i32) -> (i32, i32) {
    %c0_i32 = arith.constant 0 : i32
    %c0_i32_0 = arith.constant 0 : i32
    return %c0_i32, %arg0 : i32, i32
  }
}

</mosaic_0001>

<bundles_post_ra>
// kernel: forward.1
= control target key start
LH: loop header
LB: loop body
LE: loop exit
PB: predicated region body
PF: predicated region fallthrough
CT: control target
= control target key end

     0   :  { %v16771_v1 = vmov 0   ;;  %vm5178_vm0 = vcmask 261120   ;;  %vm8051_vm1 = vcmask 523264   ;;  %vm11831_vm2 = vmmov 0   ;;  %s16759_s0 = inlined_call_operand.vmem [shape: bf16[8,384,128], index: 0, kind: input, shape index: {}]   ;;  %s16760_s1 = inlined_call_operand.vmem [shape: bf16[256,384], index: 1, kind: input, shape index: {}]   ;;  %s16761_s2 = inlined_call_operand.vmem [shape: f32[256,1], index: 2, kind: input, shape index: {}]   ;;  %s16762_s4 = inlined_call_operand.vmem [shape: f32[64,1], index: 4, kind: input, shape index: {}, may-alias: {4,6,8}]   ;;  %s16763_s6 = inlined_call_operand.vmem [shape: f32[64,1], index: 6, kind: input, shape index: {}, may-alias: {4,6,8}]   ;;  %s16764_s8 = inlined_call_operand.vmem [shape: f32[64,1], index: 8, kind: input, shape index: {}, may-alias: {4,6,8}]   ;;  %s16765_s10 = inlined_call_operand.vmem [shape: f32[8,1], index: 10, kind: input, shape index: {}]   ;;  %s16766_s3 = inlined_call_operand.vmem [shape: bf16[64,288], index: 3, kind: input, shape index: {}]   ;;  %s16767_s5 = inlined_call_operand.vmem [shape: bf16[64,1024], index: 5, kind: input, shape index: {}]   ;;  %s16768_s7 = inlined_call_operand.vmem [shape: bf16[64,64], index: 7, kind: input, shape index: {}]   ;;  %s16769_s9 = inlined_call_operand.vmem [shape: bf16[8,64], index: 9, kind: input, shape index: {}]   ;;  %s16770_s11 = inlined_call_operand.vmem [shape: f32[8,128], index: 11, kind: output, shape index: {}]  }
   0x1   :  { %v11336_v0 = vld [vmem:[%s16759_s0 + $0x78] sm:$0xff]   ;;  %11335 = vset.pattern.permute.xlu1 %v16771_v1  ;;  %11334 = vset.pattern.permute.xlu0 %v16771_v1  ;;  %v11339_v4 = vld [vmem:[%s16759_s0 + $0x70] sm:$0xff]   ;;  %v11342_v7 = vld [vmem:[%s16759_s0 + $0x68] sm:$0xff]  }
   0x2   :  { %v11337_v2 = vld [vmem:[%s16759_s0 + $0xb8] sm:$0xff]   ;;  %8890 = vmatprep.subr.bf16.mxu0 %v11336_v0  ;;  %v11340_v5 = vld [vmem:[%s16759_s0 + $0xb0] sm:$0xff]   ;;  %v11343_v8 = vld [vmem:[%s16759_s0 + $0xa8] sm:$0xff]  }
   0x3   :  { %v11338_v3 = vld [vmem:[%s16759_s0 + $0x38] sm:$0xff]   ;;  %10727 = vmatprep.subr.bf16.mxu1 %v11337_v2  ;;  %v11341_v6 = vld [vmem:[%s16759_s0 + $0x30] sm:$0xff]   ;;  %v11344_v9 = vld [vmem:[%s16759_s0 + $0x28] sm:$0xff]  }
   0x4   :  { %8891 = vmatpush3.bf16.msra.mxu0 %v11338_v3  ;;  %10728 = vmatpush3.bf16.msra.mxu1 %v11337_v2  ;;  %v11345_v10 = vld [vmem:[%s16759_s0 + $0x60] sm:$0xff]   ;;  %v11348_v13 = vld [vmem:[%s16759_s0 + $0x58] sm:$0xff]   ;;  %v11351_v16 = vld [vmem:[%s16759_s0 + $0x50] sm:$0xff]  }
   0x5   :  { %8892 = vmatprep.subr.bf16.mxu0 %v11339_v4  ;;  %10729 = vmatprep.subr.bf16.mxu1 %v11340_v5  ;;  %v11346_v11 = vld [vmem:[%s16759_s0 + $0xa0] sm:$0xff]   ;;  %v11349_v14 = vld [vmem:[%s16759_s0 + $0x98] sm:$0xff]   ;;  %v11352_v17 = vld [vmem:[%s16759_s0 + $0x90] sm:$0xff]  }
   0x6   :  { %v11347_v12 = vld [vmem:[%s16759_s0 + $0x20] sm:$0xff]   ;;  %v11350_v15 = vld [vmem:[%s16759_s0 + $0x18] sm:$0xff]   ;;  %v11353_v18 = vld [vmem:[%s16759_s0 + $0x10] sm:$0xff]  }
   0x7   :  { %v11354_v19 = vld [vmem:[%s16759_s0 + $0x48] sm:$0xff]   ;;  %v11357_v22 = vld [vmem:[%s16759_s0 + $0x40] sm:$0xff]   ;;  %v11375_v31 = vld [vmem:[%s16759_s0 + $0x178] sm:$0xff]  }
   0x8   :  { %8893 = vmatpush3.bf16.msra.mxu0 %v11341_v6  ;;  %10730 = vmatpush3.bf16.msra.mxu1 %v11340_v5  ;;  %v11355_v20 = vld [vmem:[%s16759_s0 + $0x88] sm:$0xff]   ;;  %v11358_v23 = vld [vmem:[%s16759_s0 + $0x80] sm:$0xff]   ;;  %v11369_v33 = vld [vmem:[%s16760_s1 + $0x50] ss:$12 sps:$4 sm:$0xff]  }
   0x9   :  { %8894 = vmatprep.subr.bf16.mxu0 %v11342_v7  ;;  %10731 = vmatprep.subr.bf16.mxu1 %v11343_v8  ;;  %v11356_v21 = vld [vmem:[%s16759_s0 + $0x8] sm:$0xff]   ;;  %v11966_v24 = vld [vmem:[%s16760_s1 + $0x4] ss:$12 sps:$4 sm:$0xff]   ;;  %v12007_v34 = vld [vmem:[%s16760_s1 + $0x34] ss:$12 sps:$4 sm:$0xff]  }
   0xa   :  { %v11362_v25 = vld [vmem:[%s16760_s1 + $0x8] ss:$12 sps:$4 sm:$0xff]   ;;  %775 = vmatprep.mubr.bf16.mxu0 %v11966_v24  ;;  %v11359_v26 = vld [vmem:[%s16759_s0] sm:$0xff]   ;;  %v11386_v36 = vld [vmem:[%s16759_s0 + $0x138] sm:$0xff]  }
   0xb   :  { %10743 = vmatprep.mubr.bf16.mxu1 %v11362_v25  ;;  %v11978_v27 = vld [vmem:[%s16760_s1] ss:$12 sps:$4 sm:$0xff]   ;;  %v11986_v29 = vld [vmem:[%s16760_s1 + $0x1c] ss:$12 sps:$4 sm:$0xff]   ;;  %v11367_v30 = vld [vmem:[%s16760_s1 + $0x38] ss:$12 sps:$4 sm:$0xff]  }
   0xc   :  { %8895 = vmatpush3.bf16.msra.mxu0 %v11344_v9  ;;  %10732 = vmatpush3.bf16.msra.mxu1 %v11343_v8  ;;  %v11364_v28 = vld [vmem:[%s16760_s1 + $0x20] ss:$12 sps:$4 sm:$0xff]   ;;  %v11999_v32 = vld [vmem:[%s16760_s1 + $0x18] ss:$12 sps:$4 sm:$0xff]   ;;  %v11372_v35 = vld [vmem:[%s16760_s1 + $0x68] ss:$12 sps:$4 sm:$0xff]  }
   0xd   :  { %8896 = vmatprep.subr.bf16.mxu0 %v11345_v10  ;;  %10733 = vmatprep.subr.bf16.mxu1 %v11346_v11  ;;  %v11387_v37 = vld [vmem:[%s16759_s0 + $0x170] sm:$0xff]   ;;  %v11388_v38 = vld [vmem:[%s16759_s0 + $0xf8] sm:$0xff]   ;;  %v11374_v42 = vld [vmem:[%s16760_s1 + $0x80] ss:$12 sps:$4 sm:$0xff]  }
   0xe   :  { %v12026_v39 = vld [vmem:[%s16760_s1 + $0x30] ss:$12 sps:$4 sm:$0xff]   ;;  %v12040_v43 = vld [vmem:[%s16760_s1 + $0x4c] ss:$12 sps:$4 sm:$0xff]   ;;  %v11398_v47 = vld [vmem:[%s16759_s0 + $0x120] sm:$0xff]  }
   0xf   :  { %v11389_v40 = vld [vmem:[%s16759_s0 + $0x130] sm:$0xff]   ;;  %v11378_v44 = vld [vmem:[%s16760_s1 + $0x98] ss:$12 sps:$4 sm:$0xff]   ;;  %v11396_v45 = vld [vmem:[%s16759_s0 + $0x128] sm:$0xff]  }
  0x10   :  { %8897 = vmatpush3.bf16.msra.mxu0 %v11347_v12  ;;  %10734 = vmatpush3.bf16.msra.mxu1 %v11346_v11  ;;  %v11390_v41 = vld [vmem:[%s16759_s0 + $0xf0] sm:$0xff]   ;;  %v11397_v46 = vld [vmem:[%s16759_s0 + $0xe8] sm:$0xff]   ;;  %v11399_v50 = vld [vmem:[%s16759_s0 + $0xe0] sm:$0xff]  }
  0x11   :  { %8898 = vmatprep.subr.bf16.mxu0 %v11348_v13  ;;  %10735 = vmatprep.subr.bf16.mxu1 %v11349_v14  ;;  %v12059_v48 = vld [vmem:[%s16760_s1 + $0x48] ss:$12 sps:$4 sm:$0xff]   ;;  %v11380_v49 = vld [vmem:[%s16760_s1 + $0xb0] ss:$12 sps:$4 sm:$0xff]   ;;  %v12089_v56 = vld [vmem:[%s16760_s1 + $0x60] ss:$12 sps:$4 sm:$0xff]  }
  0x12   :  { %v12070_v51 = vld [vmem:[%s16760_s1 + $0x64] ss:$12 sps:$4 sm:$0xff]   ;;  %v11383_v52 = vld [vmem:[%s16760_s1 + $0xc8] ss:$12 sps:$4 sm:$0xff]   ;;  %v11405_v53 = vld [vmem:[%s16759_s0 + $0x118] sm:$0xff]  }
  0x13   :  { %v11406_v54 = vld [vmem:[%s16759_s0 + $0x168] sm:$0xff]   ;;  %v11407_v55 = vld [vmem:[%s16759_s0 + $0xd8] sm:$0xff]   ;;  %v11408_v57 = vld [vmem:[%s16759_s0 + $0x110] sm:$0xff]  }
  0x14   :  { %8899 = vmatpush3.bf16.msra.mxu0 %v11350_v15  ;;  %10736 = vmatpush3.bf16.msra.mxu1 %v11349_v14  ;;  %v11409_v58 = vld [vmem:[%s16759_s0 + $0xd0] sm:$0xff]   ;;  %v11385_v59 = vld [vmem:[%s16760_s1 + $0xe0] ss:$12 sps:$4 sm:$0xff]   ;;  %v12103_v60 = vld [vmem:[%s16760_s1 + $0x7c] ss:$12 sps:$4 sm:$0xff]  }
  0x15   :  { %8900 = vmatprep.subr.bf16.mxu0 %v11351_v16  ;;  %10737 = vmatprep.subr.bf16.mxu1 %v11352_v17  ;;  %v11393_v61 = vld [vmem:[%s16760_s1 + $0xf8] ss:$12 sps:$4 sm:$0xff]   ;;  %v11415_v62 = vld [vmem:[%s16759_s0 + $0x108] sm:$0xff]   ;;  %v11395_v3 = vld [vmem:[%s16760_s1 + $0x110] ss:$12 sps:$4 sm:$0xff]  }
  0x16   :  { %v11416_v63 = vld [vmem:[%s16759_s0 + $0xc8] sm:$0xff]   ;;  %v11417_v0 = vld [vmem:[%s16759_s0 + $0x100] sm:$0xff]   ;;  %v105_v9 = vld [vmem:[%s16761_s2 + $0x10] sm:$0xff] }
  0x17   :  { %v12122_v2 = vld [vmem:[%s16760_s1 + $0x78] ss:$12 sps:$4 sm:$0xff]   ;;  %v12130_v4 = vld [vmem:[%s16760_s1 + $0x94] ss:$12 sps:$4 sm:$0xff]   ;;  %195 = vperm.xlu0 %11334, %v105_v9   ;;  %v12155_v11 = vld [vmem:[%s16760_s1 + $0x90] ss:$12 sps:$4 sm:$0xff]  }
  0x18   :  { %8901 = vmatpush3.bf16.msra.mxu0 %v11353_v18  ;;  %10738 = vmatpush3.bf16.msra.mxu1 %v11352_v17  ;;  %v11418_v5 = vld [vmem:[%s16759_s0 + $0xc0] sm:$0xff]   ;;  %v11402_v7 = vld [vmem:[%s16760_s1 + $0x128] ss:$12 sps:$4 sm:$0xff]   ;;  %v11429_v10 = vld [vmem:[%s16759_s0 + $0x158] sm:$0xff]  }
  0x19   :  { %8902 = vmatprep.subr.bf16.mxu0 %v11354_v19  ;;  %10739 = vmatprep.subr.bf16.mxu1 %v11355_v20  ;;  %v11422_v6 = vld [vmem:[%s16759_s0 + $0x160] sm:$0xff]   ;;  %v104_v12 = vld [vmem:[%s16761_s2 + $0x8] sm:$0xff]  ;;  %v106_v13 = vld [vmem:[%s16761_s2 + $0x18] sm:$0xff] }
  0x1a   :  { %v103_v8 = vld [vmem:[%s16761_s2] sm:$0xff]  ;;  %v12169_v15 = vld [vmem:[%s16760_s1 + $0xac] ss:$12 sps:$4 sm:$0xff]   ;;  %v109_v17 = vld [vmem:[%s16761_s2 + $0x30] sm:$0xff] }
  0x1b   :  { %185 = vperm.xlu1 %11335, %v103_v8   ;;  %v11404_v14 = vld [vmem:[%s16760_s1 + $0x140] ss:$12 sps:$4 sm:$0xff]   ;;  %v11412_v16 = vld [vmem:[%s16760_s1 + $0x158] ss:$12 sps:$4 sm:$0xff]   ;;  %200 = vperm.xlu0 %11334, %v106_v13   ;;  %v11436_v19 = vld [vmem:[%s16759_s0 + $0x150] sm:$0xff]  }
  0x1c   :  { %8903 = vmatpush3.bf16.msra.mxu0 %v11356_v21  ;;  %10740 = vmatpush3.bf16.msra.mxu1 %v11355_v20  ;;  %v110_v18 = vld [vmem:[%s16761_s2 + $0x38] sm:$0xff]  ;;  %v12188_v20 = vld [vmem:[%s16760_s1 + $0xa8] ss:$12 sps:$4 sm:$0xff]  }
  0x1d   :  { %8904 = vmatprep.subr.bf16.mxu0 %v11357_v22  ;;  %10741 = vmatprep.subr.bf16.mxu1 %v11358_v23  ;;  %v12193_v21 = vld [vmem:[%s16760_s1 + $0x170] ss:$12 sps:$4 sm:$0xff]   ;;  %v107_v22 = vld [vmem:[%s16761_s2 + $0x20] sm:$0xff] }
  0x1e   :  { %v11442_v25 = vld [vmem:[%s16759_s0 + $0x238] sm:$0xff]  }
  0x1f   :  { %190 = vperm.xlu1 %11335, %v104_v12   ;;  %215 = vperm.xlu0 %11334, %v109_v17   ;;  %v11473_v8 = vld [vmem:[%s16759_s0 + $0x2b8] sm:$0xff]   ;;  %v127_v12 = vld [vmem:[%s16761_s2 + $0xc0] sm:$0xff]  ;;  %v11454_v17 = vld [vmem:[%s16759_s0 + $0x1b0] sm:$0xff]  }
  0x20   :  { %8905 = vmatpush3.bf16.msra.mxu0 %v11359_v26  ;;  %10742 = vmatpush3.bf16.msra.mxu1 %v11358_v23  ;;  %v108_v23 = vld [vmem:[%s16761_s2 + $0x28] sm:$0xff]  ;;  %v130_v9 = vld [vmem:[%s16761_s2 + $0xd8] sm:$0xff] }
  0x21   :  { %10775 = vmatprep.subr.bf16.mxu0 %v11375_v31  ;;  %9026 = vmatprep.subr.bf16.mxu1 %v11386_v36  ;;  %v11444_v26 = vld [vmem:[%s16759_s0 + $0x148] sm:$0xff]   ;;  %v12405_v13 = vld [vmem:[%s16760_s1 + $0x150] ss:$12 sps:$4 sm:$0xff]  }
  0x22   :  { %v112_v36 = vld [vmem:[%s16761_s2 + $0x48] sm:$0xff] }
  0x23   :  { %776 = vmatmul.mubr.bf16.vlgmr.msra.gmra.mxu0 %v11978_v27  ;;  %10744 = vmatmul.mubr.bf16.vlgmr.msra.gmra.mxu1 %v11364_v28  ;;  %v12210_v28 = vld [vmem:[%s16760_s1 + $0xc4] ss:$12 sps:$4 sm:$0xff]  }
  0x24   :  { %783 = vmatprep.mubr.bf16.mxu0 %v11986_v29  ;;  %10747 = vmatprep.mubr.bf16.mxu1 %v11367_v30  ;;  %v113_v30 = vld [vmem:[%s16761_s2 + $0x50] sm:$0xff] }
  0x25   :  { %10776 = vmatpush3.bf16.msra.mxu0 %v11375_v31  ;;  %9027 = vmatpush3.bf16.msra.mxu1 %v11388_v38  ;;  %v114_v31 = vld [vmem:[%s16761_s2 + $0x58] sm:$0xff]  ;;  %v117_v38 = vld [vmem:[%s16761_s2 + $0x70] sm:$0xff] }
  0x26   :  { %10777 = vmatprep.subr.bf16.mxu0 %v11387_v37  ;;  %9028 = vmatprep.subr.bf16.mxu1 %v11389_v40  ;;  %v118_v40 = vld [vmem:[%s16761_s2 + $0x78] sm:$0xff] }
  0x27   :  { %220 = vperm.xlu1 %11335, %v110_v18   ;;  %205 = vperm.xlu0 %11334, %v107_v22   ;;  %v12450_v18 = vld [vmem:[%s16760_s1 + $0x38] ss:$12 sps:$4 sm:$0xff]  }
  0x28   :  { %v11458_v22 = vld [vmem:[%s16759_s0 + $0x1e0] sm:$0xff]  }
  0x29   :  { %10778 = vmatpush3.bf16.msra.mxu0 %v11387_v37  ;;  %9029 = vmatpush3.bf16.msra.mxu1 %v11390_v41  ;;  %v12234_v37 = vld [vmem:[%s16760_s1 + $0xc0] ss:$12 sps:$4 sm:$0xff]   ;;  %v11449_v41 = vld [vmem:[%s16759_s0 + $0x230] sm:$0xff]  }
  0x2a   :  { %9030 = vmatprep.subr.bf16.mxu1 %v11396_v45  ;;  %10779 = vmatprep.subr.bf16.mxu0 %v11406_v54  ;;  %v115_v45 = vld [vmem:[%s16761_s2 + $0x60] sm:$0xff] }
  0x2b   :  { %784 = vmatmul.mubr.bf16.gmra.mxu0 %v11999_v32  ;;  %10748 = vmatmul.mubr.bf16.gmra.mxu1 %v11369_v33  ;;  %v11448_v33 = vld [vmem:[%s16759_s0 + $0x140] sm:$0xff]  }
  0x2c   :  { %791 = vmatprep.mubr.bf16.mxu0 %v12007_v34  ;;  %10751 = vmatprep.mubr.bf16.mxu1 %v11372_v35  ;;  %v111_v35 = vld [vmem:[%s16761_s2 + $0x40] sm:$0xff] }
  0x2d   :  { %9031 = vmatpush3.bf16.msra.mxu1 %v11397_v46  ;;  %10780 = vmatpush3.bf16.msra.mxu0 %v11406_v54  ;;  %v12274_v46 = vld [vmem:[%s16760_s1 + $0xf4] ss:$12 sps:$4 sm:$0xff]   ;;  %v12306_v54 = vld [vmem:[%s16760_s1 + $0x10c] ss:$12 sps:$4 sm:$0xff]  }
  0x2e   :  { %9032 = vmatprep.subr.bf16.mxu1 %v11398_v47  ;;  %10781 = vmatprep.subr.bf16.mxu0 %v11422_v6  ;;  %v121_v47 = vld [vmem:[%s16761_s2 + $0x90] sm:$0xff] }
  0x2f   :  { %210 = vperm.xlu1 %11335, %v108_v23   ;;  %235 = vperm.xlu0 %11334, %v113_v30   ;;  %v12466_v23 = vld [vmem:[%s16760_s1 + $0x50] ss:$12 sps:$4 sm:$0xff]  }
  0x30   :  { %v11462_v30 = vld [vmem:[%s16759_s0 + $0x198] sm:$0xff]  }
  0x31   :  { %9033 = vmatpush3.bf16.msra.mxu1 %v11399_v50  ;;  %10782 = vmatpush3.bf16.msra.mxu0 %v11422_v6  ;;  %v122_v50 = vld [vmem:[%s16761_s2 + $0x98] sm:$0xff]  ;;  %v12359_v6 = vld [vmem:[%s16760_s1 + $0x120] ss:$12 sps:$4 sm:$0xff]  }
  0x32   :  { %9034 = vmatprep.subr.bf16.mxu1 %v11405_v53  ;;  %10783 = vmatprep.subr.bf16.mxu0 %v11429_v10  ;;  %v119_v53 = vld [vmem:[%s16761_s2 + $0x80] sm:$0xff] }
  0x33   :  { %792 = vmatmul.mubr.bf16.gmra.mxu0 %v12026_v39  ;;  %10752 = vmatmul.mubr.bf16.gmra.mxu1 %v11374_v42  ;;  %v11451_v42 = vld [vmem:[%s16759_s0 + $0x1f8] sm:$0xff]  }
  0x34   :  { %799 = vmatprep.mubr.bf16.mxu0 %v12040_v43  ;;  %10755 = vmatprep.mubr.bf16.mxu1 %v11378_v44  ;;  %v12260_v44 = vld [vmem:[%s16760_s1 + $0xd8] ss:$12 sps:$4 sm:$0xff]  }
  0x35   :  { %9035 = vmatpush3.bf16.msra.mxu1 %v11407_v55  ;;  %10784 = vmatpush3.bf16.msra.mxu0 %v11429_v10  ;;  %v125_v55 = vld [vmem:[%s16761_s2 + $0xb0] sm:$0xff]  ;;  %v12385_v10 = vld [vmem:[%s16760_s1 + $0x138] ss:$12 sps:$4 sm:$0xff]  }
  0x36   :  { %9036 = vmatprep.subr.bf16.mxu1 %v11408_v57  ;;  %10785 = vmatprep.subr.bf16.mxu0 %v11436_v19  ;;  %v11464_v57 = vld [vmem:[%s16759_s0 + $0x210] sm:$0xff]  }
  0x37   :  { %240 = vperm.xlu1 %11335, %v114_v31   ;;  %225 = vperm.xlu0 %11334, %v111_v35   ;;  %v11463_v31 = vld [vmem:[%s16759_s0 + $0x1d0] sm:$0xff]  }
  0x38   :  { %v11465_v35 = vld [vmem:[%s16759_s0 + $0x190] sm:$0xff]  }
  0x39   :  { %9037 = vmatpush3.bf16.msra.mxu1 %v11409_v58  ;;  %10786 = vmatpush3.bf16.msra.mxu0 %v11436_v19  ;;  %v126_v58 = vld [vmem:[%s16761_s2 + $0xb8] sm:$0xff]  ;;  %v11456_v19 = vld [vmem:[%s16759_s0 + $0x1e8] sm:$0xff]  }
  0x3a   :  { %9038 = vmatprep.subr.bf16.mxu1 %v11415_v62  ;;  %10787 = vmatprep.subr.bf16.mxu0 %v11444_v26  ;;  %v124_v62 = vld [vmem:[%s16761_s2 + $0xa8] sm:$0xff] }
  0x3b   :  { %800 = vmatmul.mubr.bf16.gmra.mxu0 %v12059_v48  ;;  %10756 = vmatmul.mubr.bf16.gmra.mxu1 %v11380_v49  ;;  %v11455_v49 = vld [vmem:[%s16759_s0 + $0x220] sm:$0xff]  }
  0x3c   :  { %807 = vmatprep.mubr.bf16.mxu0 %v12070_v51  ;;  %10759 = vmatprep.mubr.bf16.mxu1 %v11383_v52  ;;  %v12292_v52 = vld [vmem:[%s16760_s1 + $0xf0] ss:$12 sps:$4 sm:$0xff]  }
  0x3d   :  { %9039 = vmatpush3.bf16.msra.mxu1 %v11416_v63  ;;  %10788 = vmatpush3.bf16.msra.mxu0 %v11444_v26  ;;  %v133_v63 = vld [vmem:[%s16761_s2 + $0xf0] sm:$0xff] }
  0x3e   :  { %9040 = vmatprep.subr.bf16.mxu1 %v11417_v0  ;;  %10789 = vmatprep.subr.bf16.mxu0 %v11448_v33  ;;  %v11470_v0 = vld [vmem:[%s16759_s0 + $0x200] sm:$0xff]   ;;  %v12476_v26 = vld [vmem:[%s16760_s1 + $0x68] ss:$12 sps:$4 sm:$0xff]  }
  0x3f   :  { %230 = vperm.xlu1 %11335, %v112_v36   ;;  %255 = vperm.xlu0 %11334, %v117_v38   ;;  %v12502_v36 = vld [vmem:[%s16760_s1 + $0x98] ss:$12 sps:$4 sm:$0xff]  }
  0x40   :  { %v11469_v38 = vld [vmem:[%s16759_s0 + $0x1c0] sm:$0xff]  }
  0x41   :  { %9041 = vmatpush3.bf16.msra.mxu1 %v11418_v5  ;;  %10790 = vmatpush3.bf16.msra.mxu0 %v11448_v33  ;;  %v131_v5 = vld [vmem:[%s16761_s2 + $0xe0] sm:$0xff] }
  0x42   :  { %10823 = vmatprep.subr.bf16.mxu1 %v11442_v25  ;;  %9162 = vmatprep.subr.bf16.mxu0 %v11451_v42  ;;  %v12492_v33 = vld [vmem:[%s16760_s1 + $0x80] ss:$12 sps:$4 sm:$0xff]   ;;  %v12528_v42 = vld [vmem:[%s16760_s1 + $0xc8] ss:$12 sps:$4 sm:$0xff]  }
  0x43   :  { %808 = vmatmul.mubr.bf16.gmra.mxu0 %v12089_v56  ;;  %10760 = vmatmul.mubr.bf16.gmra.mxu1 %v11385_v59  ;;  %v12324_v59 = vld [vmem:[%s16760_s1 + $0x108] ss:$12 sps:$4 sm:$0xff]  }
  0x44   :  { %815 = vmatprep.mubr.bf16.mxu0 %v12103_v60  ;;  %10763 = vmatprep.mubr.bf16.mxu1 %v11393_v61  ;;  %v123_v61 = vld [vmem:[%s16761_s2 + $0xa0] sm:$0xff] }
  0x45   :  { %260 = vperm.xlu1 %11335, %v118_v40   ;;  %245 = vperm.xlu0 %11334, %v115_v45   ;;  %v12518_v40 = vld [vmem:[%s16760_s1 + $0xb0] ss:$12 sps:$4 sm:$0xff]   ;;  %v12538_v45 = vld [vmem:[%s16760_s1 + $0xe0] ss:$12 sps:$4 sm:$0xff]  }
  0x49   :  { %275 = vperm.xlu0 %11334, %v121_v47   ;;  %v12566_v47 = vld [vmem:[%s16760_s1 + $0x140] ss:$12 sps:$4 sm:$0xff]  }
  0x4b   :  { %816 = vmatmul.mubr.bf16.gmra.mxu0 %v12122_v2  ;;  %10764 = vmatmul.mubr.bf16.gmra.mxu1 %v11395_v3  ;;  %v134_v3 = vld [vmem:[%s16761_s2 + $0xf8] sm:$0xff] }
  0x4c   :  { %823 = vmatprep.mubr.bf16.mxu0 %v12130_v4  ;;  %10767 = vmatprep.mubr.bf16.mxu1 %v11402_v7  ;;  %v132_v7 = vld [vmem:[%s16761_s2 + $0xe8] sm:$0xff] }
  0x4d   :  { %265 = vperm.xlu0 %11334, %v119_v53  }
  0x51   :  { %295 = vperm.xlu0 %11334, %v125_v55  }
  0x53   :  { %824 = vmatmul.mubr.bf16.gmra.mxu0 %v12155_v11  ;;  %10768 = vmatmul.mubr.bf16.gmra.mxu1 %v11404_v14  ;;  %v12410_v14 = vld [vmem:[%s16760_s1 + $0x16c] ss:$12 sps:$4 sm:$0xff]  }
  0x54   :  { %831 = vmatprep.mubr.bf16.mxu0 %v12169_v15  ;;  %10771 = vmatprep.mubr.bf16.mxu1 %v11412_v16  ;;  %v12440_v16 = vld [vmem:[%s16760_s1 + $0x20] ss:$12 sps:$4 sm:$0xff]  }
  0x55   :  { %285 = vperm.xlu0 %11334, %v123_v61  }
  0x59   :  { %335 = vperm.xlu0 %11334, %v133_v63   ;;  %v11483_v63 = vld [vmem:[%s16759_s0 + $0x2e8] sm:$0xff]  }
  0x5b   :  { %832 = vmatmul.mubr.bf16.gmra.mxu0 %v12188_v20  ;;  %10772 = vmatmul.mubr.bf16.gmra.mxu1 %v12193_v21 }
  0x5c   :  { %839 = vmatprep.mubr.bf16.mxu0 %v12210_v28  ;;  %1338 = vmatprep.mubr.bf16.mxu1 %v11966_v24  ;;  %v12239_v24 = vld [vmem:[%s16760_s1 + $0xdc] ss:$12 sps:$4 sm:$0xff]  }
  0x5d   :  { %325 = vperm.xlu0 %11334, %v131_v5  }
  0x63   :  { %840 = vmatmul.mubr.bf16.gmra.mxu0 %v12234_v37  ;;  %1339 = vmatmul.mubr.bf16.vlgmr.msra.gmra.mxu1 %v11978_v27  ;;  %v11450_v27 = vld [vmem:[%s16759_s0 + $0x228] sm:$0xff]  }
  0x64   :  { %847 = vmatprep.mubr.bf16.mxu0 %v12239_v24  ;;  %1346 = vmatprep.mubr.bf16.mxu1 %v11986_v29  ;;  %v116_v29 = vld [vmem:[%s16761_s2 + $0x68] sm:$0xff] }
  0x65   :  { %10824 = vmatpush3.bf16.msra.mxu1 %v11442_v25  ;;  %250 = vperm.xlu1 %11335, %v116_v29   ;;  %v11459_v25 = vld [vmem:[%s16759_s0 + $0x1a0] sm:$0xff]   ;;  %v12552_v29 = vld [vmem:[%s16760_s1 + $0x110] ss:$12 sps:$4 sm:$0xff]  }
  0x66   :  { %10825 = vmatprep.subr.bf16.mxu1 %v11449_v41 }
  0x69   :  { %10826 = vmatpush3.bf16.msra.mxu1 %v11449_v41  ;;  %280 = vperm.xlu1 %11335, %v122_v50   ;;  %v11471_v41 = vld [vmem:[%s16759_s0 + $0x180] sm:$0xff]  }
  0x6a   :  { %10827 = vmatprep.subr.bf16.mxu1 %v11450_v27  ;;  %v12581_v50 = vld [vmem:[%s16760_s1 + $0x4] ss:$12 sps:$4 sm:$0xff]  }
  0x6b   :  { %848 = vmatmul.mubr.bf16.gmra.mxu0 %v12260_v44  ;;  %1347 = vmatmul.mubr.bf16.gmra.mxu1 %v11999_v32  ;;  %v11460_v32 = vld [vmem:[%s16759_s0 + $0x218] sm:$0xff]  }
  0x6c   :  { %855 = vmatprep.mubr.bf16.mxu0 %v12274_v46  ;;  %1354 = vmatprep.mubr.bf16.mxu1 %v12007_v34  ;;  %v120_v34 = vld [vmem:[%s16761_s2 + $0x88] sm:$0xff] }
  0x6d   :  { %10828 = vmatpush3.bf16.msra.mxu1 %v11450_v27  ;;  %270 = vperm.xlu1 %11335, %v120_v34   ;;  %v12545_v27 = vld [vmem:[%s16760_s1 + $0xf8] ss:$12 sps:$4 sm:$0xff]   ;;  %v11476_v34 = vld [vmem:[%s16759_s0 + $0x2b0] sm:$0xff]  }
  0x6e   :  { %10829 = vmatprep.subr.bf16.mxu1 %v11455_v49 }
  0x71   :  { %10830 = vmatpush3.bf16.msra.mxu1 %v11455_v49  ;;  %300 = vperm.xlu1 %11335, %v126_v58   ;;  %v12573_v49 = vld [vmem:[%s16760_s1 + $0x158] ss:$12 sps:$4 sm:$0xff]   ;;  %v12610_v58 = vld [vmem:[%s16760_s1 + $0x1c] ss:$12 sps:$4 sm:$0xff]  }
  0x72   :  { %10831 = vmatprep.subr.bf16.mxu1 %v11460_v32 }
  0x73   :  { %856 = vmatmul.mubr.bf16.gmra.mxu0 %v12292_v52  ;;  %1355 = vmatmul.mubr.bf16.gmra.mxu1 %v12026_v39  ;;  %v12332_v39 = vld [vmem:[%s16760_s1 + $0x124] ss:$12 sps:$4 sm:$0xff]  }
  0x74   :  { %863 = vmatprep.mubr.bf16.mxu0 %v12306_v54  ;;  %1362 = vmatprep.mubr.bf16.mxu1 %v12040_v43  ;;  %v11467_v43 = vld [vmem:[%s16759_s0 + $0x208] sm:$0xff]  }
  0x75   :  { %10832 = vmatpush3.bf16.msra.mxu1 %v11460_v32  ;;  %290 = vperm.xlu1 %11335, %v124_v62   ;;  %v11478_v62 = vld [vmem:[%s16759_s0 + $0x2a8] sm:$0xff]  }
  0x76   :  { %10833 = vmatprep.subr.bf16.mxu1 %v11464_v57 }
  0x79   :  { %10834 = vmatpush3.bf16.msra.mxu1 %v11464_v57  ;;  %340 = vperm.xlu1 %11335, %v134_v3   ;;  %v12603_v57 = vld [vmem:[%s16760_s1] ss:$12 sps:$4 sm:$0xff]  }
  0x7a   :  { %10835 = vmatprep.subr.bf16.mxu1 %v11467_v43 }
  0x7b   :  { %864 = vmatmul.mubr.bf16.gmra.mxu0 %v12324_v59  ;;  %1363 = vmatmul.mubr.bf16.gmra.mxu1 %v12059_v48  ;;  %v12367_v48 = vld [vmem:[%s16760_s1 + $0x13c] ss:$12 sps:$4 sm:$0xff]  }
  0x7c   :  { %871 = vmatprep.mubr.bf16.mxu0 %v12332_v39  ;;  %1370 = vmatprep.mubr.bf16.mxu1 %v12070_v51  ;;  %v129_v51 = vld [vmem:[%s16761_s2 + $0xd0] sm:$0xff] }
  0x7d   :  { %10836 = vmatpush3.bf16.msra.mxu1 %v11467_v43  ;;  %330 = vperm.xlu1 %11335, %v132_v7  }
  0x7e   :  { %10837 = vmatprep.subr.bf16.mxu1 %v11470_v0  ;;  %315 = vperm.xlu0 %11334, %v129_v51  }
  0x81   :  { %10838 = vmatpush3.bf16.msra.mxu1 %v11470_v0  ;;  %320 = vperm.xlu1 %11335, %v130_v9  }
  0x82   :  { %9298 = vmatprep.subr.bf16.mxu1 %v11473_v8  ;;  %305 = vperm.xlu0 %11334, %v127_v12   ;;  %v11479_v8 = vld [vmem:[%s16759_s0 + $0x268] sm:$0xff]   ;;  %v11491_v12 = vld [vmem:[%s16759_s0 + $0x2e0] sm:$0xff]  }
  0x83   :  { %872 = vmatmul.mubr.bf16.gmra.mxu0 %v12359_v6  ;;  %1371 = vmatmul.mubr.bf16.gmra.mxu1 %v12089_v56  ;;  %v128_v56 = vld [vmem:[%s16761_s2 + $0xc8] sm:$0xff] }
  0x84   :  { %879 = vmatprep.mubr.bf16.mxu0 %v12367_v48  ;;  %1378 = vmatprep.mubr.bf16.mxu1 %v12103_v60  ;;  %v12396_v60 = vld [vmem:[%s16760_s1 + $0x154] ss:$12 sps:$4 sm:$0xff]  }
  0x85   :  { %310 = vperm.xlu1 %11335, %v128_v56  }
  0x8b   :  { %880 = vmatmul.mubr.bf16.gmra.mxu0 %v12385_v10  ;;  %1379 = vmatmul.mubr.bf16.gmra.mxu1 %v12122_v2  ;;  %v12419_v2 = vld [vmem:[%s16760_s1 + $0x168] ss:$12 sps:$4 sm:$0xff]  }
  0x8c   :  { %887 = vmatprep.mubr.bf16.mxu0 %v12396_v60  ;;  %1386 = vmatprep.mubr.bf16.mxu1 %v12130_v4  ;;  %v12427_v4 = vld [vmem:[%s16760_s1 + $0x8] ss:$12 sps:$4 sm:$0xff]  }
  0x92   :  { %v12590_v32 = vpop.permute.xlu0 %195 }
  0x93   :  { %888 = vmatmul.mubr.bf16.gmra.mxu0 %v12405_v13  ;;  %1387 = vmatmul.mubr.bf16.gmra.mxu1 %v12155_v11  ;;  %v11452_v11 = vld [vmem:[%s16759_s0 + $0x1b8] sm:$0xff]   ;;  %16974 = vst [vmem:[#allocation3_spill] sm:$0xff] %v12590_v32 }
  0x94   :  { %895 = vmatprep.mubr.bf16.mxu0 %v12410_v14  ;;  %1394 = vmatprep.mubr.bf16.mxu1 %v12169_v15  ;;  %v11453_v15 = vld [vmem:[%s16759_s0 + $0x1f0] sm:$0xff]  }
  0x96   :  { %v12588_v53 = vpop.permute.xlu1 %185 }
  0x97   :  { %16973 = vst [vmem:[#allocation2_spill] sm:$0xff] %v12588_v53 }
  0x9a   :  { %v12625_v5 = vpop.permute.xlu1 %190 }
  0x9b   :  { %896 = vmatmul.mubr.bf16.gmra.mxu0 %v12419_v2  ;;  %1395 = vmatmul.mubr.bf16.gmra.mxu1 %v12188_v20  ;;  %v11457_v20 = vld [vmem:[%s16759_s0 + $0x1a8] sm:$0xff]   ;;  %16975 = vst [vmem:[#allocation4_spill] sm:$0xff] %v12625_v5 }
  0x9c   :  { %1402 = vmatprep.mubr.bf16.mxu1 %v12210_v28  ;;  %10791 = vmatprep.mubr.bf16.mxu0 %v12427_v4  ;;  %v11461_v28 = vld [vmem:[%s16759_s0 + $0x1d8] sm:$0xff]  }
  0xa3   :  { %1403 = vmatmul.mubr.bf16.gmra.mxu1 %v12234_v37  ;;  %10792 = vmatmul.mubr.bf16.vlgmr.msra.gmra.mxu0 %v12440_v16  ;;  %v11466_v37 = vld [vmem:[%s16759_s0 + $0x1c8] sm:$0xff]  }
  0xa4   :  { %1410 = vmatprep.mubr.bf16.mxu1 %v12239_v24  ;;  %10795 = vmatprep.mubr.bf16.mxu0 %v12450_v18  ;;  %v11468_v24 = vld [vmem:[%s16759_s0 + $0x188] sm:$0xff]  }
  0xa5   :  { %9163 = vmatpush3.bf16.msra.mxu0 %v11452_v11 }
  0xa6   :  { %9164 = vmatprep.subr.bf16.mxu0 %v11453_v15 }
  0xa9   :  { %9165 = vmatpush3.bf16.msra.mxu0 %v11454_v17 }
  0xaa   :  { %9166 = vmatprep.subr.bf16.mxu0 %v11456_v19  ;;  %v11482_v19 = vld [vmem:[%s16759_s0 + $0x298] sm:$0xff]  }
  0xab   :  { %1411 = vmatmul.mubr.bf16.gmra.mxu1 %v12260_v44  ;;  %10796 = vmatmul.mubr.bf16.gmra.mxu0 %v12466_v23  ;;  %v11472_v44 = vld [vmem:[%s16759_s0 + $0x2f8] sm:$0xff]  }
  0xac   :  { %1418 = vmatprep.mubr.bf16.mxu1 %v12274_v46  ;;  %10799 = vmatprep.mubr.bf16.mxu0 %v12476_v26  ;;  %v12559_v46 = vld [vmem:[%s16760_s1 + $0x128] ss:$12 sps:$4 sm:$0xff]  }
  0xad   :  { %9167 = vmatpush3.bf16.msra.mxu0 %v11457_v20  ;;  %v11492_v20 = vld [vmem:[%s16759_s0 + $0x2d8] sm:$0xff]  }
  0xae   :  { %9168 = vmatprep.subr.bf16.mxu0 %v11458_v22 }
  0xb1   :  { %9169 = vmatpush3.bf16.msra.mxu0 %v11459_v25 }
  0xb2   :  { %9170 = vmatprep.subr.bf16.mxu0 %v11461_v28 }
  0xb3   :  { %1419 = vmatmul.mubr.bf16.gmra.mxu1 %v12292_v52  ;;  %10800 = vmatmul.mubr.bf16.gmra.mxu0 %v12492_v33  ;;  %v11475_v52 = vld [vmem:[%s16759_s0 + $0x278] sm:$0xff]  }
  0xb4   :  { %1426 = vmatprep.mubr.bf16.mxu1 %v12306_v54  ;;  %10803 = vmatprep.mubr.bf16.mxu0 %v12502_v36 }
  0xb5   :  { %9171 = vmatpush3.bf16.msra.mxu0 %v11462_v30 }
  0xb6   :  { %9172 = vmatprep.subr.bf16.mxu0 %v11463_v31 }
  0xb9   :  { %9173 = vmatpush3.bf16.msra.mxu0 %v11465_v35 }
  0xba   :  { %9174 = vmatprep.subr.bf16.mxu0 %v11466_v37  ;;  %v11484_v37 = vld [vmem:[%s16759_s0 + $0x258] sm:$0xff]  }
  0xbb   :  { %1427 = vmatmul.mubr.bf16.gmra.mxu1 %v12324_v59  ;;  %10804 = vmatmul.mubr.bf16.gmra.mxu0 %v12518_v40 }
  0xbc   :  { %1434 = vmatprep.mubr.bf16.mxu1 %v12332_v39  ;;  %10807 = vmatprep.mubr.bf16.mxu0 %v12528_v42  ;;  %v11477_v39 = vld [vmem:[%s16759_s0 + $0x270] sm:$0xff]  }
  0xbd   :  { %9175 = vmatpush3.bf16.msra.mxu0 %v11468_v24 }
  0xbe   :  { %9176 = vmatprep.subr.bf16.mxu0 %v11469_v38 }
  0xc1   :  { %9177 = vmatpush3.bf16.msra.mxu0 %v11471_v41  ;;  %v12678_v41 = vpop.permute.xlu1 %220 }
  0xc2   :  { %10871 = vmatprep.subr.bf16.mxu0 %v11472_v44  ;;  %16978 = vst [vmem:[#allocation7_spill] sm:$0xff] %v12678_v41 }
  0xc3   :  { %1435 = vmatmul.mubr.bf16.gmra.mxu1 %v12359_v6  ;;  %10808 = vmatmul.mubr.bf16.gmra.mxu0 %v12538_v45  ;;  %v12627_v6 = vpop.permute.xlu0 %200 }
  0xc4   :  { %1442 = vmatprep.mubr.bf16.mxu1 %v12367_v48  ;;  %10811 = vmatprep.mubr.bf16.mxu0 %v12545_v27  ;;  %16976 = vst [vmem:[#allocation5_spill] sm:$0xff] %v12627_v6 }
  0xcb   :  { %1443 = vmatmul.mubr.bf16.gmra.mxu1 %v12385_v10  ;;  %10812 = vmatmul.mubr.bf16.gmra.mxu0 %v12552_v29  ;;  %v11480_v10 = vld [vmem:[%s16759_s0 + $0x2a0] sm:$0xff]  }
  0xcc   :  { %1450 = vmatprep.mubr.bf16.mxu1 %v12396_v60  ;;  %10815 = vmatprep.mubr.bf16.mxu0 %v12559_v46 }
  0xd3   :  { %1451 = vmatmul.mubr.bf16.gmra.mxu1 %v12405_v13  ;;  %10816 = vmatmul.mubr.bf16.gmra.mxu0 %v12566_v47 }
  0xd4   :  { %1458 = vmatprep.mubr.bf16.mxu1 %v12410_v14  ;;  %10819 = vmatprep.mubr.bf16.mxu0 %v12573_v49  ;;  %v12644_v14 = vld [vmem:[%s16760_s1 + $0x18] ss:$12 sps:$4 sm:$0xff]  }
  0xdb   :  { %1459 = vmatmul.mubr.bf16.gmra.mxu1 %v12419_v2  ;;  %10820 = vmatmul.mubr.bf16.gmra.mxu0 %v12193_v21  ;;  %v11474_v21 = vld [vmem:[%s16759_s0 + $0x2f0] sm:$0xff]  }
  0xdc   :  { %1901 = vmatprep.mubr.bf16.mxu0 %v12581_v50  ;;  %10839 = vmatprep.mubr.bf16.mxu1 %v12427_v4  ;;  %v12651_v2 = vld [vmem:[%s16760_s1 + $0x34] ss:$12 sps:$4 sm:$0xff]  }
  0xe3   :  { %v8906_v54 = vpop.f32.mrf.mxu0  ;;  %v12598_v55 = vpop.f32.mrf.mxu1  ;;  %1902 = vmatmul.mubr.bf16.vlgmr.msra.gmra.mxu0 %v12603_v57  ;;  %10840 = vmatmul.mubr.bf16.vlgmr.msra.gmra.mxu1 %v12440_v16  ;;  %v11481_v16 = vld [vmem:[%s16759_s0 + $0x260] sm:$0xff]  }
  0xe4   :  { %1909 = vmatprep.mubr.bf16.mxu0 %v12610_v58  ;;  %10843 = vmatprep.mubr.bf16.mxu1 %v12450_v18  ;;  %v12661_v18 = vpop.permute.xlu0 %215 }
  0xe5   :  { %v8907_v59 = vpop.f32.mrf.mxu0  ;;  %v938_v61 = vpop.f32.mrf.mxu1  ;;  %10872 = vmatpush3.bf16.msra.mxu0 %v11472_v44  ;;  %9299 = vmatpush3.bf16.msra.mxu1 %v11475_v52  ;;  %16977 = vst [vmem:[#allocation6_spill] sm:$0xff] %v12661_v18  ;;  %v11485_v44 = vld [vmem:[%s16759_s0 + $0x290] sm:$0xff]  }
  0xe6   :  { %v8908_v43 = vadd.f32 %v8907_v59, %v8906_v54  ;;  %10873 = vmatprep.subr.bf16.mxu0 %v11474_v21  ;;  %9300 = vmatprep.subr.bf16.mxu1 %v11476_v34  ;;  %v11493_v52 = vld [vmem:[%s16759_s0 + $0x2d0] sm:$0xff]  }
  0xe7   :  { %v8909_v0 = vpop.f32.mrf.mxu0  ;;  %v12623_v3 = vpop.f32.mrf.mxu1 }
  0xe8   :  { %v778_v7 = vadd.f32 %v8908_v43, %v12588_v53 }
  0xe9   :  { %v8910_v48 = vpop.f32.mrf.mxu0  ;;  %v941_v51 = vpop.f32.mrf.mxu1  ;;  %10874 = vmatpush3.bf16.msra.mxu0 %v11474_v21  ;;  %9301 = vmatpush3.bf16.msra.mxu1 %v11477_v39  ;;  %v12703_v39 = vld [vmem:[%s16760_s1 + $0x4c] ss:$12 sps:$4 sm:$0xff]  }
  0xea   :  { %v8911_v9 = vadd.f32 %v8910_v48, %v8909_v0  ;;  %9302 = vmatprep.subr.bf16.mxu1 %v11478_v62  ;;  %10875 = vmatprep.subr.bf16.mxu0 %v11483_v63  ;;  %v939_v56 = vadd.f32 %v938_v61, %v778_v7  ;;  %v12698_v61 = vpop.permute.xlu0 %205  ;;  %v11487_v7 = vld [vmem:[%s16759_s0 + $0x288] sm:$0xff]  }
  0xeb   :  { %v8912_v60 = vpop.f32.mrf.mxu0  ;;  %v12639_v13 = vpop.f32.mrf.mxu1  ;;  %1910 = vmatmul.mubr.bf16.gmra.mxu0 %v12644_v14  ;;  %10844 = vmatmul.mubr.bf16.gmra.mxu1 %v12466_v23  ;;  %16980 = vst [vmem:[#allocation9_spill] sm:$0xff] %v12698_v61 }
  0xec   :  { %1917 = vmatprep.mubr.bf16.mxu0 %v12651_v2  ;;  %10847 = vmatprep.mubr.bf16.mxu1 %v12476_v26  ;;  %v781_v4 = vadd.f32 %v8911_v9, %v12625_v5  ;;  %v1065_v28 = vmax.f32 %v939_v56, 0.0 }
  0xed   :  { %v8913_v11 = vpop.f32.mrf.mxu0  ;;  %v12656_v15 = vpop.f32.mrf.mxu1  ;;  %9303 = vmatpush3.bf16.msra.mxu1 %v11479_v8  ;;  %10876 = vmatpush3.bf16.msra.mxu0 %v11483_v63 }
  0xee   :  { %v8914_v17 = vadd.f32 %v8913_v11, %v8912_v60  ;;  %9304 = vmatprep.subr.bf16.mxu1 %v11480_v10  ;;  %10877 = vmatprep.subr.bf16.mxu0 %v11491_v12  ;;  %v942_v22 = vadd.f32 %v941_v51, %v781_v4  ;;  %v12721_v10 = vpop.permute.xlu1 %210  ;;  %v11488_v60 = vld [vmem:[%s16759_s0 + $0x248] sm:$0xff]   ;;  %v11489_v11 = vld [vmem:[%s16759_s0 + $0x280] sm:$0xff]  }
  0xef   :  { %v8915_v23 = vpop.f32.mrf.mxu0  ;;  %v12669_v25 = vpop.f32.mrf.mxu1  ;;  %16981 = vst [vmem:[#allocation10_spill] sm:$0xff] %v12721_v10 }
  0xf0   :  { %v786_v26 = vadd.f32 %v8914_v17, %v12590_v32  ;;  %v1066_v30 = vmax.f32 %v942_v22, 0.0 }
  0xf1   :  { %v8916_v31 = vpop.f32.mrf.mxu0  ;;  %v12672_v35 = vpop.f32.mrf.mxu1  ;;  %9305 = vmatpush3.bf16.msra.mxu1 %v11481_v16  ;;  %10878 = vmatpush3.bf16.msra.mxu0 %v11491_v12  ;;  %v11496_v16 = vld [vmem:[%s16759_s0 + $0x2c0] sm:$0xff]  }
  0xf2   :  { %v947_v24 = vadd.f32 %v12598_v55, %v786_v26  ;;  %v8917_v38 = vadd.f32 %v8916_v31, %v8915_v23  ;;  %9306 = vmatprep.subr.bf16.mxu1 %v11482_v19  ;;  %10879 = vmatprep.subr.bf16.mxu0 %v11492_v20  ;;  %v12686_v21 = vpack.c.bf16 %v1066_v30, %v1065_v28  ;;  %v12693_v55 = vld [vmem:[%s16760_s1 + $0x30] ss:$12 sps:$4 sm:$0xff]   ;;  %v12743_v23 = vld [vmem:[%s16760_s1 + $0x48] ss:$12 sps:$4 sm:$0xff]   ;;  %v11490_v31 = vld [vmem:[%s16759_s0 + $0x240] sm:$0xff]  }
  0xf3   :  { %v8918_v34 = vpop.f32.mrf.mxu0  ;;  %v12688_v54 = vpop.f32.mrf.mxu1  ;;  %1918 = vmatmul.mubr.bf16.gmra.mxu0 %v12693_v55  ;;  %10848 = vmatmul.mubr.bf16.gmra.mxu1 %v12492_v33  ;;  %v11486_v33 = vld [vmem:[%s16759_s0 + $0x250] sm:$0xff]  }
  0xf4   :  { %16979 = vst [vmem:[#allocation8_spill] sm:$0xff] %v12686_v21  ;;  %v789_v59 = vadd.f32 %v8917_v38, %v12627_v6  ;;  %1925 = vmatprep.mubr.bf16.mxu0 %v12703_v39  ;;  %10851 = vmatprep.mubr.bf16.mxu1 %v12502_v36  ;;  %v11495_v36 = vld [vmem:[%s16759_s0 + $0x2c8] sm:$0xff]   ;;  %v1067_v8 = vmax.f32 %v947_v24, 0.0  ;;  %v12750_v26 = vld [vmem:[%s16760_s1 + $0x64] ss:$12 sps:$4 sm:$0xff]   ;;  %v12765_v24 = vld [vmem:[%s16759_s0 + $0x3b8] sm:$0xff]  }
  0xf5   :  { %v8919_v43 = vpop.f32.mrf.mxu0  ;;  %v12707_v62 = vpop.f32.mrf.mxu1  ;;  %9307 = vmatpush3.bf16.msra.mxu1 %v11484_v37  ;;  %10880 = vmatpush3.bf16.msra.mxu0 %v11492_v20 }
  0xf6   :  { %v950_v63 = vadd.f32 %v12623_v3, %v789_v59  ;;  %v8920_v0 = vadd.f32 %v8919_v43, %v8918_v34  ;;  %9308 = vmatprep.subr.bf16.mxu1 %v11485_v44  ;;  %10881 = vmatprep.subr.bf16.mxu0 %v11493_v52  ;;  %v12760_v37 = vpop.permute.xlu0 %235 }
  0xf7   :  { %v8921_v48 = vpop.f32.mrf.mxu0  ;;  %v12719_v51 = vpop.f32.mrf.mxu1  ;;  %16983 = vst [vmem:[#allocation12_spill] sm:$0xff] %v12760_v37 }
  0xf8   :  { %v1068_v9 = vmax.f32 %v950_v63, 0.0  ;;  %v794_v3 = vadd.f32 %v8920_v0, %v12698_v61 }
  0xf9   :  { %v8922_v12 = vpop.f32.mrf.mxu0  ;;  %v12724_v56 = vpop.f32.mrf.mxu1  ;;  %9309 = vmatpush3.bf16.msra.mxu1 %v11486_v33  ;;  %10882 = vmatpush3.bf16.msra.mxu0 %v11493_v52 }
  0xfa   :  { %v8923_v4 = vadd.f32 %v8922_v12, %v8921_v48  ;;  %9310 = vmatprep.subr.bf16.mxu1 %v11487_v7  ;;  %10883 = vmatprep.subr.bf16.mxu0 %v11495_v36  ;;  %v955_v17 = vadd.f32 %v12656_v15, %v794_v3  ;;  %v12736_v19 = vpack.c.bf16 %v1068_v9, %v1067_v8  ;;  %v12787_v9 = vld [vmem:[%s16760_s1 + $0x60] ss:$12 sps:$4 sm:$0xff]   ;;  %v12792_v3 = vpop.permute.xlu0 %225  ;;  %v12797_v12 = vld [vmem:[%s16760_s1 + $0x7c] ss:$12 sps:$4 sm:$0xff]  }
  0xfb   :  { %v8924_v20 = vpop.f32.mrf.mxu0  ;;  %v12738_v22 = vpop.f32.mrf.mxu1  ;;  %1926 = vmatmul.mubr.bf16.gmra.mxu0 %v12743_v23  ;;  %10852 = vmatmul.mubr.bf16.gmra.mxu1 %v12518_v40  ;;  %16986 = vst [vmem:[#allocation15_spill] sm:$0xff] %v12792_v3 }
  0xfc   :  { %16982 = vst [vmem:[#allocation11_spill] sm:$0xff] %v12736_v19  ;;  %1933 = vmatprep.mubr.bf16.mxu0 %v12750_v26  ;;  %10855 = vmatprep.mubr.bf16.mxu1 %v12528_v42  ;;  %v797_v15 = vadd.f32 %v8923_v4, %v12721_v10  ;;  %v11499_v42 = vld [vmem:[%s16759_s0 + $0x378] sm:$0xff]   ;;  %v1069_v59 = vmax.f32 %v955_v17, 0.0 }
  0xfd   :  { %v8925_v28 = vpop.f32.mrf.mxu0  ;;  %v12755_v30 = vpop.f32.mrf.mxu1  ;;  %9311 = vmatpush3.bf16.msra.mxu1 %v11488_v60  ;;  %10884 = vmatpush3.bf16.msra.mxu0 %v11495_v36 }
  0xfe   :  { %v8926_v40 = vadd.f32 %v8925_v28, %v8924_v20  ;;  %9312 = vmatprep.subr.bf16.mxu1 %v11489_v11  ;;  %10885 = vmatprep.subr.bf16.mxu0 %v11496_v16  ;;  %v958_v38 = vadd.f32 %v12672_v35, %v797_v15  ;;  %v12777_v36 = vpop.permute.xlu1 %240 }
  0xff   :  { %v8927_v44 = vpop.f32.mrf.mxu0  ;;  %v12771_v52 = vpop.f32.mrf.mxu1  ;;  %16984 = vst [vmem:[#allocation13_spill] sm:$0xff] %v12777_v36 }
 0x100   :  { %v802_v34 = vadd.f32 %v8926_v40, %v12661_v18  ;;  %v1070_v43 = vmax.f32 %v958_v38, 0.0 }
 0x101   :  { %v8928_v33 = vpop.f32.mrf.mxu0  ;;  %v12774_v63 = vpop.f32.mrf.mxu1  ;;  %9313 = vmatpush3.bf16.msra.mxu1 %v11490_v31  ;;  %10886 = vmatpush3.bf16.msra.mxu0 %v11496_v16 }
 0x102   :  { %v963_v0 = vadd.f32 %v12639_v13, %v802_v34  ;;  %v8929_v7 = vadd.f32 %v8928_v33, %v8927_v44  ;;  %10919 = vmatprep.subr.bf16.mxu1 %v12765_v24  ;;  %9434 = vmatprep.subr.bf16.mxu0 %v11499_v42  ;;  %v12780_v35 = vpack.c.bf16 %v1070_v43, %v1069_v59  ;;  %v12806_v28 = vpop.permute.xlu1 %230  ;;  %v12819_v59 = vld [vmem:[%s16760_s1 + $0x78] ss:$12 sps:$4 sm:$0xff]   ;;  %v12826_v43 = vld [vmem:[%s16760_s1 + $0x94] ss:$12 sps:$4 sm:$0xff]  }
 0x103   :  { %v8930_v48 = vpop.f32.mrf.mxu0  ;;  %v12782_v8 = vpop.f32.mrf.mxu1  ;;  %1934 = vmatmul.mubr.bf16.gmra.mxu0 %v12787_v9  ;;  %10856 = vmatmul.mubr.bf16.gmra.mxu1 %v12538_v45  ;;  %16987 = vst [vmem:[#allocation16_spill] sm:$0xff] %v12806_v28 }
 0x104   :  { %16985 = vst [vmem:[#allocation14_spill] sm:$0xff] %v12780_v35  ;;  %v805_v13 = vadd.f32 %v8929_v7, %v12678_v41  ;;  %1941 = vmatprep.mubr.bf16.mxu0 %v12797_v12  ;;  %10859 = vmatprep.mubr.bf16.mxu1 %v12545_v27  ;;  %v1071_v20 = vmax.f32 %v963_v0, 0.0 }
 0x105   :  { %v8931_v60 = vpop.f32.mrf.mxu0  ;;  %v12801_v4 = vpop.f32.mrf.mxu1 }
 0x106   :  { %v966_v11 = vadd.f32 %v12669_v25, %v805_v13  ;;  %v8932_v16 = vadd.f32 %v8931_v60, %v8930_v48  ;;  %v12833_v48 = vpop.permute.xlu0 %255 }
 0x107   :  { %v8933_v45 = vpop.f32.mrf.mxu0  ;;  %v12804_v17 = vpop.f32.mrf.mxu1  ;;  %16989 = vst [vmem:[#allocation18_spill] sm:$0xff] %v12833_v48 }
 0x108   :  { %v1072_v15 = vmax.f32 %v966_v11, 0.0  ;;  %v810_v31 = vadd.f32 %v8932_v16, %v12792_v3 }
 0x109   :  { %v8934_v40 = vpop.f32.mrf.mxu0  ;;  %v12809_v42 = vpop.f32.mrf.mxu1 }
 0x10a   :  { %v8935_v38 = vadd.f32 %v8934_v40, %v8933_v45  ;;  %v12811_v27 = vpack.c.bf16 %v1072_v15, %v1071_v20  ;;  %v971_v44 = vadd.f32 %v12707_v62, %v810_v31  ;;  %v12842_v40 = vpop.permute.xlu1 %260 }
 0x10b   :  { %v8936_v34 = vpop.f32.mrf.mxu0  ;;  %v12814_v25 = vpop.f32.mrf.mxu1  ;;  %1942 = vmatmul.mubr.bf16.gmra.mxu0 %v12819_v59  ;;  %10860 = vmatmul.mubr.bf16.gmra.mxu1 %v12552_v29  ;;  %16990 = vst [vmem:[#allocation19_spill] sm:$0xff] %v12842_v40 }
 0x10c   :  { %16988 = vst [vmem:[#allocation17_spill] sm:$0xff] %v12811_v27  ;;  %1949 = vmatprep.mubr.bf16.mxu0 %v12826_v43  ;;  %10863 = vmatprep.mubr.bf16.mxu1 %v12559_v46  ;;  %v813_v62 = vadd.f32 %v8935_v38, %v12806_v28  ;;  %v1073_v16 = vmax.f32 %v971_v44, 0.0 }
 0x10d   :  { %v8937_v33 = vpop.f32.mrf.mxu0  ;;  %v12831_v0 = vpop.f32.mrf.mxu1 }
 0x10e   :  { %v8938_v7 = vadd.f32 %v8937_v33, %v8936_v34  ;;  %v974_v13 = vadd.f32 %v12724_v56, %v813_v62  ;;  %v12851_v56 = vld [vmem:[%s16760_s1 + $0x90] ss:$12 sps:$4 sm:$0xff]   ;;  %v12861_v62 = vld [vmem:[%s16760_s1 + $0xac] ss:$12 sps:$4 sm:$0xff]  }
 0x10f   :  { %v8939_v29 = vpop.f32.mrf.mxu0  ;;  %v12836_v60 = vpop.f32.mrf.mxu1 }
 0x110   :  { %v818_v11 = vadd.f32 %v8938_v7, %v12760_v37  ;;  %v1074_v45 = vmax.f32 %v974_v13, 0.0 }
 0x111   :  { %v8940_v20 = vpop.f32.mrf.mxu0  ;;  %v12839_v15 = vpop.f32.mrf.mxu1 }
 0x112   :  { %v979_v46 = vadd.f32 %v12688_v54, %v818_v11  ;;  %v8941_v31 = vadd.f32 %v8940_v20, %v8939_v29  ;;  %v12844_v38 = vpack.c.bf16 %v1074_v45, %v1073_v16  ;;  %v12856_v54 = vpop.permute.xlu0 %245  ;;  %v12870_v20 = vpop.permute.xlu1 %250 }
 0x113   :  { %v8942_v34 = vpop.f32.mrf.mxu0  ;;  %v12846_v33 = vpop.f32.mrf.mxu1  ;;  %1950 = vmatmul.mubr.bf16.gmra.mxu0 %v12851_v56  ;;  %10864 = vmatmul.mubr.bf16.gmra.mxu1 %v12566_v47  ;;  %16992 = vst [vmem:[#allocation21_spill] sm:$0xff] %v12856_v54  ;;  %16993 = vst [vmem:[#allocation22_spill] sm:$0xff] %v12870_v20 }
 0x114   :  { %16991 = vst [vmem:[#allocation20_spill] sm:$0xff] %v12844_v38  ;;  %v821_v44 = vadd.f32 %v8941_v31, %v12777_v36  ;;  %1957 = vmatprep.mubr.bf16.mxu0 %v12861_v62  ;;  %10867 = vmatprep.mubr.bf16.mxu1 %v12573_v49  ;;  %v1075_v45 = vmax.f32 %v979_v46, 0.0  ;;  %v12883_v46 = vld [vmem:[%s16760_s1 + $0xa8] ss:$12 sps:$4 sm:$0xff]  }
 0x115   :  { %v8943_v7 = vpop.f32.mrf.mxu0  ;;  %v12865_v13 = vpop.f32.mrf.mxu1 }
 0x116   :  { %v982_v29 = vadd.f32 %v12719_v51, %v821_v44  ;;  %v8944_v11 = vadd.f32 %v8943_v7, %v8942_v34  ;;  %v12889_v34 = vld [vmem:[%s16760_s1 + $0x170] ss:$12 sps:$4 sm:$0xff]  }
 0x117   :  { %v8945_v47 = vpop.f32.mrf.mxu0  ;;  %v12868_v16 = vpop.f32.mrf.mxu1  ;;  %16995 = vst [vmem:[#allocation24_spill] sm:$0xff] %v12889_v34 }
 0x118   :  { %v826_v31 = vadd.f32 %v8944_v11, %v12856_v54  ;;  %v1076_v1 = vmax.f32 %v982_v29, 0.0 }
 0x119   :  { %v8946_v38 = vpop.f32.mrf.mxu0  ;;  %v12873_v21 = vpop.f32.mrf.mxu1 }
 0x11a   :  { %v8947_v19 = vadd.f32 %v8946_v38, %v8945_v47  ;;  %v987_v49 = vadd.f32 %v12755_v30, %v826_v31  ;;  %v12876_v35 = vpack.c.bf16 %v1076_v1, %v1075_v45  ;;  %v12895_v1 = vld [vmem:[%s16760_s1 + $0xc4] ss:$12 sps:$4 sm:$0xff]   ;;  %v12899_v30 = vpop.permute.xlu0 %275 }
 0x11b   :  { %v8948_v27 = vpop.f32.mrf.mxu0  ;;  %v12878_v51 = vpop.f32.mrf.mxu1  ;;  %1958 = vmatmul.mubr.bf16.gmra.mxu0 %v12883_v46  ;;  %10868 = vmatmul.mubr.bf16.gmra.mxu1 %v12889_v34  ;;  %16996 = vst [vmem:[#allocation25_spill] sm:$0xff] %v12899_v30 }
 0x11c   :  { %16994 = vst [vmem:[#allocation23_spill] sm:$0xff] %v12876_v35  ;;  %1965 = vmatprep.mubr.bf16.mxu0 %v12895_v1  ;;  %2464 = vmatprep.mubr.bf16.mxu1 %v12581_v50  ;;  %v829_v38 = vadd.f32 %v8947_v19, %v12870_v20  ;;  %v12908_v35 = vpop.permute.xlu1 %280  ;;  %v1077_v34 = vmax.f32 %v987_v49, 0.0  ;;  %v12923_v49 = vld [vmem:[%s16760_s1 + $0xc0] ss:$12 sps:$4 sm:$0xff]  }
 0x11d   :  { %v8949_v44 = vpop.f32.mrf.mxu0  ;;  %v12902_v7 = vpop.f32.mrf.mxu1  ;;  %16997 = vst [vmem:[#allocation26_spill] sm:$0xff] %v12908_v35 }
 0x11e   :  { %v8950_v29 = vadd.f32 %v8949_v44, %v8948_v27  ;;  %v990_v11 = vadd.f32 %v12774_v63, %v829_v38  ;;  %v12913_v36 = vpop.permute.xlu0 %265  ;;  %v11497_v63 = vld [vmem:[%s16759_s0 + $0x3b0] sm:$0xff]  }
 0x11f   :  { %v8951_v47 = vpop.f32.mrf.mxu0  ;;  %v12905_v45 = vpop.f32.mrf.mxu1  ;;  %16998 = vst [vmem:[#allocation27_spill] sm:$0xff] %v12913_v36 }
 0x120   :  { %v834_v31 = vadd.f32 %v8950_v29, %v12833_v48  ;;  %v1078_v54 = vmax.f32 %v990_v11, 0.0  ;;  %v12931_v29 = vld [vmem:[%s16760_s1 + $0xdc] ss:$12 sps:$4 sm:$0xff]  }
 0x121   :  { %v8952_v50 = vpop.f32.mrf.mxu0  ;;  %v12910_v28 = vpop.f32.mrf.mxu1 }
 0x122   :  { %v995_v19 = vadd.f32 %v12738_v22, %v834_v31  ;;  %v8953_v20 = vadd.f32 %v8952_v50, %v8951_v47  ;;  %v12918_v27 = vpack.c.bf16 %v1078_v54, %v1077_v34  ;;  %v11498_v50 = vld [vmem:[%s16759_s0 + $0x3a8] sm:$0xff]  }
 0x123   :  { %v8954_v38 = vpop.f32.mrf.mxu0  ;;  %v9042_v44 = vpop.f32.mrf.mxu1  ;;  %1966 = vmatmul.mubr.bf16.gmra.mxu0 %v12923_v49  ;;  %2465 = vmatmul.mubr.bf16.vlgmr.msra.gmra.mxu1 %v12603_v57 }
 0x124   :  { %16999 = vst [vmem:[#allocation28_spill] sm:$0xff] %v12918_v27  ;;  %v837_v22 = vadd.f32 %v8953_v20, %v12842_v40  ;;  %1973 = vmatprep.mubr.bf16.mxu0 %v12931_v29  ;;  %2472 = vmatprep.mubr.bf16.mxu1 %v12610_v58  ;;  %v12939_v57 = vpop.permute.xlu1 %270  ;;  %v12941_v20 = vpop.permute.xlu0 %295  ;;  %v1079_v40 = vmax.f32 %v995_v19, 0.0 }
 0x125   :  { %v8955_v54 = vpop.f32.mrf.mxu0  ;;  %v9043_v34 = vpop.f32.mrf.mxu1  ;;  %10920 = vmatpush3.bf16.msra.mxu1 %v12765_v24  ;;  %17000 = vst [vmem:[#allocation29_spill] sm:$0xff] %v12939_v57  ;;  %17001 = vst [vmem:[#allocation30_spill] sm:$0xff] %v12941_v20 }
 0x126   :  { %v998_v11 = vadd.f32 %v12771_v52, %v837_v22  ;;  %v8956_v47 = vadd.f32 %v8955_v54, %v8954_v38  ;;  %v12937_v31 = vadd.f32 %v9043_v34, %v9042_v44  ;;  %10921 = vmatprep.subr.bf16.mxu1 %v11497_v63  ;;  %v11503_v54 = vld [vmem:[%s16759_s0 + $0x3a0] sm:$0xff]  }
 0x127   :  { %v8957_v27 = vpop.f32.mrf.mxu0  ;;  %v9045_v58 = vpop.f32.mrf.mxu1 }
 0x128   :  { %v1080_v48 = vmax.f32 %v998_v11, 0.0  ;;  %v842_v24 = vadd.f32 %v8956_v47, %v12913_v36  ;;  %v12949_v22 = vpop.permute.xlu1 %300 }
 0x129   :  { %v8958_v3 = vpop.f32.mrf.mxu0  ;;  %v9046_v52 = vpop.f32.mrf.mxu1  ;;  %10922 = vmatpush3.bf16.msra.mxu1 %v11497_v63  ;;  %17002 = vst [vmem:[#allocation31_spill] sm:$0xff] %v12949_v22  ;;  %v12960_v63 = vld [vmem:[%s16760_s1 + $0xd8] ss:$12 sps:$4 sm:$0xff]  }
 0x12a   :  { %v8959_v38 = vadd.f32 %v8958_v3, %v8957_v27  ;;  %v12947_v44 = vadd.f32 %v9046_v52, %v9045_v58  ;;  %10923 = vmatprep.subr.bf16.mxu1 %v11498_v50  ;;  %v12954_v34 = vpack.c.bf16 %v1080_v48, %v1079_v40  ;;  %v1003_v19 = vadd.f32 %v12801_v4, %v842_v24  ;;  %v12967_v3 = vld [vmem:[%s16760_s1 + $0xf4] ss:$12 sps:$4 sm:$0xff]   ;;  %v12971_v4 = vpop.permute.xlu0 %285 }
 0x12b   :  { %v8960_v11 = vpop.f32.mrf.mxu0  ;;  %v9048_v37 = vpop.f32.mrf.mxu1  ;;  %1974 = vmatmul.mubr.bf16.gmra.mxu0 %v12960_v63  ;;  %2473 = vmatmul.mubr.bf16.gmra.mxu1 %v12644_v14  ;;  %17004 = vst [vmem:[#allocation33_spill] sm:$0xff] %v12971_v4  ;;  %v11508_v14 = vld [vmem:[%s16759_s0 + $0x398] sm:$0xff]  }
 0x12c   :  { %17003 = vst [vmem:[#allocation32_spill] sm:$0xff] %v12954_v34  ;;  %1981 = vmatprep.mubr.bf16.mxu0 %v12967_v3  ;;  %2480 = vmatprep.mubr.bf16.mxu1 %v12651_v2  ;;  %v845_v48 = vadd.f32 %v8959_v38, %v12939_v57  ;;  %v12981_v36 = vpop.permute.xlu1 %290  ;;  %v1081_v38 = vmax.f32 %v1003_v19, 0.0 }
 0x12d   :  { %v8961_v40 = vpop.f32.mrf.mxu0  ;;  %v9049_v27 = vpop.f32.mrf.mxu1  ;;  %10924 = vmatpush3.bf16.msra.mxu1 %v11498_v50  ;;  %17005 = vst [vmem:[#allocation34_spill] sm:$0xff] %v12981_v36 }
 0x12e   :  { %v8962_v47 = vadd.f32 %v8961_v40, %v8960_v11  ;;  %v12974_v58 = vadd.f32 %v9049_v27, %v9048_v37  ;;  %10925 = vmatprep.subr.bf16.mxu1 %v11503_v54  ;;  %v1006_v24 = vadd.f32 %v12809_v42, %v845_v48  ;;  %v12986_v27 = vpop.permute.xlu0 %335  ;;  %v11512_v42 = vld [vmem:[%s16759_s0 + $0x390] sm:$0xff]  }
 0x12f   :  { %v8963_v52 = vpop.f32.mrf.mxu0  ;;  %v9051_v34 = vpop.f32.mrf.mxu1  ;;  %17006 = vst [vmem:[#allocation35_spill] sm:$0xff] %v12986_v27 }
 0x130   :  { %v850_v2 = vadd.f32 %v8962_v47, %v12899_v30  ;;  %v1082_v57 = vmax.f32 %v1006_v24, 0.0 }
 0x131   :  { %v8964_v10 = vpop.f32.mrf.mxu0  ;;  %v9052_v50 = vpop.f32.mrf.mxu1  ;;  %10926 = vmatpush3.bf16.msra.mxu1 %v11503_v54  ;;  %v12996_v54 = vld [vmem:[%s16760_s1 + $0xf0] ss:$12 sps:$4 sm:$0xff]  }
 0x132   :  { %v1011_v37 = vadd.f32 %v12782_v8, %v850_v2  ;;  %v8965_v11 = vadd.f32 %v8964_v10, %v8963_v52  ;;  %v12984_v40 = vadd.f32 %v9052_v50, %v9051_v34  ;;  %10927 = vmatprep.subr.bf16.mxu1 %v11508_v14  ;;  %v12991_v48 = vpack.c.bf16 %v1082_v57, %v1081_v38  ;;  %v13004_v8 = vld [vmem:[%s16760_s1 + $0x10c] ss:$12 sps:$4 sm:$0xff]  }
 0x133   :  { %v8966_v47 = vpop.f32.mrf.mxu0  ;;  %v9054_v19 = vpop.f32.mrf.mxu1  ;;  %1982 = vmatmul.mubr.bf16.gmra.mxu0 %v12996_v54  ;;  %2481 = vmatmul.mubr.bf16.gmra.mxu1 %v12693_v55  ;;  %17008 = vst [vmem:[#allocation37_spill] sm:$0xff] %v13004_v8  ;;  %v11515_v38 = vld [vmem:[%s16759_s0 + $0x388] sm:$0xff]  }
 0x134   :  { %17007 = vst [vmem:[#allocation36_spill] sm:$0xff] %v12991_v48  ;;  %v853_v10 = vadd.f32 %v8965_v11, %v12908_v35  ;;  %1989 = vmatprep.mubr.bf16.mxu0 %v13004_v8  ;;  %2488 = vmatprep.mubr.bf16.mxu1 %v12703_v39  ;;  %v13011_v55 = vpop.permute.xlu1 %340  ;;  %v1083_v48 = vmax.f32 %v1011_v37, 0.0  ;;  %v13016_v35 = vpop.permute.xlu0 %325 }
 0x135   :  { %v8967_v57 = vpop.f32.mrf.mxu0  ;;  %v9055_v34 = vpop.f32.mrf.mxu1  ;;  %10928 = vmatpush3.bf16.msra.mxu1 %v11508_v14  ;;  %17009 = vst [vmem:[#allocation38_spill] sm:$0xff] %v13011_v55  ;;  %17010 = vst [vmem:[#allocation39_spill] sm:$0xff] %v13016_v35 }
 0x136   :  { %v1014_v24 = vadd.f32 %v12804_v17, %v853_v10  ;;  %v8968_v52 = vadd.f32 %v8967_v57, %v8966_v47  ;;  %v13009_v2 = vadd.f32 %v9055_v34, %v9054_v19  ;;  %10929 = vmatprep.subr.bf16.mxu1 %v11512_v42  ;;  %v11518_v10 = vld [vmem:[%s16759_s0 + $0x380] sm:$0xff]  }
 0x137   :  { %v8969_v50 = vpop.f32.mrf.mxu0  ;;  %v9057_v11 = vpop.f32.mrf.mxu1 }
 0x138   :  { %v858_v39 = vadd.f32 %v8968_v52, %v12971_v4  ;;  %v1084_v14 = vmax.f32 %v1014_v24, 0.0  ;;  %v13030_v24 = vld [vmem:[%s16760_s1 + $0x108] ss:$12 sps:$4 sm:$0xff]  }
 0x139   :  { %v8970_v30 = vpop.f32.mrf.mxu0  ;;  %v9058_v17 = vpop.f32.mrf.mxu1  ;;  %10930 = vmatpush3.bf16.msra.mxu1 %v11512_v42  ;;  %17012 = vst [vmem:[#allocation41_spill] sm:$0xff] %v13030_v24 }
 0x13a   :  { %v8971_v47 = vadd.f32 %v8970_v30, %v8969_v50  ;;  %v13019_v19 = vadd.f32 %v9058_v17, %v9057_v11  ;;  %10931 = vmatprep.subr.bf16.mxu1 %v11515_v38  ;;  %v1019_v57 = vadd.f32 %v12831_v0, %v858_v39  ;;  %v13025_v34 = vpack.c.bf16 %v1084_v14, %v1083_v48  ;;  %v13037_v30 = vld [vmem:[%s16760_s1 + $0x124] ss:$12 sps:$4 sm:$0xff]   ;;  %v13041_v0 = vpop.permute.xlu1 %330 }
 0x13b   :  { %v8972_v37 = vpop.f32.mrf.mxu0  ;;  %v9060_v8 = vpop.f32.mrf.mxu1  ;;  %1990 = vmatmul.mubr.bf16.gmra.mxu0 %v13030_v24  ;;  %2489 = vmatmul.mubr.bf16.gmra.mxu1 %v12743_v23  ;;  %17013 = vst [vmem:[#allocation42_spill] sm:$0xff] %v13037_v30  ;;  %17014 = vst [vmem:[#allocation43_spill] sm:$0xff] %v13041_v0 }
 0x13c   :  { %17011 = vst [vmem:[#allocation40_spill] sm:$0xff] %v13025_v34  ;;  %1997 = vmatprep.mubr.bf16.mxu0 %v13037_v30  ;;  %2496 = vmatprep.mubr.bf16.mxu1 %v12750_v26  ;;  %v861_v42 = vadd.f32 %v8971_v47, %v12981_v36  ;;  %v13046_v23 = vpop.permute.xlu0 %315  ;;  %v1085_v26 = vmax.f32 %v1019_v57, 0.0  ;;  %v13063_v57 = vld [vmem:[%s16760_s1 + $0x120] ss:$12 sps:$4 sm:$0xff]  }
 0x13d   :  { %v8973_v48 = vpop.f32.mrf.mxu0  ;;  %v9061_v52 = vpop.f32.mrf.mxu1  ;;  %10932 = vmatpush3.bf16.msra.mxu1 %v11515_v38  ;;  %17015 = vst [vmem:[#allocation44_spill] sm:$0xff] %v13046_v23  ;;  %v11521_v38 = vld [vmem:[%s16759_s0 + $0x438] sm:$0xff]  }
 0x13e   :  { %v8974_v50 = vadd.f32 %v8973_v48, %v8972_v37  ;;  %v13044_v11 = vadd.f32 %v9061_v52, %v9060_v8  ;;  %10933 = vmatprep.subr.bf16.mxu1 %v11518_v10  ;;  %v1022_v39 = vadd.f32 %v12839_v15, %v861_v42  ;;  %v13056_v48 = vpop.permute.xlu1 %320 }
 0x13f   :  { %v8975_v14 = vpop.f32.mrf.mxu0  ;;  %v9063_v17 = vpop.f32.mrf.mxu1  ;;  %17016 = vst [vmem:[#allocation45_spill] sm:$0xff] %v13056_v48 }
 0x140   :  { %v866_v34 = vadd.f32 %v8974_v50, %v12941_v20  ;;  %v1086_v4 = vmax.f32 %v1022_v39, 0.0 }
 0x141   :  { %v8976_v30 = vpop.f32.mrf.mxu0  ;;  %v9064_v24 = vpop.f32.mrf.mxu1  ;;  %10934 = vmatpush3.bf16.msra.mxu1 %v11518_v10 }
 0x142   :  { %v1027_v8 = vadd.f32 %v12814_v25, %v866_v34  ;;  %v8977_v47 = vadd.f32 %v8976_v30, %v8975_v14  ;;  %v13054_v37 = vadd.f32 %v9064_v24, %v9063_v17  ;;  %v13058_v15 = vpack.c.bf16 %v1086_v4, %v1085_v26  ;;  %v13068_v10 = vpop.permute.xlu0 %305  ;;  %v13073_v4 = vld [vmem:[%s16760_s1 + $0x13c] ss:$12 sps:$4 sm:$0xff]   ;;  %9570 = vmatprep.subr.bf16.mxu1 %v11521_v38  ;;  %v13080_v26 = vpop.permute.xlu1 %310 }
 0x143   :  { %v8978_v42 = vpop.f32.mrf.mxu0  ;;  %v9066_v52 = vpop.f32.mrf.mxu1  ;;  %1998 = vmatmul.mubr.bf16.gmra.mxu0 %v13063_v57  ;;  %2497 = vmatmul.mubr.bf16.gmra.mxu1 %v12787_v9  ;;  %17018 = vst [vmem:[#allocation47_spill] sm:$0xff] %v13068_v10  ;;  %17019 = vst [vmem:[#allocation48_spill] sm:$0xff] %v13073_v4 }
 0x144   :  { %17017 = vst [vmem:[#allocation46_spill] sm:$0xff] %v13058_v15  ;;  %v869_v25 = vadd.f32 %v8977_v47, %v12949_v22  ;;  %2005 = vmatprep.mubr.bf16.mxu0 %v13073_v4  ;;  %2504 = vmatprep.mubr.bf16.mxu1 %v12797_v12  ;;  %v1087_v17 = vmax.f32 %v1027_v8, 0.0  ;;  %17020 = vst [vmem:[#allocation49_spill] sm:$0xff] %v13080_v26  ;;  %v13091_v8 = vld [vmem:[%s16760_s1 + $0x138] ss:$12 sps:$4 sm:$0xff]  }
 0x145   :  { %v8979_v34 = vpop.f32.mrf.mxu0  ;;  %v9067_v24 = vpop.f32.mrf.mxu1 }
 0x146   :  { %v1030_v30 = vadd.f32 %v12836_v60, %v869_v25  ;;  %v8980_v50 = vadd.f32 %v8979_v34, %v8978_v42  ;;  %v13078_v9 = vadd.f32 %v9067_v24, %v9066_v52 }
 0x147   :  { %v8981_v39 = vpop.f32.mrf.mxu0  ;;  %v9069_v14 = vpop.f32.mrf.mxu1 }
 0x148   :  { %v1088_v47 = vmax.f32 %v1030_v30, 0.0  ;;  %v874_v15 = vadd.f32 %v8980_v50, %v13068_v10 }
 0x149   :  { %v8982_v36 = vpop.f32.mrf.mxu0  ;;  %v9070_v22 = vpop.f32.mrf.mxu1 }
 0x14a   :  { %v8983_v20 = vadd.f32 %v8982_v36, %v8981_v39  ;;  %v13083_v12 = vadd.f32 %v9070_v22, %v9069_v14  ;;  %v13085_v4 = vpack.c.bf16 %v1088_v47, %v1087_v17  ;;  %v1035_v60 = vadd.f32 %v12865_v13, %v874_v15  ;;  %v13098_v36 = vld [vmem:[%s16760_s1 + $0x154] ss:$12 sps:$4 sm:$0xff]  }
 0x14b   :  { %v8984_v38 = vpop.f32.mrf.mxu0  ;;  %v9072_v42 = vpop.f32.mrf.mxu1  ;;  %2006 = vmatmul.mubr.bf16.gmra.mxu0 %v13091_v8  ;;  %2505 = vmatmul.mubr.bf16.gmra.mxu1 %v12819_v59 }
 0x14c   :  { %17021 = vst [vmem:[#allocation50_spill] sm:$0xff] %v13085_v4  ;;  %2013 = vmatprep.mubr.bf16.mxu0 %v13098_v36  ;;  %2512 = vmatprep.mubr.bf16.mxu1 %v12826_v43  ;;  %v877_v13 = vadd.f32 %v8983_v20, %v13080_v26  ;;  %v1089_v50 = vmax.f32 %v1035_v60, 0.0 }
 0x14d   :  { %v8985_v22 = vpop.f32.mrf.mxu0  ;;  %v9073_v15 = vpop.f32.mrf.mxu1 }
 0x14e   :  { %v8986_v52 = vadd.f32 %v8985_v22, %v8984_v38  ;;  %v13103_v25 = vadd.f32 %v9073_v15, %v9072_v42  ;;  %v1038_v34 = vadd.f32 %v12873_v21, %v877_v13  ;;  %v13115_v21 = vld [vmem:[%s16760_s1 + $0x150] ss:$12 sps:$4 sm:$0xff]  }
 0x14f   :  { %v8987_v24 = vpop.f32.mrf.mxu0  ;;  %v9075_v59 = vpop.f32.mrf.mxu1 }
 0x150   :  { %v882_v30 = vadd.f32 %v8986_v52, %v13046_v23  ;;  %v1090_v39 = vmax.f32 %v1038_v34, 0.0 }
 0x151   :  { %v8988_v14 = vpop.f32.mrf.mxu0  ;;  %v9076_v17 = vpop.f32.mrf.mxu1 }
 0x152   :  { %v1043_v47 = vadd.f32 %v12846_v33, %v882_v30  ;;  %v8989_v43 = vadd.f32 %v8988_v14, %v8987_v24  ;;  %v13108_v4 = vadd.f32 %v9076_v17, %v9075_v59  ;;  %v13110_v20 = vpack.c.bf16 %v1090_v39, %v1089_v50  ;;  %v13123_v33 = vld [vmem:[%s16760_s1 + $0x16c] ss:$12 sps:$4 sm:$0xff]  }
 0x153   :  { %v8990_v38 = vpop.f32.mrf.mxu0  ;;  %v9078_v42 = vpop.f32.mrf.mxu1  ;;  %2014 = vmatmul.mubr.bf16.gmra.mxu0 %v13115_v21  ;;  %2513 = vmatmul.mubr.bf16.gmra.mxu1 %v12851_v56 }
 0x154   :  { %17022 = vst [vmem:[#allocation51_spill] sm:$0xff] %v13110_v20  ;;  %v885_v60 = vadd.f32 %v8989_v43, %v13056_v48  ;;  %2021 = vmatprep.mubr.bf16.mxu0 %v13123_v33  ;;  %2520 = vmatprep.mubr.bf16.mxu1 %v12861_v62  ;;  %v1091_v59 = vmax.f32 %v1043_v47, 0.0 }
 0x155   :  { %v8991_v13 = vpop.f32.mrf.mxu0  ;;  %v9079_v22 = vpop.f32.mrf.mxu1 }
 0x156   :  { %v1046_v15 = vadd.f32 %v12868_v16, %v885_v60  ;;  %v8992_v52 = vadd.f32 %v8991_v13, %v8990_v38  ;;  %v13128_v34 = vadd.f32 %v9079_v22, %v9078_v42  ;;  %v13139_v38 = vld [vmem:[%s16760_s1 + $0x168] ss:$12 sps:$4 sm:$0xff]  }
 0x157   :  { %v8993_v24 = vpop.f32.mrf.mxu0  ;;  %v9081_v56 = vpop.f32.mrf.mxu1 }
 0x158   :  { %v890_v30 = vadd.f32 %v8992_v52, %v13016_v35  ;;  %v1092_v50 = vmax.f32 %v1046_v15, 0.0 }
 0x159   :  { %v8994_v39 = vpop.f32.mrf.mxu0  ;;  %v9082_v14 = vpop.f32.mrf.mxu1 }
 0x15a   :  { %v1051_v17 = vadd.f32 %v12902_v7, %v890_v30  ;;  %v8995_v43 = vadd.f32 %v8994_v39, %v8993_v24  ;;  %v13132_v20 = vadd.f32 %v9082_v14, %v9081_v56  ;;  %v13134_v62 = vpack.c.bf16 %v1092_v50, %v1091_v59  ;;  %v13148_v7 = vld [vmem:[%s16760_s1 + $0x8] ss:$12 sps:$4 sm:$0xff]   ;;  %v11500_v50 = vld [vmem:[%s16759_s0 + $0x338] sm:$0xff]  }
 0x15b   :  { %v8996_v26 = vpop.f32.mrf.mxu0  ;;  %v9084_v16 = vpop.f32.mrf.mxu1  ;;  %2022 = vmatmul.mubr.bf16.gmra.mxu0 %v13139_v38  ;;  %2521 = vmatmul.mubr.bf16.gmra.mxu1 %v12883_v46 }
 0x15c   :  { %17023 = vst [vmem:[#allocation52_spill] sm:$0xff] %v13134_v62  ;;  %v893_v47 = vadd.f32 %v8995_v43, %v13041_v0  ;;  %2528 = vmatprep.mubr.bf16.mxu1 %v12895_v1  ;;  %10887 = vmatprep.mubr.bf16.mxu0 %v13148_v7  ;;  %v1093_v24 = vmax.f32 %v1051_v17, 0.0  ;;  %v17035_v62 = vld [vmem:[#allocation16_spill] sm:$0xff] }
 0x15d   :  { %v8997_v42 = vpop.f32.mrf.mxu0  ;;  %v9085_v60 = vpop.f32.mrf.mxu1 }
 0x15e   :  { %v1054_v13 = vadd.f32 %v12910_v28, %v893_v47  ;;  %v8998_v22 = vadd.f32 %v8997_v42, %v8996_v26  ;;  %v13152_v15 = vadd.f32 %v9085_v60, %v9084_v16  ;;  %v1349_v28 = vadd.f32 %v12974_v58, %v12590_v32  ;;  %v11501_v26 = vld [vmem:[%s16759_s0 + $0x370] sm:$0xff]   ;;  %v13171_v47 = vld [vmem:[%s16760_s1 + $0x20] ss:$12 sps:$4 sm:$0xff]  }
 0x15f   :  { %v8999_v52 = vpop.f32.mrf.mxu0  ;;  %v9087_v46 = vpop.f32.mrf.mxu1  ;;  %v1341_v58 = vadd.f32 %v12937_v31, %v12588_v53  ;;  %v11502_v31 = vld [vmem:[%s16759_s0 + $0x330] sm:$0xff]  }
 0x160   :  { %v898_v56 = vadd.f32 %v8998_v22, %v12986_v27  ;;  %v1094_v1 = vmax.f32 %v1054_v13, 0.0 }
 0x161   :  { %v9000_v59 = vpop.f32.mrf.mxu0  ;;  %v9088_v30 = vpop.f32.mrf.mxu1 }
 0x162   :  { %v9001_v39 = vadd.f32 %v9000_v59, %v8999_v52  ;;  %v13158_v14 = vadd.f32 %v9088_v30, %v9087_v46  ;;  %v13165_v17 = vpack.c.bf16 %v1094_v1, %v1093_v24  ;;  %v1059_v42 = vadd.f32 %v12878_v51, %v898_v56  ;;  %v11504_v56 = vld [vmem:[%s16759_s0 + $0x368] sm:$0xff]  }
 0x163   :  { %v9090_v43 = vpop.f32.mrf.mxu1  ;;  %v10793_v16 = vpop.f32.mrf.mxu0  ;;  %2529 = vmatmul.mubr.bf16.gmra.mxu1 %v12923_v49  ;;  %10888 = vmatmul.mubr.bf16.vlgmr.msra.gmra.mxu0 %v13171_v47  ;;  %v13182_v49 = vld [vmem:[%s16760_s1 + $0x38] ss:$12 sps:$4 sm:$0xff]  }
 0x164   :  { %17024 = vst [vmem:[#allocation53_spill] sm:$0xff] %v13165_v17  ;;  %v901_v60 = vadd.f32 %v9001_v39, %v13011_v55  ;;  %v1510_v13 = vadd.f32 %v10793_v16, %v1349_v28  ;;  %2536 = vmatprep.mubr.bf16.mxu1 %v12931_v29  ;;  %10891 = vmatprep.mubr.bf16.mxu0 %v13182_v49  ;;  %v1095_v30 = vmax.f32 %v1059_v42, 0.0 }
 0x165   :  { %v9091_v22 = vpop.f32.mrf.mxu1  ;;  %v1501_v52 = vpop.f32.mrf.mxu0  ;;  %9435 = vmatpush3.bf16.msra.mxu0 %v11500_v50  ;;  %v1352_v29 = vadd.f32 %v12984_v40, %v12627_v6  ;;  %v1344_v39 = vadd.f32 %v12947_v44, %v12625_v5  ;;  %v11505_v40 = vld [vmem:[%s16759_s0 + $0x328] sm:$0xff]   ;;  %v11506_v44 = vld [vmem:[%s16759_s0 + $0x360] sm:$0xff]   ;;  %v1376_v17 = vadd.f32 %v13083_v12, %v17035_v62 }
 0x166   :  { %v1062_v51 = vadd.f32 %v12905_v45, %v901_v60  ;;  %v13189_v46 = vadd.f32 %v9091_v22, %v9090_v43  ;;  %v1502_v24 = vadd.f32 %v1501_v52, %v1341_v58  ;;  %9436 = vmatprep.subr.bf16.mxu0 %v11501_v26  ;;  %v1630_v45 = vmax.f32 %v1510_v13, 0.0  ;;  %v11517_v12 = vld [vmem:[%s16759_s0 + $0x340] sm:$0xff]  }
 0x167   :  { %v9093_v1 = vpop.f32.mrf.mxu1  ;;  %v10794_v59 = vpop.f32.mrf.mxu0  ;;  %v1365_v58 = vadd.f32 %v13044_v11, %v12661_v18  ;;  %v13214_v11 = vld [vmem:[%s16760_s1 + $0x50] ss:$12 sps:$4 sm:$0xff]  }
 0x168   :  { %v1513_v50 = vadd.f32 %v10794_v59, %v1352_v29  ;;  %v1096_v28 = vmax.f32 %v1062_v51, 0.0  ;;  %v1628_v51 = vmax.f32 %v1502_v24, 0.0 }
 0x169   :  { %v9094_v43 = vpop.f32.mrf.mxu1  ;;  %v1504_v16 = vpop.f32.mrf.mxu0  ;;  %9437 = vmatpush3.bf16.msra.mxu0 %v11502_v31  ;;  %v1357_v31 = vadd.f32 %v13009_v2, %v12698_v61  ;;  %v11507_v2 = vld [vmem:[%s16759_s0 + $0x320] sm:$0xff]  }
 0x16a   :  { %v1631_v26 = vmax.f32 %v1513_v50, 0.0  ;;  %v13203_v60 = vadd.f32 %v9094_v43, %v9093_v1  ;;  %v1505_v42 = vadd.f32 %v1504_v16, %v1344_v39  ;;  %9438 = vmatprep.subr.bf16.mxu0 %v11504_v56  ;;  %v13208_v13 = vpack.c.bf16 %v1096_v28, %v1095_v30  ;;  %v11509_v28 = vld [vmem:[%s16759_s0 + $0x358] sm:$0xff]  }
 0x16b   :  { %v9096_v22 = vpop.f32.mrf.mxu1  ;;  %v10797_v52 = vpop.f32.mrf.mxu0  ;;  %2537 = vmatmul.mubr.bf16.gmra.mxu1 %v12960_v63  ;;  %10892 = vmatmul.mubr.bf16.gmra.mxu0 %v13214_v11  ;;  %v13225_v63 = vld [vmem:[%s16760_s1 + $0x68] ss:$12 sps:$4 sm:$0xff]  }
 0x16c   :  { %17025 = vst [vmem:[#allocation54_spill] sm:$0xff] %v13208_v13  ;;  %v13219_v29 = vpack.c.bf16 %v1631_v26, %v1630_v45  ;;  %v1629_v56 = vmax.f32 %v1505_v42, 0.0  ;;  %v1526_v1 = vadd.f32 %v10797_v52, %v1365_v58  ;;  %2544 = vmatprep.mubr.bf16.mxu1 %v12967_v3  ;;  %10895 = vmatprep.mubr.bf16.mxu0 %v13225_v63  ;;  %v17028_v58 = vld [vmem:[#allocation10_spill] sm:$0xff]  ;;  %v17029_v52 = vld [vmem:[#allocation12_spill] sm:$0xff] }
 0x16d   :  { %v9097_v59 = vpop.f32.mrf.mxu1  ;;  %v1517_v30 = vpop.f32.mrf.mxu0  ;;  %9439 = vmatpush3.bf16.msra.mxu0 %v11505_v40  ;;  %v1368_v3 = vadd.f32 %v13054_v37, %v12678_v41  ;;  %v1360_v40 = vadd.f32 %v13019_v19, %v17028_v58  ;;  %v11510_v37 = vld [vmem:[%s16759_s0 + $0x318] sm:$0xff]   ;;  %v11511_v19 = vld [vmem:[%s16759_s0 + $0x350] sm:$0xff]   ;;  %v17036_v13 = vld [vmem:[#allocation18_spill] sm:$0xff] }
 0x16e   :  { %17026 = vst [vmem:[#allocation55_spill] sm:$0xff] %v13219_v29  ;;  %v13231_v24 = vpack.c.bf16 %v1629_v56, %v1628_v51  ;;  %v13233_v50 = vadd.f32 %v9097_v59, %v9096_v22  ;;  %v1518_v39 = vadd.f32 %v1517_v30, %v1357_v31  ;;  %9440 = vmatprep.subr.bf16.mxu0 %v11506_v44  ;;  %v1634_v44 = vmax.f32 %v1526_v1, 0.0  ;;  %v17030_v1 = vld [vmem:[#allocation15_spill] sm:$0xff]  ;;  %v17041_v29 = vld [vmem:[#allocation42_spill] sm:$0xff] }
 0x16f   :  { %v9099_v45 = vpop.f32.mrf.mxu1  ;;  %v10798_v43 = vpop.f32.mrf.mxu0  ;;  %v1381_v22 = vadd.f32 %v13103_v25, %v17029_v52  ;;  %v13256_v25 = vld [vmem:[%s16760_s1 + $0x80] ss:$12 sps:$4 sm:$0xff]  }
 0x170   :  { %17027 = vst [vmem:[#allocation56_spill] sm:$0xff] %v13231_v24  ;;  %v1529_v16 = vadd.f32 %v10798_v43, %v1368_v3  ;;  %v1632_v3 = vmax.f32 %v1518_v39, 0.0 }
 0x171   :  { %v9100_v26 = vpop.f32.mrf.mxu1  ;;  %v1520_v42 = vpop.f32.mrf.mxu0  ;;  %9441 = vmatpush3.bf16.msra.mxu0 %v11507_v2  ;;  %v1373_v2 = vadd.f32 %v13078_v9, %v17030_v1  ;;  %v11513_v9 = vld [vmem:[%s16759_s0 + $0x310] sm:$0xff]  }
 0x172   :  { %v1635_v31 = vmax.f32 %v1529_v16, 0.0  ;;  %v13247_v51 = vadd.f32 %v9100_v26, %v9099_v45  ;;  %v1521_v56 = vadd.f32 %v1520_v42, %v1360_v40  ;;  %9442 = vmatprep.subr.bf16.mxu0 %v11509_v28  ;;  %v17032_v16 = vld [vmem:[#allocation37_spill] sm:$0xff] }
 0x173   :  { %v9102_v59 = vpop.f32.mrf.mxu1  ;;  %v10801_v30 = vpop.f32.mrf.mxu0  ;;  %2545 = vmatmul.mubr.bf16.gmra.mxu1 %v12996_v54  ;;  %10896 = vmatmul.mubr.bf16.gmra.mxu0 %v13256_v25  ;;  %v13267_v54 = vld [vmem:[%s16760_s1 + $0x98] ss:$12 sps:$4 sm:$0xff]  }
 0x174   :  { %v13261_v28 = vpack.c.bf16 %v1635_v31, %v1634_v44  ;;  %v1633_v45 = vmax.f32 %v1521_v56, 0.0  ;;  %v1542_v43 = vadd.f32 %v10801_v30, %v1381_v22  ;;  %2552 = vmatprep.mubr.bf16.mxu1 %v17032_v16  ;;  %10899 = vmatprep.mubr.bf16.mxu0 %v13267_v54  ;;  %v17034_v44 = vld [vmem:[#allocation13_spill] sm:$0xff]  ;;  %v11514_v56 = vld [vmem:[%s16759_s0 + $0x348] sm:$0xff]  }
 0x175   :  { %v9103_v40 = vpop.f32.mrf.mxu1  ;;  %v1533_v26 = vpop.f32.mrf.mxu0  ;;  %9443 = vmatpush3.bf16.msra.mxu0 %v11510_v37  ;;  %v1384_v31 = vadd.f32 %v13108_v4, %v17034_v44  ;;  %v11516_v4 = vld [vmem:[%s16759_s0 + $0x308] sm:$0xff]  }
 0x176   :  { %17031 = vst [vmem:[#allocation57_spill] sm:$0xff] %v13261_v28  ;;  %v13273_v39 = vpack.c.bf16 %v1633_v45, %v1632_v3  ;;  %v13275_v42 = vadd.f32 %v9103_v40, %v9102_v59  ;;  %v1534_v22 = vadd.f32 %v1533_v26, %v1373_v2  ;;  %9444 = vmatprep.subr.bf16.mxu0 %v11511_v19  ;;  %v1638_v19 = vmax.f32 %v1542_v43, 0.0  ;;  %v17038_v43 = vld [vmem:[#allocation21_spill] sm:$0xff] }
 0x177   :  { %v9105_v30 = vpop.f32.mrf.mxu1  ;;  %v10802_v16 = vpop.f32.mrf.mxu0  ;;  %v1397_v3 = vadd.f32 %v13152_v15, %v17036_v13  ;;  %v17037_v15 = vld [vmem:[#allocation41_spill] sm:$0xff] }
 0x178   :  { %17033 = vst [vmem:[#allocation37_spill] sm:$0xff] %v13273_v39  ;;  %v1545_v37 = vadd.f32 %v10802_v16, %v1384_v31 }
 0x179   :  { %v9106_v59 = vpop.f32.mrf.mxu1  ;;  %v1536_v45 = vpop.f32.mrf.mxu0  ;;  %9445 = vmatpush3.bf16.msra.mxu0 %v11513_v9  ;;  %v13298_v9 = vld [vmem:[%s16760_s1 + $0xb0] ss:$12 sps:$4 sm:$0xff]  }
 0x17a   :  { %v1639_v2 = vmax.f32 %v1545_v37, 0.0  ;;  %v13289_v40 = vadd.f32 %v9106_v59, %v9105_v30  ;;  %v1537_v26 = vadd.f32 %v1536_v45, %v1376_v17  ;;  %9446 = vmatprep.subr.bf16.mxu0 %v11514_v56  ;;  %v1389_v30 = vadd.f32 %v13128_v34, %v17038_v43  ;;  %v17039_v17 = vld [vmem:[#allocation19_spill] sm:$0xff]  ;;  %v11519_v34 = vld [vmem:[%s16759_s0 + $0x300] sm:$0xff]  }
 0x17b   :  { %v9108_v31 = vpop.f32.mrf.mxu1  ;;  %v10805_v16 = vpop.f32.mrf.mxu0  ;;  %2553 = vmatmul.mubr.bf16.gmra.mxu1 %v17037_v15  ;;  %10900 = vmatmul.mubr.bf16.gmra.mxu0 %v13298_v9  ;;  %v1400_v56 = vadd.f32 %v13158_v14, %v17039_v17  ;;  %v1636_v37 = vmax.f32 %v1534_v22, 0.0  ;;  %v13311_v15 = vld [vmem:[%s16760_s1 + $0xc8] ss:$12 sps:$4 sm:$0xff]  }
 0x17c   :  { %v13305_v59 = vpack.c.bf16 %v1639_v2, %v1638_v19  ;;  %v1637_v45 = vmax.f32 %v1537_v26, 0.0  ;;  %v1558_v24 = vadd.f32 %v10805_v16, %v1397_v3  ;;  %2560 = vmatprep.mubr.bf16.mxu1 %v17041_v29  ;;  %10903 = vmatprep.mubr.bf16.mxu0 %v13311_v15  ;;  %v13320_v29 = vld [vmem:[%s16759_s0 + $0x478] sm:$0xff]   ;;  %v17043_v16 = vld [vmem:[#allocation22_spill] sm:$0xff] }
 0x17d   :  { %v9109_v39 = vpop.f32.mrf.mxu1  ;;  %v1549_v28 = vpop.f32.mrf.mxu0  ;;  %9447 = vmatpush3.bf16.msra.mxu0 %v11516_v4  ;;  %v1392_v4 = vadd.f32 %v13132_v20, %v17043_v16  ;;  %v13335_v20 = vld [vmem:[%s16760_s1 + $0xe0] ss:$12 sps:$4 sm:$0xff]  }
 0x17e   :  { %17040 = vst [vmem:[#allocation41_spill] sm:$0xff] %v13305_v59  ;;  %v9110_v14 = vadd.f32 %v9109_v39, %v9108_v31  ;;  %v1550_v22 = vadd.f32 %v1549_v28, %v1389_v30  ;;  %9448 = vmatprep.subr.bf16.mxu0 %v11517_v12  ;;  %v13322_v3 = vpack.c.bf16 %v1637_v45, %v1636_v37  ;;  %v17044_v59 = vld [vmem:[#allocation25_spill] sm:$0xff]  ;;  %v17045_v28 = vld [vmem:[#allocation27_spill] sm:$0xff]  ;;  %v1642_v31 = vmax.f32 %v1558_v24, 0.0 }
 0x17f   :  { %v9111_v19 = vpop.f32.mrf.mxu1  ;;  %v10806_v2 = vpop.f32.mrf.mxu0  ;;  %v1413_v17 = vadd.f32 %v13233_v50, %v17044_v59  ;;  %v1405_v12 = vadd.f32 %v13189_v46, %v17045_v28  ;;  %v17046_v50 = vld [vmem:[#allocation26_spill] sm:$0xff]  ;;  %v17052_v59 = vld [vmem:[#allocation33_spill] sm:$0xff] }
 0x180   :  { %17042 = vst [vmem:[#allocation42_spill] sm:$0xff] %v13322_v3  ;;  %v1561_v26 = vadd.f32 %v10806_v2, %v1400_v56  ;;  %v1416_v46 = vadd.f32 %v13247_v51, %v17046_v50  ;;  %v1640_v24 = vmax.f32 %v1550_v22, 0.0  ;;  %v17048_v2 = vld [vmem:[#allocation48_spill] sm:$0xff]  ;;  %v1421_v28 = vadd.f32 %v13275_v42, %v17052_v59 }
 0x181   :  { %v9112_v13 = vpop.f32.mrf.mxu1  ;;  %v1552_v39 = vpop.f32.mrf.mxu0  ;;  %9449 = vmatpush3.bf16.msra.mxu0 %v11519_v34 }
 0x182   :  { %v1643_v30 = vmax.f32 %v1561_v26, 0.0  ;;  %v9113_v43 = vadd.f32 %v9112_v13, %v9111_v19  ;;  %v1553_v37 = vadd.f32 %v1552_v39, %v1392_v4  ;;  %10967 = vmatprep.subr.bf16.mxu0 %v13320_v29 }
 0x183   :  { %v9114_v45 = vpop.f32.mrf.mxu1  ;;  %v10809_v56 = vpop.f32.mrf.mxu0  ;;  %2561 = vmatmul.mubr.bf16.gmra.mxu1 %v13063_v57  ;;  %10904 = vmatmul.mubr.bf16.gmra.mxu0 %v13335_v20  ;;  %v13346_v57 = vld [vmem:[%s16760_s1 + $0xf8] ss:$12 sps:$4 sm:$0xff]  }
 0x184   :  { %v13340_v34 = vpack.c.bf16 %v1643_v30, %v1642_v31  ;;  %v1641_v13 = vmax.f32 %v1553_v37, 0.0  ;;  %v1574_v19 = vadd.f32 %v10809_v56, %v1413_v17  ;;  %2568 = vmatprep.mubr.bf16.mxu1 %v17048_v2  ;;  %10907 = vmatprep.mubr.bf16.mxu0 %v13346_v57  ;;  %v17050_v37 = vld [vmem:[#allocation29_spill] sm:$0xff]  ;;  %v17051_v56 = vld [vmem:[#allocation30_spill] sm:$0xff] }
 0x185   :  { %v9115_v26 = vpop.f32.mrf.mxu1  ;;  %v1565_v4 = vpop.f32.mrf.mxu0  ;;  %v1408_v17 = vadd.f32 %v13203_v60, %v17050_v37  ;;  %v1429_v2 = vadd.f32 %v9110_v14, %v17051_v56  ;;  %v17053_v60 = vld [vmem:[#allocation31_spill] sm:$0xff] }
 0x186   :  { %17047 = vst [vmem:[#allocation58_spill] sm:$0xff] %v13340_v34  ;;  %v13349_v39 = vpack.c.bf16 %v1641_v13, %v1640_v24  ;;  %v9116_v3 = vadd.f32 %v9115_v26, %v9114_v45  ;;  %v1566_v51 = vadd.f32 %v1565_v4, %v1405_v12  ;;  %v1646_v16 = vmax.f32 %v1574_v19, 0.0  ;;  %v13360_v12 = vld [vmem:[%s16760_s1 + $0x110] ss:$12 sps:$4 sm:$0xff]  }
 0x187   :  { %v9117_v22 = vpop.f32.mrf.mxu1  ;;  %v10810_v31 = vpop.f32.mrf.mxu0  ;;  %v1432_v14 = vadd.f32 %v9113_v43, %v17053_v60 }
 0x188   :  { %17049 = vst [vmem:[#allocation48_spill] sm:$0xff] %v13349_v39  ;;  %v1577_v30 = vadd.f32 %v10810_v31, %v1416_v46  ;;  %v1644_v46 = vmax.f32 %v1566_v51, 0.0  ;;  %v17055_v31 = vld [vmem:[#allocation34_spill] sm:$0xff] }
 0x189   :  { %v9118_v34 = vpop.f32.mrf.mxu1  ;;  %v1568_v50 = vpop.f32.mrf.mxu0  ;;  %v1424_v43 = vadd.f32 %v13289_v40, %v17055_v31  ;;  %v13383_v40 = vld [vmem:[%s16760_s1 + $0x140] ss:$12 sps:$4 sm:$0xff]  }
 0x18a   :  { %v1647_v44 = vmax.f32 %v1577_v30, 0.0  ;;  %v9119_v52 = vadd.f32 %v9118_v34, %v9117_v22  ;;  %v1569_v24 = vadd.f32 %v1568_v50, %v1408_v17 }
 0x18b   :  { %v9120_v13 = vpop.f32.mrf.mxu1  ;;  %v10813_v45 = vpop.f32.mrf.mxu0  ;;  %2569 = vmatmul.mubr.bf16.gmra.mxu1 %v13091_v8  ;;  %10908 = vmatmul.mubr.bf16.gmra.mxu0 %v13360_v12  ;;  %v13370_v8 = vld [vmem:[%s16760_s1 + $0x128] ss:$12 sps:$4 sm:$0xff]  }
 0x18c   :  { %v13364_v26 = vpack.c.bf16 %v1647_v44, %v1646_v16  ;;  %v1645_v42 = vmax.f32 %v1569_v24, 0.0  ;;  %v1590_v19 = vadd.f32 %v10813_v45, %v1429_v2  ;;  %2576 = vmatprep.mubr.bf16.mxu1 %v13098_v36  ;;  %10911 = vmatprep.mubr.bf16.mxu0 %v13370_v8  ;;  %v1437_v24 = vadd.f32 %v9116_v3, %v13068_v10 }
 0x18d   :  { %v9121_v50 = vpop.f32.mrf.mxu1  ;;  %v1581_v34 = vpop.f32.mrf.mxu0 }
 0x18e   :  { %17054 = vst [vmem:[#allocation30_spill] sm:$0xff] %v13364_v26  ;;  %v9122_v4 = vadd.f32 %v9121_v50, %v9120_v13  ;;  %v1582_v22 = vadd.f32 %v1581_v34, %v1421_v28  ;;  %v13375_v44 = vpack.c.bf16 %v1645_v42, %v1644_v46  ;;  %v1650_v45 = vmax.f32 %v1590_v19, 0.0  ;;  %v13393_v19 = vld [vmem:[%s16760_s1 + $0x158] ss:$12 sps:$4 sm:$0xff]  }
 0x18f   :  { %v9123_v16 = vpop.f32.mrf.mxu1  ;;  %v10814_v51 = vpop.f32.mrf.mxu0 }
 0x190   :  { %17056 = vst [vmem:[#allocation59_spill] sm:$0xff] %v13375_v44  ;;  %v1593_v30 = vadd.f32 %v10814_v51, %v1432_v14  ;;  %v1445_v36 = vadd.f32 %v9122_v4, %v13046_v23  ;;  %v1648_v13 = vmax.f32 %v1582_v22, 0.0 }
 0x191   :  { %v9124_v17 = vpop.f32.mrf.mxu1  ;;  %v1584_v2 = vpop.f32.mrf.mxu0 }
 0x192   :  { %v1651_v26 = vmax.f32 %v1593_v30, 0.0  ;;  %v9125_v39 = vadd.f32 %v9124_v17, %v9123_v16  ;;  %v1585_v60 = vadd.f32 %v1584_v2, %v1424_v43  ;;  %v17059_v43 = vld [vmem:[#allocation49_spill] sm:$0xff] }
 0x193   :  { %v9126_v28 = vpop.f32.mrf.mxu1  ;;  %v10817_v50 = vpop.f32.mrf.mxu0  ;;  %2577 = vmatmul.mubr.bf16.gmra.mxu1 %v13115_v21  ;;  %10912 = vmatmul.mubr.bf16.gmra.mxu0 %v13383_v40 }
 0x194   :  { %v13386_v14 = vpack.c.bf16 %v1651_v26, %v1650_v45  ;;  %v1649_v46 = vmax.f32 %v1585_v60, 0.0  ;;  %v1606_v3 = vadd.f32 %v10817_v50, %v1445_v36  ;;  %v1448_v42 = vadd.f32 %v9125_v39, %v13056_v48  ;;  %2584 = vmatprep.mubr.bf16.mxu1 %v13123_v33  ;;  %10915 = vmatprep.mubr.bf16.mxu0 %v13393_v19 }
 0x195   :  { %v9127_v21 = vpop.f32.mrf.mxu1  ;;  %v1597_v34 = vpop.f32.mrf.mxu0  ;;  %v1440_v60 = vadd.f32 %v9119_v52, %v17059_v43 }
 0x196   :  { %17057 = vst [vmem:[#allocation60_spill] sm:$0xff] %v13386_v14  ;;  %v13396_v4 = vpack.c.bf16 %v1649_v46, %v1648_v13  ;;  %v9128_v22 = vadd.f32 %v9127_v21, %v9126_v28  ;;  %v1598_v26 = vadd.f32 %v1597_v34, %v1437_v24  ;;  %v1654_v30 = vmax.f32 %v1606_v3, 0.0  ;;  %v17060_v13 = vld [vmem:[#allocation24_spill] sm:$0xff] }
 0x197   :  { %v9129_v16 = vpop.f32.mrf.mxu1  ;;  %v10818_v51 = vpop.f32.mrf.mxu0  ;;  %v13407_v46 = vld [vmem:[%s16760_s1 + $0x4] ss:$12 sps:$4 sm:$0xff]  }
 0x198   :  { %17058 = vst [vmem:[#allocation61_spill] sm:$0xff] %v13396_v4  ;;  %v1609_v39 = vadd.f32 %v10818_v51, %v1448_v42  ;;  %v1453_v50 = vadd.f32 %v9128_v22, %v13016_v35  ;;  %v1652_v24 = vmax.f32 %v1598_v26, 0.0  ;;  %v5077_v26 = vld [vmem:[%s16762_s4 + $0x38] sm:$0xff]  ;;  %v7497_v4 = vld [vmem:[%s16763_s6 + $0x10] sm:$0xff] }
 0x199   :  { %v9130_v33 = vpop.f32.mrf.mxu1  ;;  %v1600_v36 = vpop.f32.mrf.mxu0  ;;  %5115 = vperm.xlu1 %11335, %v5077_v26   ;;  %v11525_v26 = vld [vmem:[%s16759_s0 + $0x3f0] sm:$0xff]  }
 0x19a   :  { %v1655_v17 = vmax.f32 %v1609_v39, 0.0  ;;  %v9131_v2 = vadd.f32 %v9130_v33, %v9129_v16  ;;  %v1601_v45 = vadd.f32 %v1600_v36, %v1440_v60  ;;  %v11523_v33 = vld [vmem:[%s16759_s0 + $0x3f8] sm:$0xff]  }
 0x19b   :  { %v9132_v14 = vpop.f32.mrf.mxu1  ;;  %v10821_v44 = vpop.f32.mrf.mxu0  ;;  %2585 = vmatmul.mubr.bf16.gmra.mxu1 %v13139_v38  ;;  %10916 = vmatmul.mubr.bf16.gmra.mxu0 %v17060_v13  ;;  %v5076_v38 = vld [vmem:[%s16762_s4 + $0x30] sm:$0xff] }
 0x19c   :  { %v13402_v28 = vpack.c.bf16 %v1655_v17, %v1654_v30  ;;  %v1653_v52 = vmax.f32 %v1601_v45, 0.0  ;;  %3027 = vmatprep.mubr.bf16.mxu0 %v13407_v46  ;;  %10935 = vmatprep.mubr.bf16.mxu1 %v13148_v7  ;;  %v1456_v22 = vadd.f32 %v9131_v2, %v13041_v0  ;;  %v5074_v7 = vld [vmem:[%s16762_s4 + $0x20] sm:$0xff]  ;;  %v11522_v45 = vld [vmem:[%s16759_s0 + $0x470] sm:$0xff]  }
 0x19d   :  { %v9133_v3 = vpop.f32.mrf.mxu1  ;;  %v1613_v42 = vpop.f32.mrf.mxu0  ;;  %5110 = vperm.xlu0 %11334, %v5076_v38   ;;  %v13446_v38 = vld [vmem:[%s16760_s1 + $0x1c] ss:$12 sps:$4 sm:$0xff]  }
 0x19e   :  { %17061 = vst [vmem:[#allocation24_spill] sm:$0xff] %v13402_v28  ;;  %v9134_v21 = vadd.f32 %v9133_v3, %v9132_v14  ;;  %v1614_v34 = vadd.f32 %v1613_v42, %v1453_v50  ;;  %v13418_v60 = vpack.c.bf16 %v1653_v52, %v1652_v24  ;;  %v11524_v50 = vld [vmem:[%s16759_s0 + $0x430] sm:$0xff]   ;;  %v13438_v52 = vld [vmem:[%s16760_s1] ss:$12 sps:$4 sm:$0xff]  }
 0x19f   :  { %v9135_v16 = vpop.f32.mrf.mxu1  ;;  %v10822_v51 = vpop.f32.mrf.mxu0 }
 0x1a0   :  { %17062 = vst [vmem:[#allocation62_spill] sm:$0xff] %v13418_v60  ;;  %v1461_v39 = vadd.f32 %v9134_v21, %v12986_v27  ;;  %v5072_v21 = vld [vmem:[%s16762_s4 + $0x10] sm:$0xff] }
 0x1a1   :  { %v9136_v14 = vpop.f32.mrf.mxu1  ;;  %v1616_v30 = vpop.f32.mrf.mxu0  ;;  %5100 = vperm.xlu0 %11334, %v5074_v7  }
 0x1a2   :  { %v1622_v36 = vadd.f32 %v10821_v44, %v1461_v39  ;;  %v9137_v17 = vadd.f32 %v9136_v14, %v9135_v16  ;;  %v1617_v2 = vadd.f32 %v1616_v30, %v1456_v22  ;;  %v1656_v44 = vmax.f32 %v1614_v34, 0.0  ;;  %v11531_v39 = vld [vmem:[%s16759_s0 + $0x468] sm:$0xff]  }
 0x1a3   :  { %v9178_v13 = vpop.f32.mrf.mxu0  ;;  %v13433_v24 = vpop.f32.mrf.mxu1  ;;  %3028 = vmatmul.mubr.bf16.vlgmr.msra.gmra.mxu0 %v13438_v52  ;;  %10936 = vmatmul.mubr.bf16.vlgmr.msra.gmra.mxu1 %v13171_v47  ;;  %v5075_v47 = vld [vmem:[%s16762_s4 + $0x28] sm:$0xff] }
 0x1a4   :  { %v1464_v3 = vadd.f32 %v9137_v17, %v13011_v55  ;;  %v1657_v42 = vmax.f32 %v1617_v2, 0.0  ;;  %3035 = vmatprep.mubr.bf16.mxu0 %v13446_v38  ;;  %10939 = vmatprep.mubr.bf16.mxu1 %v13182_v49  ;;  %v11526_v49 = vld [vmem:[%s16759_s0 + $0x428] sm:$0xff]  }
 0x1a5   :  { %v9179_v34 = vpop.f32.mrf.mxu0  ;;  %v2064_v22 = vpop.f32.mrf.mxu1  ;;  %10968 = vmatpush3.bf16.msra.mxu0 %v13320_v29  ;;  %9571 = vmatpush3.bf16.msra.mxu1 %v11523_v33  ;;  %v1658_v33 = vmax.f32 %v1622_v36, 0.0  ;;  %v11539_v36 = vld [vmem:[%s16759_s0 + $0x460] sm:$0xff]  }
 0x1a6   :  { %v1625_v16 = vadd.f32 %v10822_v51, %v1464_v3  ;;  %v9180_v7 = vadd.f32 %v9179_v34, %v9178_v13  ;;  %10969 = vmatprep.subr.bf16.mxu0 %v11522_v45  ;;  %9572 = vmatprep.subr.bf16.mxu1 %v11524_v50  ;;  %v13466_v14 = vpack.c.bf16 %v1657_v42, %v1656_v44  ;;  %v11527_v13 = vld [vmem:[%s16759_s0 + $0x3e8] sm:$0xff]   ;;  %v11528_v42 = vld [vmem:[%s16759_s0 + $0x420] sm:$0xff]  }
 0x1a7   :  { %v9181_v29 = vpop.f32.mrf.mxu0  ;;  %v13468_v30 = vpop.f32.mrf.mxu1  ;;  %5090 = vperm.xlu0 %11334, %v5072_v21   ;;  %5105 = vperm.xlu1 %11335, %v5075_v47   ;;  %v13487_v34 = vld [vmem:[%s16760_s1 + $0x18] ss:$12 sps:$4 sm:$0xff]  }
 0x1a8   :  { %17063 = vst [vmem:[#allocation63_spill] sm:$0xff] %v13466_v14  ;;  %v1904_v51 = vadd.f32 %v9180_v7, %v12588_v53  ;;  %v1659_v17 = vmax.f32 %v1625_v16, 0.0  ;;  %v5070_v16 = vld [vmem:[%s16762_s4] sm:$0xff]  ;;  %v5073_v7 = vld [vmem:[%s16762_s4 + $0x18] sm:$0xff] }
 0x1a9   :  { %v9182_v2 = vpop.f32.mrf.mxu0  ;;  %v2067_v50 = vpop.f32.mrf.mxu1  ;;  %10970 = vmatpush3.bf16.msra.mxu0 %v11522_v45  ;;  %9573 = vmatpush3.bf16.msra.mxu1 %v11525_v26  ;;  %v13495_v26 = vld [vmem:[%s16760_s1 + $0x34] ss:$12 sps:$4 sm:$0xff]  }
 0x1aa   :  { %v2065_v3 = vadd.f32 %v2064_v22, %v1904_v51  ;;  %v9183_v44 = vadd.f32 %v9182_v2, %v9181_v29  ;;  %9574 = vmatprep.subr.bf16.mxu1 %v11526_v49  ;;  %10971 = vmatprep.subr.bf16.mxu0 %v11531_v39  ;;  %v13480_v21 = vpack.c.bf16 %v1659_v17, %v1658_v33  ;;  %v11529_v29 = vld [vmem:[%s16759_s0 + $0x3e0] sm:$0xff]   ;;  %v11540_v17 = vld [vmem:[%s16759_s0 + $0x458] sm:$0xff]  }
 0x1ab   :  { %v9184_v45 = vpop.f32.mrf.mxu0  ;;  %v13482_v47 = vpop.f32.mrf.mxu1  ;;  %3036 = vmatmul.mubr.bf16.gmra.mxu0 %v13487_v34  ;;  %10940 = vmatmul.mubr.bf16.gmra.mxu1 %v13214_v11 }
 0x1ac   :  { %17064 = vst [vmem:[#allocation64_spill] sm:$0xff] %v13480_v21  ;;  %v1907_v22 = vadd.f32 %v9183_v44, %v12625_v5  ;;  %3043 = vmatprep.mubr.bf16.mxu0 %v13495_v26  ;;  %10943 = vmatprep.mubr.bf16.mxu1 %v13225_v63  ;;  %v11530_v63 = vld [vmem:[%s16759_s0 + $0x418] sm:$0xff]  }
 0x1ad   :  { %v9185_v11 = vpop.f32.mrf.mxu0  ;;  %v13505_v49 = vpop.f32.mrf.mxu1  ;;  %9575 = vmatpush3.bf16.msra.mxu1 %v11527_v13  ;;  %10972 = vmatpush3.bf16.msra.mxu0 %v11531_v39  ;;  %v2191_v13 = vmax.f32 %v2065_v3, 0.0  ;;  %v11533_v3 = vld [vmem:[%s16759_s0 + $0x410] sm:$0xff]  }
 0x1ae   :  { %v2068_v33 = vadd.f32 %v2067_v50, %v1907_v22  ;;  %v9186_v51 = vadd.f32 %v9185_v11, %v9184_v45  ;;  %9576 = vmatprep.subr.bf16.mxu1 %v11528_v42  ;;  %10973 = vmatprep.subr.bf16.mxu0 %v11539_v36  ;;  %v11532_v45 = vld [vmem:[%s16759_s0 + $0x3d8] sm:$0xff]  }
 0x1af   :  { %v9187_v2 = vpop.f32.mrf.mxu0  ;;  %v13516_v44 = vpop.f32.mrf.mxu1  ;;  %5080 = vperm.xlu0 %11334, %v5070_v16   ;;  %5095 = vperm.xlu1 %11335, %v5073_v7   ;;  %v11541_v16 = vld [vmem:[%s16759_s0 + $0x450] sm:$0xff]  }
 0x1b0   :  { %v2192_v14 = vmax.f32 %v2068_v33, 0.0  ;;  %v1912_v39 = vadd.f32 %v9186_v51, %v12590_v32  ;;  %v7501_v33 = vld [vmem:[%s16763_s6 + $0x30] sm:$0xff]  ;;  %v5071_v51 = vld [vmem:[%s16762_s4 + $0x8] sm:$0xff] }
 0x1b1   :  { %v9188_v50 = vpop.f32.mrf.mxu0  ;;  %v13519_v42 = vpop.f32.mrf.mxu1  ;;  %9577 = vmatpush3.bf16.msra.mxu1 %v11529_v29  ;;  %10974 = vmatpush3.bf16.msra.mxu0 %v11539_v36  ;;  %v13546_v36 = vld [vmem:[%s16760_s1 + $0x4c] ss:$12 sps:$4 sm:$0xff]  }
 0x1b2   :  { %v13524_v22 = vpack.c.bf16 %v2192_v14, %v2191_v13  ;;  %v2073_v11 = vadd.f32 %v13433_v24, %v1912_v39  ;;  %v9189_v60 = vadd.f32 %v9188_v50, %v9187_v2  ;;  %9578 = vmatprep.subr.bf16.mxu1 %v11530_v63  ;;  %10975 = vmatprep.subr.bf16.mxu0 %v11540_v17  ;;  %v13538_v14 = vld [vmem:[%s16760_s1 + $0x30] ss:$12 sps:$4 sm:$0xff]   ;;  %v11535_v13 = vld [vmem:[%s16759_s0 + $0x408] sm:$0xff]  }
 0x1b3   :  { %v9190_v7 = vpop.f32.mrf.mxu0  ;;  %v13533_v29 = vpop.f32.mrf.mxu1  ;;  %3044 = vmatmul.mubr.bf16.gmra.mxu0 %v13538_v14  ;;  %10944 = vmatmul.mubr.bf16.gmra.mxu1 %v13256_v25  ;;  %v11543_v39 = vld [vmem:[%s16759_s0 + $0x448] sm:$0xff]  }
 0x1b4   :  { %17065 = vst [vmem:[#allocation65_spill] sm:$0xff] %v13524_v22  ;;  %v1915_v24 = vadd.f32 %v9189_v60, %v12627_v6  ;;  %3051 = vmatprep.mubr.bf16.mxu0 %v13546_v36  ;;  %10947 = vmatprep.mubr.bf16.mxu1 %v13267_v54  ;;  %v11534_v60 = vld [vmem:[%s16759_s0 + $0x3d0] sm:$0xff]   ;;  %v2193_v22 = vmax.f32 %v2073_v11, 0.0  ;;  %v11537_v11 = vld [vmem:[%s16759_s0 + $0x400] sm:$0xff]  }
 0x1b5   :  { %v9191_v25 = vpop.f32.mrf.mxu0  ;;  %v13556_v63 = vpop.f32.mrf.mxu1  ;;  %9579 = vmatpush3.bf16.msra.mxu1 %v11532_v45  ;;  %10976 = vmatpush3.bf16.msra.mxu0 %v11540_v17 }
 0x1b6   :  { %v2076_v2 = vadd.f32 %v13468_v30, %v1915_v24  ;;  %v9192_v54 = vadd.f32 %v9191_v25, %v9190_v7  ;;  %9580 = vmatprep.subr.bf16.mxu1 %v11533_v3  ;;  %10977 = vmatprep.subr.bf16.mxu0 %v11541_v16  ;;  %v11536_v24 = vld [vmem:[%s16759_s0 + $0x3c8] sm:$0xff]  }
 0x1b7   :  { %v9193_v50 = vpop.f32.mrf.mxu0  ;;  %v13568_v45 = vpop.f32.mrf.mxu1  ;;  %7535 = vperm.xlu0 %11334, %v7501_v33   ;;  %5085 = vperm.xlu1 %11335, %v5071_v51   ;;  %v11544_v33 = vld [vmem:[%s16759_s0 + $0x440] sm:$0xff]  }
 0x1b8   :  { %v2194_v17 = vmax.f32 %v2076_v2, 0.0  ;;  %v1920_v30 = vadd.f32 %v9192_v54, %v12698_v61  ;;  %v13598_v54 = vld [vmem:[%s16760_s1 + $0x64] ss:$12 sps:$4 sm:$0xff]  }
 0x1b9   :  { %v9194_v7 = vpop.f32.mrf.mxu0  ;;  %v13571_v3 = vpop.f32.mrf.mxu1  ;;  %9581 = vmatpush3.bf16.msra.mxu1 %v11534_v60  ;;  %10978 = vmatpush3.bf16.msra.mxu0 %v11541_v16 }
 0x1ba   :  { %v2081_v25 = vadd.f32 %v13505_v49, %v1920_v30  ;;  %v9195_v28 = vadd.f32 %v9194_v7, %v9193_v50  ;;  %9582 = vmatprep.subr.bf16.mxu1 %v11535_v13  ;;  %10979 = vmatprep.subr.bf16.mxu0 %v11543_v39  ;;  %v13583_v51 = vpack.c.bf16 %v2194_v17, %v2193_v22  ;;  %v13590_v49 = vld [vmem:[%s16760_s1 + $0x48] ss:$12 sps:$4 sm:$0xff]   ;;  %v7499_v22 = vld [vmem:[%s16763_s6 + $0x20] sm:$0xff]  ;;  %v7502_v13 = vld [vmem:[%s16763_s6 + $0x38] sm:$0xff] }
 0x1bb   :  { %v9196_v60 = vpop.f32.mrf.mxu0  ;;  %v13585_v2 = vpop.f32.mrf.mxu1  ;;  %3052 = vmatmul.mubr.bf16.gmra.mxu0 %v13590_v49  ;;  %10948 = vmatmul.mubr.bf16.gmra.mxu1 %v13298_v9  ;;  %v13617_v30 = vld [vmem:[%s16759_s0 + $0x538] sm:$0xff]  }
 0x1bc   :  { %17066 = vst [vmem:[#allocation66_spill] sm:$0xff] %v13583_v51  ;;  %v1923_v16 = vadd.f32 %v9195_v28, %v17028_v58  ;;  %3059 = vmatprep.mubr.bf16.mxu0 %v13598_v54  ;;  %10951 = vmatprep.mubr.bf16.mxu1 %v13311_v15  ;;  %v11538_v28 = vld [vmem:[%s16759_s0 + $0x3c0] sm:$0xff]   ;;  %v11547_v7 = vld [vmem:[%s16759_s0 + $0x4f8] sm:$0xff]  }
 0x1bd   :  { %v9197_v9 = vpop.f32.mrf.mxu0  ;;  %v13608_v50 = vpop.f32.mrf.mxu1  ;;  %9583 = vmatpush3.bf16.msra.mxu1 %v11536_v24  ;;  %10980 = vmatpush3.bf16.msra.mxu0 %v11543_v39  ;;  %v2195_v39 = vmax.f32 %v2081_v25, 0.0  ;;  %v7500_v25 = vld [vmem:[%s16763_s6 + $0x28] sm:$0xff] }
 0x1be   :  { %v2084_v17 = vadd.f32 %v13519_v42, %v1923_v16  ;;  %v9198_v15 = vadd.f32 %v9197_v9, %v9196_v60  ;;  %9584 = vmatprep.subr.bf16.mxu1 %v11537_v11  ;;  %10981 = vmatprep.subr.bf16.mxu0 %v11544_v33 }
 0x1bf   :  { %v9199_v24 = vpop.f32.mrf.mxu0  ;;  %v13622_v51 = vpop.f32.mrf.mxu1  ;;  %7525 = vperm.xlu0 %11334, %v7499_v22   ;;  %7540 = vperm.xlu1 %11335, %v7502_v13  }
 0x1c0   :  { %v2196_v21 = vmax.f32 %v2084_v17, 0.0  ;;  %v1928_v42 = vadd.f32 %v9198_v15, %v12661_v18 }
 0x1c1   :  { %v9200_v11 = vpop.f32.mrf.mxu0  ;;  %v13625_v60 = vpop.f32.mrf.mxu1  ;;  %9585 = vmatpush3.bf16.msra.mxu1 %v11538_v28  ;;  %10982 = vmatpush3.bf16.msra.mxu0 %v11544_v33  ;;  %v13650_v28 = vld [vmem:[%s16760_s1 + $0x7c] ss:$12 sps:$4 sm:$0xff]  }
 0x1c2   :  { %v2089_v16 = vadd.f32 %v13482_v47, %v1928_v42  ;;  %v9201_v9 = vadd.f32 %v9200_v11, %v9199_v24  ;;  %11015 = vmatprep.subr.bf16.mxu1 %v13617_v30  ;;  %9706 = vmatprep.subr.bf16.mxu0 %v11547_v7  ;;  %v13635_v22 = vpack.c.bf16 %v2196_v21, %v2195_v39  ;;  %v13642_v47 = vld [vmem:[%s16760_s1 + $0x60] ss:$12 sps:$4 sm:$0xff]   ;;  %v7498_v39 = vld [vmem:[%s16763_s6 + $0x18] sm:$0xff] }
 0x1c3   :  { %v9202_v13 = vpop.f32.mrf.mxu0  ;;  %v13637_v17 = vpop.f32.mrf.mxu1  ;;  %3060 = vmatmul.mubr.bf16.gmra.mxu0 %v13642_v47  ;;  %10952 = vmatmul.mubr.bf16.gmra.mxu1 %v13335_v20  ;;  %v7495_v20 = vld [vmem:[%s16763_s6] sm:$0xff] }
 0x1c4   :  { %17067 = vst [vmem:[#allocation67_spill] sm:$0xff] %v13635_v22  ;;  %v1931_v33 = vadd.f32 %v9201_v9, %v12678_v41  ;;  %3067 = vmatprep.mubr.bf16.mxu0 %v13650_v28  ;;  %10955 = vmatprep.mubr.bf16.mxu1 %v13346_v57  ;;  %v2197_v57 = vmax.f32 %v2089_v16, 0.0 }
 0x1c5   :  { %v9203_v21 = vpop.f32.mrf.mxu0  ;;  %v13654_v15 = vpop.f32.mrf.mxu1  ;;  %7515 = vperm.xlu0 %11334, %v7497_v4   ;;  %7530 = vperm.xlu1 %11335, %v7500_v25  }
 0x1c6   :  { %v2092_v7 = vadd.f32 %v13516_v44, %v1931_v33  ;;  %v9204_v24 = vadd.f32 %v9203_v21, %v9202_v13  ;;  %v7989_v33 = vld [vmem:[%s16764_s8 + $0x30] sm:$0xff]  ;;  %v7496_v21 = vld [vmem:[%s16763_s6 + $0x8] sm:$0xff] }
 0x1c7   :  { %v9205_v42 = vpop.f32.mrf.mxu0  ;;  %v13663_v11 = vpop.f32.mrf.mxu1 }
 0x1c8   :  { %v2198_v9 = vmax.f32 %v2092_v7, 0.0  ;;  %v1936_v22 = vadd.f32 %v9204_v24, %v17030_v1 }
 0x1c9   :  { %v9206_v4 = vpop.f32.mrf.mxu0  ;;  %v13666_v25 = vpop.f32.mrf.mxu1  ;;  %7505 = vperm.xlu0 %11334, %v7495_v20   ;;  %7520 = vperm.xlu1 %11335, %v7498_v39   ;;  %v13682_v20 = vld [vmem:[%s16760_s1 + $0x78] ss:$12 sps:$4 sm:$0xff]  }
 0x1ca   :  { %v2097_v44 = vadd.f32 %v13556_v63, %v1936_v22  ;;  %v9207_v13 = vadd.f32 %v9206_v4, %v9205_v42  ;;  %v13675_v16 = vpack.c.bf16 %v2198_v9, %v2197_v57  ;;  %v13690_v22 = vld [vmem:[%s16760_s1 + $0x94] ss:$12 sps:$4 sm:$0xff]   ;;  %v7990_v4 = vld [vmem:[%s16764_s8 + $0x38] sm:$0xff] }
 0x1cb   :  { %v9208_v7 = vpop.f32.mrf.mxu0  ;;  %v13677_v24 = vpop.f32.mrf.mxu1  ;;  %3068 = vmatmul.mubr.bf16.gmra.mxu0 %v13682_v20  ;;  %10956 = vmatmul.mubr.bf16.gmra.mxu1 %v13360_v12  ;;  %v7987_v12 = vld [vmem:[%s16764_s8 + $0x20] sm:$0xff] }
 0x1cc   :  { %17068 = vst [vmem:[#allocation68_spill] sm:$0xff] %v13675_v16  ;;  %v1939_v63 = vadd.f32 %v9207_v13, %v17035_v62  ;;  %3075 = vmatprep.mubr.bf16.mxu0 %v13690_v22  ;;  %10959 = vmatprep.mubr.bf16.mxu1 %v13370_v8  ;;  %v2199_v8 = vmax.f32 %v2097_v44, 0.0  ;;  %v17069_v62 = vld [vmem:[#allocation12_spill] sm:$0xff] }
 0x1cd   :  { %v9209_v39 = vpop.f32.mrf.mxu0  ;;  %v13694_v42 = vpop.f32.mrf.mxu1  ;;  %8023 = vperm.xlu0 %11334, %v7989_v33   ;;  %7510 = vperm.xlu1 %11335, %v7496_v21  }
 0x1ce   :  { %v2100_v57 = vadd.f32 %v13571_v3, %v1939_v63  ;;  %v9210_v9 = vadd.f32 %v9209_v39, %v9208_v7  ;;  %v7985_v63 = vld [vmem:[%s16764_s8 + $0x10] sm:$0xff]  ;;  %v7988_v39 = vld [vmem:[%s16764_s8 + $0x28] sm:$0xff] }
 0x1cf   :  { %v9211_v13 = vpop.f32.mrf.mxu0  ;;  %v13703_v16 = vpop.f32.mrf.mxu1 }
 0x1d0   :  { %v1944_v1 = vadd.f32 %v9210_v9, %v17069_v62  ;;  %v2200_v58 = vmax.f32 %v2100_v57, 0.0  ;;  %v17072_v62 = vld [vmem:[#allocation21_spill] sm:$0xff] }
 0x1d1   :  { %v9212_v33 = vpop.f32.mrf.mxu0  ;;  %v13706_v21 = vpop.f32.mrf.mxu1  ;;  %8013 = vperm.xlu0 %11334, %v7987_v12   ;;  %8028 = vperm.xlu1 %11335, %v7990_v4   ;;  %v13722_v12 = vld [vmem:[%s16760_s1 + $0x90] ss:$12 sps:$4 sm:$0xff]   ;;  %v13730_v4 = vld [vmem:[%s16760_s1 + $0xac] ss:$12 sps:$4 sm:$0xff]  }
 0x1d2   :  { %v2105_v3 = vadd.f32 %v13533_v29, %v1944_v1  ;;  %v9213_v7 = vadd.f32 %v9212_v33, %v9211_v13  ;;  %v13715_v44 = vpack.c.bf16 %v2200_v58, %v2199_v8  ;;  %v17071_v1 = vld [vmem:[#allocation13_spill] sm:$0xff] }
 0x1d3   :  { %v9214_v9 = vpop.f32.mrf.mxu0  ;;  %v13717_v57 = vpop.f32.mrf.mxu1  ;;  %3076 = vmatmul.mubr.bf16.gmra.mxu0 %v13722_v12  ;;  %10960 = vmatmul.mubr.bf16.gmra.mxu1 %v13383_v40  ;;  %v7983_v40 = vld [vmem:[%s16764_s8] sm:$0xff] }
 0x1d4   :  { %17070 = vst [vmem:[#allocation69_spill] sm:$0xff] %v13715_v44  ;;  %v1947_v29 = vadd.f32 %v9213_v7, %v17071_v1  ;;  %3083 = vmatprep.mubr.bf16.mxu0 %v13730_v4  ;;  %10963 = vmatprep.mubr.bf16.mxu1 %v13393_v19  ;;  %v7986_v7 = vld [vmem:[%s16764_s8 + $0x18] sm:$0xff]  ;;  %v2201_v19 = vmax.f32 %v2105_v3, 0.0 }
 0x1d5   :  { %v9215_v58 = vpop.f32.mrf.mxu0  ;;  %v13734_v13 = vpop.f32.mrf.mxu1  ;;  %8003 = vperm.xlu0 %11334, %v7985_v63   ;;  %8018 = vperm.xlu1 %11335, %v7988_v39  }
 0x1d6   :  { %v2108_v8 = vadd.f32 %v13568_v45, %v1947_v29  ;;  %v9216_v33 = vadd.f32 %v9215_v58, %v9214_v9  ;;  %v8142_v29 = vld [vmem:[%s16765_s10] sm:$0xff]  ;;  %v7984_v58 = vld [vmem:[%s16764_s8 + $0x8] sm:$0xff] }
 0x1d7   :  { %v9217_v44 = vpop.f32.mrf.mxu0  ;;  %v13743_v1 = vpop.f32.mrf.mxu1 }
 0x1d8   :  { %v1952_v41 = vadd.f32 %v9216_v33, %v17072_v62  ;;  %v2202_v61 = vmax.f32 %v2108_v8, 0.0 }
 0x1d9   :  { %v9218_v63 = vpop.f32.mrf.mxu0  ;;  %v13746_v39 = vpop.f32.mrf.mxu1  ;;  %7993 = vperm.xlu0 %11334, %v7983_v40   ;;  %8008 = vperm.xlu1 %11335, %v7986_v7   ;;  %v13762_v40 = vld [vmem:[%s16760_s1 + $0xa8] ss:$12 sps:$4 sm:$0xff]  }
 0x1da   :  { %v2113_v45 = vadd.f32 %v13608_v50, %v1952_v41  ;;  %v9219_v9 = vadd.f32 %v9218_v63, %v9217_v44  ;;  %v13755_v3 = vpack.c.bf16 %v2202_v61, %v2201_v19  ;;  %v13768_v41 = vld [vmem:[%s16760_s1 + $0x170] ss:$12 sps:$4 sm:$0xff]   ;;  %v17076_v50 = vld [vmem:[#allocation22_spill] sm:$0xff] }
 0x1db   :  { %v9220_v33 = vpop.f32.mrf.mxu0  ;;  %v13757_v8 = vpop.f32.mrf.mxu1  ;;  %3084 = vmatmul.mubr.bf16.gmra.mxu0 %v13762_v40  ;;  %17075 = vst [vmem:[#allocation72_spill] sm:$0xff] %v13768_v41  ;;  %10964 = vmatmul.mubr.bf16.gmra.mxu1 %v13768_v41  ;;  %v13775_v44 = vld [vmem:[%s16760_s1 + $0xc4] ss:$12 sps:$4 sm:$0xff]  }
 0x1dc   :  { %17073 = vst [vmem:[#allocation70_spill] sm:$0xff] %v13755_v3  ;;  %17074 = vst [vmem:[#allocation71_spill] sm:$0xff] %v13757_v8  ;;  %v1955_v61 = vadd.f32 %v9219_v9, %v17076_v50  ;;  %3091 = vmatprep.mubr.bf16.mxu0 %v13775_v44  ;;  %3590 = vmatprep.mubr.bf16.mxu1 %v13407_v46  ;;  %v2203_v9 = vmax.f32 %v2113_v45, 0.0  ;;  %v17078_v50 = vld [vmem:[#allocation18_spill] sm:$0xff] }
 0x1dd   :  { %v9221_v7 = vpop.f32.mrf.mxu0  ;;  %v13779_v19 = vpop.f32.mrf.mxu1  ;;  %8145 = vperm.xlu0 %11334, %v8142_v29   ;;  %7998 = vperm.xlu1 %11335, %v7984_v58   ;;  %v11545_v29 = vld [vmem:[%s16759_s0 + $0x530] sm:$0xff]   ;;  %v13796_v45 = vld [vmem:[%s16760_s1 + $0xc0] ss:$12 sps:$4 sm:$0xff]  }
 0x1de   :  { %v2116_v63 = vadd.f32 %v13625_v60, %v1955_v61  ;;  %v9222_v3 = vadd.f32 %v9221_v7, %v9220_v33 }
 0x1df   :  { %v9223_v41 = vpop.f32.mrf.mxu0  ;;  %v13782_v62 = vpop.f32.mrf.mxu1 }
 0x1e0   :  { %17077 = vst [vmem:[#allocation73_spill] sm:$0xff] %v13782_v62  ;;  %v1960_v18 = vadd.f32 %v9222_v3, %v17078_v50  ;;  %v2204_v5 = vmax.f32 %v2116_v63, 0.0  ;;  %v17080_v3 = vld [vmem:[#allocation19_spill] sm:$0xff] }
 0x1e1   :  { %v9224_v6 = vpop.f32.mrf.mxu0  ;;  %v13785_v55 = vpop.f32.mrf.mxu1 }
 0x1e2   :  { %v2121_v46 = vadd.f32 %v13585_v2, %v1960_v18  ;;  %v9225_v8 = vadd.f32 %v9224_v6, %v9223_v41  ;;  %v13791_v58 = vpack.c.bf16 %v2204_v5, %v2203_v9  ;;  %v13804_v6 = vld [vmem:[%s16760_s1 + $0xdc] ss:$12 sps:$4 sm:$0xff]  }
 0x1e3   :  { %v9226_v60 = vpop.f32.mrf.mxu0  ;;  %v9314_v33 = vpop.f32.mrf.mxu1  ;;  %3092 = vmatmul.mubr.bf16.gmra.mxu0 %v13796_v45  ;;  %3591 = vmatmul.mubr.bf16.vlgmr.msra.gmra.mxu1 %v13438_v52  ;;  %v11546_v52 = vld [vmem:[%s16759_s0 + $0x528] sm:$0xff]  }
 0x1e4   :  { %17079 = vst [vmem:[#allocation74_spill] sm:$0xff] %v13791_v58  ;;  %v1963_v18 = vadd.f32 %v9225_v8, %v17080_v3  ;;  %3099 = vmatprep.mubr.bf16.mxu0 %v13804_v6  ;;  %3598 = vmatprep.mubr.bf16.mxu1 %v13446_v38  ;;  %v2205_v9 = vmax.f32 %v2121_v46, 0.0  ;;  %v17081_v58 = vld [vmem:[#allocation27_spill] sm:$0xff] }
 0x1e5   :  { %v9227_v5 = vpop.f32.mrf.mxu0  ;;  %v9315_v2 = vpop.f32.mrf.mxu1  ;;  %11016 = vmatpush3.bf16.msra.mxu1 %v13617_v30 }
 0x1e6   :  { %v2124_v41 = vadd.f32 %v13622_v51, %v1963_v18  ;;  %v9228_v61 = vadd.f32 %v9227_v5, %v9226_v60  ;;  %v13810_v7 = vadd.f32 %v9315_v2, %v9314_v33  ;;  %11017 = vmatprep.subr.bf16.mxu1 %v11545_v29  ;;  %v11551_v33 = vld [vmem:[%s16759_s0 + $0x520] sm:$0xff]  }
 0x1e7   :  { %v9229_v8 = vpop.f32.mrf.mxu0  ;;  %v9317_v63 = vpop.f32.mrf.mxu1  ;;  %v13827_v2 = vld [vmem:[%s16760_s1 + $0xd8] ss:$12 sps:$4 sm:$0xff]  }
 0x1e8   :  { %v1968_v3 = vadd.f32 %v9228_v61, %v17081_v58  ;;  %v2206_v38 = vmax.f32 %v2124_v41, 0.0 }
 0x1e9   :  { %v9230_v50 = vpop.f32.mrf.mxu0  ;;  %v9318_v62 = vpop.f32.mrf.mxu1  ;;  %11018 = vmatpush3.bf16.msra.mxu1 %v11545_v29 }
 0x1ea   :  { %v2129_v30 = vadd.f32 %v13654_v15, %v1968_v3  ;;  %v9231_v51 = vadd.f32 %v9230_v50, %v9229_v8  ;;  %v13817_v60 = vadd.f32 %v9318_v62, %v9317_v63  ;;  %11019 = vmatprep.subr.bf16.mxu1 %v11546_v52  ;;  %v13822_v18 = vpack.c.bf16 %v2206_v38, %v2205_v9  ;;  %v13835_v15 = vld [vmem:[%s16760_s1 + $0xf4] ss:$12 sps:$4 sm:$0xff]   ;;  %v17083_v38 = vld [vmem:[#allocation25_spill] sm:$0xff] }
 0x1eb   :  { %v9232_v5 = vpop.f32.mrf.mxu0  ;;  %v9320_v46 = vpop.f32.mrf.mxu1  ;;  %3100 = vmatmul.mubr.bf16.gmra.mxu0 %v13827_v2  ;;  %3599 = vmatmul.mubr.bf16.gmra.mxu1 %v13487_v34  ;;  %v11556_v34 = vld [vmem:[%s16759_s0 + $0x518] sm:$0xff]  }
 0x1ec   :  { %17082 = vst [vmem:[#allocation75_spill] sm:$0xff] %v13822_v18  ;;  %v1971_v62 = vadd.f32 %v9231_v51, %v17050_v37  ;;  %3107 = vmatprep.mubr.bf16.mxu0 %v13835_v15  ;;  %3606 = vmatprep.mubr.bf16.mxu1 %v13495_v26  ;;  %v2207_v9 = vmax.f32 %v2129_v30, 0.0 }
 0x1ed   :  { %v9233_v50 = vpop.f32.mrf.mxu0  ;;  %v9321_v29 = vpop.f32.mrf.mxu1  ;;  %11020 = vmatpush3.bf16.msra.mxu1 %v11546_v52 }
 0x1ee   :  { %v2132_v3 = vadd.f32 %v13666_v25, %v1971_v62  ;;  %v9234_v41 = vadd.f32 %v9233_v50, %v9232_v5  ;;  %v13840_v61 = vadd.f32 %v9321_v29, %v9320_v46  ;;  %11021 = vmatprep.subr.bf16.mxu1 %v11551_v33  ;;  %v11559_v46 = vld [vmem:[%s16759_s0 + $0x510] sm:$0xff]  }
 0x1ef   :  { %v9235_v8 = vpop.f32.mrf.mxu0  ;;  %v9323_v63 = vpop.f32.mrf.mxu1  ;;  %v13857_v29 = vld [vmem:[%s16760_s1 + $0xf0] ss:$12 sps:$4 sm:$0xff]  }
 0x1f0   :  { %v1976_v51 = vadd.f32 %v9234_v41, %v17083_v38  ;;  %v2208_v18 = vmax.f32 %v2132_v3, 0.0 }
 0x1f1   :  { %v9236_v26 = vpop.f32.mrf.mxu0  ;;  %v9324_v37 = vpop.f32.mrf.mxu1  ;;  %11022 = vmatpush3.bf16.msra.mxu1 %v11551_v33  ;;  %v13865_v33 = vld [vmem:[%s16760_s1 + $0x10c] ss:$12 sps:$4 sm:$0xff]  }
 0x1f2   :  { %v2137_v52 = vadd.f32 %v13637_v17, %v1976_v51  ;;  %v9237_v25 = vadd.f32 %v9236_v26, %v9235_v8  ;;  %v13847_v5 = vadd.f32 %v9324_v37, %v9323_v63  ;;  %11023 = vmatprep.subr.bf16.mxu1 %v11556_v34  ;;  %v13852_v62 = vpack.c.bf16 %v2208_v18, %v2207_v9  ;;  %v17085_v37 = vld [vmem:[#allocation26_spill] sm:$0xff] }
 0x1f3   :  { %v9238_v50 = vpop.f32.mrf.mxu0  ;;  %v9326_v30 = vpop.f32.mrf.mxu1  ;;  %3108 = vmatmul.mubr.bf16.gmra.mxu0 %v13857_v29  ;;  %3607 = vmatmul.mubr.bf16.gmra.mxu1 %v13538_v14  ;;  %v11562_v14 = vld [vmem:[%s16759_s0 + $0x508] sm:$0xff]  }
 0x1f4   :  { %17084 = vst [vmem:[#allocation76_spill] sm:$0xff] %v13852_v62  ;;  %v1979_v17 = vadd.f32 %v9237_v25, %v17085_v37  ;;  %3115 = vmatprep.mubr.bf16.mxu0 %v13865_v33  ;;  %3614 = vmatprep.mubr.bf16.mxu1 %v13546_v36  ;;  %v2209_v26 = vmax.f32 %v2137_v52, 0.0 }
 0x1f5   :  { %v9239_v18 = vpop.f32.mrf.mxu0  ;;  %v9327_v3 = vpop.f32.mrf.mxu1  ;;  %11024 = vmatpush3.bf16.msra.mxu1 %v11556_v34 }
 0x1f6   :  { %v2140_v41 = vadd.f32 %v13663_v11, %v1979_v17  ;;  %v9240_v8 = vadd.f32 %v9239_v18, %v9238_v50  ;;  %v13870_v63 = vadd.f32 %v9327_v3, %v9326_v30  ;;  %11025 = vmatprep.subr.bf16.mxu1 %v11559_v46  ;;  %v11565_v30 = vld [vmem:[%s16759_s0 + $0x500] sm:$0xff]   ;;  %v13887_v3 = vld [vmem:[%s16760_s1 + $0x108] ss:$12 sps:$4 sm:$0xff]  }
 0x1f7   :  { %v9241_v9 = vpop.f32.mrf.mxu0  ;;  %v9329_v51 = vpop.f32.mrf.mxu1 }
 0x1f8   :  { %v1984_v25 = vadd.f32 %v9240_v8, %v17052_v59  ;;  %v2210_v62 = vmax.f32 %v2140_v41, 0.0 }
 0x1f9   :  { %v9242_v36 = vpop.f32.mrf.mxu0  ;;  %v9330_v37 = vpop.f32.mrf.mxu1  ;;  %11026 = vmatpush3.bf16.msra.mxu1 %v11559_v46  ;;  %v13895_v46 = vld [vmem:[%s16760_s1 + $0x124] ss:$12 sps:$4 sm:$0xff]  }
 0x1fa   :  { %v2145_v34 = vadd.f32 %v13694_v42, %v1984_v25  ;;  %v9243_v11 = vadd.f32 %v9242_v36, %v9241_v9  ;;  %v13877_v50 = vadd.f32 %v9330_v37, %v9329_v51  ;;  %11027 = vmatprep.subr.bf16.mxu1 %v11562_v14  ;;  %v13882_v17 = vpack.c.bf16 %v2210_v62, %v2209_v26 }
 0x1fb   :  { %v9244_v18 = vpop.f32.mrf.mxu0  ;;  %v9332_v52 = vpop.f32.mrf.mxu1  ;;  %3116 = vmatmul.mubr.bf16.gmra.mxu0 %v13887_v3  ;;  %3615 = vmatmul.mubr.bf16.gmra.mxu1 %v13590_v49  ;;  %v11568_v49 = vld [vmem:[%s16759_s0 + $0x5b8] sm:$0xff]  }
 0x1fc   :  { %17086 = vst [vmem:[#allocation77_spill] sm:$0xff] %v13882_v17  ;;  %v1987_v42 = vadd.f32 %v9243_v11, %v17055_v31  ;;  %3123 = vmatprep.mubr.bf16.mxu0 %v13895_v46  ;;  %3622 = vmatprep.mubr.bf16.mxu1 %v13598_v54  ;;  %v2211_v25 = vmax.f32 %v2145_v34, 0.0  ;;  %v13914_v34 = vld [vmem:[%s16760_s1 + $0x120] ss:$12 sps:$4 sm:$0xff]  }
 0x1fd   :  { %v9245_v62 = vpop.f32.mrf.mxu0  ;;  %v9333_v37 = vpop.f32.mrf.mxu1  ;;  %11028 = vmatpush3.bf16.msra.mxu1 %v11562_v14 }
 0x1fe   :  { %v2148_v41 = vadd.f32 %v13706_v21, %v1987_v42  ;;  %v9246_v8 = vadd.f32 %v9245_v62, %v9244_v18  ;;  %v13900_v9 = vadd.f32 %v9333_v37, %v9332_v52  ;;  %11029 = vmatprep.subr.bf16.mxu1 %v11565_v30 }
 0x1ff   :  { %v9247_v51 = vpop.f32.mrf.mxu0  ;;  %v9335_v26 = vpop.f32.mrf.mxu1 }
 0x200   :  { %v1992_v36 = vadd.f32 %v9246_v8, %v17051_v56  ;;  %v2212_v11 = vmax.f32 %v2148_v41, 0.0 }
 0x201   :  { %v9248_v54 = vpop.f32.mrf.mxu0  ;;  %v9336_v17 = vpop.f32.mrf.mxu1  ;;  %11030 = vmatpush3.bf16.msra.mxu1 %v11565_v30  ;;  %v17088_v30 = vld [vmem:[#allocation31_spill] sm:$0xff] }
 0x202   :  { %v2153_v14 = vadd.f32 %v13677_v24, %v1992_v36  ;;  %v9249_v21 = vadd.f32 %v9248_v54, %v9247_v51  ;;  %v13907_v18 = vadd.f32 %v9336_v17, %v9335_v26  ;;  %9842 = vmatprep.subr.bf16.mxu1 %v11568_v49  ;;  %v13909_v52 = vpack.c.bf16 %v2212_v11, %v2211_v25  ;;  %v13922_v24 = vld [vmem:[%s16760_s1 + $0x13c] ss:$12 sps:$4 sm:$0xff]  }
 0x203   :  { %v9250_v42 = vpop.f32.mrf.mxu0  ;;  %v9338_v62 = vpop.f32.mrf.mxu1  ;;  %3124 = vmatmul.mubr.bf16.gmra.mxu0 %v13914_v34  ;;  %3623 = vmatmul.mubr.bf16.gmra.mxu1 %v13642_v47 }
 0x204   :  { %17087 = vst [vmem:[#allocation78_spill] sm:$0xff] %v13909_v52  ;;  %v1995_v37 = vadd.f32 %v9249_v21, %v17088_v30  ;;  %3131 = vmatprep.mubr.bf16.mxu0 %v13922_v24  ;;  %3630 = vmatprep.mubr.bf16.mxu1 %v13650_v28  ;;  %v2213_v25 = vmax.f32 %v2153_v14, 0.0 }
 0x205   :  { %v9251_v17 = vpop.f32.mrf.mxu0  ;;  %v9339_v41 = vpop.f32.mrf.mxu1 }
 0x206   :  { %v2156_v8 = vadd.f32 %v13703_v16, %v1995_v37  ;;  %v9252_v49 = vadd.f32 %v9251_v17, %v9250_v42  ;;  %v13927_v51 = vadd.f32 %v9339_v41, %v9338_v62  ;;  %v13938_v42 = vld [vmem:[%s16760_s1 + $0x138] ss:$12 sps:$4 sm:$0xff]  }
 0x207   :  { %v9253_v26 = vpop.f32.mrf.mxu0  ;;  %v9341_v47 = vpop.f32.mrf.mxu1 }
 0x208   :  { %v2000_v36 = vadd.f32 %v9252_v49, %v13068_v10  ;;  %v2214_v11 = vmax.f32 %v2156_v8, 0.0 }
 0x209   :  { %v9254_v54 = vpop.f32.mrf.mxu0  ;;  %v9342_v21 = vpop.f32.mrf.mxu1 }
 0x20a   :  { %v2161_v52 = vadd.f32 %v13734_v13, %v2000_v36  ;;  %v9255_v31 = vadd.f32 %v9254_v54, %v9253_v26  ;;  %v13931_v30 = vadd.f32 %v9342_v21, %v9341_v47  ;;  %v13933_v28 = vpack.c.bf16 %v2214_v11, %v2213_v25  ;;  %v13946_v13 = vld [vmem:[%s16760_s1 + $0x154] ss:$12 sps:$4 sm:$0xff]  }
 0x20b   :  { %v9256_v59 = vpop.f32.mrf.mxu0  ;;  %v9344_v16 = vpop.f32.mrf.mxu1  ;;  %3132 = vmatmul.mubr.bf16.gmra.mxu0 %v13938_v42  ;;  %3631 = vmatmul.mubr.bf16.gmra.mxu1 %v13682_v20 }
 0x20c   :  { %17089 = vst [vmem:[#allocation79_spill] sm:$0xff] %v13933_v28  ;;  %v2003_v14 = vadd.f32 %v9255_v31, %v17059_v43  ;;  %3139 = vmatprep.mubr.bf16.mxu0 %v13946_v13  ;;  %3638 = vmatprep.mubr.bf16.mxu1 %v13690_v22  ;;  %v2215_v26 = vmax.f32 %v2161_v52, 0.0 }
 0x20d   :  { %v9257_v62 = vpop.f32.mrf.mxu0  ;;  %v9345_v37 = vpop.f32.mrf.mxu1 }
 0x20e   :  { %v2164_v17 = vadd.f32 %v13746_v39, %v2003_v14  ;;  %v9258_v41 = vadd.f32 %v9257_v62, %v9256_v59  ;;  %v13951_v8 = vadd.f32 %v9345_v37, %v9344_v16  ;;  %v13962_v59 = vld [vmem:[%s16760_s1 + $0x150] ss:$12 sps:$4 sm:$0xff]  }
 0x20f   :  { %v9259_v49 = vpop.f32.mrf.mxu0  ;;  %v9347_v20 = vpop.f32.mrf.mxu1 }
 0x210   :  { %v2008_v31 = vadd.f32 %v9258_v41, %v13046_v23  ;;  %v2216_v47 = vmax.f32 %v2164_v17, 0.0 }
 0x211   :  { %v9260_v25 = vpop.f32.mrf.mxu0  ;;  %v9348_v36 = vpop.f32.mrf.mxu1 }
 0x212   :  { %v2169_v11 = vadd.f32 %v13717_v57, %v2008_v31  ;;  %v9261_v54 = vadd.f32 %v9260_v25, %v9259_v49  ;;  %v13955_v21 = vadd.f32 %v9348_v36, %v9347_v20  ;;  %v13957_v22 = vpack.c.bf16 %v2216_v47, %v2215_v26  ;;  %v13970_v57 = vld [vmem:[%s16760_s1 + $0x16c] ss:$12 sps:$4 sm:$0xff]  }
 0x213   :  { %v9262_v28 = vpop.f32.mrf.mxu0  ;;  %v9350_v39 = vpop.f32.mrf.mxu1  ;;  %3140 = vmatmul.mubr.bf16.gmra.mxu0 %v13962_v59  ;;  %3639 = vmatmul.mubr.bf16.gmra.mxu1 %v13722_v12 }
 0x214   :  { %17090 = vst [vmem:[#allocation80_spill] sm:$0xff] %v13957_v22  ;;  %v2011_v52 = vadd.f32 %v9261_v54, %v13056_v48  ;;  %3147 = vmatprep.mubr.bf16.mxu0 %v13970_v57  ;;  %3646 = vmatprep.mubr.bf16.mxu1 %v13730_v4  ;;  %v2217_v49 = vmax.f32 %v2169_v11, 0.0 }
 0x215   :  { %v9263_v16 = vpop.f32.mrf.mxu0  ;;  %v9351_v14 = vpop.f32.mrf.mxu1 }
 0x216   :  { %v2172_v62 = vadd.f32 %v13743_v1, %v2011_v52  ;;  %v9264_v37 = vadd.f32 %v9263_v16, %v9262_v28  ;;  %v13975_v17 = vadd.f32 %v9351_v14, %v9350_v39  ;;  %v13986_v28 = vld [vmem:[%s16760_s1 + $0x168] ss:$12 sps:$4 sm:$0xff]  }
 0x217   :  { %v9265_v41 = vpop.f32.mrf.mxu0  ;;  %v9353_v12 = vpop.f32.mrf.mxu1 }
 0x218   :  { %v2016_v20 = vadd.f32 %v9264_v37, %v13016_v35  ;;  %v2218_v26 = vmax.f32 %v2172_v62, 0.0 }
 0x219   :  { %v9266_v31 = vpop.f32.mrf.mxu0  ;;  %v9354_v47 = vpop.f32.mrf.mxu1 }
 0x21a   :  { %v2177_v25 = vadd.f32 %v13779_v19, %v2016_v20  ;;  %v9267_v36 = vadd.f32 %v9266_v31, %v9265_v41  ;;  %v13979_v54 = vadd.f32 %v9354_v47, %v9353_v12  ;;  %v13981_v4 = vpack.c.bf16 %v2218_v26, %v2217_v49  ;;  %v13995_v19 = vld [vmem:[%s16760_s1 + $0x8] ss:$12 sps:$4 sm:$0xff]   ;;  %v11548_v26 = vld [vmem:[%s16759_s0 + $0x4b8] sm:$0xff]  }
 0x21b   :  { %v9268_v22 = vpop.f32.mrf.mxu0  ;;  %v9356_v1 = vpop.f32.mrf.mxu1  ;;  %3148 = vmatmul.mubr.bf16.gmra.mxu0 %v13986_v28  ;;  %3647 = vmatmul.mubr.bf16.gmra.mxu1 %v13762_v40 }
 0x21c   :  { %17091 = vst [vmem:[#allocation81_spill] sm:$0xff] %v13981_v4  ;;  %v2019_v11 = vadd.f32 %v9267_v36, %v13041_v0  ;;  %3654 = vmatprep.mubr.bf16.mxu1 %v13775_v44  ;;  %10983 = vmatprep.mubr.bf16.mxu0 %v13995_v19  ;;  %v2219_v41 = vmax.f32 %v2177_v25, 0.0 }
 0x21d   :  { %v9269_v39 = vpop.f32.mrf.mxu0  ;;  %v9357_v52 = vpop.f32.mrf.mxu1 }
 0x21e   :  { %v2180_v16 = vadd.f32 %v13785_v55, %v2019_v11  ;;  %v9270_v14 = vadd.f32 %v9269_v39, %v9268_v22  ;;  %v13999_v62 = vadd.f32 %v9357_v52, %v9356_v1  ;;  %v2475_v55 = vadd.f32 %v13840_v61, %v12590_v32  ;;  %v11549_v22 = vld [vmem:[%s16759_s0 + $0x4f0] sm:$0xff]   ;;  %v14018_v11 = vld [vmem:[%s16760_s1 + $0x20] ss:$12 sps:$4 sm:$0xff]  }
 0x21f   :  { %v9271_v37 = vpop.f32.mrf.mxu0  ;;  %v9359_v40 = vpop.f32.mrf.mxu1  ;;  %v2467_v61 = vadd.f32 %v13810_v7, %v12588_v53  ;;  %v17093_v39 = vld [vmem:[#allocation71_spill] sm:$0xff]  ;;  %v11550_v7 = vld [vmem:[%s16759_s0 + $0x4b0] sm:$0xff]  }
 0x220   :  { %v2024_v12 = vadd.f32 %v9270_v14, %v12986_v27  ;;  %v2220_v44 = vmax.f32 %v2180_v16, 0.0  ;;  %v17094_v16 = vld [vmem:[#allocation38_spill] sm:$0xff] }
 0x221   :  { %v9272_v49 = vpop.f32.mrf.mxu0  ;;  %v9360_v20 = vpop.f32.mrf.mxu1 }
 0x222   :  { %v9273_v31 = vadd.f32 %v9272_v49, %v9271_v37  ;;  %v14005_v47 = vadd.f32 %v9360_v20, %v9359_v40  ;;  %v14012_v25 = vpack.c.bf16 %v2220_v44, %v2219_v41  ;;  %v2185_v52 = vadd.f32 %v17093_v39, %v2024_v12  ;;  %v17095_v12 = vld [vmem:[#allocation73_spill] sm:$0xff] }
 0x223   :  { %v9362_v36 = vpop.f32.mrf.mxu1  ;;  %v10889_v1 = vpop.f32.mrf.mxu0  ;;  %3655 = vmatmul.mubr.bf16.gmra.mxu1 %v13796_v45  ;;  %10984 = vmatmul.mubr.bf16.vlgmr.msra.gmra.mxu0 %v14018_v11  ;;  %v14029_v45 = vld [vmem:[%s16760_s1 + $0x38] ss:$12 sps:$4 sm:$0xff]  }
 0x224   :  { %17092 = vst [vmem:[#allocation82_spill] sm:$0xff] %v14012_v25  ;;  %v2027_v14 = vadd.f32 %v9273_v31, %v17094_v16  ;;  %v2636_v37 = vadd.f32 %v10889_v1, %v2475_v55  ;;  %3662 = vmatprep.mubr.bf16.mxu1 %v13804_v6  ;;  %10987 = vmatprep.mubr.bf16.mxu0 %v14029_v45  ;;  %v17096_v6 = vld [vmem:[#allocation5_spill] sm:$0xff]  ;;  %v11552_v55 = vld [vmem:[%s16759_s0 + $0x4e8] sm:$0xff]   ;;  %v17097_v25 = vld [vmem:[#allocation4_spill] sm:$0xff] }
 0x225   :  { %v9363_v40 = vpop.f32.mrf.mxu1  ;;  %v2627_v41 = vpop.f32.mrf.mxu0  ;;  %9707 = vmatpush3.bf16.msra.mxu0 %v11548_v26  ;;  %v2478_v31 = vadd.f32 %v13847_v5, %v17096_v6  ;;  %v2221_v26 = vmax.f32 %v2185_v52, 0.0  ;;  %v2470_v32 = vadd.f32 %v13817_v60, %v17097_v25  ;;  %v11553_v5 = vld [vmem:[%s16759_s0 + $0x4a8] sm:$0xff]   ;;  %v11554_v60 = vld [vmem:[%s16759_s0 + $0x4e0] sm:$0xff]  }
 0x226   :  { %v2188_v44 = vadd.f32 %v17095_v12, %v2027_v14  ;;  %v14036_v49 = vadd.f32 %v9363_v40, %v9362_v36  ;;  %v2628_v20 = vadd.f32 %v2627_v41, %v2467_v61  ;;  %9708 = vmatprep.subr.bf16.mxu0 %v11549_v22  ;;  %v2756_v14 = vmax.f32 %v2636_v37, 0.0  ;;  %v17098_v61 = vld [vmem:[#allocation6_spill] sm:$0xff] }
 0x227   :  { %v9365_v1 = vpop.f32.mrf.mxu1  ;;  %v10890_v39 = vpop.f32.mrf.mxu0  ;;  %v2491_v41 = vadd.f32 %v13900_v9, %v17098_v61  ;;  %v14061_v9 = vld [vmem:[%s16760_s1 + $0x50] ss:$12 sps:$4 sm:$0xff]  }
 0x228   :  { %v2639_v4 = vadd.f32 %v10890_v39, %v2478_v31  ;;  %v2222_v53 = vmax.f32 %v2188_v44, 0.0 }
 0x229   :  { %v9366_v36 = vpop.f32.mrf.mxu1  ;;  %v2630_v40 = vpop.f32.mrf.mxu0  ;;  %9709 = vmatpush3.bf16.msra.mxu0 %v11550_v7  ;;  %v2754_v7 = vmax.f32 %v2628_v20, 0.0 }
 0x22a   :  { %v2757_v22 = vmax.f32 %v2639_v4, 0.0  ;;  %v14050_v12 = vadd.f32 %v9366_v36, %v9365_v1  ;;  %v2631_v52 = vadd.f32 %v2630_v40, %v2470_v32  ;;  %9710 = vmatprep.subr.bf16.mxu0 %v11552_v55  ;;  %v14055_v37 = vpack.c.bf16 %v2222_v53, %v2221_v26  ;;  %v17100_v4 = vld [vmem:[#allocation9_spill] sm:$0xff] }
 0x22b   :  { %v9368_v44 = vpop.f32.mrf.mxu1  ;;  %v10893_v31 = vpop.f32.mrf.mxu0  ;;  %3663 = vmatmul.mubr.bf16.gmra.mxu1 %v13827_v2  ;;  %10988 = vmatmul.mubr.bf16.gmra.mxu0 %v14061_v9  ;;  %v2483_v32 = vadd.f32 %v13870_v63, %v17100_v4  ;;  %v14072_v2 = vld [vmem:[%s16760_s1 + $0x68] ss:$12 sps:$4 sm:$0xff]   ;;  %v11555_v63 = vld [vmem:[%s16759_s0 + $0x4a0] sm:$0xff]  }
 0x22c   :  { %17099 = vst [vmem:[#allocation71_spill] sm:$0xff] %v14055_v37  ;;  %v14066_v55 = vpack.c.bf16 %v2757_v22, %v2756_v14  ;;  %v2755_v1 = vmax.f32 %v2631_v52, 0.0  ;;  %v2652_v53 = vadd.f32 %v10893_v31, %v2491_v41  ;;  %3670 = vmatprep.mubr.bf16.mxu1 %v13835_v15  ;;  %10991 = vmatprep.mubr.bf16.mxu0 %v14072_v2  ;;  %v17103_v15 = vld [vmem:[#allocation7_spill] sm:$0xff]  ;;  %v11557_v41 = vld [vmem:[%s16759_s0 + $0x4d8] sm:$0xff]   ;;  %v17104_v31 = vld [vmem:[#allocation10_spill] sm:$0xff] }
 0x22d   :  { %v9369_v39 = vpop.f32.mrf.mxu1  ;;  %v2643_v26 = vpop.f32.mrf.mxu0  ;;  %9711 = vmatpush3.bf16.msra.mxu0 %v11553_v5  ;;  %v2494_v40 = vadd.f32 %v13907_v18, %v17103_v15  ;;  %v2486_v37 = vadd.f32 %v13877_v50, %v17104_v31  ;;  %v11558_v18 = vld [vmem:[%s16759_s0 + $0x498] sm:$0xff]   ;;  %v11560_v50 = vld [vmem:[%s16759_s0 + $0x4d0] sm:$0xff]  }
 0x22e   :  { %17101 = vst [vmem:[#allocation73_spill] sm:$0xff] %v14066_v55  ;;  %v14078_v20 = vpack.c.bf16 %v2755_v1, %v2754_v7  ;;  %v14080_v14 = vadd.f32 %v9369_v39, %v9368_v44  ;;  %v2644_v36 = vadd.f32 %v2643_v26, %v2483_v32  ;;  %9712 = vmatprep.subr.bf16.mxu0 %v11554_v60  ;;  %v17105_v1 = vld [vmem:[#allocation12_spill] sm:$0xff]  ;;  %v2760_v60 = vmax.f32 %v2652_v53, 0.0  ;;  %v17106_v53 = vld [vmem:[#allocation15_spill] sm:$0xff] }
 0x22f   :  { %v9371_v22 = vpop.f32.mrf.mxu1  ;;  %v10894_v52 = vpop.f32.mrf.mxu0  ;;  %v2507_v44 = vadd.f32 %v13951_v8, %v17105_v1  ;;  %v14103_v8 = vld [vmem:[%s16760_s1 + $0x80] ss:$12 sps:$4 sm:$0xff]  }
 0x230   :  { %17102 = vst [vmem:[#allocation83_spill] sm:$0xff] %v14078_v20  ;;  %v2655_v5 = vadd.f32 %v10894_v52, %v2494_v40 }
 0x231   :  { %v9372_v55 = vpop.f32.mrf.mxu1  ;;  %v2646_v7 = vpop.f32.mrf.mxu0  ;;  %9713 = vmatpush3.bf16.msra.mxu0 %v11555_v63 }
 0x232   :  { %v2761_v32 = vmax.f32 %v2655_v5, 0.0  ;;  %v14094_v39 = vadd.f32 %v9372_v55, %v9371_v22  ;;  %v2647_v26 = vadd.f32 %v2646_v7, %v2486_v37  ;;  %9714 = vmatprep.subr.bf16.mxu0 %v11557_v41  ;;  %v2499_v55 = vadd.f32 %v13927_v51, %v17106_v53  ;;  %v11561_v51 = vld [vmem:[%s16759_s0 + $0x490] sm:$0xff]   ;;  %v17111_v53 = vld [vmem:[#allocation18_spill] sm:$0xff] }
 0x233   :  { %v9374_v40 = vpop.f32.mrf.mxu1  ;;  %v10897_v52 = vpop.f32.mrf.mxu0  ;;  %3671 = vmatmul.mubr.bf16.gmra.mxu1 %v13857_v29  ;;  %10992 = vmatmul.mubr.bf16.gmra.mxu0 %v14103_v8  ;;  %v2758_v37 = vmax.f32 %v2644_v36, 0.0  ;;  %v14114_v29 = vld [vmem:[%s16760_s1 + $0x98] ss:$12 sps:$4 sm:$0xff]  }
 0x234   :  { %v14108_v63 = vpack.c.bf16 %v2761_v32, %v2760_v60  ;;  %v2759_v41 = vmax.f32 %v2647_v26, 0.0  ;;  %v2668_v22 = vadd.f32 %v10897_v52, %v2507_v44  ;;  %3678 = vmatprep.mubr.bf16.mxu1 %v13865_v33  ;;  %10995 = vmatprep.mubr.bf16.mxu0 %v14114_v29  ;;  %v17109_v33 = vld [vmem:[#allocation13_spill] sm:$0xff]  ;;  %v11563_v26 = vld [vmem:[%s16759_s0 + $0x4c8] sm:$0xff]  }
 0x235   :  { %v9375_v5 = vpop.f32.mrf.mxu1  ;;  %v2659_v7 = vpop.f32.mrf.mxu0  ;;  %9715 = vmatpush3.bf16.msra.mxu0 %v11558_v18  ;;  %v2510_v32 = vadd.f32 %v13955_v21, %v17109_v33  ;;  %v11564_v21 = vld [vmem:[%s16759_s0 + $0x488] sm:$0xff]  }
 0x236   :  { %17107 = vst [vmem:[#allocation84_spill] sm:$0xff] %v14108_v63  ;;  %v14120_v36 = vpack.c.bf16 %v2759_v41, %v2758_v37  ;;  %v14122_v60 = vadd.f32 %v9375_v5, %v9374_v40  ;;  %v2660_v44 = vadd.f32 %v2659_v7, %v2499_v55  ;;  %9716 = vmatprep.subr.bf16.mxu0 %v11560_v50  ;;  %v17110_v63 = vld [vmem:[#allocation16_spill] sm:$0xff]  ;;  %v2764_v50 = vmax.f32 %v2668_v22, 0.0  ;;  %v17112_v22 = vld [vmem:[#allocation21_spill] sm:$0xff] }
 0x237   :  { %v9377_v52 = vpop.f32.mrf.mxu1  ;;  %v10898_v20 = vpop.f32.mrf.mxu0  ;;  %v2502_v1 = vadd.f32 %v13931_v30, %v17110_v63  ;;  %v2523_v37 = vadd.f32 %v13999_v62, %v17111_v53  ;;  %v11566_v30 = vld [vmem:[%s16759_s0 + $0x4c0] sm:$0xff]   ;;  %v14145_v62 = vld [vmem:[%s16760_s1 + $0xb0] ss:$12 sps:$4 sm:$0xff]  }
 0x238   :  { %17108 = vst [vmem:[#allocation85_spill] sm:$0xff] %v14120_v36  ;;  %v2671_v18 = vadd.f32 %v10898_v20, %v2510_v32 }
 0x239   :  { %v9378_v40 = vpop.f32.mrf.mxu1  ;;  %v2662_v41 = vpop.f32.mrf.mxu0  ;;  %9717 = vmatpush3.bf16.msra.mxu0 %v11561_v51  ;;  %v2515_v51 = vadd.f32 %v13975_v17, %v17112_v22  ;;  %v11567_v17 = vld [vmem:[%s16759_s0 + $0x480] sm:$0xff]  }
 0x23a   :  { %v2765_v55 = vmax.f32 %v2671_v18, 0.0  ;;  %v14136_v5 = vadd.f32 %v9378_v40, %v9377_v52  ;;  %v2663_v7 = vadd.f32 %v2662_v41, %v2502_v1  ;;  %9718 = vmatprep.subr.bf16.mxu0 %v11563_v26  ;;  %v17113_v1 = vld [vmem:[#allocation19_spill] sm:$0xff]  ;;  %v2762_v52 = vmax.f32 %v2660_v44, 0.0 }
 0x23b   :  { %v9380_v20 = vpop.f32.mrf.mxu1  ;;  %v10901_v32 = vpop.f32.mrf.mxu0  ;;  %3679 = vmatmul.mubr.bf16.gmra.mxu1 %v13887_v3  ;;  %10996 = vmatmul.mubr.bf16.gmra.mxu0 %v14145_v62  ;;  %v2526_v26 = vadd.f32 %v14005_v47, %v17113_v1  ;;  %v14158_v3 = vld [vmem:[%s16760_s1 + $0xc8] ss:$12 sps:$4 sm:$0xff]  }
 0x23c   :  { %v14152_v18 = vpack.c.bf16 %v2765_v55, %v2764_v50  ;;  %v2763_v40 = vmax.f32 %v2663_v7, 0.0  ;;  %v2684_v41 = vadd.f32 %v10901_v32, %v2523_v37  ;;  %3686 = vmatprep.mubr.bf16.mxu1 %v13895_v46  ;;  %10999 = vmatprep.mubr.bf16.mxu0 %v14158_v3  ;;  %v14167_v46 = vld [vmem:[%s16759_s0 + $0x5f8] sm:$0xff]   ;;  %v17116_v32 = vld [vmem:[#allocation22_spill] sm:$0xff] }
 0x23d   :  { %v9381_v36 = vpop.f32.mrf.mxu1  ;;  %v2675_v53 = vpop.f32.mrf.mxu0  ;;  %9719 = vmatpush3.bf16.msra.mxu0 %v11564_v21  ;;  %v2518_v21 = vadd.f32 %v13979_v54, %v17116_v32  ;;  %v14182_v54 = vld [vmem:[%s16760_s1 + $0xe0] ss:$12 sps:$4 sm:$0xff]  }
 0x23e   :  { %17114 = vst [vmem:[#allocation86_spill] sm:$0xff] %v14152_v18  ;;  %v9382_v47 = vadd.f32 %v9381_v36, %v9380_v20  ;;  %v2676_v44 = vadd.f32 %v2675_v53, %v2515_v51  ;;  %9720 = vmatprep.subr.bf16.mxu0 %v11566_v30  ;;  %v14169_v37 = vpack.c.bf16 %v2763_v40, %v2762_v52  ;;  %v2768_v30 = vmax.f32 %v2684_v41, 0.0 }
 0x23f   :  { %v9383_v50 = vpop.f32.mrf.mxu1  ;;  %v10902_v55 = vpop.f32.mrf.mxu0  ;;  %v2539_v18 = vadd.f32 %v14080_v14, %v17083_v38  ;;  %v2531_v53 = vadd.f32 %v14036_v49, %v17081_v58  ;;  %v17117_v14 = vld [vmem:[#allocation26_spill] sm:$0xff] }
 0x240   :  { %17115 = vst [vmem:[#allocation87_spill] sm:$0xff] %v14169_v37  ;;  %v2687_v7 = vadd.f32 %v10902_v55, %v2526_v26  ;;  %v2542_v49 = vadd.f32 %v14094_v39, %v17117_v14  ;;  %v2766_v41 = vmax.f32 %v2676_v44, 0.0  ;;  %v17121_v37 = vld [vmem:[#allocation33_spill] sm:$0xff] }
 0x241   :  { %v9384_v1 = vpop.f32.mrf.mxu1  ;;  %v2678_v36 = vpop.f32.mrf.mxu0  ;;  %9721 = vmatpush3.bf16.msra.mxu0 %v11567_v17  ;;  %v2547_v14 = vadd.f32 %v14122_v60, %v17121_v37 }
 0x242   :  { %v2769_v20 = vmax.f32 %v2687_v7, 0.0  ;;  %v9385_v51 = vadd.f32 %v9384_v1, %v9383_v50  ;;  %v2679_v52 = vadd.f32 %v2678_v36, %v2518_v21  ;;  %11063 = vmatprep.subr.bf16.mxu0 %v14167_v46 }
 0x243   :  { %v9386_v40 = vpop.f32.mrf.mxu1  ;;  %v10905_v26 = vpop.f32.mrf.mxu0  ;;  %3687 = vmatmul.mubr.bf16.gmra.mxu1 %v13914_v34  ;;  %11000 = vmatmul.mubr.bf16.gmra.mxu0 %v14182_v54  ;;  %v14193_v34 = vld [vmem:[%s16760_s1 + $0xf8] ss:$12 sps:$4 sm:$0xff]  }
 0x244   :  { %v14187_v17 = vpack.c.bf16 %v2769_v20, %v2768_v30  ;;  %v2767_v1 = vmax.f32 %v2679_v52, 0.0  ;;  %v2700_v50 = vadd.f32 %v10905_v26, %v2539_v18  ;;  %3694 = vmatprep.mubr.bf16.mxu1 %v13922_v24  ;;  %11003 = vmatprep.mubr.bf16.mxu0 %v14193_v34  ;;  %v17120_v52 = vld [vmem:[#allocation29_spill] sm:$0xff]  ;;  %v2555_v24 = vadd.f32 %v9382_v47, %v17051_v56 }
 0x245   :  { %v9387_v55 = vpop.f32.mrf.mxu1  ;;  %v2691_v7 = vpop.f32.mrf.mxu0  ;;  %v2534_v18 = vadd.f32 %v14050_v12, %v17120_v52  ;;  %v17122_v12 = vld [vmem:[#allocation31_spill] sm:$0xff] }
 0x246   :  { %17118 = vst [vmem:[#allocation88_spill] sm:$0xff] %v14187_v17  ;;  %v14196_v21 = vpack.c.bf16 %v2767_v1, %v2766_v41  ;;  %v9388_v36 = vadd.f32 %v9387_v55, %v9386_v40  ;;  %v2692_v39 = vadd.f32 %v2691_v7, %v2531_v53  ;;  %v2772_v38 = vmax.f32 %v2700_v50, 0.0  ;;  %v14207_v53 = vld [vmem:[%s16760_s1 + $0x110] ss:$12 sps:$4 sm:$0xff]  }
 0x247   :  { %v9389_v44 = vpop.f32.mrf.mxu1  ;;  %v10906_v30 = vpop.f32.mrf.mxu0  ;;  %v2558_v47 = vadd.f32 %v9385_v51, %v17122_v12 }
 0x248   :  { %17119 = vst [vmem:[#allocation89_spill] sm:$0xff] %v14196_v21  ;;  %v2703_v20 = vadd.f32 %v10906_v30, %v2542_v49  ;;  %v2770_v49 = vmax.f32 %v2692_v39, 0.0 }
 0x249   :  { %v9390_v26 = vpop.f32.mrf.mxu1  ;;  %v2694_v17 = vpop.f32.mrf.mxu0 }
 0x24a   :  { %v2773_v58 = vmax.f32 %v2703_v20, 0.0  ;;  %v9391_v32 = vadd.f32 %v9390_v26, %v9389_v44  ;;  %v2695_v41 = vadd.f32 %v2694_v17, %v2534_v18  ;;  %v17124_v20 = vld [vmem:[#allocation34_spill] sm:$0xff] }
 0x24b   :  { %v9392_v1 = vpop.f32.mrf.mxu1  ;;  %v10909_v40 = vpop.f32.mrf.mxu0  ;;  %3695 = vmatmul.mubr.bf16.gmra.mxu1 %v13938_v42  ;;  %11004 = vmatmul.mubr.bf16.gmra.mxu0 %v14207_v53  ;;  %v14217_v42 = vld [vmem:[%s16760_s1 + $0x128] ss:$12 sps:$4 sm:$0xff]   ;;  %v2550_v51 = vadd.f32 %v14136_v5, %v17124_v20  ;;  %v14230_v5 = vld [vmem:[%s16760_s1 + $0x140] ss:$12 sps:$4 sm:$0xff]  }
 0x24c   :  { %v14211_v55 = vpack.c.bf16 %v2773_v58, %v2772_v38  ;;  %v2771_v60 = vmax.f32 %v2695_v41, 0.0  ;;  %v2716_v50 = vadd.f32 %v10909_v40, %v2555_v24  ;;  %3702 = vmatprep.mubr.bf16.mxu1 %v13946_v13  ;;  %11007 = vmatprep.mubr.bf16.mxu0 %v14217_v42  ;;  %v2563_v41 = vadd.f32 %v9388_v36, %v13068_v10 }
 0x24d   :  { %v9393_v17 = vpop.f32.mrf.mxu1  ;;  %v2707_v7 = vpop.f32.mrf.mxu0 }
 0x24e   :  { %17123 = vst [vmem:[#allocation33_spill] sm:$0xff] %v14211_v55  ;;  %v9394_v44 = vadd.f32 %v9393_v17, %v9392_v1  ;;  %v2708_v30 = vadd.f32 %v2707_v7, %v2547_v14  ;;  %v14222_v58 = vpack.c.bf16 %v2771_v60, %v2770_v49  ;;  %v2776_v40 = vmax.f32 %v2716_v50, 0.0  ;;  %v14240_v50 = vld [vmem:[%s16760_s1 + $0x158] ss:$12 sps:$4 sm:$0xff]  }
 0x24f   :  { %v9395_v38 = vpop.f32.mrf.mxu1  ;;  %v10910_v39 = vpop.f32.mrf.mxu0 }
 0x250   :  { %17125 = vst [vmem:[#allocation90_spill] sm:$0xff] %v14222_v58  ;;  %v2719_v18 = vadd.f32 %v10910_v39, %v2558_v47  ;;  %v2571_v13 = vadd.f32 %v9394_v44, %v13046_v23  ;;  %v2774_v1 = vmax.f32 %v2708_v30, 0.0 }
 0x251   :  { %v9396_v24 = vpop.f32.mrf.mxu1  ;;  %v2710_v26 = vpop.f32.mrf.mxu0 }
 0x252   :  { %v2777_v55 = vmax.f32 %v2719_v18, 0.0  ;;  %v9397_v21 = vadd.f32 %v9396_v24, %v9395_v38  ;;  %v2711_v12 = vadd.f32 %v2710_v26, %v2550_v51 }
 0x253   :  { %v9398_v14 = vpop.f32.mrf.mxu1  ;;  %v10913_v17 = vpop.f32.mrf.mxu0  ;;  %3703 = vmatmul.mubr.bf16.gmra.mxu1 %v13962_v59  ;;  %11008 = vmatmul.mubr.bf16.gmra.mxu0 %v14230_v5 }
 0x254   :  { %v14233_v47 = vpack.c.bf16 %v2777_v55, %v2776_v40  ;;  %v2775_v49 = vmax.f32 %v2711_v12, 0.0  ;;  %v2732_v36 = vadd.f32 %v10913_v17, %v2571_v13  ;;  %v2574_v60 = vadd.f32 %v9397_v21, %v13056_v48  ;;  %3710 = vmatprep.mubr.bf16.mxu1 %v13970_v57  ;;  %11011 = vmatprep.mubr.bf16.mxu0 %v14240_v50 }
 0x255   :  { %v9399_v59 = vpop.f32.mrf.mxu1  ;;  %v2723_v7 = vpop.f32.mrf.mxu0  ;;  %v2566_v12 = vadd.f32 %v9391_v32, %v17059_v43 }
 0x256   :  { %17126 = vst [vmem:[#allocation91_spill] sm:$0xff] %v14233_v47  ;;  %v14243_v44 = vpack.c.bf16 %v2775_v49, %v2774_v1  ;;  %v9400_v30 = vadd.f32 %v9399_v59, %v9398_v14  ;;  %v2724_v55 = vadd.f32 %v2723_v7, %v2563_v41  ;;  %v2780_v39 = vmax.f32 %v2732_v36, 0.0  ;;  %v17128_v1 = vld [vmem:[#allocation72_spill] sm:$0xff]  ;;  %v17137_v47 = vld [vmem:[#allocation57_spill] sm:$0xff] }
 0x257   :  { %v9401_v51 = vpop.f32.mrf.mxu1  ;;  %v10914_v38 = vpop.f32.mrf.mxu0  ;;  %v14254_v49 = vld [vmem:[%s16760_s1 + $0x4] ss:$12 sps:$4 sm:$0xff]  }
 0x258   :  { %17127 = vst [vmem:[#allocation92_spill] sm:$0xff] %v14243_v44  ;;  %v2735_v21 = vadd.f32 %v10914_v38, %v2574_v60  ;;  %v2579_v40 = vadd.f32 %v9400_v30, %v13016_v35  ;;  %v2778_v41 = vmax.f32 %v2724_v55, 0.0  ;;  %v11569_v38 = vld [vmem:[%s16759_s0 + $0x578] sm:$0xff]  }
 0x259   :  { %v9402_v57 = vpop.f32.mrf.mxu1  ;;  %v2726_v18 = vpop.f32.mrf.mxu0 }
 0x25a   :  { %v2781_v13 = vmax.f32 %v2735_v21, 0.0  ;;  %v9403_v24 = vadd.f32 %v9402_v57, %v9401_v51  ;;  %v2727_v26 = vadd.f32 %v2726_v18, %v2566_v12 }
 0x25b   :  { %v9404_v17 = vpop.f32.mrf.mxu1  ;;  %v10917_v58 = vpop.f32.mrf.mxu0  ;;  %3711 = vmatmul.mubr.bf16.gmra.mxu1 %v13986_v28  ;;  %11012 = vmatmul.mubr.bf16.gmra.mxu0 %v17128_v1 }
 0x25c   :  { %v14249_v14 = vpack.c.bf16 %v2781_v13, %v2780_v39  ;;  %v2779_v32 = vmax.f32 %v2727_v26, 0.0  ;;  %4153 = vmatprep.mubr.bf16.mxu0 %v14254_v49  ;;  %11031 = vmatprep.mubr.bf16.mxu1 %v13995_v19  ;;  %v2582_v28 = vadd.f32 %v9403_v24, %v13041_v0  ;;  %v11570_v19 = vld [vmem:[%s16759_s0 + $0x5b0] sm:$0xff]  }
 0x25d   :  { %v9405_v36 = vpop.f32.mrf.mxu1  ;;  %v2739_v60 = vpop.f32.mrf.mxu0 }
 0x25e   :  { %17129 = vst [vmem:[#allocation72_spill] sm:$0xff] %v14249_v14  ;;  %v9406_v59 = vadd.f32 %v9405_v36, %v9404_v17  ;;  %v2740_v7 = vadd.f32 %v2739_v60, %v2579_v40  ;;  %v14259_v30 = vpack.c.bf16 %v2779_v32, %v2778_v41  ;;  %v14273_v40 = vld [vmem:[%s16760_s1] ss:$12 sps:$4 sm:$0xff]   ;;  %v11585_v17 = vld [vmem:[%s16759_s0 + $0x5f0] sm:$0xff]   ;;  %v14287_v36 = vld [vmem:[%s16760_s1 + $0x1c] ss:$12 sps:$4 sm:$0xff]  }
 0x25f   :  { %v9407_v55 = vpop.f32.mrf.mxu1  ;;  %v10918_v12 = vpop.f32.mrf.mxu0  ;;  %v11571_v32 = vld [vmem:[%s16759_s0 + $0x570] sm:$0xff]  }
 0x260   :  { %17130 = vst [vmem:[#allocation93_spill] sm:$0xff] %v14259_v30  ;;  %v2587_v51 = vadd.f32 %v9406_v59, %v12986_v27  ;;  %v2782_v1 = vmax.f32 %v2740_v7, 0.0  ;;  %v11572_v59 = vld [vmem:[%s16759_s0 + $0x5a8] sm:$0xff]  }
 0x261   :  { %v9408_v21 = vpop.f32.mrf.mxu1  ;;  %v2742_v39 = vpop.f32.mrf.mxu0 }
 0x262   :  { %v2748_v57 = vadd.f32 %v10917_v58, %v2587_v51  ;;  %v9409_v18 = vadd.f32 %v9408_v21, %v9407_v55  ;;  %v2743_v13 = vadd.f32 %v2742_v39, %v2582_v28  ;;  %v17132_v39 = vld [vmem:[#allocation2_spill] sm:$0xff] }
 0x263   :  { %v9450_v24 = vpop.f32.mrf.mxu0  ;;  %v14268_v26 = vpop.f32.mrf.mxu1  ;;  %4154 = vmatmul.mubr.bf16.vlgmr.msra.gmra.mxu0 %v14273_v40  ;;  %11032 = vmatmul.mubr.bf16.vlgmr.msra.gmra.mxu1 %v14018_v11 }
 0x264   :  { %v2590_v58 = vadd.f32 %v9409_v18, %v17094_v16  ;;  %v2783_v41 = vmax.f32 %v2743_v13, 0.0  ;;  %9843 = vmatpush3.bf16.msra.mxu1 %v11569_v38  ;;  %4161 = vmatprep.mubr.bf16.mxu0 %v14287_v36  ;;  %v2784_v21 = vmax.f32 %v2748_v57, 0.0  ;;  %v11586_v57 = vld [vmem:[%s16759_s0 + $0x5e8] sm:$0xff]  }
 0x265   :  { %v9451_v11 = vpop.f32.mrf.mxu0  ;;  %v3190_v60 = vpop.f32.mrf.mxu1  ;;  %9844 = vmatprep.subr.bf16.mxu1 %v11570_v19  ;;  %11035 = vmatprep.mubr.bf16.mxu1 %v14029_v45  ;;  %v11573_v45 = vld [vmem:[%s16759_s0 + $0x568] sm:$0xff]  }
 0x266   :  { %v2751_v7 = vadd.f32 %v10918_v12, %v2590_v58  ;;  %v9452_v28 = vadd.f32 %v9451_v11, %v9450_v24  ;;  %11064 = vmatpush3.bf16.msra.mxu0 %v14167_v46  ;;  %v14295_v55 = vpack.c.bf16 %v2783_v41, %v2782_v1  ;;  %v11574_v46 = vld [vmem:[%s16759_s0 + $0x5a0] sm:$0xff]  }
 0x267   :  { %v9453_v51 = vpop.f32.mrf.mxu0  ;;  %v14297_v38 = vpop.f32.mrf.mxu1  ;;  %11065 = vmatprep.subr.bf16.mxu0 %v11585_v17  ;;  %v14316_v11 = vld [vmem:[%s16760_s1 + $0x18] ss:$12 sps:$4 sm:$0xff]  }
 0x268   :  { %17131 = vst [vmem:[#allocation94_spill] sm:$0xff] %v14295_v55  ;;  %v3030_v18 = vadd.f32 %v9452_v28, %v17132_v39  ;;  %9845 = vmatpush3.bf16.msra.mxu1 %v11571_v32  ;;  %v2785_v19 = vmax.f32 %v2751_v7, 0.0  ;;  %v11587_v7 = vld [vmem:[%s16759_s0 + $0x5e0] sm:$0xff]   ;;  %v17134_v55 = vld [vmem:[#allocation3_spill] sm:$0xff] }
 0x269   :  { %v9454_v13 = vpop.f32.mrf.mxu0  ;;  %v3193_v12 = vpop.f32.mrf.mxu1  ;;  %9846 = vmatprep.subr.bf16.mxu1 %v11572_v59  ;;  %v14327_v59 = vld [vmem:[%s16760_s1 + $0x34] ss:$12 sps:$4 sm:$0xff]  }
 0x26a   :  { %v3191_v24 = vadd.f32 %v3190_v60, %v3030_v18  ;;  %v9455_v1 = vadd.f32 %v9454_v13, %v9453_v51  ;;  %11066 = vmatpush3.bf16.msra.mxu0 %v11585_v17  ;;  %v14309_v58 = vpack.c.bf16 %v2785_v19, %v2784_v21  ;;  %v11575_v60 = vld [vmem:[%s16759_s0 + $0x560] sm:$0xff]   ;;  %v11576_v51 = vld [vmem:[%s16759_s0 + $0x598] sm:$0xff]  }
 0x26b   :  { %v9456_v41 = vpop.f32.mrf.mxu0  ;;  %v14311_v32 = vpop.f32.mrf.mxu1  ;;  %4162 = vmatmul.mubr.bf16.gmra.mxu0 %v14316_v11  ;;  %11036 = vmatmul.mubr.bf16.gmra.mxu1 %v14061_v9 }
 0x26c   :  { %17133 = vst [vmem:[#allocation95_spill] sm:$0xff] %v14309_v58  ;;  %v3033_v17 = vadd.f32 %v9455_v1, %v17097_v25  ;;  %9847 = vmatpush3.bf16.msra.mxu1 %v11573_v45  ;;  %4169 = vmatprep.mubr.bf16.mxu0 %v14327_v59  ;;  %v3317_v13 = vmax.f32 %v3191_v24, 0.0  ;;  %v17140_v25 = vmov 0  }
 0x26d   :  { %v9457_v28 = vpop.f32.mrf.mxu0  ;;  %v3206_v9 = vpop.f32.mrf.mxu1  ;;  %9848 = vmatprep.subr.bf16.mxu1 %v11574_v46  ;;  %11039 = vmatprep.mubr.bf16.mxu1 %v14072_v2  ;;  %v11577_v2 = vld [vmem:[%s16759_s0 + $0x558] sm:$0xff]  }
 0x26e   :  { %v3194_v21 = vadd.f32 %v3193_v12, %v3033_v17  ;;  %v9458_v18 = vadd.f32 %v9457_v28, %v9456_v41  ;;  %11067 = vmatprep.subr.bf16.mxu0 %v11586_v57  ;;  %v11579_v12 = vld [vmem:[%s16759_s0 + $0x590] sm:$0xff]  }
 0x26f   :  { %v9459_v45 = vpop.f32.mrf.mxu0  ;;  %v14337_v19 = vpop.f32.mrf.mxu1  ;;  %11068 = vmatpush3.bf16.msra.mxu0 %v11586_v57 }
 0x270   :  { %v3318_v1 = vmax.f32 %v3194_v21, 0.0  ;;  %v3038_v30 = vadd.f32 %v9458_v18, %v17134_v55  ;;  %9849 = vmatpush3.bf16.msra.mxu1 %v11575_v60  ;;  %11069 = vmatprep.subr.bf16.mxu0 %v11587_v7  ;;  %v14354_v60 = vld [vmem:[%s16760_s1 + $0x30] ss:$12 sps:$4 sm:$0xff]  }
 0x271   :  { %v9460_v46 = vpop.f32.mrf.mxu0  ;;  %v3209_v58 = vpop.f32.mrf.mxu1  ;;  %9850 = vmatprep.subr.bf16.mxu1 %v11576_v51  ;;  %v11588_v51 = vld [vmem:[%s16759_s0 + $0x5d8] sm:$0xff]  }
 0x272   :  { %v14346_v41 = vpack.c.bf16 %v3318_v1, %v3317_v13  ;;  %v3199_v24 = vadd.f32 %v14268_v26, %v3038_v30  ;;  %v9461_v57 = vadd.f32 %v9460_v46, %v9459_v45  ;;  %v11580_v30 = vld [vmem:[%s16759_s0 + $0x550] sm:$0xff]   ;;  %v14368_v26 = vld [vmem:[%s16760_s1 + $0x4c] ss:$12 sps:$4 sm:$0xff]  }
 0x273   :  { %v9462_v17 = vpop.f32.mrf.mxu0  ;;  %v14349_v28 = vpop.f32.mrf.mxu1  ;;  %4170 = vmatmul.mubr.bf16.gmra.mxu0 %v14354_v60  ;;  %11040 = vmatmul.mubr.bf16.gmra.mxu1 %v14103_v8  ;;  %v11581_v45 = vld [vmem:[%s16759_s0 + $0x588] sm:$0xff]  }
 0x274   :  { %17135 = vst [vmem:[#allocation96_spill] sm:$0xff] %v14346_v41  ;;  %v3041_v21 = vadd.f32 %v9461_v57, %v17096_v6  ;;  %9851 = vmatpush3.bf16.msra.mxu1 %v11577_v2  ;;  %4177 = vmatprep.mubr.bf16.mxu0 %v14368_v26  ;;  %v3319_v57 = vmax.f32 %v3199_v24, 0.0  ;;  %v11589_v24 = vld [vmem:[%s16759_s0 + $0x5d0] sm:$0xff]  }
 0x275   :  { %v9463_v18 = vpop.f32.mrf.mxu0  ;;  %v14371_v8 = vpop.f32.mrf.mxu1  ;;  %9852 = vmatprep.subr.bf16.mxu1 %v11579_v12  ;;  %11043 = vmatprep.mubr.bf16.mxu1 %v14114_v29  ;;  %v11582_v29 = vld [vmem:[%s16759_s0 + $0x548] sm:$0xff]  }
 0x276   :  { %v3202_v13 = vadd.f32 %v14297_v38, %v3041_v21  ;;  %v9464_v1 = vadd.f32 %v9463_v18, %v9462_v17  ;;  %11070 = vmatpush3.bf16.msra.mxu0 %v11587_v7  ;;  %v11583_v38 = vld [vmem:[%s16759_s0 + $0x580] sm:$0xff]  }
 0x277   :  { %v9465_v2 = vpop.f32.mrf.mxu0  ;;  %v14378_v46 = vpop.f32.mrf.mxu1  ;;  %11071 = vmatprep.subr.bf16.mxu0 %v11588_v51 }
 0x278   :  { %v3320_v41 = vmax.f32 %v3202_v13, 0.0  ;;  %v3046_v14 = vadd.f32 %v9464_v1, %v17100_v4  ;;  %9853 = vmatpush3.bf16.msra.mxu1 %v11580_v30 }
 0x279   :  { %v9466_v12 = vpop.f32.mrf.mxu0  ;;  %v14384_v44 = vpop.f32.mrf.mxu1  ;;  %9854 = vmatprep.subr.bf16.mxu1 %v11581_v45  ;;  %v14399_v45 = vld [vmem:[%s16760_s1 + $0x48] ss:$12 sps:$4 sm:$0xff]  }
 0x27a   :  { %v3207_v7 = vadd.f32 %v3206_v9, %v3046_v14  ;;  %v9467_v17 = vadd.f32 %v9466_v12, %v9465_v2  ;;  %11072 = vmatpush3.bf16.msra.mxu0 %v11588_v51  ;;  %v14392_v21 = vpack.c.bf16 %v3320_v41, %v3319_v57  ;;  %v11584_v9 = vld [vmem:[%s16759_s0 + $0x540] sm:$0xff]   ;;  %v11590_v51 = vld [vmem:[%s16759_s0 + $0x5c8] sm:$0xff]  }
 0x27b   :  { %v9468_v30 = vpop.f32.mrf.mxu0  ;;  %v14394_v18 = vpop.f32.mrf.mxu1  ;;  %4178 = vmatmul.mubr.bf16.gmra.mxu0 %v14399_v45  ;;  %11044 = vmatmul.mubr.bf16.gmra.mxu1 %v14145_v62  ;;  %v14410_v41 = vld [vmem:[%s16760_s1 + $0x64] ss:$12 sps:$4 sm:$0xff]  }
 0x27c   :  { %17136 = vst [vmem:[#allocation97_spill] sm:$0xff] %v14392_v21  ;;  %v3049_v14 = vadd.f32 %v9467_v17, %v17104_v31  ;;  %9855 = vmatpush3.bf16.msra.mxu1 %v11582_v29  ;;  %4185 = vmatprep.mubr.bf16.mxu0 %v14410_v41  ;;  %v3321_v12 = vmax.f32 %v3207_v7, 0.0 }
 0x27d   :  { %v9469_v13 = vpop.f32.mrf.mxu0  ;;  %v14416_v62 = vpop.f32.mrf.mxu1  ;;  %9856 = vmatprep.subr.bf16.mxu1 %v11583_v38  ;;  %11047 = vmatprep.mubr.bf16.mxu1 %v14158_v3  ;;  %v11591_v38 = vld [vmem:[%s16759_s0 + $0x5c0] sm:$0xff]  }
 0x27e   :  { %v3210_v1 = vadd.f32 %v3209_v58, %v3049_v14  ;;  %v9470_v2 = vadd.f32 %v9469_v13, %v9468_v30  ;;  %11073 = vmatprep.subr.bf16.mxu0 %v11589_v24  ;;  %v14436_v14 = vld [vmem:[%s16760_s1 + $0x60] ss:$12 sps:$4 sm:$0xff]  }
 0x27f   :  { %v9471_v57 = vpop.f32.mrf.mxu0  ;;  %v14419_v29 = vpop.f32.mrf.mxu1  ;;  %11074 = vmatpush3.bf16.msra.mxu0 %v11589_v24 }
 0x280   :  { %v3322_v17 = vmax.f32 %v3210_v1, 0.0  ;;  %v3054_v21 = vadd.f32 %v9470_v2, %v17098_v61  ;;  %9857 = vmatpush3.bf16.msra.mxu1 %v11584_v9  ;;  %11075 = vmatprep.subr.bf16.mxu0 %v11590_v51 }
 0x281   :  { %11111 = vmatprep.subr.bf16.mxu1 %v17137_v47  ;;  %v9472_v31 = vpop.f32.mrf.mxu0  ;;  %v14423_v4 = vpop.f32.mrf.mxu1 }
 0x282   :  { %v3215_v3 = vadd.f32 %v14311_v32, %v3054_v21  ;;  %v9473_v58 = vadd.f32 %v9472_v31, %v9471_v57  ;;  %v14429_v30 = vpack.c.bf16 %v3322_v17, %v3321_v12  ;;  %v14444_v32 = vld [vmem:[%s16760_s1 + $0x7c] ss:$12 sps:$4 sm:$0xff]  }
 0x283   :  { %v9474_v7 = vpop.f32.mrf.mxu0  ;;  %v14431_v24 = vpop.f32.mrf.mxu1  ;;  %4186 = vmatmul.mubr.bf16.gmra.mxu0 %v14436_v14  ;;  %11048 = vmatmul.mubr.bf16.gmra.mxu1 %v14182_v54  ;;  %v17139_v17 = vld [vmem:[#allocation15_spill] sm:$0xff] }
 0x284   :  { %17138 = vst [vmem:[#allocation98_spill] sm:$0xff] %v14429_v30  ;;  %v3057_v31 = vadd.f32 %v9473_v58, %v17103_v15  ;;  %4193 = vmatprep.mubr.bf16.mxu0 %v14444_v32  ;;  %11051 = vmatprep.mubr.bf16.mxu1 %v14193_v34  ;;  %v3323_v57 = vmax.f32 %v3215_v3, 0.0  ;;  %v14465_v3 = vld [vmem:[%s16760_s1 + $0x78] ss:$12 sps:$4 sm:$0xff]  }
 0x285   :  { %v9475_v21 = vpop.f32.mrf.mxu0  ;;  %v14448_v9 = vpop.f32.mrf.mxu1  ;;  %11076 = vmatpush3.bf16.msra.mxu0 %v11590_v51 }
 0x286   :  { %v3218_v13 = vadd.f32 %v14337_v19, %v3057_v31  ;;  %v9476_v1 = vadd.f32 %v9475_v21, %v9474_v7  ;;  %11077 = vmatprep.subr.bf16.mxu0 %v11591_v38 }
 0x287   :  { %v9477_v54 = vpop.f32.mrf.mxu0  ;;  %v14451_v2 = vpop.f32.mrf.mxu1 }
 0x288   :  { %v3324_v12 = vmax.f32 %v3218_v13, 0.0  ;;  %v3062_v58 = vadd.f32 %v9476_v1, %v17139_v17 }
 0x289   :  { %v9478_v30 = vpop.f32.mrf.mxu0  ;;  %v14454_v15 = vpop.f32.mrf.mxu1  ;;  %11078 = vmatpush3.bf16.msra.mxu0 %v11591_v38 }
 0x28a   :  { %v3223_v34 = vadd.f32 %v14371_v8, %v3062_v58  ;;  %v9479_v61 = vadd.f32 %v9478_v30, %v9477_v54  ;;  %5205 = vmatprep.subr.bf16.mxu0 %v17140_v25  ;;  %v14458_v51 = vpack.c.bf16 %v3324_v12, %v3323_v57  ;;  %v14473_v8 = vld [vmem:[%s16760_s1 + $0x94] ss:$12 sps:$4 sm:$0xff]  }
 0x28b   :  { %v9480_v19 = vpop.f32.mrf.mxu0  ;;  %v14460_v7 = vpop.f32.mrf.mxu1  ;;  %4194 = vmatmul.mubr.bf16.gmra.mxu0 %v14465_v3  ;;  %11052 = vmatmul.mubr.bf16.gmra.mxu1 %v14207_v53 }
 0x28c   :  { %17141 = vst [vmem:[#allocation99_spill] sm:$0xff] %v14458_v51  ;;  %v3065_v38 = vadd.f32 %v9479_v61, %v17110_v63  ;;  %4201 = vmatprep.mubr.bf16.mxu0 %v14473_v8  ;;  %11055 = vmatprep.mubr.bf16.mxu1 %v14217_v42  ;;  %v3325_v53 = vmax.f32 %v3223_v34, 0.0  ;;  %v17142_v61 = vld [vmem:[#allocation12_spill] sm:$0xff] }
 0x28d   :  { %v9481_v30 = vpop.f32.mrf.mxu0  ;;  %v14477_v31 = vpop.f32.mrf.mxu1 }
 0x28e   :  { %v3226_v21 = vadd.f32 %v14384_v44, %v3065_v38  ;;  %v9482_v13 = vadd.f32 %v9481_v30, %v9480_v19  ;;  %v14493_v44 = vld [vmem:[%s16760_s1 + $0x90] ss:$12 sps:$4 sm:$0xff]  }
 0x28f   :  { %v9483_v1 = vpop.f32.mrf.mxu0  ;;  %v14480_v54 = vpop.f32.mrf.mxu1 }
 0x290   :  { %v3070_v57 = vadd.f32 %v9482_v13, %v17142_v61  ;;  %v3326_v12 = vmax.f32 %v3226_v21, 0.0 }
 0x291   :  { %v9484_v58 = vpop.f32.mrf.mxu0  ;;  %v14483_v51 = vpop.f32.mrf.mxu1 }
 0x292   :  { %v3231_v63 = vadd.f32 %v14349_v28, %v3070_v57  ;;  %v9485_v17 = vadd.f32 %v9484_v58, %v9483_v1  ;;  %v14486_v42 = vpack.c.bf16 %v3326_v12, %v3325_v53  ;;  %v14501_v28 = vld [vmem:[%s16760_s1 + $0xac] ss:$12 sps:$4 sm:$0xff]  }
 0x293   :  { %v9486_v6 = vpop.f32.mrf.mxu0  ;;  %v14488_v25 = vpop.f32.mrf.mxu1  ;;  %4202 = vmatmul.mubr.bf16.gmra.mxu0 %v14493_v44  ;;  %11056 = vmatmul.mubr.bf16.gmra.mxu1 %v14230_v5 }
 0x294   :  { %17143 = vst [vmem:[#allocation100_spill] sm:$0xff] %v14486_v42  ;;  %v3073_v34 = vadd.f32 %v9485_v17, %v17109_v33  ;;  %4209 = vmatprep.mubr.bf16.mxu0 %v14501_v28  ;;  %11059 = vmatprep.mubr.bf16.mxu1 %v14240_v50  ;;  %v3327_v5 = vmax.f32 %v3231_v63, 0.0  ;;  %v14527_v63 = vld [vmem:[%s16760_s1 + $0x170] ss:$12 sps:$4 sm:$0xff]  }
 0x295   :  { %v9487_v19 = vpop.f32.mrf.mxu0  ;;  %v14505_v38 = vpop.f32.mrf.mxu1  ;;  %17146 = vst [vmem:[#allocation103_spill] sm:$0xff] %v14527_v63 }
 0x296   :  { %v3234_v30 = vadd.f32 %v14378_v46, %v3073_v34  ;;  %v9488_v21 = vadd.f32 %v9487_v19, %v9486_v6  ;;  %v14521_v6 = vld [vmem:[%s16760_s1 + $0xa8] ss:$12 sps:$4 sm:$0xff]   ;;  %v17147_v46 = vld [vmem:[#allocation22_spill] sm:$0xff] }
 0x297   :  { %v9489_v13 = vpop.f32.mrf.mxu0  ;;  %v14508_v1 = vpop.f32.mrf.mxu1  ;;  %v14534_v34 = vld [vmem:[%s16760_s1 + $0xc4] ss:$12 sps:$4 sm:$0xff]  }
 0x298   :  { %v3078_v17 = vadd.f32 %v9488_v21, %v17112_v22  ;;  %v3328_v53 = vmax.f32 %v3234_v30, 0.0 }
 0x299   :  { %v9490_v57 = vpop.f32.mrf.mxu0  ;;  %v14511_v12 = vpop.f32.mrf.mxu1 }
 0x29a   :  { %v3239_v58 = vadd.f32 %v14416_v62, %v3078_v17  ;;  %v9491_v42 = vadd.f32 %v9490_v57, %v9489_v13  ;;  %v14514_v50 = vpack.c.bf16 %v3328_v53, %v3327_v5 }
 0x29b   :  { %v9492_v33 = vpop.f32.mrf.mxu0  ;;  %v14516_v61 = vpop.f32.mrf.mxu1  ;;  %4210 = vmatmul.mubr.bf16.gmra.mxu0 %v14521_v6  ;;  %11060 = vmatmul.mubr.bf16.gmra.mxu1 %v14527_v63 }
 0x29c   :  { %17144 = vst [vmem:[#allocation101_spill] sm:$0xff] %v14514_v50  ;;  %17145 = vst [vmem:[#allocation102_spill] sm:$0xff] %v14516_v61  ;;  %v3081_v62 = vadd.f32 %v9491_v42, %v17147_v46  ;;  %4217 = vmatprep.mubr.bf16.mxu0 %v14534_v34  ;;  %4716 = vmatprep.mubr.bf16.mxu1 %v14254_v49  ;;  %v3329_v53 = vmax.f32 %v3239_v58, 0.0  ;;  %v17149_v42 = vld [vmem:[#allocation18_spill] sm:$0xff] }
 0x29d   :  { %v9493_v19 = vpop.f32.mrf.mxu0  ;;  %v14538_v30 = vpop.f32.mrf.mxu1 }
 0x29e   :  { %v3242_v21 = vadd.f32 %v14423_v4, %v3081_v62  ;;  %v9494_v13 = vadd.f32 %v9493_v19, %v9492_v33  ;;  %v14552_v4 = vld [vmem:[%s16760_s1 + $0xc0] ss:$12 sps:$4 sm:$0xff]  }
 0x29f   :  { %v9495_v5 = vpop.f32.mrf.mxu0  ;;  %v14541_v17 = vpop.f32.mrf.mxu1  ;;  %v17151_v33 = vld [vmem:[#allocation19_spill] sm:$0xff] }
 0x2a0   :  { %17148 = vst [vmem:[#allocation104_spill] sm:$0xff] %v14541_v17  ;;  %v3086_v57 = vadd.f32 %v9494_v13, %v17149_v42  ;;  %v3330_v50 = vmax.f32 %v3242_v21, 0.0 }
 0x2a1   :  { %v9496_v63 = vpop.f32.mrf.mxu0  ;;  %v14544_v46 = vpop.f32.mrf.mxu1 }
 0x2a2   :  { %v3247_v22 = vadd.f32 %v14394_v18, %v3086_v57  ;;  %v9497_v16 = vadd.f32 %v9496_v63, %v9495_v5  ;;  %v14547_v49 = vpack.c.bf16 %v3330_v50, %v3329_v53  ;;  %v14561_v18 = vld [vmem:[%s16760_s1 + $0xdc] ss:$12 sps:$4 sm:$0xff]  }
 0x2a3   :  { %v9498_v61 = vpop.f32.mrf.mxu0  ;;  %v9586_v39 = vpop.f32.mrf.mxu1  ;;  %4218 = vmatmul.mubr.bf16.gmra.mxu0 %v14552_v4  ;;  %4717 = vmatmul.mubr.bf16.vlgmr.msra.gmra.mxu1 %v14273_v40  ;;  %17152 = vst [vmem:[#allocation106_spill] sm:$0xff] %v14561_v18  ;;  %v17153_v50 = vld [vmem:[#allocation37_spill] sm:$0xff]  ;;  %v17154_v53 = vld [vmem:[#allocation27_spill] sm:$0xff] }
 0x2a4   :  { %17150 = vst [vmem:[#allocation105_spill] sm:$0xff] %v14547_v49  ;;  %v3089_v58 = vadd.f32 %v9497_v16, %v17151_v33  ;;  %11112 = vmatpush3.bf16.msra.mxu1 %v17137_v47  ;;  %4225 = vmatprep.mubr.bf16.mxu0 %v14561_v18  ;;  %v3331_v5 = vmax.f32 %v3247_v22, 0.0  ;;  %v17155_v47 = vld [vmem:[#allocation58_spill] sm:$0xff] }
 0x2a5   :  { %11113 = vmatprep.subr.bf16.mxu1 %v17153_v50  ;;  %v9499_v63 = vpop.f32.mrf.mxu0  ;;  %v9587_v62 = vpop.f32.mrf.mxu1  ;;  %4724 = vmatprep.mubr.bf16.mxu1 %v14287_v36  ;;  %v14580_v22 = vld [vmem:[%s16760_s1 + $0xd8] ss:$12 sps:$4 sm:$0xff]  }
 0x2a6   :  { %v3250_v19 = vadd.f32 %v14419_v29, %v3089_v58  ;;  %v9500_v40 = vadd.f32 %v9499_v63, %v9498_v61  ;;  %v14567_v21 = vadd.f32 %v9587_v62, %v9586_v39 }
 0x2a7   :  { %v9501_v16 = vpop.f32.mrf.mxu0  ;;  %v9589_v13 = vpop.f32.mrf.mxu1 }
 0x2a8   :  { %v3094_v57 = vadd.f32 %v9500_v40, %v17154_v53  ;;  %11114 = vmatpush3.bf16.msra.mxu1 %v17153_v50  ;;  %v3332_v49 = vmax.f32 %v3250_v19, 0.0 }
 0x2a9   :  { %11123 = vmatprep.subr.bf16.mxu1 %v17155_v47  ;;  %v9502_v33 = vpop.f32.mrf.mxu0  ;;  %v9590_v42 = vpop.f32.mrf.mxu1 }
 0x2aa   :  { %v3255_v17 = vadd.f32 %v14448_v9, %v3094_v57  ;;  %v9503_v36 = vadd.f32 %v9502_v33, %v9501_v16  ;;  %v14573_v18 = vadd.f32 %v9590_v42, %v9589_v13  ;;  %v14575_v29 = vpack.c.bf16 %v3332_v49, %v3331_v5  ;;  %v14588_v9 = vld [vmem:[%s16760_s1 + $0xf4] ss:$12 sps:$4 sm:$0xff]   ;;  %v17157_v16 = vld [vmem:[#allocation25_spill] sm:$0xff] }
 0x2ab   :  { %v9504_v39 = vpop.f32.mrf.mxu0  ;;  %v9592_v61 = vpop.f32.mrf.mxu1  ;;  %4226 = vmatmul.mubr.bf16.gmra.mxu0 %v14580_v22  ;;  %4725 = vmatmul.mubr.bf16.gmra.mxu1 %v14316_v11 }
 0x2ac   :  { %17156 = vst [vmem:[#allocation107_spill] sm:$0xff] %v14575_v29  ;;  %v3097_v58 = vadd.f32 %v9503_v36, %v17120_v52  ;;  %4233 = vmatprep.mubr.bf16.mxu0 %v14588_v9  ;;  %4732 = vmatprep.mubr.bf16.mxu1 %v14327_v59  ;;  %v3333_v40 = vmax.f32 %v3255_v17, 0.0  ;;  %v17159_v17 = vld [vmem:[#allocation26_spill] sm:$0xff] }
 0x2ad   :  { %v9505_v42 = vpop.f32.mrf.mxu0  ;;  %v9593_v49 = vpop.f32.mrf.mxu1 }
 0x2ae   :  { %v3258_v33 = vadd.f32 %v14454_v15, %v3097_v58  ;;  %v9506_v63 = vadd.f32 %v9505_v42, %v9504_v39  ;;  %v14593_v62 = vadd.f32 %v9593_v49, %v9592_v61  ;;  %v14604_v39 = vld [vmem:[%s16760_s1 + $0xf0] ss:$12 sps:$4 sm:$0xff]  }
 0x2af   :  { %v9507_v19 = vpop.f32.mrf.mxu0  ;;  %v9595_v11 = vpop.f32.mrf.mxu1 }
 0x2b0   :  { %v3102_v13 = vadd.f32 %v9506_v63, %v17157_v16  ;;  %v3334_v5 = vmax.f32 %v3258_v33, 0.0 }
 0x2b1   :  { %v9508_v57 = vpop.f32.mrf.mxu0  ;;  %v9596_v36 = vpop.f32.mrf.mxu1 }
 0x2b2   :  { %v3263_v29 = vadd.f32 %v14431_v24, %v3102_v13  ;;  %v9509_v50 = vadd.f32 %v9508_v57, %v9507_v19  ;;  %v14597_v47 = vadd.f32 %v9596_v36, %v9595_v11  ;;  %v14599_v59 = vpack.c.bf16 %v3334_v5, %v3333_v40  ;;  %v14612_v24 = vld [vmem:[%s16760_s1 + $0x10c] ss:$12 sps:$4 sm:$0xff]  }
 0x2b3   :  { %v9510_v52 = vpop.f32.mrf.mxu0  ;;  %v9598_v15 = vpop.f32.mrf.mxu1  ;;  %4234 = vmatmul.mubr.bf16.gmra.mxu0 %v14604_v39  ;;  %4733 = vmatmul.mubr.bf16.gmra.mxu1 %v14354_v60 }
 0x2b4   :  { %17158 = vst [vmem:[#allocation25_spill] sm:$0xff] %v14599_v59  ;;  %v3105_v61 = vadd.f32 %v9509_v50, %v17159_v17  ;;  %4241 = vmatprep.mubr.bf16.mxu0 %v14612_v24  ;;  %4740 = vmatprep.mubr.bf16.mxu1 %v14368_v26  ;;  %v3335_v11 = vmax.f32 %v3263_v29, 0.0 }
 0x2b5   :  { %v9511_v58 = vpop.f32.mrf.mxu0  ;;  %v9599_v42 = vpop.f32.mrf.mxu1 }
 0x2b6   :  { %v3266_v49 = vadd.f32 %v14451_v2, %v3105_v61  ;;  %v9512_v33 = vadd.f32 %v9511_v58, %v9510_v52  ;;  %v14617_v63 = vadd.f32 %v9599_v42, %v9598_v15  ;;  %v14628_v52 = vld [vmem:[%s16760_s1 + $0x108] ss:$12 sps:$4 sm:$0xff]  }
 0x2b7   :  { %v9513_v19 = vpop.f32.mrf.mxu0  ;;  %v9601_v60 = vpop.f32.mrf.mxu1 }
 0x2b8   :  { %v3110_v50 = vadd.f32 %v9512_v33, %v17121_v37  ;;  %v3336_v40 = vmax.f32 %v3266_v49, 0.0 }
 0x2b9   :  { %v9514_v13 = vpop.f32.mrf.mxu0  ;;  %v9602_v5 = vpop.f32.mrf.mxu1 }
 0x2ba   :  { %v3271_v57 = vadd.f32 %v14477_v31, %v3110_v50  ;;  %v9515_v36 = vadd.f32 %v9514_v13, %v9513_v19  ;;  %v14621_v59 = vadd.f32 %v9602_v5, %v9601_v60  ;;  %v14623_v26 = vpack.c.bf16 %v3336_v40, %v3335_v11  ;;  %v14636_v31 = vld [vmem:[%s16760_s1 + $0x124] ss:$12 sps:$4 sm:$0xff]  }
 0x2bb   :  { %v9516_v17 = vpop.f32.mrf.mxu0  ;;  %v9604_v2 = vpop.f32.mrf.mxu1  ;;  %4242 = vmatmul.mubr.bf16.gmra.mxu0 %v14628_v52  ;;  %4741 = vmatmul.mubr.bf16.gmra.mxu1 %v14399_v45 }
 0x2bc   :  { %17160 = vst [vmem:[#allocation108_spill] sm:$0xff] %v14623_v26  ;;  %v3113_v29 = vadd.f32 %v9515_v36, %v17124_v20  ;;  %4249 = vmatprep.mubr.bf16.mxu0 %v14636_v31  ;;  %4748 = vmatprep.mubr.bf16.mxu1 %v14410_v41  ;;  %v3337_v19 = vmax.f32 %v3271_v57, 0.0  ;;  %v17162_v57 = vld [vmem:[#allocation31_spill] sm:$0xff] }
 0x2bd   :  { %v9517_v15 = vpop.f32.mrf.mxu0  ;;  %v9605_v61 = vpop.f32.mrf.mxu1 }
 0x2be   :  { %v3274_v58 = vadd.f32 %v14483_v51, %v3113_v29  ;;  %v9518_v42 = vadd.f32 %v9517_v15, %v9516_v17  ;;  %v14641_v49 = vadd.f32 %v9605_v61, %v9604_v2  ;;  %v14652_v17 = vld [vmem:[%s16760_s1 + $0x120] ss:$12 sps:$4 sm:$0xff]  }
 0x2bf   :  { %v9519_v33 = vpop.f32.mrf.mxu0  ;;  %v9607_v45 = vpop.f32.mrf.mxu1 }
 0x2c0   :  { %v3118_v60 = vadd.f32 %v9518_v42, %v17051_v56  ;;  %v3338_v11 = vmax.f32 %v3274_v58, 0.0 }
 0x2c1   :  { %v9520_v50 = vpop.f32.mrf.mxu0  ;;  %v9608_v40 = vpop.f32.mrf.mxu1 }
 0x2c2   :  { %v3279_v13 = vadd.f32 %v14460_v7, %v3118_v60  ;;  %v9521_v5 = vadd.f32 %v9520_v50, %v9519_v33  ;;  %v14645_v36 = vadd.f32 %v9608_v40, %v9607_v45  ;;  %v14647_v41 = vpack.c.bf16 %v3338_v11, %v3337_v19  ;;  %v14660_v7 = vld [vmem:[%s16760_s1 + $0x13c] ss:$12 sps:$4 sm:$0xff]  }
 0x2c3   :  { %v9522_v26 = vpop.f32.mrf.mxu0  ;;  %v9610_v51 = vpop.f32.mrf.mxu1  ;;  %4250 = vmatmul.mubr.bf16.gmra.mxu0 %v14652_v17  ;;  %4749 = vmatmul.mubr.bf16.gmra.mxu1 %v14436_v14 }
 0x2c4   :  { %17161 = vst [vmem:[#allocation109_spill] sm:$0xff] %v14647_v41  ;;  %v3121_v2 = vadd.f32 %v9521_v5, %v17162_v57  ;;  %4257 = vmatprep.mubr.bf16.mxu0 %v14660_v7  ;;  %4756 = vmatprep.mubr.bf16.mxu1 %v14444_v32  ;;  %v3339_v45 = vmax.f32 %v3279_v13, 0.0 }
 0x2c5   :  { %v9523_v29 = vpop.f32.mrf.mxu0  ;;  %v9611_v15 = vpop.f32.mrf.mxu1 }
 0x2c6   :  { %v3282_v61 = vadd.f32 %v14480_v54, %v3121_v2  ;;  %v9524_v58 = vadd.f32 %v9523_v29, %v9522_v26  ;;  %v14665_v42 = vadd.f32 %v9611_v15, %v9610_v51  ;;  %v14676_v26 = vld [vmem:[%s16760_s1 + $0x138] ss:$12 sps:$4 sm:$0xff]  }
 0x2c7   :  { %v9525_v33 = vpop.f32.mrf.mxu0  ;;  %v9613_v14 = vpop.f32.mrf.mxu1 }
 0x2c8   :  { %v3126_v19 = vadd.f32 %v9524_v58, %v13068_v10  ;;  %v3340_v60 = vmax.f32 %v3282_v61, 0.0 }
 0x2c9   :  { %v9526_v11 = vpop.f32.mrf.mxu0  ;;  %v9614_v50 = vpop.f32.mrf.mxu1 }
 0x2ca   :  { %v3287_v40 = vadd.f32 %v14505_v38, %v3126_v19  ;;  %v9527_v5 = vadd.f32 %v9526_v11, %v9525_v33  ;;  %v14669_v41 = vadd.f32 %v9614_v50, %v9613_v14  ;;  %v14671_v32 = vpack.c.bf16 %v3340_v60, %v3339_v45  ;;  %v14684_v38 = vld [vmem:[%s16760_s1 + $0x154] ss:$12 sps:$4 sm:$0xff]  }
 0x2cb   :  { %v9528_v20 = vpop.f32.mrf.mxu0  ;;  %v9616_v54 = vpop.f32.mrf.mxu1  ;;  %4258 = vmatmul.mubr.bf16.gmra.mxu0 %v14676_v26  ;;  %4757 = vmatmul.mubr.bf16.gmra.mxu1 %v14465_v3 }
 0x2cc   :  { %17163 = vst [vmem:[#allocation110_spill] sm:$0xff] %v14671_v32  ;;  %v3129_v13 = vadd.f32 %v9527_v5, %v17059_v43  ;;  %4265 = vmatprep.mubr.bf16.mxu0 %v14684_v38  ;;  %4764 = vmatprep.mubr.bf16.mxu1 %v14473_v8  ;;  %v3341_v33 = vmax.f32 %v3287_v40, 0.0 }
 0x2cd   :  { %v9529_v51 = vpop.f32.mrf.mxu0  ;;  %v9617_v2 = vpop.f32.mrf.mxu1 }
 0x2ce   :  { %v3290_v29 = vadd.f32 %v14511_v12, %v3129_v13  ;;  %v9530_v15 = vadd.f32 %v9529_v51, %v9528_v20  ;;  %v14689_v61 = vadd.f32 %v9617_v2, %v9616_v54  ;;  %v14700_v20 = vld [vmem:[%s16760_s1 + $0x150] ss:$12 sps:$4 sm:$0xff]  }
 0x2cf   :  { %v9531_v58 = vpop.f32.mrf.mxu0  ;;  %v9619_v3 = vpop.f32.mrf.mxu1 }
 0x2d0   :  { %v3134_v14 = vadd.f32 %v9530_v15, %v13046_v23  ;;  %v3342_v45 = vmax.f32 %v3290_v29, 0.0 }
 0x2d1   :  { %v9532_v19 = vpop.f32.mrf.mxu0  ;;  %v9620_v60 = vpop.f32.mrf.mxu1 }
 0x2d2   :  { %v3295_v11 = vadd.f32 %v14488_v25, %v3134_v14  ;;  %v9533_v50 = vadd.f32 %v9532_v19, %v9531_v58  ;;  %v14693_v5 = vadd.f32 %v9620_v60, %v9619_v3  ;;  %v14695_v8 = vpack.c.bf16 %v3342_v45, %v3341_v33  ;;  %v14708_v25 = vld [vmem:[%s16760_s1 + $0x16c] ss:$12 sps:$4 sm:$0xff]  }
 0x2d3   :  { %v9534_v32 = vpop.f32.mrf.mxu0  ;;  %v9622_v12 = vpop.f32.mrf.mxu1  ;;  %4266 = vmatmul.mubr.bf16.gmra.mxu0 %v14700_v20  ;;  %4765 = vmatmul.mubr.bf16.gmra.mxu1 %v14493_v44 }
 0x2d4   :  { %17164 = vst [vmem:[#allocation111_spill] sm:$0xff] %v14695_v8  ;;  %v3137_v40 = vadd.f32 %v9533_v50, %v13056_v48  ;;  %4273 = vmatprep.mubr.bf16.mxu0 %v14708_v25  ;;  %4772 = vmatprep.mubr.bf16.mxu1 %v14501_v28  ;;  %v3343_v58 = vmax.f32 %v3295_v11, 0.0 }
 0x2d5   :  { %v9535_v54 = vpop.f32.mrf.mxu0  ;;  %v9623_v13 = vpop.f32.mrf.mxu1 }
 0x2d6   :  { %v3298_v51 = vadd.f32 %v14508_v1, %v3137_v40  ;;  %v9536_v2 = vadd.f32 %v9535_v54, %v9534_v32  ;;  %v14713_v29 = vadd.f32 %v9623_v13, %v9622_v12  ;;  %v14724_v32 = vld [vmem:[%s16760_s1 + $0x168] ss:$12 sps:$4 sm:$0xff]  }
 0x2d7   :  { %v9537_v15 = vpop.f32.mrf.mxu0  ;;  %v9625_v44 = vpop.f32.mrf.mxu1 }
 0x2d8   :  { %v3142_v3 = vadd.f32 %v9536_v2, %v13016_v35  ;;  %v3344_v33 = vmax.f32 %v3298_v51, 0.0 }
 0x2d9   :  { %v9538_v14 = vpop.f32.mrf.mxu0  ;;  %v9626_v45 = vpop.f32.mrf.mxu1 }
 0x2da   :  { %v3303_v19 = vadd.f32 %v14538_v30, %v3142_v3  ;;  %v9539_v60 = vadd.f32 %v9538_v14, %v9537_v15  ;;  %v14717_v50 = vadd.f32 %v9626_v45, %v9625_v44  ;;  %v14719_v28 = vpack.c.bf16 %v3344_v33, %v3343_v58  ;;  %v11790_v30 = vld [vmem:[%s16760_s1 + $0x8] ss:$12 sps:$4 sm:$0xff]  }
 0x2db   :  { %v9540_v8 = vpop.f32.mrf.mxu0  ;;  %v9628_v1 = vpop.f32.mrf.mxu1  ;;  %4274 = vmatmul.mubr.bf16.gmra.mxu0 %v14724_v32  ;;  %4773 = vmatmul.mubr.bf16.gmra.mxu1 %v14521_v6  ;;  %v3601_v45 = vadd.f32 %v14593_v62, %v17134_v55  ;;  %v17170_v62 = vmov 0  }
 0x2dc   :  { %17165 = vst [vmem:[#allocation112_spill] sm:$0xff] %v14719_v28  ;;  %v3145_v11 = vadd.f32 %v9539_v60, %v13041_v0  ;;  %4780 = vmatprep.mubr.bf16.mxu1 %v14534_v34  ;;  %11079 = vmatprep.mubr.bf16.mxu0 %v11790_v30  ;;  %v3345_v44 = vmax.f32 %v3303_v19, 0.0  ;;  %v11791_v19 = vld [vmem:[%s16760_s1 + $0x20] ss:$12 sps:$4 sm:$0xff]   ;;  %v17175_v28 = vld [vmem:[#allocation4_spill] sm:$0xff] }
 0x2dd   :  { %v9541_v12 = vpop.f32.mrf.mxu0  ;;  %v9629_v40 = vpop.f32.mrf.mxu1  ;;  %v17168_v30 = vld [vmem:[#allocation102_spill] sm:$0xff] }
 0x2de   :  { %v3306_v54 = vadd.f32 %v14544_v46, %v3145_v11  ;;  %v9542_v13 = vadd.f32 %v9541_v12, %v9540_v8  ;;  %v14734_v51 = vadd.f32 %v9629_v40, %v9628_v1  ;;  %v17167_v1 = vld [vmem:[#allocation2_spill] sm:$0xff] }
 0x2df   :  { %v9543_v2 = vpop.f32.mrf.mxu0  ;;  %v9631_v15 = vpop.f32.mrf.mxu1  ;;  %v3593_v11 = vadd.f32 %v14567_v21, %v17167_v1  ;;  %v17169_v40 = vld [vmem:[#allocation38_spill] sm:$0xff] }
 0x2e0   :  { %v3150_v6 = vadd.f32 %v9542_v13, %v12986_v27  ;;  %v3346_v58 = vmax.f32 %v3306_v54, 0.0 }
 0x2e1   :  { %v9544_v3 = vpop.f32.mrf.mxu0  ;;  %v9632_v34 = vpop.f32.mrf.mxu1 }
 0x2e2   :  { %v9545_v33 = vadd.f32 %v9544_v3, %v9543_v2  ;;  %v14737_v14 = vadd.f32 %v9632_v34, %v9631_v15  ;;  %v14741_v60 = vpack.c.bf16 %v3346_v58, %v3345_v44  ;;  %v3311_v12 = vadd.f32 %v17168_v30, %v3150_v6  ;;  %v17171_v2 = vld [vmem:[#allocation106_spill] sm:$0xff]  ;;  %v17172_v58 = vld [vmem:[#allocation104_spill] sm:$0xff]  ;;  %v17173_v34 = vld [vmem:[#allocation5_spill] sm:$0xff] }
 0x2e3   :  { %v9634_v46 = vpop.f32.mrf.mxu1  ;;  %v10985_v8 = vpop.f32.mrf.mxu0  ;;  %4781 = vmatmul.mubr.bf16.gmra.mxu1 %v14552_v4  ;;  %11080 = vmatmul.mubr.bf16.vlgmr.msra.gmra.mxu0 %v11791_v19  ;;  %v11792_v4 = vld [vmem:[%s16760_s1 + $0x38] ss:$12 sps:$4 sm:$0xff]  }
 0x2e4   :  { %17166 = vst [vmem:[#allocation113_spill] sm:$0xff] %v14741_v60  ;;  %v3153_v54 = vadd.f32 %v9545_v33, %v17169_v40  ;;  %v3762_v13 = vadd.f32 %v10985_v8, %v3601_v45  ;;  %5206 = vmatpush1.bf16.msra.mxu0 %v17170_v62  ;;  %4788 = vmatprep.mubr.bf16.mxu1 %v17171_v2  ;;  %v3347_v19 = vmax.f32 %v3311_v12, 0.0  ;;  %v17174_v2 = vld [vmem:[#allocation55_spill] sm:$0xff] }
 0x2e5   :  { %v9635_v15 = vpop.f32.mrf.mxu1  ;;  %v3753_v44 = vpop.f32.mrf.mxu0  ;;  %5207 = vmatprep.subr.bf16.mxu0 %v17170_v62  ;;  %11083 = vmatprep.mubr.bf16.mxu0 %v11792_v4  ;;  %v3604_v33 = vadd.f32 %v14597_v47, %v17173_v34  ;;  %v3596_v60 = vadd.f32 %v14573_v18, %v17175_v28  ;;  %v11793_v18 = vld [vmem:[%s16760_s1 + $0x50] ss:$12 sps:$4 sm:$0xff]  }
 0x2e6   :  { %v3314_v21 = vadd.f32 %v17172_v58, %v3153_v54  ;;  %v14758_v3 = vadd.f32 %v9635_v15, %v9634_v46  ;;  %v3754_v6 = vadd.f32 %v3753_v44, %v3593_v11  ;;  %v3882_v1 = vmax.f32 %v3762_v13, 0.0  ;;  %v17176_v46 = vld [vmem:[#allocation6_spill] sm:$0xff]  ;;  %v17178_v13 = vld [vmem:[#allocation9_spill] sm:$0xff] }
 0x2e7   :  { %v9637_v45 = vpop.f32.mrf.mxu1  ;;  %v10986_v8 = vpop.f32.mrf.mxu0  ;;  %v3617_v11 = vadd.f32 %v14641_v49, %v17176_v46 }
 0x2e8   :  { %v3765_v30 = vadd.f32 %v10986_v8, %v3604_v33  ;;  %5208 = vmatpush2.bf16.msra.mxu0 %v17174_v2  ;;  %v3348_v55 = vmax.f32 %v3314_v21, 0.0  ;;  %v3609_v21 = vadd.f32 %v14617_v63, %v17178_v13  ;;  %v3880_v33 = vmax.f32 %v3754_v6, 0.0  ;;  %v17182_v6 = vld [vmem:[#allocation7_spill] sm:$0xff] }
 0x2e9   :  { %v9638_v4 = vpop.f32.mrf.mxu1  ;;  %v3756_v40 = vpop.f32.mrf.mxu0  ;;  %5209 = vmatprep.subr.bf16.mxu0 %v17170_v62 }
 0x2ea   :  { %v3883_v54 = vmax.f32 %v3765_v30, 0.0  ;;  %v14768_v47 = vadd.f32 %v9638_v4, %v9637_v45  ;;  %v3757_v15 = vadd.f32 %v3756_v40, %v3596_v60  ;;  %v14770_v12 = vpack.c.bf16 %v3348_v55, %v3347_v19  ;;  %v17180_v60 = vld [vmem:[#allocation56_spill] sm:$0xff] }
 0x2eb   :  { %v9640_v44 = vpop.f32.mrf.mxu1  ;;  %v10989_v58 = vpop.f32.mrf.mxu0  ;;  %4789 = vmatmul.mubr.bf16.gmra.mxu1 %v14580_v22  ;;  %11084 = vmatmul.mubr.bf16.gmra.mxu0 %v11793_v18  ;;  %v11794_v22 = vld [vmem:[%s16760_s1 + $0x68] ss:$12 sps:$4 sm:$0xff]   ;;  %v3620_v30 = vadd.f32 %v14645_v36, %v17182_v6 }
 0x2ec   :  { %17177 = vst [vmem:[#allocation102_spill] sm:$0xff] %v14770_v12  ;;  %v14778_v49 = vpack.c.bf16 %v3883_v54, %v3882_v1  ;;  %v3881_v45 = vmax.f32 %v3757_v15, 0.0  ;;  %v3778_v8 = vadd.f32 %v10989_v58, %v3617_v11  ;;  %5210 = vmatpush2.bf16.msra.mxu0 %v17180_v60  ;;  %4796 = vmatprep.mubr.bf16.mxu1 %v14588_v9  ;;  %v17183_v54 = vld [vmem:[#allocation10_spill] sm:$0xff] }
 0x2ed   :  { %v9641_v55 = vpop.f32.mrf.mxu1  ;;  %v3769_v40 = vpop.f32.mrf.mxu0  ;;  %5211 = vmatprep.subr.bf16.mxu0 %v17170_v62  ;;  %11087 = vmatprep.mubr.bf16.mxu0 %v11794_v22  ;;  %v3612_v15 = vadd.f32 %v14621_v59, %v17183_v54  ;;  %v11795_v59 = vld [vmem:[%s16760_s1 + $0x80] ss:$12 sps:$4 sm:$0xff]  }
 0x2ee   :  { %17179 = vst [vmem:[#allocation106_spill] sm:$0xff] %v14778_v49  ;;  %v14786_v19 = vpack.c.bf16 %v3881_v45, %v3880_v33  ;;  %v14788_v63 = vadd.f32 %v9641_v55, %v9640_v44  ;;  %v3770_v1 = vadd.f32 %v3769_v40, %v3609_v21  ;;  %v17184_v33 = vld [vmem:[#allocation12_spill] sm:$0xff]  ;;  %v3886_v45 = vmax.f32 %v3778_v8, 0.0 }
 0x2ef   :  { %v9643_v4 = vpop.f32.mrf.mxu1  ;;  %v10990_v11 = vpop.f32.mrf.mxu0  ;;  %v3633_v44 = vadd.f32 %v14689_v61, %v17184_v33 }
 0x2f0   :  { %17181 = vst [vmem:[#allocation104_spill] sm:$0xff] %v14786_v19  ;;  %v3781_v9 = vadd.f32 %v10990_v11, %v3620_v30  ;;  %5212 = vmatpush2.bf16.msra.mxu0 %v17170_v62  ;;  %v17185_v30 = vld [vmem:[#allocation15_spill] sm:$0xff]  ;;  %v3884_v12 = vmax.f32 %v3770_v1, 0.0 }
 0x2f1   :  { %v9644_v58 = vpop.f32.mrf.mxu1  ;;  %v3772_v18 = vpop.f32.mrf.mxu0  ;;  %5213 = vmatprep.subr.bf16.mxu0 %v17170_v62  ;;  %v3625_v11 = vadd.f32 %v14665_v42, %v17185_v30 }
 0x2f2   :  { %v3887_v21 = vmax.f32 %v3781_v9, 0.0  ;;  %v14798_v55 = vadd.f32 %v9644_v58, %v9643_v4  ;;  %v3773_v36 = vadd.f32 %v3772_v18, %v3612_v15  ;;  %v17188_v58 = vld [vmem:[#allocation13_spill] sm:$0xff] }
 0x2f3   :  { %v9646_v40 = vpop.f32.mrf.mxu1  ;;  %v10993_v22 = vpop.f32.mrf.mxu0  ;;  %4797 = vmatmul.mubr.bf16.gmra.mxu1 %v14604_v39  ;;  %11088 = vmatmul.mubr.bf16.gmra.mxu0 %v11795_v59  ;;  %v11796_v39 = vld [vmem:[%s16760_s1 + $0x98] ss:$12 sps:$4 sm:$0xff]   ;;  %v3636_v18 = vadd.f32 %v14693_v5, %v17188_v58 }
 0x2f4   :  { %v14806_v19 = vpack.c.bf16 %v3887_v21, %v3886_v45  ;;  %v3885_v61 = vmax.f32 %v3773_v36, 0.0  ;;  %v3794_v8 = vadd.f32 %v10993_v22, %v3633_v44  ;;  %5214 = vmatpush2.bf16.msra.mxu0 %v17170_v62  ;;  %4804 = vmatprep.mubr.bf16.mxu1 %v14612_v24  ;;  %v17189_v21 = vld [vmem:[#allocation17_spill] sm:$0xff]  ;;  %v17190_v36 = vld [vmem:[#allocation16_spill] sm:$0xff] }
 0x2f5   :  { %v9647_v4 = vpop.f32.mrf.mxu1  ;;  %v3785_v9 = vpop.f32.mrf.mxu0  ;;  %5215 = vmatprep.subr.bf16.mxu0 %v17170_v62  ;;  %11091 = vmatprep.mubr.bf16.mxu0 %v11796_v39  ;;  %v3628_v22 = vadd.f32 %v14669_v41, %v17190_v36  ;;  %v11797_v41 = vld [vmem:[%s16760_s1 + $0xb0] ss:$12 sps:$4 sm:$0xff]  }
 0x2f6   :  { %17186 = vst [vmem:[#allocation55_spill] sm:$0xff] %v14806_v19  ;;  %v14814_v15 = vpack.c.bf16 %v3885_v61, %v3884_v12  ;;  %v14816_v42 = vadd.f32 %v9647_v4, %v9646_v40  ;;  %v3786_v1 = vadd.f32 %v3785_v9, %v3625_v11  ;;  %v17191_v12 = vld [vmem:[#allocation18_spill] sm:$0xff]  ;;  %v3890_v61 = vmax.f32 %v3794_v8, 0.0 }
 0x2f7   :  { %v9649_v44 = vpop.f32.mrf.mxu1  ;;  %v10994_v45 = vpop.f32.mrf.mxu0  ;;  %v3649_v40 = vadd.f32 %v14734_v51, %v17191_v12 }
 0x2f8   :  { %17187 = vst [vmem:[#allocation12_spill] sm:$0xff] %v14814_v15  ;;  %v3797_v24 = vadd.f32 %v10994_v45, %v3636_v18  ;;  %5216 = vmatpush2.bf16.msra.mxu0 %v17189_v21  ;;  %v17192_v18 = vld [vmem:[#allocation21_spill] sm:$0xff]  ;;  %v3888_v15 = vmax.f32 %v3786_v1, 0.0  ;;  %v17195_v1 = vld [vmem:[#allocation19_spill] sm:$0xff] }
 0x2f9   :  { %v9650_v59 = vpop.f32.mrf.mxu1  ;;  %v3788_v49 = vpop.f32.mrf.mxu0  ;;  %5217 = vmatprep.subr.bf16.mxu0 %v17170_v62  ;;  %v3641_v45 = vadd.f32 %v14713_v29, %v17192_v18 }
 0x2fa   :  { %v3891_v11 = vmax.f32 %v3797_v24, 0.0  ;;  %v14826_v4 = vadd.f32 %v9650_v59, %v9649_v44  ;;  %v3789_v5 = vadd.f32 %v3788_v49, %v3628_v22  ;;  %v17194_v44 = vld [vmem:[#allocation14_spill] sm:$0xff]  ;;  %v3652_v59 = vadd.f32 %v14737_v14, %v17195_v1 }
 0x2fb   :  { %v9652_v9 = vpop.f32.mrf.mxu1  ;;  %v10997_v39 = vpop.f32.mrf.mxu0  ;;  %4805 = vmatmul.mubr.bf16.gmra.mxu1 %v14628_v52  ;;  %11092 = vmatmul.mubr.bf16.gmra.mxu0 %v11797_v41  ;;  %v11798_v52 = vld [vmem:[%s16760_s1 + $0xc8] ss:$12 sps:$4 sm:$0xff]  }
 0x2fc   :  { %v14834_v19 = vpack.c.bf16 %v3891_v11, %v3890_v61  ;;  %v3889_v51 = vmax.f32 %v3789_v5, 0.0  ;;  %v3810_v8 = vadd.f32 %v10997_v39, %v3649_v40  ;;  %5218 = vmatpush2.bf16.msra.mxu0 %v17194_v44  ;;  %4812 = vmatprep.mubr.bf16.mxu1 %v14636_v31  ;;  %v17197_v31 = vld [vmem:[#allocation11_spill] sm:$0xff]  ;;  %v17198_v39 = vld [vmem:[#allocation22_spill] sm:$0xff] }
 0x2fd   :  { %v9653_v49 = vpop.f32.mrf.mxu1  ;;  %v3801_v24 = vpop.f32.mrf.mxu0  ;;  %5219 = vmatprep.subr.bf16.mxu0 %v17170_v62  ;;  %11095 = vmatprep.mubr.bf16.mxu0 %v11798_v52  ;;  %v3644_v41 = vadd.f32 %v14717_v50, %v17198_v39  ;;  %v11799_v52 = vld [vmem:[%s16760_s1 + $0xe0] ss:$12 sps:$4 sm:$0xff]   ;;  %v3657_v50 = vadd.f32 %v14758_v3, %v17154_v53 }
 0x2fe   :  { %17193 = vst [vmem:[#allocation13_spill] sm:$0xff] %v14834_v19  ;;  %v9654_v22 = vadd.f32 %v9653_v49, %v9652_v9  ;;  %v3802_v29 = vadd.f32 %v3801_v24, %v3641_v45  ;;  %v14844_v61 = vpack.c.bf16 %v3889_v51, %v3888_v15  ;;  %v3665_v9 = vadd.f32 %v14788_v63, %v17157_v16 }
 0x2ff   :  { %v9655_v40 = vpop.f32.mrf.mxu1  ;;  %v10998_v11 = vpop.f32.mrf.mxu0  ;;  %v3894_v45 = vmax.f32 %v3810_v8, 0.0 }
 0x300   :  { %17196 = vst [vmem:[#allocation17_spill] sm:$0xff] %v14844_v61  ;;  %v3813_v5 = vadd.f32 %v10998_v11, %v3652_v59  ;;  %5220 = vmatpush2.bf16.msra.mxu0 %v17197_v31  ;;  %v3892_v59 = vmax.f32 %v3802_v29, 0.0 }
 0x301   :  { %v9656_v19 = vpop.f32.mrf.mxu1  ;;  %v3804_v60 = vpop.f32.mrf.mxu0  ;;  %5221 = vmatprep.subr.bf16.mxu0 %v17170_v62 }
 0x302   :  { %v3895_v49 = vmax.f32 %v3813_v5, 0.0  ;;  %v9657_v14 = vadd.f32 %v9656_v19, %v9655_v40  ;;  %v3805_v15 = vadd.f32 %v3804_v60, %v3644_v41  ;;  %v17200_v5 = vld [vmem:[#allocation8_spill] sm:$0xff]  ;;  %v17201_v60 = vld [vmem:[#allocation41_spill] sm:$0xff]  ;;  %v17203_v41 = vld [vmem:[#allocation26_spill] sm:$0xff] }
 0x303   :  { %v9658_v51 = vpop.f32.mrf.mxu1  ;;  %v11001_v24 = vpop.f32.mrf.mxu0  ;;  %4813 = vmatmul.mubr.bf16.gmra.mxu1 %v14652_v17  ;;  %11096 = vmatmul.mubr.bf16.gmra.mxu0 %v11799_v52  ;;  %v11800_v40 = vld [vmem:[%s16760_s1 + $0xf8] ss:$12 sps:$4 sm:$0xff]  }
 0x304   :  { %v14858_v11 = vpack.c.bf16 %v3895_v49, %v3894_v45  ;;  %v3893_v63 = vmax.f32 %v3805_v15, 0.0  ;;  %v3826_v8 = vadd.f32 %v11001_v24, %v3665_v9  ;;  %5222 = vmatpush2.bf16.msra.mxu0 %v17200_v5  ;;  %4820 = vmatprep.mubr.bf16.mxu1 %v14660_v7  ;;  %v3668_v9 = vadd.f32 %v14798_v55, %v17203_v41  ;;  %v17204_v7 = vld [vmem:[#allocation29_spill] sm:$0xff] }
 0x305   :  { %9984 = vmatprep.subr.bf16.mxu0 %v17201_v60  ;;  %v9659_v17 = vpop.f32.mrf.mxu1  ;;  %v3817_v19 = vpop.f32.mrf.mxu0  ;;  %11099 = vmatprep.mubr.bf16.mxu0 %v11800_v40  ;;  %v3660_v24 = vadd.f32 %v14768_v47, %v17204_v7  ;;  %v11801_v55 = vld [vmem:[%s16760_s1 + $0x110] ss:$12 sps:$4 sm:$0xff]   ;;  %v3673_v47 = vadd.f32 %v14816_v42, %v17121_v37 }
 0x306   :  { %17199 = vst [vmem:[#allocation18_spill] sm:$0xff] %v14858_v11  ;;  %v14866_v31 = vpack.c.bf16 %v3893_v63, %v3892_v59  ;;  %v9660_v3 = vadd.f32 %v9659_v17, %v9658_v51  ;;  %v3818_v29 = vadd.f32 %v3817_v19, %v3657_v50  ;;  %v3681_v11 = vadd.f32 %v9654_v22, %v17051_v56  ;;  %v11802_v19 = vld [vmem:[%s16760_s1 + $0x128] ss:$12 sps:$4 sm:$0xff]  }
 0x307   :  { %v9661_v45 = vpop.f32.mrf.mxu1  ;;  %v11002_v49 = vpop.f32.mrf.mxu0  ;;  %v3898_v61 = vmax.f32 %v3826_v8, 0.0 }
 0x308   :  { %17202 = vst [vmem:[#allocation21_spill] sm:$0xff] %v14866_v31  ;;  %v3829_v15 = vadd.f32 %v11002_v49, %v3668_v9  ;;  %v3896_v50 = vmax.f32 %v3818_v29, 0.0  ;;  %v17207_v29 = vld [vmem:[#allocation34_spill] sm:$0xff] }
 0x309   :  { %v9662_v52 = vpop.f32.mrf.mxu1  ;;  %v3820_v5 = vpop.f32.mrf.mxu0 }
 0x30a   :  { %v3899_v60 = vmax.f32 %v3829_v15, 0.0  ;;  %v9663_v40 = vadd.f32 %v9662_v52, %v9661_v45  ;;  %v3821_v59 = vadd.f32 %v3820_v5, %v3660_v24  ;;  %v3684_v15 = vadd.f32 %v9657_v14, %v17162_v57  ;;  %v11803_v14 = vld [vmem:[%s16760_s1 + $0x140] ss:$12 sps:$4 sm:$0xff]  }
 0x30b   :  { %v9664_v63 = vpop.f32.mrf.mxu1  ;;  %v11005_v51 = vpop.f32.mrf.mxu0  ;;  %4821 = vmatmul.mubr.bf16.gmra.mxu1 %v14676_v26  ;;  %11100 = vmatmul.mubr.bf16.gmra.mxu0 %v11801_v55 }
 0x30c   :  { %v14879_v17 = vpack.c.bf16 %v3899_v60, %v3898_v61  ;;  %v3897_v22 = vmax.f32 %v3821_v59, 0.0  ;;  %v3842_v8 = vadd.f32 %v11005_v51, %v3681_v11  ;;  %4828 = vmatprep.mubr.bf16.mxu1 %v14684_v38  ;;  %11103 = vmatprep.mubr.bf16.mxu0 %v11802_v19  ;;  %v3676_v11 = vadd.f32 %v14826_v4, %v17207_v29 }
 0x30d   :  { %v9665_v26 = vpop.f32.mrf.mxu1  ;;  %v3833_v9 = vpop.f32.mrf.mxu0 }
 0x30e   :  { %17205 = vst [vmem:[#allocation14_spill] sm:$0xff] %v14879_v17  ;;  %v9666_v45 = vadd.f32 %v9665_v26, %v9664_v63  ;;  %v3834_v49 = vadd.f32 %v3833_v9, %v3673_v47  ;;  %v14886_v24 = vpack.c.bf16 %v3897_v22, %v3896_v50  ;;  %v3902_v38 = vmax.f32 %v3842_v8, 0.0  ;;  %v11804_v9 = vld [vmem:[%s16760_s1 + $0x158] ss:$12 sps:$4 sm:$0xff]  }
 0x30f   :  { %v9667_v42 = vpop.f32.mrf.mxu1  ;;  %v11006_v61 = vpop.f32.mrf.mxu0  ;;  %v3689_v50 = vadd.f32 %v9660_v3, %v13068_v10 }
 0x310   :  { %17206 = vst [vmem:[#allocation19_spill] sm:$0xff] %v14886_v24  ;;  %v3845_v60 = vadd.f32 %v11006_v61, %v3684_v15  ;;  %v3697_v19 = vadd.f32 %v9666_v45, %v13046_v23  ;;  %v3900_v4 = vmax.f32 %v3834_v49, 0.0 }
 0x311   :  { %v9668_v52 = vpop.f32.mrf.mxu1  ;;  %v3836_v5 = vpop.f32.mrf.mxu0 }
 0x312   :  { %v3903_v59 = vmax.f32 %v3845_v60, 0.0  ;;  %v9669_v51 = vadd.f32 %v9668_v52, %v9667_v42  ;;  %v3837_v55 = vadd.f32 %v3836_v5, %v3676_v11  ;;  %v14914_v52 = vld [vmem:[%s16766_s3 + $0x8] ss:$12 sps:$4 sm:$0xff]  }
 0x313   :  { %v9670_v63 = vpop.f32.mrf.mxu1  ;;  %v11009_v47 = vpop.f32.mrf.mxu0  ;;  %4829 = vmatmul.mubr.bf16.gmra.mxu1 %v14700_v20  ;;  %11104 = vmatmul.mubr.bf16.gmra.mxu0 %v11803_v14 }
 0x314   :  { %v14896_v22 = vpack.c.bf16 %v3903_v59, %v3902_v38  ;;  %v3901_v8 = vmax.f32 %v3837_v55, 0.0  ;;  %v3858_v26 = vadd.f32 %v11009_v47, %v3697_v19  ;;  %4836 = vmatprep.mubr.bf16.mxu1 %v14708_v25  ;;  %11107 = vmatprep.mubr.bf16.mxu0 %v11804_v9  ;;  %v3700_v3 = vadd.f32 %v9669_v51, %v13056_v48  ;;  %v14909_v25 = vld [vmem:[%s16766_s3 + $0x4] ss:$12 sps:$4 sm:$0xff]  }
 0x315   :  { %v9671_v20 = vpop.f32.mrf.mxu1  ;;  %v3849_v45 = vpop.f32.mrf.mxu0  ;;  %v3692_v38 = vadd.f32 %v9663_v40, %v17059_v43  ;;  %v17210_v40 = vld [vmem:[#allocation103_spill] sm:$0xff] }
 0x316   :  { %17208 = vst [vmem:[#allocation11_spill] sm:$0xff] %v14896_v22  ;;  %v14902_v15 = vpack.c.bf16 %v3901_v8, %v3900_v4  ;;  %v9672_v42 = vadd.f32 %v9671_v20, %v9670_v63  ;;  %v3850_v61 = vadd.f32 %v3849_v45, %v3689_v50  ;;  %v3906_v55 = vmax.f32 %v3858_v26, 0.0  ;;  %v17222_v22 = vld [vmem:[#allocation37_spill] sm:$0xff] }
 0x317   :  { %v9673_v49 = vpop.f32.mrf.mxu1  ;;  %v11010_v60 = vpop.f32.mrf.mxu0 }
 0x318   :  { %17209 = vst [vmem:[#allocation8_spill] sm:$0xff] %v14902_v15  ;;  %v3861_v11 = vadd.f32 %v11010_v60, %v3700_v3  ;;  %v3904_v50 = vmax.f32 %v3850_v61, 0.0  ;;  %v3705_v9 = vadd.f32 %v9672_v42, %v13016_v35  ;;  %v14929_v61 = vld [vmem:[%s16766_s3] ss:$12 sps:$4 sm:$0xff]  }
 0x319   :  { %v9674_v5 = vpop.f32.mrf.mxu1  ;;  %v3852_v59 = vpop.f32.mrf.mxu0  ;;  %v14934_v42 = vld [vmem:[%s16766_s3 + $0x20] ss:$12 sps:$4 sm:$0xff]  }
 0x31a   :  { %v3907_v51 = vmax.f32 %v3861_v11, 0.0  ;;  %v9675_v19 = vadd.f32 %v9674_v5, %v9673_v49  ;;  %v3853_v63 = vadd.f32 %v3852_v59, %v3692_v38 }
 0x31b   :  { %v9676_v47 = vpop.f32.mrf.mxu1  ;;  %v11013_v14 = vpop.f32.mrf.mxu0  ;;  %4837 = vmatmul.mubr.bf16.gmra.mxu1 %v14724_v32  ;;  %11108 = vmatmul.mubr.bf16.gmra.mxu0 %v17210_v40  ;;  %v14946_v40 = vld [vmem:[%s16766_s3 + $0x38] ss:$12 sps:$4 sm:$0xff]  }
 0x31c   :  { %v14918_v4 = vpack.c.bf16 %v3907_v51, %v3906_v55  ;;  %v3905_v8 = vmax.f32 %v3853_v63, 0.0  ;;  %5223 = vmatprep.mubr.bf16.mxu0 %v14909_v25  ;;  %11115 = vmatprep.mubr.msk.bf16.mxu1 %vm5178_vm0, %v14914_v52  ;;  %v3708_v38 = vadd.f32 %v9675_v19, %v13041_v0 }
 0x31d   :  { %v9677_v26 = vpop.f32.mrf.mxu1  ;;  %v3865_v20 = vpop.f32.mrf.mxu0 }
 0x31e   :  { %17211 = vst [vmem:[#allocation26_spill] sm:$0xff] %v14918_v4  ;;  %v9678_v45 = vadd.f32 %v9677_v26, %v9676_v47  ;;  %v3866_v3 = vadd.f32 %v3865_v20, %v3705_v9  ;;  %v14924_v49 = vpack.c.bf16 %v3905_v8, %v3904_v50  ;;  %v14941_v47 = vld [vmem:[%s16766_s3 + $0x1c] ss:$12 sps:$4 sm:$0xff]   ;;  %v17214_v20 = vld [vmem:[#allocation58_spill] sm:$0xff] }
 0x31f   :  { %v9679_v32 = vpop.f32.mrf.mxu1  ;;  %v11014_v60 = vpop.f32.mrf.mxu0 }
 0x320   :  { %17212 = vst [vmem:[#allocation103_spill] sm:$0xff] %v14924_v49  ;;  %v3713_v11 = vadd.f32 %v9678_v45, %v12986_v27  ;;  %v3908_v19 = vmax.f32 %v3866_v3, 0.0  ;;  %v17215_v45 = vld [vmem:[#allocation42_spill] sm:$0xff]  ;;  %v14969_v49 = vld [vmem:[%s16766_s3 + $0x50] ss:$12 sps:$4 sm:$0xff]  }
 0x321   :  { %v9680_v5 = vpop.f32.mrf.mxu1  ;;  %v3868_v59 = vpop.f32.mrf.mxu0 }
 0x322   :  { %v3874_v55 = vadd.f32 %v11013_v14, %v3713_v11  ;;  %v9681_v51 = vadd.f32 %v9680_v5, %v9679_v32  ;;  %v3869_v63 = vadd.f32 %v3868_v59, %v3708_v38  ;;  %v17213_v14 = vld [vmem:[#allocation38_spill] sm:$0xff]  ;;  %v17216_v32 = vld [vmem:[#allocation48_spill] sm:$0xff] }
 0x323   :  { %v9722_v50 = vpop.f32.mrf.mxu0  ;;  %v11033_v8 = vpop.f32.mrf.mxu1  ;;  %5224 = vmatmul.mubr.bf16.vlgmr.msra.gmra.mxu0 %v14929_v61  ;;  %11116 = vmatmul.mubr.msk.bf16.vlgmr.msra.gmra.mxu1 %vm5178_vm0, %v14934_v42 }
 0x324   :  { %v3716_v9 = vadd.f32 %v9681_v51, %v17213_v14  ;;  %v3909_v26 = vmax.f32 %v3869_v63, 0.0  ;;  %9985 = vmatpush3.bf16.msra.mxu0 %v17189_v21  ;;  %11124 = vmatpush3.bf16.msra.mxu1 %v17214_v20  ;;  %v14964_v21 = vld [vmem:[%s16766_s3 + $0x18] ss:$12 sps:$4 sm:$0xff]  }
 0x325   :  { %9986 = vmatprep.subr.bf16.mxu0 %v17215_v45  ;;  %11125 = vmatprep.subr.bf16.mxu1 %v17216_v32  ;;  %v9723_v11 = vpop.f32.mrf.mxu0  ;;  %v4316_v38 = vpop.f32.mrf.mxu1  ;;  %v17224_v45 = vld [vmem:[#allocation32_spill] sm:$0xff] }
 0x326   :  { %v3877_v5 = vadd.f32 %v11014_v60, %v3716_v9  ;;  %v9724_v59 = vadd.f32 %v9723_v11, %v9722_v50  ;;  %5231 = vmatprep.mubr.bf16.mxu0 %v14941_v47  ;;  %11119 = vmatprep.mubr.msk.bf16.mxu1 %vm5178_vm0, %v14946_v40  ;;  %v14959_v3 = vpack.c.bf16 %v3909_v26, %v3908_v19  ;;  %v3910_v60 = vmax.f32 %v3874_v55, 0.0  ;;  %v17218_v50 = vld [vmem:[#allocation2_spill] sm:$0xff]  ;;  %v17219_v11 = vld [vmem:[#allocation57_spill] sm:$0xff] }
 0x327   :  { %v9725_v51 = vpop.f32.mrf.mxu0  ;;  %v11034_v63 = vpop.f32.mrf.mxu1  ;;  %v14977_v19 = vld [vmem:[%s16766_s3 + $0x34] ss:$12 sps:$4 sm:$0xff]  }
 0x328   :  { %17217 = vst [vmem:[#allocation114_spill] sm:$0xff] %v14959_v3  ;;  %v4156_v9 = vadd.f32 %v9724_v59, %v17218_v50  ;;  %9987 = vmatpush3.bf16.msra.mxu0 %v17194_v44  ;;  %11126 = vmatpush3.bf16.msra.mxu1 %v17216_v32  ;;  %v3911_v26 = vmax.f32 %v3877_v5, 0.0  ;;  %v17220_v3 = vld [vmem:[#allocation30_spill] sm:$0xff] }
 0x329   :  { %9988 = vmatprep.subr.bf16.mxu0 %v17219_v11  ;;  %10030 = vmatprep.subr.bf16.mxu1 %v17220_v3  ;;  %v9726_v4 = vpop.f32.mrf.mxu0  ;;  %v4319_v15 = vpop.f32.mrf.mxu1  ;;  %v17223_v3 = vld [vmem:[#allocation3_spill] sm:$0xff] }
 0x32a   :  { %v4317_v24 = vadd.f32 %v4316_v38, %v4156_v9  ;;  %v9727_v55 = vadd.f32 %v9726_v4, %v9725_v51  ;;  %v14981_v17 = vpack.c.bf16 %v3911_v26, %v3910_v60 }
 0x32b   :  { %v9728_v59 = vpop.f32.mrf.mxu0  ;;  %v14983_v44 = vpop.f32.mrf.mxu1  ;;  %5232 = vmatmul.mubr.bf16.gmra.mxu0 %v14964_v21  ;;  %11120 = vmatmul.mubr.msk.bf16.gmra.mxu1 %vm5178_vm0, %v14969_v49 }
 0x32c   :  { %17221 = vst [vmem:[#allocation57_spill] sm:$0xff] %v14981_v17  ;;  %v4159_v5 = vadd.f32 %v9727_v55, %v17175_v28  ;;  %9989 = vmatpush3.bf16.msra.mxu0 %v17170_v62  ;;  %5239 = vmatprep.mubr.bf16.mxu0 %v14977_v19  ;;  %v14999_v55 = vld [vmem:[%s16766_s3 + $0x30] ss:$12 sps:$4 sm:$0xff]   ;;  %v4443_v17 = vmax.f32 %v4317_v24, 0.0 }
 0x32d   :  { %9990 = vmatprep.subr.bf16.mxu0 %v17222_v22  ;;  %v9729_v38 = vpop.f32.mrf.mxu0  ;;  %v4332_v4 = vpop.f32.mrf.mxu1  ;;  %11127 = vmatprep.mubr.msk.bf16.mxu1 %vm5178_vm0, %v14914_v52 }
 0x32e   :  { %v4320_v51 = vadd.f32 %v4319_v15, %v4159_v5  ;;  %v9730_v60 = vadd.f32 %v9729_v38, %v9728_v59  ;;  %v15009_v38 = vld [vmem:[%s16766_s3 + $0x4c] ss:$12 sps:$4 sm:$0xff]  }
 0x32f   :  { %v9731_v9 = vpop.f32.mrf.mxu0  ;;  %v14994_v26 = vpop.f32.mrf.mxu1 }
 0x330   :  { %v4444_v31 = vmax.f32 %v4320_v51, 0.0  ;;  %v4164_v28 = vadd.f32 %v9730_v60, %v17223_v3  ;;  %9991 = vmatpush3.bf16.msra.mxu0 %v17170_v62 }
 0x331   :  { %9992 = vmatprep.subr.bf16.mxu0 %v17224_v45  ;;  %v9732_v14 = vpop.f32.mrf.mxu0  ;;  %v4335_v50 = vpop.f32.mrf.mxu1 }
 0x332   :  { %v15004_v15 = vpack.c.bf16 %v4444_v31, %v4443_v17  ;;  %v4325_v59 = vadd.f32 %v11033_v8, %v4164_v28  ;;  %v9733_v5 = vadd.f32 %v9732_v14, %v9731_v9  ;;  %v17226_v28 = vld [vmem:[#allocation28_spill] sm:$0xff]  ;;  %v17227_v31 = vld [vmem:[#allocation59_spill] sm:$0xff] }
 0x333   :  { %v9734_v27 = vpop.f32.mrf.mxu0  ;;  %v15011_v24 = vpop.f32.mrf.mxu1  ;;  %5240 = vmatmul.mubr.bf16.gmra.mxu0 %v14999_v55  ;;  %11128 = vmatmul.mubr.msk.bf16.vlgmr.msra.gmra.mxu1 %vm5178_vm0, %v14934_v42 }
 0x334   :  { %17225 = vst [vmem:[#allocation37_spill] sm:$0xff] %v15004_v15  ;;  %v4167_v51 = vadd.f32 %v9733_v5, %v17173_v34  ;;  %9993 = vmatpush3.bf16.msra.mxu0 %v17170_v62  ;;  %10031 = vmatpush3.bf16.msra.mxu1 %v17224_v45  ;;  %v15031_v45 = vld [vmem:[%s16766_s3 + $0x48] ss:$12 sps:$4 sm:$0xff]   ;;  %v4445_v15 = vmax.f32 %v4325_v59, 0.0 }
 0x335   :  { %9994 = vmatprep.subr.bf16.mxu0 %v17226_v28  ;;  %10032 = vmatprep.subr.bf16.mxu1 %v17227_v31  ;;  %v9735_v17 = vpop.f32.mrf.mxu0  ;;  %v15021_v8 = vpop.f32.mrf.mxu1 }
 0x336   :  { %v4328_v14 = vadd.f32 %v11034_v63, %v4167_v51  ;;  %v9736_v60 = vadd.f32 %v9735_v17, %v9734_v27  ;;  %5247 = vmatprep.mubr.bf16.mxu0 %v15009_v38  ;;  %11131 = vmatprep.mubr.msk.bf16.mxu1 %vm5178_vm0, %v14946_v40  ;;  %v17228_v27 = vld [vmem:[#allocation23_spill] sm:$0xff] }
 0x337   :  { %v9737_v9 = vpop.f32.mrf.mxu0  ;;  %v15026_v5 = vpop.f32.mrf.mxu1 }
 0x338   :  { %v4446_v31 = vmax.f32 %v4328_v14, 0.0  ;;  %v4172_v34 = vadd.f32 %v9736_v60, %v17178_v13  ;;  %9995 = vmatpush3.bf16.msra.mxu0 %v17170_v62  ;;  %10033 = vmatpush3.bf16.msra.mxu1 %v17226_v28  ;;  %v17230_v14 = vld [vmem:[#allocation20_spill] sm:$0xff]  ;;  %v17234_v13 = vld [vmem:[#allocation46_spill] sm:$0xff] }
 0x339   :  { %9996 = vmatprep.subr.bf16.mxu0 %v17228_v27  ;;  %10034 = vmatprep.subr.bf16.mxu1 %v17214_v20  ;;  %v9738_v63 = vpop.f32.mrf.mxu0  ;;  %v15038_v51 = vpop.f32.mrf.mxu1  ;;  %v17237_v20 = vld [vmem:[#allocation64_spill] sm:$0xff] }
 0x33a   :  { %v4333_v17 = vadd.f32 %v4332_v4, %v4172_v34  ;;  %v9739_v3 = vadd.f32 %v9738_v63, %v9737_v9  ;;  %v15040_v0 = vpack.c.bf16 %v4446_v31, %v4445_v15 }
 0x33b   :  { %v9740_v35 = vpop.f32.mrf.mxu0  ;;  %v15042_v59 = vpop.f32.mrf.mxu1  ;;  %5248 = vmatmul.mubr.bf16.gmra.mxu0 %v15031_v45  ;;  %11132 = vmatmul.mubr.msk.bf16.gmra.mxu1 %vm5178_vm0, %v14969_v49 }
 0x33c   :  { %17229 = vst [vmem:[#allocation32_spill] sm:$0xff] %v15040_v0  ;;  %v4175_v28 = vadd.f32 %v9739_v3, %v17183_v54  ;;  %9997 = vmatpush3.bf16.msra.mxu0 %v17170_v62  ;;  %10035 = vmatpush3.bf16.msra.mxu1 %v17170_v62  ;;  %v4447_v3 = vmax.f32 %v4333_v17, 0.0  ;;  %v17232_v0 = vld [vmem:[#allocation60_spill] sm:$0xff] }
 0x33d   :  { %9998 = vmatprep.subr.bf16.mxu0 %v17230_v14  ;;  %10036 = vmatprep.subr.bf16.mxu1 %v17216_v32  ;;  %v9741_v34 = vpop.f32.mrf.mxu0  ;;  %v15052_v4 = vpop.f32.mrf.mxu1  ;;  %v17231_v14 = vld [vmem:[#allocation50_spill] sm:$0xff] }
 0x33e   :  { %v4336_v15 = vadd.f32 %v4335_v50, %v4175_v28  ;;  %v9742_v31 = vadd.f32 %v9741_v34, %v9740_v35  ;;  %5365 = vmatprep.mubr.bf16.mxu0 %v14909_v25  ;;  %5507 = vmatprep.mubr.bf16.mxu1 %v14909_v25 }
 0x33f   :  { %v9743_v60 = vpop.f32.mrf.mxu0  ;;  %v15056_v9 = vpop.f32.mrf.mxu1 }
 0x340   :  { %v4448_v27 = vmax.f32 %v4336_v15, 0.0  ;;  %v4180_v63 = vadd.f32 %v9742_v31, %v17176_v46  ;;  %9999 = vmatpush3.bf16.msra.mxu0 %v17170_v62  ;;  %10037 = vmatpush3.bf16.msra.mxu1 %v17170_v62  ;;  %v17235_v46 = vld [vmem:[#allocation61_spill] sm:$0xff] }
 0x341   :  { %10038 = vmatprep.subr.bf16.mxu1 %v17231_v14  ;;  %11135 = vmatprep.subr.bf16.mxu0 %v17232_v0  ;;  %v9744_v35 = vpop.f32.mrf.mxu0  ;;  %v15063_v50 = vpop.f32.mrf.mxu1 }
 0x342   :  { %v4341_v28 = vadd.f32 %v14983_v44, %v4180_v63  ;;  %v9745_v34 = vadd.f32 %v9744_v35, %v9743_v60  ;;  %v15066_v54 = vpack.c.bf16 %v4448_v27, %v4447_v3 }
 0x343   :  { %v9746_v17 = vpop.f32.mrf.mxu0  ;;  %v15068_v15 = vpop.f32.mrf.mxu1  ;;  %5366 = vmatmul.mubr.bf16.vlgmr.msra.gmra.mxu0 %v14929_v61 }
 0x344   :  { %17233 = vst [vmem:[#allocation28_spill] sm:$0xff] %v15066_v54  ;;  %v4183_v31 = vadd.f32 %v9745_v34, %v17182_v6  ;;  %10039 = vmatpush3.bf16.msra.mxu1 %v17170_v62  ;;  %11136 = vmatpush3.bf16.msra.mxu0 %v17232_v0  ;;  %v4449_v35 = vmax.f32 %v4341_v28, 0.0  ;;  %v17236_v6 = vld [vmem:[#allocation40_spill] sm:$0xff] }
 0x345   :  { %10040 = vmatprep.subr.bf16.mxu1 %v17234_v13  ;;  %11137 = vmatprep.subr.bf16.mxu0 %v17235_v46  ;;  %v9747_v32 = vpop.f32.mrf.mxu0  ;;  %v15076_v44 = vpop.f32.mrf.mxu1 }
 0x346   :  { %v4344_v60 = vadd.f32 %v14994_v26, %v4183_v31  ;;  %v9748_v3 = vadd.f32 %v9747_v32, %v9746_v17  ;;  %5373 = vmatprep.mubr.bf16.mxu0 %v14941_v47 }
 0x347   :  { %v9749_v27 = vpop.f32.mrf.mxu0  ;;  %v15080_v63 = vpop.f32.mrf.mxu1 }
 0x348   :  { %v4450_v34 = vmax.f32 %v4344_v60, 0.0  ;;  %v4188_v54 = vadd.f32 %v9748_v3, %v17185_v30  ;;  %10041 = vmatpush3.bf16.msra.mxu1 %v17170_v62  ;;  %11138 = vmatpush3.bf16.msra.mxu0 %v17235_v46 }
 0x349   :  { %10042 = vmatprep.subr.bf16.mxu1 %v17236_v6  ;;  %11147 = vmatprep.subr.bf16.mxu0 %v17237_v20  ;;  %v9750_v48 = vpop.f32.mrf.mxu0  ;;  %v15087_v26 = vpop.f32.mrf.mxu1  ;;  %v17239_v6 = vld [vmem:[#allocation36_spill] sm:$0xff] }
 0x34a   :  { %v4349_v32 = vadd.f32 %v15021_v8, %v4188_v54  ;;  %v9751_v17 = vadd.f32 %v9750_v48, %v9749_v27  ;;  %v15090_v31 = vpack.c.bf16 %v4450_v34, %v4449_v35 }
 0x34b   :  { %v9752_v28 = vpop.f32.mrf.mxu0  ;;  %v15092_v60 = vpop.f32.mrf.mxu1  ;;  %5374 = vmatmul.mubr.bf16.gmra.mxu0 %v14964_v21 }
 0x34c   :  { %17238 = vst [vmem:[#allocation23_spill] sm:$0xff] %v15090_v31  ;;  %v4191_v3 = vadd.f32 %v9751_v17, %v17190_v36  ;;  %10043 = vmatpush3.bf16.msra.mxu1 %v17170_v62  ;;  %5381 = vmatprep.mubr.bf16.mxu0 %v14977_v19  ;;  %v4451_v35 = vmax.f32 %v4349_v32, 0.0  ;;  %v17240_v31 = vld [vmem:[#allocation24_spill] sm:$0xff] }
 0x34d   :  { %10044 = vmatprep.subr.bf16.mxu1 %v17239_v6  ;;  %v9753_v30 = vpop.f32.mrf.mxu0  ;;  %v15099_v23 = vpop.f32.mrf.mxu1 }
 0x34e   :  { %v4352_v48 = vadd.f32 %v15038_v51, %v4191_v3  ;;  %v9754_v54 = vadd.f32 %v9753_v30, %v9752_v28  ;;  %v17242_v28 = vld [vmem:[#allocation62_spill] sm:$0xff] }
 0x34f   :  { %v9755_v8 = vpop.f32.mrf.mxu0  ;;  %v15102_v27 = vpop.f32.mrf.mxu1 }
 0x350   :  { %v4196_v34 = vadd.f32 %v9754_v54, %v17184_v33  ;;  %10045 = vmatpush3.bf16.msra.mxu1 %v17170_v62  ;;  %v4452_v17 = vmax.f32 %v4352_v48, 0.0 }
 0x351   :  { %10076 = vmatprep.subr.bf16.mxu1 %v17240_v31  ;;  %v9756_v36 = vpop.f32.mrf.mxu0  ;;  %v15107_v43 = vpop.f32.mrf.mxu1 }
 0x352   :  { %v4357_v6 = vadd.f32 %v15011_v24, %v4196_v34  ;;  %v9757_v10 = vadd.f32 %v9756_v36, %v9755_v8  ;;  %v15110_v57 = vpack.c.bf16 %v4452_v17, %v4451_v35 }
 0x353   :  { %5508 = vmatmul.mubr.bf16.vlgmr.msra.gmra.mxu1 %v14929_v61  ;;  %v9758_v30 = vpop.f32.mrf.mxu0  ;;  %v15113_v51 = vpop.f32.mrf.mxu1  ;;  %5382 = vmatmul.mubr.bf16.gmra.mxu0 %v14999_v55 }
 0x354   :  { %17241 = vst [vmem:[#allocation20_spill] sm:$0xff] %v15110_v57  ;;  %v4199_v32 = vadd.f32 %v9757_v10, %v17188_v58  ;;  %10077 = vmatpush3.bf16.msra.mxu1 %v17231_v14  ;;  %5515 = vmatprep.mubr.bf16.mxu1 %v14941_v47  ;;  %v4453_v35 = vmax.f32 %v4357_v6, 0.0 }
 0x355   :  { %10078 = vmatprep.subr.bf16.mxu1 %v17242_v28  ;;  %v9759_v3 = vpop.f32.mrf.mxu0  ;;  %v15120_v24 = vpop.f32.mrf.mxu1  ;;  %5389 = vmatprep.mubr.bf16.mxu0 %v15009_v38 }
 0x356   :  { %v4360_v36 = vadd.f32 %v15026_v5, %v4199_v32  ;;  %v9760_v48 = vadd.f32 %v9759_v3, %v9758_v30 }
 0x357   :  { %v9761_v54 = vpop.f32.mrf.mxu0  ;;  %v15124_v8 = vpop.f32.mrf.mxu1 }
 0x358   :  { %v4204_v10 = vadd.f32 %v9760_v48, %v17192_v18  ;;  %10079 = vmatpush3.bf16.msra.mxu1 %v17234_v13  ;;  %v4454_v14 = vmax.f32 %v4360_v36, 0.0 }
 0x359   :  { %10080 = vmatprep.subr.bf16.mxu1 %v17232_v0  ;;  %v9762_v34 = vpop.f32.mrf.mxu0  ;;  %v15129_v17 = vpop.f32.mrf.mxu1 }
 0x35a   :  { %v4365_v57 = vadd.f32 %v15052_v4, %v4204_v10  ;;  %v9763_v28 = vadd.f32 %v9762_v34, %v9761_v54  ;;  %v15132_v31 = vpack.c.bf16 %v4454_v14, %v4453_v35  ;;  %v17244_v10 = vld [vmem:[#allocation54_spill] sm:$0xff] }
 0x35b   :  { %5516 = vmatmul.mubr.bf16.gmra.mxu1 %v14964_v21  ;;  %v9764_v5 = vpop.f32.mrf.mxu0  ;;  %v15135_v30 = vpop.f32.mrf.mxu1  ;;  %5390 = vmatmul.mubr.bf16.gmra.mxu0 %v15031_v45 }
 0x35c   :  { %17243 = vst [vmem:[#allocation50_spill] sm:$0xff] %v15132_v31  ;;  %v4207_v13 = vadd.f32 %v9763_v28, %v17198_v39  ;;  %10081 = vmatpush3.bf16.msra.mxu1 %v17170_v62  ;;  %5523 = vmatprep.mubr.bf16.mxu1 %v14977_v19  ;;  %v4455_v54 = vmax.f32 %v4365_v57, 0.0 }
 0x35d   :  { %10082 = vmatprep.subr.bf16.mxu1 %v17235_v46  ;;  %v9765_v6 = vpop.f32.mrf.mxu0  ;;  %v15142_v4 = vpop.f32.mrf.mxu1  ;;  %11139 = vmatprep.mubr.msk.bf16.mxu0 %vm5178_vm0, %v14914_v52 }
 0x35e   :  { %v4368_v32 = vadd.f32 %v15063_v50, %v4207_v13  ;;  %v9766_v3 = vadd.f32 %v9765_v6, %v9764_v5  ;;  %v17246_v13 = vld [vmem:[#allocation53_spill] sm:$0xff]  ;;  %v17247_v6 = vld [vmem:[#allocation63_spill] sm:$0xff] }
 0x35f   :  { %v9767_v36 = vpop.f32.mrf.mxu0  ;;  %v15147_v48 = vpop.f32.mrf.mxu1 }
 0x360   :  { %v4212_v28 = vadd.f32 %v9766_v3, %v17191_v12  ;;  %10083 = vmatpush3.bf16.msra.mxu1 %v17170_v62  ;;  %v4456_v35 = vmax.f32 %v4368_v32, 0.0 }
 0x361   :  { %10084 = vmatprep.subr.bf16.mxu1 %v17244_v10  ;;  %v9768_v14 = vpop.f32.mrf.mxu0  ;;  %v15152_v34 = vpop.f32.mrf.mxu1 }
 0x362   :  { %v4373_v31 = vadd.f32 %v15042_v59, %v4212_v28  ;;  %v9769_v39 = vadd.f32 %v9768_v14, %v9767_v36  ;;  %v15155_v46 = vpack.c.bf16 %v4456_v35, %v4455_v54 }
 0x363   :  { %5524 = vmatmul.mubr.bf16.gmra.mxu1 %v14999_v55  ;;  %v9770_v50 = vpop.f32.mrf.mxu0  ;;  %v9858_v5 = vpop.f32.mrf.mxu1  ;;  %11140 = vmatmul.mubr.msk.bf16.vlgmr.msra.gmra.mxu0 %vm5178_vm0, %v14934_v42 }
 0x364   :  { %17245 = vst [vmem:[#allocation60_spill] sm:$0xff] %v15155_v46  ;;  %v4215_v57 = vadd.f32 %v9769_v39, %v17195_v1  ;;  %10085 = vmatpush3.bf16.msra.mxu1 %v17170_v62  ;;  %11148 = vmatpush3.bf16.msra.mxu0 %v17237_v20  ;;  %v4457_v35 = vmax.f32 %v4373_v31, 0.0 }
 0x365   :  { %10086 = vmatprep.subr.bf16.mxu1 %v17246_v13  ;;  %11149 = vmatprep.subr.bf16.mxu0 %v17247_v6  ;;  %v9771_v59 = vpop.f32.mrf.mxu0  ;;  %v9859_v32 = vpop.f32.mrf.mxu1  ;;  %v17248_v13 = vld [vmem:[#allocation52_spill] sm:$0xff] }
 0x366   :  { %v4376_v3 = vadd.f32 %v15056_v9, %v4215_v57  ;;  %v9772_v36 = vadd.f32 %v9771_v59, %v9770_v50  ;;  %v15166_v54 = vadd.f32 %v9859_v32, %v9858_v5  ;;  %5531 = vmatprep.mubr.bf16.mxu1 %v15009_v38  ;;  %11143 = vmatprep.mubr.msk.bf16.mxu0 %vm5178_vm0, %v14946_v40 }
 0x367   :  { %v9773_v39 = vpop.f32.mrf.mxu0  ;;  %v9861_v28 = vpop.f32.mrf.mxu1 }
 0x368   :  { %v4220_v10 = vadd.f32 %v9772_v36, %v17154_v53  ;;  %10087 = vmatpush3.bf16.msra.mxu1 %v17170_v62  ;;  %11150 = vmatpush3.bf16.msra.mxu0 %v17247_v6  ;;  %v4458_v14 = vmax.f32 %v4376_v3, 0.0 }
 0x369   :  { %10088 = vmatprep.subr.bf16.mxu1 %v17248_v13  ;;  %v9774_v9 = vpop.f32.mrf.mxu0  ;;  %v9862_v50 = vpop.f32.mrf.mxu1  ;;  %5763 = vmatprep.subr.bf16.mxu0 %v17170_v62  ;;  %v17250_v13 = vld [vmem:[#allocation51_spill] sm:$0xff] }
 0x36a   :  { %v4381_v5 = vadd.f32 %v15076_v44, %v4220_v10  ;;  %v9775_v57 = vadd.f32 %v9774_v9, %v9773_v39  ;;  %v15177_v59 = vadd.f32 %v9862_v50, %v9861_v28  ;;  %v15179_v32 = vpack.c.bf16 %v4458_v14, %v4457_v35 }
 0x36b   :  { %5532 = vmatmul.mubr.bf16.gmra.mxu1 %v15031_v45  ;;  %v9776_v31 = vpop.f32.mrf.mxu0  ;;  %v9864_v36 = vpop.f32.mrf.mxu1  ;;  %11144 = vmatmul.mubr.msk.bf16.gmra.mxu0 %vm5178_vm0, %v14969_v49 }
 0x36c   :  { %17249 = vst [vmem:[#allocation46_spill] sm:$0xff] %v15179_v32  ;;  %v4223_v3 = vadd.f32 %v9775_v57, %v17204_v7  ;;  %10089 = vmatpush3.bf16.msra.mxu1 %v17170_v62  ;;  %5649 = vmatprep.mubr.bf16.mxu1 %v14909_v25  ;;  %v4459_v50 = vmax.f32 %v4381_v5, 0.0  ;;  %v17251_v32 = vld [vmem:[#allocation84_spill] sm:$0xff] }
 0x36d   :  { %10090 = vmatprep.subr.bf16.mxu1 %v17250_v13  ;;  %v9777_v44 = vpop.f32.mrf.mxu0  ;;  %v9865_v39 = vpop.f32.mrf.mxu1  ;;  %11151 = vmatprep.mubr.msk.bf16.mxu0 %vm5178_vm0, %v14914_v52 }
 0x36e   :  { %v4384_v28 = vadd.f32 %v15087_v26, %v4223_v3  ;;  %v9778_v35 = vadd.f32 %v9777_v44, %v9776_v31  ;;  %v15191_v10 = vadd.f32 %v9865_v39, %v9864_v36  ;;  %v17253_v3 = vld [vmem:[#allocation85_spill] sm:$0xff] }
 0x36f   :  { %v9779_v14 = vpop.f32.mrf.mxu0  ;;  %v9867_v9 = vpop.f32.mrf.mxu1 }
 0x370   :  { %v4228_v57 = vadd.f32 %v9778_v35, %v17157_v16  ;;  %10091 = vmatpush3.bf16.msra.mxu1 %v17170_v62  ;;  %v4460_v46 = vmax.f32 %v4384_v28, 0.0 }
 0x371   :  { %11159 = vmatprep.subr.bf16.mxu1 %v17251_v32  ;;  %v9780_v13 = vpop.f32.mrf.mxu0  ;;  %v9868_v6 = vpop.f32.mrf.mxu1 }
 0x372   :  { %v4389_v20 = vadd.f32 %v15068_v15, %v4228_v57  ;;  %v9781_v7 = vadd.f32 %v9780_v13, %v9779_v14  ;;  %v15197_v53 = vadd.f32 %v9868_v6, %v9867_v9  ;;  %v15199_v26 = vpack.c.bf16 %v4460_v46, %v4459_v50  ;;  %v17254_v50 = vld [vmem:[#allocation86_spill] sm:$0xff] }
 0x373   :  { %5650 = vmatmul.mubr.bf16.vlgmr.msra.gmra.mxu1 %v14929_v61  ;;  %v9782_v31 = vpop.f32.mrf.mxu0  ;;  %v9870_v5 = vpop.f32.mrf.mxu1  ;;  %11152 = vmatmul.mubr.msk.bf16.vlgmr.msra.gmra.mxu0 %vm5178_vm0, %v14934_v42 }
 0x374   :  { %17252 = vst [vmem:[#allocation40_spill] sm:$0xff] %v15199_v26  ;;  %v4231_v36 = vadd.f32 %v9781_v7, %v17203_v41  ;;  %5764 = vmatpush1.bf16.msra.mxu0 %v17219_v11  ;;  %11160 = vmatpush3.bf16.msra.mxu1 %v17251_v32  ;;  %v4461_v35 = vmax.f32 %v4389_v20, 0.0 }
 0x375   :  { %11161 = vmatprep.subr.bf16.mxu1 %v17253_v3  ;;  %v9783_v15 = vpop.f32.mrf.mxu0  ;;  %v9871_v6 = vpop.f32.mrf.mxu1  ;;  %5765 = vmatprep.subr.bf16.mxu0 %v17170_v62 }
 0x376   :  { %v4392_v46 = vadd.f32 %v15080_v63, %v4231_v36  ;;  %v9784_v44 = vadd.f32 %v9783_v15, %v9782_v31  ;;  %v15210_v39 = vadd.f32 %v9871_v6, %v9870_v5  ;;  %5657 = vmatprep.mubr.bf16.mxu1 %v14941_v47  ;;  %11155 = vmatprep.mubr.msk.bf16.mxu0 %vm5178_vm0, %v14946_v40 }
 0x377   :  { %v9785_v7 = vpop.f32.mrf.mxu0  ;;  %v9873_v28 = vpop.f32.mrf.mxu1 }
 0x378   :  { %v4236_v14 = vadd.f32 %v9784_v44, %v17121_v37  ;;  %5766 = vmatpush1.bf16.msra.mxu0 %v17222_v22  ;;  %11162 = vmatpush3.bf16.msra.mxu1 %v17253_v3  ;;  %v4462_v9 = vmax.f32 %v4392_v46, 0.0 }
 0x379   :  { %10128 = vmatprep.subr.bf16.mxu1 %v17254_v50  ;;  %v9786_v63 = vpop.f32.mrf.mxu0  ;;  %v9874_v57 = vpop.f32.mrf.mxu1  ;;  %5767 = vmatprep.subr.bf16.mxu0 %v17170_v62 }
 0x37a   :  { %v4397_v13 = vadd.f32 %v15099_v23, %v4236_v14  ;;  %v9787_v31 = vadd.f32 %v9786_v63, %v9785_v7  ;;  %v15221_v5 = vadd.f32 %v9874_v57, %v9873_v28  ;;  %v15223_v36 = vpack.c.bf16 %v4462_v9, %v4461_v35  ;;  %v17256_v57 = vld [vmem:[#allocation56_spill] sm:$0xff] }
 0x37b   :  { %5658 = vmatmul.mubr.bf16.gmra.mxu1 %v14964_v21  ;;  %v9788_v20 = vpop.f32.mrf.mxu0  ;;  %v9876_v15 = vpop.f32.mrf.mxu1  ;;  %11156 = vmatmul.mubr.msk.bf16.gmra.mxu0 %vm5178_vm0, %v14969_v49 }
 0x37c   :  { %17255 = vst [vmem:[#allocation36_spill] sm:$0xff] %v15223_v36  ;;  %v4239_v6 = vadd.f32 %v9787_v31, %v17207_v29  ;;  %5768 = vmatpush1.bf16.msra.mxu0 %v17174_v2  ;;  %5665 = vmatprep.mubr.bf16.mxu1 %v14977_v19  ;;  %v4463_v9 = vmax.f32 %v4397_v13, 0.0 }
 0x37d   :  { %v9789_v46 = vpop.f32.mrf.mxu0  ;;  %v9877_v23 = vpop.f32.mrf.mxu1  ;;  %5769 = vmatprep.subr.bf16.mxu0 %v17170_v62  ;;  %5791 = vmatprep.mubr.bf16.mxu0 %v14909_v25 }
 0x37e   :  { %v4400_v44 = vadd.f32 %v15107_v43, %v4239_v6  ;;  %v9790_v7 = vadd.f32 %v9789_v46, %v9788_v20  ;;  %v15234_v28 = vadd.f32 %v9877_v23, %v9876_v15  ;;  %v17258_v15 = vld [vmem:[#allocation31_spill] sm:$0xff] }
 0x37f   :  { %v9791_v35 = vpop.f32.mrf.mxu0  ;;  %v9879_v14 = vpop.f32.mrf.mxu1 }
 0x380   :  { %v4244_v63 = vadd.f32 %v9790_v7, %v17051_v56  ;;  %5770 = vmatpush1.bf16.msra.mxu0 %v17256_v57  ;;  %v4464_v2 = vmax.f32 %v4400_v44, 0.0 }
 0x381   :  { %v9792_v31 = vpop.f32.mrf.mxu0  ;;  %v9880_v26 = vpop.f32.mrf.mxu1  ;;  %5771 = vmatprep.subr.bf16.mxu0 %v17170_v62 }
 0x382   :  { %v4405_v36 = vadd.f32 %v15092_v60, %v4244_v63  ;;  %v9793_v50 = vadd.f32 %v9792_v31, %v9791_v35  ;;  %v15240_v29 = vadd.f32 %v9880_v26, %v9879_v14  ;;  %v15242_v43 = vpack.c.bf16 %v4464_v2, %v4463_v9  ;;  %v17259_v9 = vld [vmem:[#allocation47_spill] sm:$0xff] }
 0x383   :  { %5666 = vmatmul.mubr.bf16.gmra.mxu1 %v14999_v55  ;;  %v9794_v20 = vpop.f32.mrf.mxu0  ;;  %v9882_v13 = vpop.f32.mrf.mxu1 }
 0x384   :  { %17257 = vst [vmem:[#allocation54_spill] sm:$0xff] %v15242_v43  ;;  %v4247_v6 = vadd.f32 %v9793_v50, %v17258_v15  ;;  %5772 = vmatpush1.bf16.msra.mxu0 %v17170_v62  ;;  %5673 = vmatprep.mubr.bf16.mxu1 %v15009_v38  ;;  %v4465_v14 = vmax.f32 %v4405_v36, 0.0 }
 0x385   :  { %v9795_v46 = vpop.f32.mrf.mxu0  ;;  %v9883_v23 = vpop.f32.mrf.mxu1  ;;  %5773 = vmatprep.subr.bf16.mxu0 %v17170_v62 }
 0x386   :  { %v4408_v60 = vadd.f32 %v15102_v27, %v4247_v6  ;;  %v9796_v26 = vadd.f32 %v9795_v46, %v9794_v20  ;;  %v15250_v44 = vadd.f32 %v9883_v23, %v9882_v13  ;;  %v17261_v13 = vld [vmem:[#allocation49_spill] sm:$0xff] }
 0x387   :  { %v9797_v7 = vpop.f32.mrf.mxu0  ;;  %v9885_v35 = vpop.f32.mrf.mxu1  ;;  %v17262_v46 = vld [vmem:[#allocation73_spill] sm:$0xff] }
 0x388   :  { %v4252_v63 = vadd.f32 %v9796_v26, %v17259_v9  ;;  %5774 = vmatpush1.bf16.msra.mxu0 %v17170_v62  ;;  %v4466_v50 = vmax.f32 %v4408_v60, 0.0 }
 0x389   :  { %v9798_v57 = vpop.f32.mrf.mxu0  ;;  %v9886_v2 = vpop.f32.mrf.mxu1  ;;  %5775 = vmatprep.subr.bf16.mxu0 %v17170_v62 }
 0x38a   :  { %v4413_v31 = vadd.f32 %v15120_v24, %v4252_v63  ;;  %v9799_v43 = vadd.f32 %v9798_v57, %v9797_v7  ;;  %v15256_v15 = vadd.f32 %v9886_v2, %v9885_v35  ;;  %v15258_v27 = vpack.c.bf16 %v4466_v50, %v4465_v14  ;;  %v17263_v50 = vld [vmem:[#allocation44_spill] sm:$0xff] }
 0x38b   :  { %5674 = vmatmul.mubr.bf16.gmra.mxu1 %v15031_v45  ;;  %v9800_v20 = vpop.f32.mrf.mxu0  ;;  %v9888_v36 = vpop.f32.mrf.mxu1 }
 0x38c   :  { %17260 = vst [vmem:[#allocation53_spill] sm:$0xff] %v15258_v27  ;;  %v4255_v6 = vadd.f32 %v9799_v43, %v17261_v13  ;;  %5776 = vmatpush2.bf16.msra.mxu0 %v17262_v46  ;;  %11163 = vmatprep.mubr.msk.bf16.mxu1 %vm5178_vm0, %v14914_v52  ;;  %v4467_v63 = vmax.f32 %v4413_v31, 0.0  ;;  %v17264_v43 = vld [vmem:[#allocation83_spill] sm:$0xff] }
 0x38d   :  { %v9801_v23 = vpop.f32.mrf.mxu0  ;;  %v9889_v60 = vpop.f32.mrf.mxu1  ;;  %5777 = vmatprep.subr.bf16.mxu0 %v17170_v62 }
 0x38e   :  { %v4416_v24 = vadd.f32 %v15129_v17, %v4255_v6  ;;  %v9802_v26 = vadd.f32 %v9801_v23, %v9800_v20  ;;  %v15267_v7 = vadd.f32 %v9889_v60, %v9888_v36  ;;  %v17266_v36 = vld [vmem:[#allocation45_spill] sm:$0xff]  ;;  %v17267_v23 = vld [vmem:[#allocation68_spill] sm:$0xff]  ;;  %v17268_v60 = vld [vmem:[#allocation87_spill] sm:$0xff] }
 0x38f   :  { %v9803_v35 = vpop.f32.mrf.mxu0  ;;  %v9891_v14 = vpop.f32.mrf.mxu1 }
 0x390   :  { %v4260_v57 = vadd.f32 %v9802_v26, %v17263_v50  ;;  %5778 = vmatpush2.bf16.msra.mxu0 %v17264_v43  ;;  %v4468_v2 = vmax.f32 %v4416_v24, 0.0 }
 0x391   :  { %v9804_v27 = vpop.f32.mrf.mxu0  ;;  %v9892_v46 = vpop.f32.mrf.mxu1  ;;  %5779 = vmatprep.subr.bf16.mxu0 %v17170_v62 }
 0x392   :  { %v4421_v52 = vadd.f32 %v15113_v51, %v4260_v57  ;;  %v9805_v13 = vadd.f32 %v9804_v27, %v9803_v35  ;;  %v15273_v9 = vadd.f32 %v9892_v46, %v9891_v14  ;;  %v15275_v17 = vpack.c.bf16 %v4468_v2, %v4467_v63  ;;  %v17269_v14 = vld [vmem:[#allocation39_spill] sm:$0xff] }
 0x393   :  { %11164 = vmatmul.mubr.msk.bf16.vlgmr.msra.gmra.mxu1 %vm5178_vm0, %v14934_v42  ;;  %v9806_v31 = vpop.f32.mrf.mxu0  ;;  %v9894_v20 = vpop.f32.mrf.mxu1  ;;  %v17270_v57 = vld [vmem:[#allocation67_spill] sm:$0xff] }
 0x394   :  { %17265 = vst [vmem:[#allocation52_spill] sm:$0xff] %v15275_v17  ;;  %v4263_v6 = vadd.f32 %v9805_v13, %v17266_v36  ;;  %10129 = vmatpush3.bf16.msra.mxu1 %v17267_v23  ;;  %5780 = vmatpush2.bf16.msra.mxu0 %v17170_v62  ;;  %v4469_v35 = vmax.f32 %v4421_v52, 0.0 }
 0x395   :  { %10130 = vmatprep.subr.bf16.mxu1 %v17268_v60  ;;  %v9807_v24 = vpop.f32.mrf.mxu0  ;;  %v9895_v51 = vpop.f32.mrf.mxu1  ;;  %5781 = vmatprep.subr.bf16.mxu0 %v17170_v62 }
 0x396   :  { %v4424_v27 = vadd.f32 %v15124_v8, %v4263_v6  ;;  %v9808_v46 = vadd.f32 %v9807_v24, %v9806_v31  ;;  %v15285_v26 = vadd.f32 %v9895_v51, %v9894_v20  ;;  %11167 = vmatprep.mubr.msk.bf16.mxu1 %vm5178_vm0, %v14946_v40  ;;  %v17272_v51 = vld [vmem:[#allocation43_spill] sm:$0xff] }
 0x397   :  { %v9809_v42 = vpop.f32.mrf.mxu0  ;;  %v9897_v13 = vpop.f32.mrf.mxu1 }
 0x398   :  { %v4268_v63 = vadd.f32 %v9808_v46, %v17269_v14  ;;  %10131 = vmatpush3.bf16.msra.mxu1 %v17270_v57  ;;  %5782 = vmatpush2.bf16.msra.mxu0 %v17170_v62  ;;  %v4470_v2 = vmax.f32 %v4424_v27, 0.0  ;;  %v17273_v46 = vld [vmem:[#allocation58_spill] sm:$0xff] }
 0x399   :  { %10132 = vmatprep.subr.bf16.mxu1 %v17251_v32  ;;  %v9810_v17 = vpop.f32.mrf.mxu0  ;;  %v9898_v8 = vpop.f32.mrf.mxu1  ;;  %5783 = vmatprep.subr.bf16.mxu0 %v17170_v62 }
 0x39a   :  { %v4429_v31 = vadd.f32 %v15142_v4, %v4268_v63  ;;  %v9811_v20 = vadd.f32 %v9810_v17, %v9809_v42  ;;  %v15295_v40 = vadd.f32 %v9898_v8, %v9897_v13  ;;  %v15297_v6 = vpack.c.bf16 %v4470_v2, %v4469_v35  ;;  %v17274_v2 = vld [vmem:[#allocation35_spill] sm:$0xff] }
 0x39b   :  { %v9812_v52 = vpop.f32.mrf.mxu0  ;;  %v9900_v24 = vpop.f32.mrf.mxu1  ;;  %11168 = vmatmul.mubr.msk.bf16.gmra.mxu1 %vm5178_vm0, %v14969_v49 }
 0x39c   :  { %17271 = vst [vmem:[#allocation51_spill] sm:$0xff] %v15297_v6  ;;  %v4271_v27 = vadd.f32 %v9811_v20, %v17272_v51  ;;  %10133 = vmatpush3.bf16.msra.mxu1 %v17273_v46  ;;  %5784 = vmatpush2.bf16.msra.mxu0 %v17267_v23  ;;  %v4471_v63 = vmax.f32 %v4429_v31, 0.0  ;;  %v17275_v20 = vld [vmem:[#allocation48_spill] sm:$0xff]  ;;  %v17276_v6 = vld [vmem:[#allocation75_spill] sm:$0xff]  ;;  %v17281_v51 = vld [vmem:[#allocation41_spill] sm:$0xff] }
 0x39d   :  { %10134 = vmatprep.subr.bf16.mxu1 %v17253_v3  ;;  %v9813_v60 = vpop.f32.mrf.mxu0  ;;  %v9901_v4 = vpop.f32.mrf.mxu1  ;;  %5785 = vmatprep.subr.bf16.mxu0 %v17170_v62 }
 0x39e   :  { %v4432_v17 = vadd.f32 %v15152_v34, %v4271_v27  ;;  %v9814_v42 = vadd.f32 %v9813_v60, %v9812_v52  ;;  %v15307_v13 = vadd.f32 %v9901_v4, %v9900_v24  ;;  %5933 = vmatprep.mubr.bf16.mxu1 %v14909_v25  ;;  %v17277_v25 = vld [vmem:[#allocation3_spill] sm:$0xff]  ;;  %v17279_v4 = vld [vmem:[#allocation2_spill] sm:$0xff] }
 0x39f   :  { %v9815_v49 = vpop.f32.mrf.mxu0  ;;  %v9903_v35 = vpop.f32.mrf.mxu1  ;;  %v4727_v52 = vadd.f32 %v15191_v10, %v17277_v25  ;;  %v17285_v25 = vld [vmem:[#allocation42_spill] sm:$0xff] }
 0x3a0   :  { %v4276_v8 = vadd.f32 %v9814_v42, %v17274_v2  ;;  %10135 = vmatpush3.bf16.msra.mxu1 %v17275_v20  ;;  %5786 = vmatpush2.bf16.msra.mxu0 %v17270_v57  ;;  %v4472_v23 = vmax.f32 %v4432_v17, 0.0  ;;  %v4719_v57 = vadd.f32 %v15166_v54, %v17279_v4  ;;  %v17280_v42 = vld [vmem:[#allocation38_spill] sm:$0xff]  ;;  %v17287_v4 = vld [vmem:[#allocation4_spill] sm:$0xff] }
 0x3a1   :  { %10136 = vmatprep.subr.bf16.mxu1 %v17276_v6  ;;  %v9816_v43 = vpop.f32.mrf.mxu0  ;;  %v9904_v3 = vpop.f32.mrf.mxu1  ;;  %5787 = vmatprep.subr.bf16.mxu0 %v17170_v62 }
 0x3a2   :  { %v9817_v34 = vadd.f32 %v9816_v43, %v9815_v49  ;;  %v15315_v60 = vadd.f32 %v9904_v3, %v9903_v35  ;;  %v15319_v31 = vpack.c.bf16 %v4472_v23, %v4471_v63  ;;  %v4437_v17 = vadd.f32 %v15135_v30, %v4276_v8  ;;  %v17282_v43 = vld [vmem:[#allocation66_spill] sm:$0xff]  ;;  %v17284_v23 = vld [vmem:[#allocation5_spill] sm:$0xff] }
 0x3a3   :  { %v9906_v24 = vpop.f32.mrf.mxu1  ;;  %v11081_v27 = vpop.f32.mrf.mxu0  ;;  %v17283_v3 = vld [vmem:[#allocation74_spill] sm:$0xff]  ;;  %v4730_v30 = vadd.f32 %v15197_v53, %v17284_v23 }
 0x3a4   :  { %17278 = vst [vmem:[#allocation56_spill] sm:$0xff] %v15319_v31  ;;  %v4279_v32 = vadd.f32 %v9817_v34, %v17280_v42  ;;  %10137 = vmatpush3.bf16.msra.mxu1 %v17281_v51  ;;  %v4888_v2 = vadd.f32 %v11081_v27, %v4727_v52  ;;  %5788 = vmatpush2.bf16.msra.mxu0 %v17282_v43  ;;  %v4473_v51 = vmax.f32 %v4437_v17, 0.0  ;;  %v17286_v27 = vld [vmem:[#allocation65_spill] sm:$0xff]  ;;  %v17290_v53 = vld [vmem:[#allocation6_spill] sm:$0xff] }
 0x3a5   :  { %10138 = vmatprep.subr.bf16.mxu1 %v17283_v3  ;;  %v9907_v49 = vpop.f32.mrf.mxu1  ;;  %v4879_v10 = vpop.f32.mrf.mxu0  ;;  %5789 = vmatprep.subr.bf16.mxu0 %v17170_v62  ;;  %v4722_v43 = vadd.f32 %v15177_v59, %v17287_v4 }
 0x3a6   :  { %v4440_v35 = vadd.f32 %v15147_v48, %v4279_v32  ;;  %v15330_v63 = vadd.f32 %v9907_v49, %v9906_v24  ;;  %v4880_v54 = vadd.f32 %v4879_v10, %v4719_v57  ;;  %v5008_v42 = vmax.f32 %v4888_v2, 0.0  ;;  %v17288_v48 = vld [vmem:[#allocation70_spill] sm:$0xff]  ;;  %v17289_v32 = vld [vmem:[#allocation88_spill] sm:$0xff]  ;;  %v17292_v2 = vld [vmem:[#allocation9_spill] sm:$0xff] }
 0x3a7   :  { %v9909_v8 = vpop.f32.mrf.mxu1  ;;  %v11082_v34 = vpop.f32.mrf.mxu0  ;;  %v4743_v49 = vadd.f32 %v15234_v28, %v17290_v53 }
 0x3a8   :  { %10139 = vmatpush3.bf16.msra.mxu1 %v17285_v25  ;;  %v4891_v52 = vadd.f32 %v11082_v34, %v4730_v30  ;;  %5790 = vmatpush2.bf16.msra.mxu0 %v17286_v27  ;;  %v4474_v31 = vmax.f32 %v4440_v35, 0.0  ;;  %v4735_v34 = vadd.f32 %v15210_v39, %v17292_v2  ;;  %v5006_v25 = vmax.f32 %v4880_v54, 0.0  ;;  %v17297_v54 = vld [vmem:[#allocation7_spill] sm:$0xff] }
 0x3a9   :  { %10140 = vmatprep.subr.bf16.mxu1 %v17288_v48  ;;  %11171 = vmatprep.subr.bf16.mxu0 %v17289_v32  ;;  %v9910_v24 = vpop.f32.mrf.mxu1  ;;  %v4882_v57 = vpop.f32.mrf.mxu0 }
 0x3aa   :  { %v5009_v17 = vmax.f32 %v4891_v52, 0.0  ;;  %v15342_v10 = vadd.f32 %v9910_v24, %v9909_v8  ;;  %v4883_v23 = vadd.f32 %v4882_v57, %v4722_v43  ;;  %v15344_v30 = vpack.c.bf16 %v4474_v31, %v4473_v51  ;;  %v17294_v8 = vld [vmem:[#allocation69_spill] sm:$0xff]  ;;  %v17298_v57 = vld [vmem:[#allocation10_spill] sm:$0xff] }
 0x3ab   :  { %5792 = vmatmul.mubr.bf16.vlgmr.msra.gmra.mxu0 %v14929_v61  ;;  %v9912_v59 = vpop.f32.mrf.mxu1  ;;  %v11085_v35 = vpop.f32.mrf.mxu0  ;;  %v17295_v31 = vld [vmem:[#allocation89_spill] sm:$0xff]  ;;  %v4738_v53 = vadd.f32 %v15221_v5, %v17298_v57 }
 0x3ac   :  { %17291 = vst [vmem:[#allocation44_spill] sm:$0xff] %v15344_v30  ;;  %v15349_v27 = vpack.c.bf16 %v5009_v17, %v5008_v42  ;;  %v5007_v4 = vmax.f32 %v4883_v23, 0.0  ;;  %10141 = vmatpush3.bf16.msra.mxu1 %v17219_v11  ;;  %v4904_v28 = vadd.f32 %v11085_v35, %v4743_v49  ;;  %11172 = vmatpush3.bf16.msra.mxu0 %v17289_v32  ;;  %v17299_v49 = vld [vmem:[#allocation33_spill] sm:$0xff]  ;;  %v17300_v17 = vld [vmem:[#allocation91_spill] sm:$0xff]  ;;  %v17339_v30 = vld [vmem:[#allocation24_spill] sm:$0xff] }
 0x3ad   :  { %10142 = vmatprep.subr.bf16.mxu1 %v17294_v8  ;;  %11173 = vmatprep.subr.bf16.mxu0 %v17295_v31  ;;  %v9913_v51 = vpop.f32.mrf.mxu1  ;;  %v4895_v61 = vpop.f32.mrf.mxu0  ;;  %v4746_v42 = vadd.f32 %v15240_v29, %v17297_v54  ;;  %v4759_v29 = vadd.f32 %v15267_v7, %v17184_v33 }
 0x3ae   :  { %17293 = vst [vmem:[#allocation45_spill] sm:$0xff] %v15349_v27  ;;  %v15355_v52 = vpack.c.bf16 %v5007_v4, %v5006_v25  ;;  %v15357_v43 = vadd.f32 %v9913_v51, %v9912_v59  ;;  %v4896_v39 = vadd.f32 %v4895_v61, %v4735_v34  ;;  %5799 = vmatprep.mubr.bf16.mxu0 %v14941_v47  ;;  %v5012_v47 = vmax.f32 %v4904_v28, 0.0  ;;  %v15375_v34 = vld [vmem:[%s16766_s3] ss:$12 sps:$4 sm:$0xff]   ;;  %v15387_v61 = vld [vmem:[%s16766_s3 + $0x1c] ss:$12 sps:$4 sm:$0xff]  }
 0x3af   :  { %v9915_v11 = vpop.f32.mrf.mxu1  ;;  %v11086_v48 = vpop.f32.mrf.mxu0  ;;  %v17301_v4 = vld [vmem:[#allocation15_spill] sm:$0xff] }
 0x3b0   :  { %17296 = vst [vmem:[#allocation68_spill] sm:$0xff] %v15355_v52  ;;  %10143 = vmatpush3.bf16.msra.mxu1 %v17222_v22  ;;  %v4907_v24 = vadd.f32 %v11086_v48, %v4746_v42  ;;  %11174 = vmatpush3.bf16.msra.mxu0 %v17295_v31  ;;  %v4751_v8 = vadd.f32 %v15250_v44, %v17301_v4  ;;  %v5010_v33 = vmax.f32 %v4896_v39, 0.0 }
 0x3b1   :  { %10174 = vmatprep.subr.bf16.mxu1 %v17299_v49  ;;  %11183 = vmatprep.subr.bf16.mxu0 %v17300_v17  ;;  %v9916_v23 = vpop.f32.mrf.mxu1  ;;  %v4898_v59 = vpop.f32.mrf.mxu0 }
 0x3b2   :  { %v5013_v35 = vmax.f32 %v4907_v24, 0.0  ;;  %v15370_v2 = vadd.f32 %v9916_v23, %v9915_v11  ;;  %v4899_v22 = vadd.f32 %v4898_v59, %v4738_v53  ;;  %v17303_v53 = vld [vmem:[#allocation16_spill] sm:$0xff] }
 0x3b3   :  { %5934 = vmatmul.mubr.bf16.vlgmr.msra.gmra.mxu1 %v15375_v34  ;;  %5800 = vmatmul.mubr.bf16.gmra.mxu0 %v14964_v21  ;;  %v9918_v5 = vpop.f32.mrf.mxu1  ;;  %v11089_v25 = vpop.f32.mrf.mxu0  ;;  %v17302_v21 = vld [vmem:[#allocation90_spill] sm:$0xff]  ;;  %v4754_v23 = vadd.f32 %v15256_v15, %v17303_v53 }
 0x3b4   :  { %v15381_v7 = vpack.c.bf16 %v5013_v35, %v5012_v47  ;;  %v5011_v28 = vmax.f32 %v4899_v22, 0.0  ;;  %10175 = vmatpush3.bf16.msra.mxu1 %v17276_v6  ;;  %v4920_v51 = vadd.f32 %v11089_v25, %v4759_v29  ;;  %5941 = vmatprep.mubr.bf16.mxu1 %v15387_v61  ;;  %v4762_v6 = vadd.f32 %v15273_v9, %v17188_v58 }
 0x3b5   :  { %10176 = vmatprep.subr.bf16.mxu1 %v17302_v21  ;;  %v9919_v54 = vpop.f32.mrf.mxu1  ;;  %v4911_v42 = vpop.f32.mrf.mxu0  ;;  %5807 = vmatprep.mubr.bf16.mxu0 %v14977_v19  ;;  %v4775_v29 = vadd.f32 %v15307_v13, %v17191_v12 }
 0x3b6   :  { %v15392_v44 = vadd.f32 %v9919_v54, %v9918_v5  ;;  %v4912_v39 = vadd.f32 %v4911_v42, %v4751_v8  ;;  %v15396_v11 = vpack.c.bf16 %v5011_v28, %v5010_v33  ;;  %v5016_v47 = vmax.f32 %v4920_v51, 0.0  ;;  %v15421_v8 = vld [vmem:[%s16766_s3 + $0x34] ss:$12 sps:$4 sm:$0xff]  }
 0x3b7   :  { %v9921_v48 = vpop.f32.mrf.mxu1  ;;  %v11090_v24 = vpop.f32.mrf.mxu0  ;;  %v4767_v5 = vadd.f32 %v15285_v26, %v17192_v18  ;;  %v4778_v28 = vadd.f32 %v15315_v60, %v17195_v1 }
 0x3b8   :  { %10177 = vmatpush3.bf16.msra.mxu1 %v17283_v3  ;;  %v4923_v57 = vadd.f32 %v11090_v24, %v4762_v6  ;;  %v15409_v3 = vld [vmem:[%s16766_s3 + $0x18] ss:$12 sps:$4 sm:$0xff]   ;;  %v5014_v12 = vmax.f32 %v4912_v39, 0.0 }
 0x3b9   :  { %10178 = vmatprep.subr.bf16.mxu1 %v17289_v32  ;;  %v9922_v59 = vpop.f32.mrf.mxu1  ;;  %v4914_v19 = vpop.f32.mrf.mxu0  ;;  %v17306_v39 = vld [vmem:[#allocation61_spill] sm:$0xff] }
 0x3ba   :  { %v5017_v35 = vmax.f32 %v4923_v57, 0.0  ;;  %v15404_v58 = vadd.f32 %v9922_v59, %v9921_v48  ;;  %v4915_v9 = vadd.f32 %v4914_v19, %v4754_v23  ;;  %v17307_v48 = vld [vmem:[#allocation22_spill] sm:$0xff]  ;;  %v17308_v57 = vld [vmem:[#allocation79_spill] sm:$0xff] }
 0x3bb   :  { %5942 = vmatmul.mubr.bf16.gmra.mxu1 %v15409_v3  ;;  %5808 = vmatmul.mubr.bf16.gmra.mxu0 %v14999_v55  ;;  %v9924_v15 = vpop.f32.mrf.mxu1  ;;  %v11093_v22 = vpop.f32.mrf.mxu0  ;;  %v4770_v24 = vadd.f32 %v15295_v40, %v17307_v48 }
 0x3bc   :  { %v15415_v13 = vpack.c.bf16 %v5017_v35, %v5016_v47  ;;  %v5015_v25 = vmax.f32 %v4915_v9, 0.0  ;;  %10179 = vmatpush3.bf16.msra.mxu1 %v17232_v0  ;;  %v4936_v4 = vadd.f32 %v11093_v22, %v4775_v29  ;;  %5949 = vmatprep.mubr.bf16.mxu1 %v15421_v8  ;;  %v15439_v29 = vld [vmem:[%s16766_s3 + $0x30] ss:$12 sps:$4 sm:$0xff]   ;;  %v17309_v35 = vld [vmem:[#allocation27_spill] sm:$0xff]  ;;  %v17311_v22 = vld [vmem:[#allocation30_spill] sm:$0xff] }
 0x3bd   :  { %10180 = vmatprep.subr.bf16.mxu1 %v17295_v31  ;;  %v9925_v55 = vpop.f32.mrf.mxu1  ;;  %v4927_v33 = vpop.f32.mrf.mxu0  ;;  %5815 = vmatprep.mubr.bf16.mxu0 %v15009_v38  ;;  %v4791_v38 = vadd.f32 %v15357_v43, %v17157_v16  ;;  %v4783_v9 = vadd.f32 %v15330_v63, %v17309_v35  ;;  %v15458_v63 = vld [vmem:[%s16766_s3 + $0x8] ss:$12 sps:$4 sm:$0xff]   ;;  %v4799_v35 = vadd.f32 %v15392_v44, %v17121_v37  ;;  %v15500_v37 = vld [vmem:[%s16766_s3 + $0x4] ss:$12 sps:$4 sm:$0xff]  }
 0x3be   :  { %17304 = vst [vmem:[#allocation39_spill] sm:$0xff] %v15415_v13  ;;  %v9926_v18 = vadd.f32 %v9925_v55, %v9924_v15  ;;  %v4928_v26 = vadd.f32 %v4927_v33, %v4767_v5  ;;  %v15428_v51 = vpack.c.bf16 %v5015_v25, %v5014_v12  ;;  %v5020_v59 = vmax.f32 %v4936_v4, 0.0  ;;  %v15451_v12 = vld [vmem:[%s16766_s3 + $0x4c] ss:$12 sps:$4 sm:$0xff]  }
 0x3bf   :  { %v9927_v54 = vpop.f32.mrf.mxu1  ;;  %v11094_v42 = vpop.f32.mrf.mxu0  ;;  %v17373_v13 = vld [vmem:[#allocation101_spill] sm:$0xff] }
 0x3c0   :  { %17305 = vst [vmem:[#allocation67_spill] sm:$0xff] %v15428_v51  ;;  %10181 = vmatpush3.bf16.msra.mxu1 %v17306_v39  ;;  %v4939_v6 = vadd.f32 %v11094_v42, %v4778_v28  ;;  %v5018_v15 = vmax.f32 %v4928_v26, 0.0  ;;  %v4794_v26 = vadd.f32 %v15370_v2, %v17203_v41  ;;  %v15478_v2 = vld [vmem:[%s16766_s3 + $0x48] ss:$12 sps:$4 sm:$0xff]  }
 0x3c1   :  { %10182 = vmatprep.subr.bf16.mxu1 %v17308_v57  ;;  %v9928_v53 = vpop.f32.mrf.mxu1  ;;  %v4930_v23 = vpop.f32.mrf.mxu0 }
 0x3c2   :  { %v5021_v19 = vmax.f32 %v4939_v6, 0.0  ;;  %v9929_v1 = vadd.f32 %v9928_v53, %v9927_v54  ;;  %v4931_v60 = vadd.f32 %v4930_v23, %v4770_v24  ;;  %v17314_v6 = vld [vmem:[#allocation59_spill] sm:$0xff]  ;;  %v17315_v24 = vld [vmem:[#allocation29_spill] sm:$0xff] }
 0x3c3   :  { %5950 = vmatmul.mubr.bf16.gmra.mxu1 %v15439_v29  ;;  %5816 = vmatmul.mubr.bf16.gmra.mxu0 %v15031_v45  ;;  %v9930_v40 = vpop.f32.mrf.mxu1  ;;  %v11097_v47 = vpop.f32.mrf.mxu0  ;;  %v17312_v45 = vld [vmem:[#allocation78_spill] sm:$0xff]  ;;  %v4786_v53 = vadd.f32 %v15342_v10, %v17315_v24  ;;  %v17316_v23 = vld [vmem:[#allocation77_spill] sm:$0xff] }
 0x3c4   :  { %v15445_v16 = vpack.c.bf16 %v5021_v19, %v5020_v59  ;;  %v5019_v43 = vmax.f32 %v4931_v60, 0.0  ;;  %10183 = vmatpush3.bf16.msra.mxu1 %v17311_v22  ;;  %v4952_v5 = vadd.f32 %v11097_v47, %v4791_v38  ;;  %5957 = vmatprep.mubr.bf16.mxu1 %v15451_v12  ;;  %v4807_v19 = vadd.f32 %v9926_v18, %v17051_v56  ;;  %v15484_v10 = vld [vmem:[%s16766_s3 + $0x20] ss:$12 sps:$4 sm:$0xff]   ;;  %v15512_v24 = vpop.permute.xlu0 %5110 }
 0x3c5   :  { %10184 = vmatprep.subr.bf16.mxu1 %v17312_v45  ;;  %v9931_v25 = vpop.f32.mrf.mxu1  ;;  %v4943_v4 = vpop.f32.mrf.mxu0  ;;  %11175 = vmatprep.mubr.msk.bf16.mxu0 %vm5178_vm0, %v15458_v63 }
 0x3c6   :  { %17310 = vst [vmem:[#allocation58_spill] sm:$0xff] %v15445_v16  ;;  %v15462_v55 = vadd.f32 %v9931_v25, %v9930_v40  ;;  %v4944_v33 = vadd.f32 %v4943_v4, %v4783_v9  ;;  %v15466_v28 = vpack.c.bf16 %v5019_v43, %v5018_v15  ;;  %v5024_v60 = vmax.f32 %v4952_v5, 0.0  ;;  %v17318_v5 = vld [vmem:[#allocation76_spill] sm:$0xff] }
 0x3c7   :  { %v9933_v54 = vpop.f32.mrf.mxu1  ;;  %v11098_v42 = vpop.f32.mrf.mxu0  ;;  %v17319_v25 = vld [vmem:[#allocation92_spill] sm:$0xff] }
 0x3c8   :  { %17313 = vst [vmem:[#allocation48_spill] sm:$0xff] %v15466_v28  ;;  %10185 = vmatpush3.bf16.msra.mxu1 %v17314_v6  ;;  %v4955_v48 = vadd.f32 %v11098_v42, %v4794_v26  ;;  %v5022_v9 = vmax.f32 %v4944_v33, 0.0 }
 0x3c9   :  { %10186 = vmatprep.subr.bf16.mxu1 %v17316_v23  ;;  %v9934_v38 = vpop.f32.mrf.mxu1  ;;  %v4946_v59 = vpop.f32.mrf.mxu0  ;;  %v17322_v23 = vld [vmem:[#allocation34_spill] sm:$0xff] }
 0x3ca   :  { %v5025_v40 = vmax.f32 %v4955_v48, 0.0  ;;  %v15473_v47 = vadd.f32 %v9934_v38, %v9933_v54  ;;  %v4947_v41 = vadd.f32 %v4946_v59, %v4786_v53  ;;  %v17320_v54 = vld [vmem:[#allocation31_spill] sm:$0xff]  ;;  %v4802_v38 = vadd.f32 %v15404_v58, %v17322_v23 }
 0x3cb   :  { %5958 = vmatmul.mubr.bf16.gmra.mxu1 %v15478_v2  ;;  %11176 = vmatmul.mubr.msk.bf16.vlgmr.msra.gmra.mxu0 %vm5178_vm0, %v15484_v10  ;;  %v9936_v56 = vpop.f32.mrf.mxu1  ;;  %v11101_v18 = vpop.f32.mrf.mxu0  ;;  %v4810_v42 = vadd.f32 %v9929_v1, %v17320_v54 }
 0x3cc   :  { %v15490_v15 = vpack.c.bf16 %v5025_v40, %v5024_v60  ;;  %v5023_v43 = vmax.f32 %v4947_v41, 0.0  ;;  %10187 = vmatpush3.bf16.msra.mxu1 %v17273_v46  ;;  %11184 = vmatpush3.bf16.msra.mxu0 %v17300_v17  ;;  %v4968_v22 = vadd.f32 %v11101_v18, %v4807_v19  ;;  %v15506_v46 = vld [vmem:[%s16766_s3 + $0x38] ss:$12 sps:$4 sm:$0xff]   ;;  %v17323_v19 = vld [vmem:[#allocation72_spill] sm:$0xff]  ;;  %v17324_v60 = vld [vmem:[#allocation95_spill] sm:$0xff] }
 0x3cd   :  { %10188 = vmatprep.subr.bf16.mxu1 %v17318_v5  ;;  %11185 = vmatprep.subr.bf16.mxu0 %v17319_v25  ;;  %v9937_v4 = vpop.f32.mrf.mxu1  ;;  %v4959_v26 = vpop.f32.mrf.mxu0 }
 0x3ce   :  { %17317 = vst [vmem:[#allocation75_spill] sm:$0xff] %v15490_v15  ;;  %v9938_v6 = vadd.f32 %v9937_v4, %v9936_v56  ;;  %v4960_v48 = vadd.f32 %v4959_v26, %v4799_v35  ;;  %6075 = vmatprep.mubr.bf16.mxu1 %v15500_v37  ;;  %11179 = vmatprep.mubr.msk.bf16.mxu0 %vm5178_vm0, %v15506_v46  ;;  %v5028_v59 = vmax.f32 %v4968_v22, 0.0  ;;  %v17325_v22 = vld [vmem:[#allocation47_spill] sm:$0xff]  ;;  %v15531_v4 = vpop.permute.xlu1 %5115 }
 0x3cf   :  { %v15510_v44 = vpack.c.bf16 %v5023_v43, %v5022_v9  ;;  %v9939_v1 = vpop.f32.mrf.mxu1  ;;  %v11102_v33 = vpop.f32.mrf.mxu0  ;;  %v4815_v5 = vadd.f32 %v15462_v55, %v17325_v22 }
 0x3d0   :  { %10189 = vmatpush3.bf16.msra.mxu1 %v17275_v20  ;;  %11186 = vmatpush3.bf16.msra.mxu0 %v17319_v25  ;;  %v4971_v53 = vadd.f32 %v11102_v33, %v4810_v42  ;;  %v4823_v9 = vadd.f32 %v9938_v6, %v17263_v50  ;;  %v15525_v20 = vld [vmem:[%s16766_s3 + $0x50] ss:$12 sps:$4 sm:$0xff]   ;;  %v5026_v26 = vmax.f32 %v4960_v48, 0.0 }
 0x3d1   :  { %17321 = vst [vmem:[#allocation3_spill] sm:$0xff] %v15510_v44  ;;  %10220 = vmatprep.subr.bf16.mxu1 %v17323_v19  ;;  %11195 = vmatprep.subr.bf16.mxu0 %v17324_v60  ;;  %v9940_v40 = vpop.f32.mrf.mxu1  ;;  %v4962_v41 = vpop.f32.mrf.mxu0  ;;  %v17327_v6 = vld [vmem:[#allocation93_spill] sm:$0xff] }
 0x3d2   :  { %v5029_v56 = vmax.f32 %v4971_v53, 0.0  ;;  %v9941_v18 = vadd.f32 %v9940_v40, %v9939_v1  ;;  %v4963_v35 = vadd.f32 %v4962_v41, %v4802_v38  ;;  %v15540_v53 = vpop.permute.xlu0 %5100  ;;  %v17329_v41 = vld [vmem:[#allocation49_spill] sm:$0xff] }
 0x3d3   :  { %6076 = vmatmul.mubr.bf16.vlgmr.msra.gmra.mxu1 %v15375_v34  ;;  %11180 = vmatmul.mubr.msk.bf16.gmra.mxu0 %vm5178_vm0, %v15525_v20  ;;  %v9942_v58 = vpop.f32.mrf.mxu1  ;;  %v11105_v43 = vpop.f32.mrf.mxu0 }
 0x3d4   :  { %v15533_v54 = vpack.c.bf16 %v5029_v56, %v5028_v59  ;;  %v5027_v50 = vmax.f32 %v4963_v35, 0.0  ;;  %10221 = vmatpush3.bf16.msra.mxu1 %v17308_v57  ;;  %v4984_v42 = vadd.f32 %v11105_v43, %v4823_v9  ;;  %6083 = vmatprep.mubr.bf16.mxu1 %v15387_v61  ;;  %v4826_v48 = vadd.f32 %v9941_v18, %v17266_v36  ;;  %v15549_v43 = vpop.permute.xlu1 %5105 }
 0x3d5   :  { %10222 = vmatprep.subr.bf16.mxu1 %v17327_v6  ;;  %v9943_v1 = vpop.f32.mrf.mxu1  ;;  %v4975_v33 = vpop.f32.mrf.mxu0  ;;  %11187 = vmatprep.mubr.msk.bf16.mxu0 %vm5178_vm0, %v15458_v63  ;;  %v4818_v56 = vadd.f32 %v15473_v47, %v17329_v41 }
 0x3d6   :  { %17326 = vst [vmem:[#allocation2_spill] sm:$0xff] %v15533_v54  ;;  %v9944_v55 = vadd.f32 %v9943_v1, %v9942_v58  ;;  %v4976_v23 = vadd.f32 %v4975_v33, %v4815_v5  ;;  %v15543_v38 = vpack.c.bf16 %v5027_v50, %v5026_v26  ;;  %v5032_v58 = vmax.f32 %v4984_v42, 0.0  ;;  %v15554_v26 = vpop.permute.xlu0 %5090  ;;  %v17331_v33 = vld [vmem:[#allocation64_spill] sm:$0xff] }
 0x3d7   :  { %v9945_v59 = vpop.f32.mrf.mxu1  ;;  %v11106_v57 = vpop.f32.mrf.mxu0 }
 0x3d8   :  { %17328 = vst [vmem:[#allocation41_spill] sm:$0xff] %v15543_v38  ;;  %10223 = vmatpush3.bf16.msra.mxu1 %v17312_v45  ;;  %v4987_v40 = vadd.f32 %v11106_v57, %v4826_v48  ;;  %v5030_v47 = vmax.f32 %v4976_v23, 0.0  ;;  %v4831_v42 = vadd.f32 %v9944_v55, %v17269_v14  ;;  %v17332_v48 = vld [vmem:[#allocation94_spill] sm:$0xff]  ;;  %v17334_v14 = vld [vmem:[#allocation35_spill] sm:$0xff] }
 0x3d9   :  { %10224 = vmatprep.subr.bf16.mxu1 %v17300_v17  ;;  %v9946_v35 = vpop.f32.mrf.mxu1  ;;  %v4978_v9 = vpop.f32.mrf.mxu0 }
 0x3da   :  { %v5033_v22 = vmax.f32 %v4987_v40, 0.0  ;;  %v9947_v5 = vadd.f32 %v9946_v35, %v9945_v59  ;;  %v4979_v36 = vadd.f32 %v4978_v9, %v4818_v56  ;;  %v15568_v9 = vpop.permute.xlu1 %5095 }
 0x3db   :  { %6084 = vmatmul.mubr.bf16.gmra.mxu1 %v15409_v3  ;;  %11188 = vmatmul.mubr.msk.bf16.vlgmr.msra.gmra.mxu0 %vm5178_vm0, %v15484_v10  ;;  %v9948_v45 = vpop.f32.mrf.mxu1  ;;  %v11109_v18 = vpop.f32.mrf.mxu0 }
 0x3dc   :  { %v15556_v50 = vpack.c.bf16 %v5033_v22, %v5032_v58  ;;  %v5031_v1 = vmax.f32 %v4979_v36, 0.0  ;;  %10225 = vmatpush3.bf16.msra.mxu1 %v17331_v33  ;;  %11196 = vmatpush3.bf16.msra.mxu0 %v17324_v60  ;;  %v17335_v58 = vld [vmem:[#allocation63_spill] sm:$0xff] }
 0x3dd   :  { %10226 = vmatprep.subr.bf16.mxu1 %v17319_v25  ;;  %11197 = vmatprep.subr.bf16.mxu0 %v17332_v48  ;;  %v9949_v59 = vpop.f32.mrf.mxu1  ;;  %v4991_v57 = vpop.f32.mrf.mxu0  ;;  %v17336_v22 = vld [vmem:[#allocation43_spill] sm:$0xff] }
 0x3de   :  { %17330 = vst [vmem:[#allocation66_spill] sm:$0xff] %v15556_v50  ;;  %v9950_v40 = vadd.f32 %v9949_v59, %v9948_v45  ;;  %v4992_v41 = vadd.f32 %v4991_v57, %v4831_v42  ;;  %6091 = vmatprep.mubr.bf16.mxu1 %v15421_v8  ;;  %11191 = vmatprep.mubr.msk.bf16.mxu0 %vm5178_vm0, %v15506_v46  ;;  %v17337_v45 = vld [vmem:[#allocation71_spill] sm:$0xff] }
 0x3df   :  { %v15566_v23 = vpack.c.bf16 %v5031_v1, %v5030_v47  ;;  %v9951_v56 = vpop.f32.mrf.mxu1  ;;  %v11110_v35 = vpop.f32.mrf.mxu0  ;;  %v4834_v36 = vadd.f32 %v9947_v5, %v17336_v22  ;;  %v17338_v5 = vld [vmem:[#allocation38_spill] sm:$0xff] }
 0x3e0   :  { %v4839_v55 = vadd.f32 %v9950_v40, %v17334_v14  ;;  %10227 = vmatpush3.bf16.msra.mxu1 %v17335_v58  ;;  %11198 = vmatpush3.bf16.msra.mxu0 %v17332_v48  ;;  %v15576_v47 = vpop.permute.xlu0 %5080  ;;  %v5034_v58 = vmax.f32 %v4992_v41, 0.0 }
 0x3e1   :  { %17333 = vst [vmem:[#allocation74_spill] sm:$0xff] %v15566_v23  ;;  %10228 = vmatprep.subr.bf16.mxu1 %v17337_v45  ;;  %v9952_v33 = vpop.f32.mrf.mxu1  ;;  %v4994_v42 = vpop.f32.mrf.mxu0  ;;  %6331 = vmatprep.subr.bf16.mxu0 %v17170_v62 }
 0x3e2   :  { %v5000_v1 = vadd.f32 %v11109_v18, %v4839_v55  ;;  %v9953_v59 = vadd.f32 %v9952_v33, %v9951_v56  ;;  %v4995_v57 = vadd.f32 %v4994_v42, %v4834_v36  ;;  %v17340_v18 = vld [vmem:[#allocation82_spill] sm:$0xff]  ;;  %v15588_v36 = vpop.permute.xlu1 %5085 }
 0x3e3   :  { %6092 = vmatmul.mubr.bf16.gmra.mxu1 %v15439_v29  ;;  %11192 = vmatmul.mubr.msk.bf16.gmra.mxu0 %vm5178_vm0, %v15525_v20  ;;  %v5225_v40 = vpop.f32.mrf.mxu0  ;;  %v11117_v14 = vpop.f32.mrf.mxu1 }
 0x3e4   :  { %v4842_v22 = vadd.f32 %v9953_v59, %v17338_v5  ;;  %v5035_v45 = vmax.f32 %v4995_v57, 0.0  ;;  %10229 = vmatpush3.bf16.msra.mxu1 %v17339_v30  ;;  %v5226_v23 = vadd.f32 %v5225_v40, %v15576_v47  ;;  %6099 = vmatprep.mubr.bf16.mxu1 %v15451_v12  ;;  %v5036_v30 = vmax.f32 %v5000_v1, 0.0  ;;  %v17342_v5 = vld [vmem:[#allocation62_spill] sm:$0xff] }
 0x3e5   :  { %10230 = vmatprep.subr.bf16.mxu1 %v17340_v18  ;;  %v5227_v56 = vpop.f32.mrf.mxu0  ;;  %v5290_v55 = vpop.f32.mrf.mxu1  ;;  %11199 = vmatprep.mubr.msk.bf16.mxu0 %vm5178_vm0, %v15458_v63  ;;  %v17343_v18 = vld [vmem:[#allocation81_spill] sm:$0xff] }
 0x3e6   :  { %v5003_v33 = vadd.f32 %v11110_v35, %v4842_v22  ;;  %v5291_v41 = vadd.f32 %v5290_v55, %v5226_v23  ;;  %v15590_v42 = vpack.c.bf16 %v5035_v45, %v5034_v58  ;;  %v17345_v22 = vld [vmem:[#allocation84_spill] sm:$0xff] }
 0x3e7   :  { %v5228_v59 = vpop.f32.mrf.mxu0  ;;  %v11118_v57 = vpop.f32.mrf.mxu1  ;;  %v17346_v55 = vld [vmem:[#allocation80_spill] sm:$0xff] }
 0x3e8   :  { %17341 = vst [vmem:[#allocation5_spill] sm:$0xff] %v15590_v42  ;;  %10231 = vmatpush3.bf16.msra.mxu1 %v17342_v5  ;;  %v5229_v40 = vadd.f32 %v5228_v59, %v15588_v36  ;;  %v5037_v50 = vmax.f32 %v5003_v33, 0.0  ;;  %v5321_v1 = vmax.f32 %v5291_v41, 0.0  ;;  %v17348_v41 = vld [vmem:[#allocation85_spill] sm:$0xff]  ;;  %v17349_v5 = vld [vmem:[#allocation55_spill] sm:$0xff] }
 0x3e9   :  { %10232 = vmatprep.subr.bf16.mxu1 %v17343_v18  ;;  %v5230_v56 = vpop.f32.mrf.mxu0  ;;  %v5293_v38 = vpop.f32.mrf.mxu1 }
 0x3ea   :  { %v5294_v44 = vadd.f32 %v5293_v38, %v5229_v40  ;;  %v15595_v15 = vpack.c.bf16 %v5037_v50, %v5036_v30 }
 0x3eb   :  { %6100 = vmatmul.mubr.bf16.gmra.mxu1 %v15478_v2  ;;  %11200 = vmatmul.mubr.msk.bf16.vlgmr.msra.gmra.mxu0 %vm5178_vm0, %v15484_v10  ;;  %v5233_v23 = vpop.f32.mrf.mxu0  ;;  %v11121_v35 = vpop.f32.mrf.mxu1 }
 0x3ec   :  { %17344 = vst [vmem:[#allocation42_spill] sm:$0xff] %v15595_v15  ;;  %v5322_v58 = vmax.f32 %v5294_v44, 0.0  ;;  %10233 = vmatpush3.bf16.msra.mxu1 %v17232_v0  ;;  %6332 = vmatpush1.bf16.msra.mxu0 %v17345_v22  ;;  %v5234_v45 = vadd.f32 %v5233_v23, %v15554_v26 }
 0x3ed   :  { %10234 = vmatprep.subr.bf16.mxu1 %v17346_v55  ;;  %v5235_v38 = vpop.f32.mrf.mxu0  ;;  %6333 = vmatprep.subr.bf16.mxu0 %v17170_v62  ;;  %v5306_v50 = vpop.f32.mrf.mxu1  ;;  %v17351_v55 = vld [vmem:[#allocation12_spill] sm:$0xff] }
 0x3ee   :  { %v15605_v33 = vpack.c.bf16 %v5322_v58, %v5321_v1  ;;  %v5299_v59 = vadd.f32 %v11117_v14, %v5234_v45  ;;  %6217 = vmatprep.mubr.bf16.mxu1 %v15500_v37  ;;  %11203 = vmatprep.mubr.msk.bf16.mxu0 %vm5178_vm0, %v15506_v46  ;;  %v17350_v58 = vld [vmem:[#allocation73_spill] sm:$0xff] }
 0x3ef   :  { %v5236_v44 = vpop.f32.mrf.mxu0  ;;  %v11122_v0 = vpop.f32.mrf.mxu1 }
 0x3f0   :  { %17347 = vst [vmem:[#allocation65_spill] sm:$0xff] %v15605_v33  ;;  %10235 = vmatpush3.bf16.msra.mxu1 %v17306_v39  ;;  %6334 = vmatpush1.bf16.msra.mxu0 %v17348_v41  ;;  %v5237_v30 = vadd.f32 %v5236_v44, %v15568_v9  ;;  %v5323_v39 = vmax.f32 %v5299_v59, 0.0 }
 0x3f1   :  { %11207 = vmatprep.subr.bf16.mxu1 %v17349_v5  ;;  %v5238_v40 = vpop.f32.mrf.mxu0  ;;  %6335 = vmatprep.subr.bf16.mxu0 %v17170_v62  ;;  %v5309_v18 = vpop.f32.mrf.mxu1 }
 0x3f2   :  { %v5302_v14 = vadd.f32 %v11118_v57, %v5237_v30  ;;  %v17353_v40 = vld [vmem:[#allocation83_spill] sm:$0xff] }
 0x3f3   :  { %6218 = vmatmul.mubr.bf16.vlgmr.msra.gmra.mxu1 %v15375_v34  ;;  %v5241_v56 = vpop.f32.mrf.mxu0  ;;  %v15616_v23 = vpop.f32.mrf.mxu1  ;;  %11204 = vmatmul.mubr.msk.bf16.gmra.mxu0 %vm5178_vm0, %v15525_v20 }
 0x3f4   :  { %v5324_v1 = vmax.f32 %v5302_v14, 0.0  ;;  %6336 = vmatpush1.bf16.msra.mxu0 %v17350_v58  ;;  %11208 = vmatpush3.bf16.msra.mxu1 %v17349_v5  ;;  %v5242_v45 = vadd.f32 %v5241_v56, %v15540_v53  ;;  %v17354_v56 = vld [vmem:[#allocation13_spill] sm:$0xff] }
 0x3f5   :  { %11209 = vmatprep.subr.bf16.mxu1 %v17351_v55  ;;  %v5243_v38 = vpop.f32.mrf.mxu0  ;;  %6337 = vmatprep.subr.bf16.mxu0 %v17170_v62  ;;  %v5432_v30 = vpop.f32.mrf.mxu1 }
 0x3f6   :  { %v15625_v57 = vpack.c.bf16 %v5324_v1, %v5323_v39  ;;  %v5307_v44 = vadd.f32 %v5306_v50, %v5242_v45  ;;  %6225 = vmatprep.mubr.bf16.mxu1 %v15387_v61  ;;  %6359 = vmatprep.mubr.bf16.mxu0 %v15500_v37 }
 0x3f7   :  { %v5244_v59 = vpop.f32.mrf.mxu0  ;;  %v15635_v1 = vpop.f32.mrf.mxu1 }
 0x3f8   :  { %17352 = vst [vmem:[#allocation4_spill] sm:$0xff] %v15625_v57  ;;  %6338 = vmatpush1.bf16.msra.mxu0 %v17353_v40  ;;  %11210 = vmatpush3.bf16.msra.mxu1 %v17351_v55  ;;  %v5245_v14 = vadd.f32 %v5244_v59, %v15549_v43  ;;  %v5325_v45 = vmax.f32 %v5307_v44, 0.0 }
 0x3f9   :  { %10272 = vmatprep.subr.bf16.mxu1 %v17354_v56  ;;  %v5246_v58 = vpop.f32.mrf.mxu0  ;;  %6339 = vmatprep.subr.bf16.mxu0 %v17170_v62 }
 0x3fa   :  { %v5310_v39 = vadd.f32 %v5309_v18, %v5245_v14  ;;  %v5435_v14 = vpop.f32.mrf.mxu1 }
 0x3fb   :  { %6226 = vmatmul.mubr.bf16.gmra.mxu1 %v15409_v3  ;;  %v5249_v50 = vpop.f32.mrf.mxu0 }
 0x3fc   :  { %v5326_v38 = vmax.f32 %v5310_v39, 0.0  ;;  %6340 = vmatpush1.bf16.msra.mxu0 %v17170_v62  ;;  %v5250_v40 = vadd.f32 %v5249_v50, %v15512_v24  ;;  %6233 = vmatprep.mubr.bf16.mxu1 %v15421_v8  ;;  %v15647_v42 = vpop.f32.mrf.mxu1 }
 0x3fd   :  { %v5251_v59 = vpop.f32.mrf.mxu0  ;;  %6341 = vmatprep.subr.bf16.mxu0 %v17170_v62 }
 0x3fe   :  { %v15641_v58 = vpack.c.bf16 %v5326_v38, %v5325_v45  ;;  %v5315_v33 = vadd.f32 %v11121_v35, %v5250_v40  ;;  %v17356_v45 = vld [vmem:[#allocation106_spill] sm:$0xff] }
 0x3ff   :  { %v5252_v18 = vpop.f32.mrf.mxu0 }
 0x400   :  { %17355 = vst [vmem:[#allocation70_spill] sm:$0xff] %v15641_v58  ;;  %6342 = vmatpush1.bf16.msra.mxu0 %v17170_v62  ;;  %v5253_v57 = vadd.f32 %v5252_v18, %v15531_v4  ;;  %v5327_v59 = vmax.f32 %v5315_v33, 0.0 }
 0x401   :  { %v5254_v44 = vpop.f32.mrf.mxu0  ;;  %6343 = vmatprep.subr.bf16.mxu0 %v17170_v62 }
 0x402   :  { %v5318_v39 = vadd.f32 %v11122_v0, %v5253_v57  ;;  %v5448_v44 = vpop.f32.mrf.mxu1  ;;  %v17358_v57 = vld [vmem:[#allocation104_spill] sm:$0xff] }
 0x403   :  { %6234 = vmatmul.mubr.bf16.gmra.mxu1 %v15439_v29  ;;  %v10000_v50 = vpop.f32.mrf.mxu0 }
 0x404   :  { %v5328_v15 = vmax.f32 %v5318_v39, 0.0  ;;  %6344 = vmatpush2.bf16.msra.mxu0 %v17356_v45  ;;  %6241 = vmatprep.mubr.bf16.mxu1 %v15451_v12  ;;  %v15658_v28 = vpop.f32.mrf.mxu1 }
 0x405   :  { %v10001_v35 = vpop.f32.mrf.mxu0  ;;  %6345 = vmatprep.subr.bf16.mxu0 %v17170_v62 }
 0x406   :  { %v15652_v38 = vpack.c.bf16 %v5328_v15, %v5327_v59  ;;  %v10002_v40 = vadd.f32 %v10001_v35, %v10000_v50 }
 0x407   :  { %v10003_v18 = vpop.f32.mrf.mxu0 }
 0x408   :  { %17357 = vst [vmem:[#allocation88_spill] sm:$0xff] %v15652_v38  ;;  %v5368_v0 = vadd.f32 %v10002_v40, %v15576_v47  ;;  %6346 = vmatpush2.bf16.msra.mxu0 %v17358_v57 }
 0x409   :  { %v10004_v58 = vpop.f32.mrf.mxu0  ;;  %6347 = vmatprep.subr.bf16.mxu0 %v17170_v62 }
 0x40a   :  { %v5433_v33 = vadd.f32 %v5432_v30, %v5368_v0  ;;  %v10005_v39 = vadd.f32 %v10004_v58, %v10003_v18  ;;  %v5451_v30 = vpop.f32.mrf.mxu1 }
 0x40b   :  { %6242 = vmatmul.mubr.bf16.gmra.mxu1 %v15478_v2  ;;  %v10006_v54 = vpop.f32.mrf.mxu0 }
 0x40c   :  { %v5371_v15 = vadd.f32 %v10005_v39, %v15588_v36  ;;  %6348 = vmatpush2.bf16.msra.mxu0 %v17170_v62  ;;  %11211 = vmatprep.mubr.msk.bf16.mxu1 %vm5178_vm0, %v15458_v63  ;;  %v5463_v58 = vmax.f32 %v5433_v33, 0.0 }
 0x40d   :  { %v10007_v50 = vpop.f32.mrf.mxu0  ;;  %6349 = vmatprep.subr.bf16.mxu0 %v17170_v62 }
 0x40e   :  { %v5436_v59 = vadd.f32 %v5435_v14, %v5371_v15  ;;  %v10008_v35 = vadd.f32 %v10007_v50, %v10006_v54  ;;  %v17360_v15 = vld [vmem:[#allocation99_spill] sm:$0xff]  ;;  %v17361_v50 = vld [vmem:[#allocation17_spill] sm:$0xff] }
 0x40f   :  { %v10009_v40 = vpop.f32.mrf.mxu0 }
 0x410   :  { %v5464_v18 = vmax.f32 %v5436_v59, 0.0  ;;  %v5376_v0 = vadd.f32 %v10008_v35, %v15554_v26  ;;  %6350 = vmatpush2.bf16.msra.mxu0 %v17170_v62 }
 0x411   :  { %v10010_v38 = vpop.f32.mrf.mxu0  ;;  %6351 = vmatprep.subr.bf16.mxu0 %v17170_v62 }
 0x412   :  { %v5441_v39 = vadd.f32 %v15616_v23, %v5376_v0  ;;  %v10011_v16 = vadd.f32 %v10010_v38, %v10009_v40  ;;  %v15669_v56 = vpack.c.bf16 %v5464_v18, %v5463_v58 }
 0x413   :  { %11212 = vmatmul.mubr.msk.bf16.vlgmr.msra.gmra.mxu1 %vm5178_vm0, %v15484_v10  ;;  %v10046_v54 = vpop.f32.mrf.mxu1  ;;  %v10012_v14 = vpop.f32.mrf.mxu0 }
 0x414   :  { %17359 = vst [vmem:[#allocation6_spill] sm:$0xff] %v15669_v56  ;;  %v5379_v33 = vadd.f32 %v10011_v16, %v15568_v9  ;;  %10273 = vmatpush3.bf16.msra.mxu1 %v17360_v15  ;;  %6352 = vmatpush2.bf16.msra.mxu0 %v17360_v15  ;;  %v5465_v16 = vmax.f32 %v5441_v39, 0.0  ;;  %v17362_v15 = vld [vmem:[#allocation98_spill] sm:$0xff] }
 0x415   :  { %10274 = vmatprep.subr.bf16.mxu1 %v17361_v50  ;;  %v10047_v59 = vpop.f32.mrf.mxu1  ;;  %v10013_v35 = vpop.f32.mrf.mxu0  ;;  %6353 = vmatprep.subr.bf16.mxu0 %v17170_v62 }
 0x416   :  { %v5444_v23 = vadd.f32 %v15635_v1, %v5379_v33  ;;  %v10048_v38 = vadd.f32 %v10047_v59, %v10046_v54  ;;  %v10014_v40 = vadd.f32 %v10013_v35, %v10012_v14  ;;  %11215 = vmatprep.mubr.msk.bf16.mxu1 %vm5178_vm0, %v15506_v46 }
 0x417   :  { %v10049_v58 = vpop.f32.mrf.mxu1  ;;  %v10015_v18 = vpop.f32.mrf.mxu0 }
 0x418   :  { %v5466_v0 = vmax.f32 %v5444_v23, 0.0  ;;  %v5384_v56 = vadd.f32 %v10014_v40, %v15540_v53  ;;  %10275 = vmatpush3.bf16.msra.mxu1 %v17362_v15  ;;  %6354 = vmatpush2.bf16.msra.mxu0 %v17362_v15  ;;  %v17364_v23 = vld [vmem:[#allocation97_spill] sm:$0xff]  ;;  %v5510_v57 = vadd.f32 %v10048_v38, %v15576_v47 }
 0x419   :  { %10276 = vmatprep.subr.bf16.mxu1 %v17349_v5  ;;  %v10050_v50 = vpop.f32.mrf.mxu1  ;;  %v10016_v52 = vpop.f32.mrf.mxu0  ;;  %6355 = vmatprep.subr.bf16.mxu0 %v17170_v62 }
 0x41a   :  { %v5449_v1 = vadd.f32 %v5448_v44, %v5384_v56  ;;  %v10051_v54 = vadd.f32 %v10050_v50, %v10049_v58  ;;  %v10017_v14 = vadd.f32 %v10016_v52, %v10015_v18  ;;  %v15686_v33 = vpack.c.bf16 %v5466_v0, %v5465_v16 }
 0x41b   :  { %v10052_v59 = vpop.f32.mrf.mxu1  ;;  %v10018_v39 = vpop.f32.mrf.mxu0  ;;  %11216 = vmatmul.mubr.msk.bf16.gmra.mxu1 %vm5178_vm0, %v15525_v20 }
 0x41c   :  { %17363 = vst [vmem:[#allocation9_spill] sm:$0xff] %v15686_v33  ;;  %v5387_v35 = vadd.f32 %v10017_v14, %v15549_v43  ;;  %10277 = vmatpush3.bf16.msra.mxu1 %v17289_v32  ;;  %6356 = vmatpush2.bf16.msra.mxu0 %v17364_v23  ;;  %v5467_v18 = vmax.f32 %v5449_v1, 0.0  ;;  %v17365_v14 = vld [vmem:[#allocation96_spill] sm:$0xff]  ;;  %v17366_v23 = vld [vmem:[#allocation107_spill] sm:$0xff]  ;;  %v17367_v33 = vld [vmem:[#allocation18_spill] sm:$0xff] }
 0x41d   :  { %10278 = vmatprep.subr.bf16.mxu1 %v17351_v55  ;;  %v10053_v40 = vpop.f32.mrf.mxu1  ;;  %v10019_v15 = vpop.f32.mrf.mxu0  ;;  %6357 = vmatprep.subr.bf16.mxu0 %v17170_v62 }
 0x41e   :  { %v5452_v52 = vadd.f32 %v5451_v30, %v5387_v35  ;;  %v10054_v56 = vadd.f32 %v10053_v40, %v10052_v59  ;;  %v10020_v44 = vadd.f32 %v10019_v15, %v10018_v39  ;;  %6501 = vmatprep.mubr.bf16.mxu1 %v15500_v37 }
 0x41f   :  { %v10055_v50 = vpop.f32.mrf.mxu1  ;;  %v10021_v58 = vpop.f32.mrf.mxu0 }
 0x420   :  { %v5468_v16 = vmax.f32 %v5452_v52, 0.0  ;;  %v5392_v0 = vadd.f32 %v10020_v44, %v15512_v24  ;;  %10279 = vmatpush3.bf16.msra.mxu1 %v17295_v31  ;;  %6358 = vmatpush2.bf16.msra.mxu0 %v17365_v14  ;;  %v5518_v59 = vadd.f32 %v10054_v56, %v15554_v26  ;;  %v17369_v14 = vld [vmem:[#allocation86_spill] sm:$0xff]  ;;  %v17370_v56 = vld [vmem:[#allocation105_spill] sm:$0xff] }
 0x421   :  { %10280 = vmatprep.subr.bf16.mxu1 %v17366_v23  ;;  %11219 = vmatprep.subr.bf16.mxu0 %v17367_v33  ;;  %v10056_v27 = vpop.f32.mrf.mxu1  ;;  %v10022_v30 = vpop.f32.mrf.mxu0 }
 0x422   :  { %v5457_v39 = vadd.f32 %v15647_v42, %v5392_v0  ;;  %v10057_v35 = vadd.f32 %v10056_v27, %v10055_v50  ;;  %v10023_v40 = vadd.f32 %v10022_v30, %v10021_v58  ;;  %v15703_v1 = vpack.c.bf16 %v5468_v16, %v5467_v18  ;;  %v17371_v42 = vld [vmem:[#allocation21_spill] sm:$0xff] }
 0x423   :  { %6360 = vmatmul.mubr.bf16.vlgmr.msra.gmra.mxu0 %v15375_v34  ;;  %v10058_v15 = vpop.f32.mrf.mxu1  ;;  %v11141_v52 = vpop.f32.mrf.mxu0 }
 0x424   :  { %17368 = vst [vmem:[#allocation69_spill] sm:$0xff] %v15703_v1  ;;  %v5395_v44 = vadd.f32 %v10023_v40, %v15531_v4  ;;  %10281 = vmatpush3.bf16.msra.mxu1 %v17369_v14  ;;  %11220 = vmatpush3.bf16.msra.mxu0 %v17367_v33  ;;  %v5583_v51 = vadd.f32 %v11141_v52, %v5518_v59  ;;  %v5469_v14 = vmax.f32 %v5457_v39, 0.0  ;;  %v17372_v52 = vld [vmem:[#allocation87_spill] sm:$0xff] }
 0x425   :  { %10282 = vmatprep.subr.bf16.mxu1 %v17370_v56  ;;  %11221 = vmatprep.subr.bf16.mxu0 %v17371_v42  ;;  %v10059_v27 = vpop.f32.mrf.mxu1  ;;  %v5574_v50 = vpop.f32.mrf.mxu0  ;;  %v5521_v0 = vadd.f32 %v10057_v35, %v15568_v9  ;;  %v5513_v1 = vadd.f32 %v10051_v54, %v15588_v36 }
 0x426   :  { %v5460_v58 = vadd.f32 %v15658_v28, %v5395_v44  ;;  %v10060_v18 = vadd.f32 %v10059_v27, %v10058_v15  ;;  %v5575_v16 = vadd.f32 %v5574_v50, %v5510_v57  ;;  %6367 = vmatprep.mubr.bf16.mxu0 %v15387_v61  ;;  %v5607_v45 = vmax.f32 %v5583_v51, 0.0  ;;  %v17374_v28 = vld [vmem:[#allocation11_spill] sm:$0xff]  ;;  %v17376_v51 = vld [vmem:[#allocation100_spill] sm:$0xff] }
 0x427   :  { %v10061_v30 = vpop.f32.mrf.mxu1  ;;  %v11142_v40 = vpop.f32.mrf.mxu0 }
 0x428   :  { %v5470_v59 = vmax.f32 %v5460_v58, 0.0  ;;  %10283 = vmatpush3.bf16.msra.mxu1 %v17372_v52  ;;  %11222 = vmatpush3.bf16.msra.mxu0 %v17371_v42  ;;  %v5586_v38 = vadd.f32 %v11142_v40, %v5521_v0  ;;  %v5605_v52 = vmax.f32 %v5575_v16, 0.0  ;;  %v17378_v16 = vld [vmem:[#allocation14_spill] sm:$0xff] }
 0x429   :  { %10284 = vmatprep.subr.bf16.mxu1 %v17373_v13  ;;  %11231 = vmatprep.subr.bf16.mxu0 %v17374_v28  ;;  %v10062_v57 = vpop.f32.mrf.mxu1  ;;  %v5577_v35 = vpop.f32.mrf.mxu0  ;;  %v5526_v13 = vadd.f32 %v10060_v18, %v15540_v53 }
 0x42a   :  { %v5608_v15 = vmax.f32 %v5586_v38, 0.0  ;;  %v10063_v44 = vadd.f32 %v10062_v57, %v10061_v30  ;;  %v5578_v27 = vadd.f32 %v5577_v35, %v5513_v1  ;;  %v15720_v50 = vpack.c.bf16 %v5470_v59, %v5469_v14 }
 0x42b   :  { %6368 = vmatmul.mubr.bf16.gmra.mxu0 %v15409_v3  ;;  %v10064_v39 = vpop.f32.mrf.mxu1  ;;  %v11145_v58 = vpop.f32.mrf.mxu0 }
 0x42c   :  { %v15723_v0 = vpack.c.bf16 %v5608_v15, %v5607_v45  ;;  %v5606_v54 = vmax.f32 %v5578_v27, 0.0  ;;  %10285 = vmatpush3.bf16.msra.mxu1 %v17345_v22  ;;  %6375 = vmatprep.mubr.bf16.mxu0 %v15421_v8  ;;  %v5529_v22 = vadd.f32 %v10063_v44, %v15549_v43 }
 0x42d   :  { %10286 = vmatprep.subr.bf16.mxu1 %v17376_v51  ;;  %v10065_v30 = vpop.f32.mrf.mxu1  ;;  %v5590_v1 = vpop.f32.mrf.mxu0 }
 0x42e   :  { %17375 = vst [vmem:[#allocation89_spill] sm:$0xff] %v15723_v0  ;;  %v10066_v40 = vadd.f32 %v10065_v30, %v10064_v39  ;;  %v5591_v14 = vadd.f32 %v5590_v1, %v5526_v13  ;;  %v15729_v59 = vpack.c.bf16 %v5606_v54, %v5605_v52 }
 0x42f   :  { %v10067_v38 = vpop.f32.mrf.mxu1  ;;  %v11146_v57 = vpop.f32.mrf.mxu0 }
 0x430   :  { %17377 = vst [vmem:[#allocation7_spill] sm:$0xff] %v15729_v59  ;;  %v5534_v45 = vadd.f32 %v10066_v40, %v15512_v24  ;;  %10287 = vmatpush3.bf16.msra.mxu1 %v17348_v41  ;;  %v5609_v54 = vmax.f32 %v5591_v14, 0.0  ;;  %v17379_v41 = vld [vmem:[#allocation19_spill] sm:$0xff] }
 0x431   :  { %10318 = vmatprep.subr.bf16.mxu1 %v17378_v16  ;;  %v10068_v18 = vpop.f32.mrf.mxu1  ;;  %v5593_v35 = vpop.f32.mrf.mxu0 }
 0x432   :  { %v5599_v15 = vadd.f32 %v11145_v58, %v5534_v45  ;;  %v10069_v27 = vadd.f32 %v10068_v18, %v10067_v38  ;;  %v5594_v51 = vadd.f32 %v5593_v35, %v5529_v22 }
 0x433   :  { %6502 = vmatmul.mubr.bf16.vlgmr.msra.gmra.mxu1 %v15375_v34  ;;  %6376 = vmatmul.mubr.bf16.gmra.mxu0 %v15439_v29  ;;  %v10092_v39 = vpop.f32.mrf.mxu1  ;;  %v11153_v52 = vpop.f32.mrf.mxu0 }
 0x434   :  { %v5537_v13 = vadd.f32 %v10069_v27, %v15531_v4  ;;  %v5610_v30 = vmax.f32 %v5594_v51, 0.0  ;;  %10319 = vmatpush3.bf16.msra.mxu1 %v17366_v23  ;;  %6509 = vmatprep.mubr.bf16.mxu1 %v15387_v61  ;;  %v5611_v45 = vmax.f32 %v5599_v15, 0.0 }
 0x435   :  { %10320 = vmatprep.subr.bf16.mxu1 %v17379_v41  ;;  %v10093_v44 = vpop.f32.mrf.mxu1  ;;  %v5716_v58 = vpop.f32.mrf.mxu0  ;;  %6383 = vmatprep.mubr.bf16.mxu0 %v15451_v12 }
 0x436   :  { %v5602_v1 = vadd.f32 %v11146_v57, %v5537_v13  ;;  %v10094_v34 = vadd.f32 %v10093_v44, %v10092_v39  ;;  %v15742_v40 = vpack.c.bf16 %v5610_v30, %v5609_v54 }
 0x437   :  { %v10095_v38 = vpop.f32.mrf.mxu1  ;;  %v11154_v61 = vpop.f32.mrf.mxu0 }
 0x438   :  { %17380 = vst [vmem:[#allocation10_spill] sm:$0xff] %v15742_v40  ;;  %v5652_v14 = vadd.f32 %v10094_v34, %v15576_v47  ;;  %10321 = vmatpush3.bf16.msra.mxu1 %v17370_v56  ;;  %v5612_v22 = vmax.f32 %v5602_v1, 0.0  ;;  %v17382_v1 = vld [vmem:[#allocation110_spill] sm:$0xff] }
 0x439   :  { %10322 = vmatprep.subr.bf16.mxu1 %v17367_v33  ;;  %v10096_v23 = vpop.f32.mrf.mxu1  ;;  %v5719_v56 = vpop.f32.mrf.mxu0 }
 0x43a   :  { %v5717_v18 = vadd.f32 %v5716_v58, %v5652_v14  ;;  %v10097_v35 = vadd.f32 %v10096_v23, %v10095_v38  ;;  %v15747_v27 = vpack.c.bf16 %v5612_v22, %v5611_v45 }
 0x43b   :  { %6510 = vmatmul.mubr.bf16.gmra.mxu1 %v15409_v3  ;;  %6384 = vmatmul.mubr.bf16.gmra.mxu0 %v15478_v2  ;;  %v10098_v57 = vpop.f32.mrf.mxu1  ;;  %v11157_v3 = vpop.f32.mrf.mxu0 }
 0x43c   :  { %17381 = vst [vmem:[#allocation33_spill] sm:$0xff] %v15747_v27  ;;  %v5655_v15 = vadd.f32 %v10097_v35, %v15588_v36  ;;  %10323 = vmatpush3.bf16.msra.mxu1 %v17300_v17  ;;  %6517 = vmatprep.mubr.bf16.mxu1 %v15421_v8  ;;  %v5747_v30 = vmax.f32 %v5717_v18, 0.0  ;;  %v17384_v18 = vld [vmem:[#allocation109_spill] sm:$0xff]  ;;  %v17385_v35 = vld [vmem:[#allocation8_spill] sm:$0xff] }
 0x43d   :  { %10324 = vmatprep.subr.bf16.mxu1 %v17371_v42  ;;  %v10099_v51 = vpop.f32.mrf.mxu1  ;;  %11223 = vmatprep.mubr.msk.bf16.mxu0 %vm5178_vm0, %v15458_v63  ;;  %v5732_v22 = vpop.f32.mrf.mxu0 }
 0x43e   :  { %v5720_v39 = vadd.f32 %v5719_v56, %v5655_v15  ;;  %v10100_v54 = vadd.f32 %v10099_v51, %v10098_v57 }
 0x43f   :  { %v10101_v13 = vpop.f32.mrf.mxu1  ;;  %v11158_v56 = vpop.f32.mrf.mxu0 }
 0x440   :  { %v5748_v44 = vmax.f32 %v5720_v39, 0.0  ;;  %v5660_v58 = vadd.f32 %v10100_v54, %v15554_v26  ;;  %10325 = vmatpush3.bf16.msra.mxu1 %v17319_v25  ;;  %v17386_v54 = vld [vmem:[#allocation108_spill] sm:$0xff] }
 0x441   :  { %10326 = vmatprep.subr.bf16.mxu1 %v17382_v1  ;;  %v10102_v8 = vpop.f32.mrf.mxu1 }
 0x442   :  { %v5725_v34 = vadd.f32 %v11153_v52, %v5660_v58  ;;  %v10103_v38 = vadd.f32 %v10102_v8, %v10101_v13  ;;  %v15760_v45 = vpack.c.bf16 %v5748_v44, %v5747_v30  ;;  %v17387_v13 = vld [vmem:[#allocation26_spill] sm:$0xff]  ;;  %v5735_v58 = vpop.f32.mrf.mxu0 }
 0x443   :  { %6518 = vmatmul.mubr.bf16.gmra.mxu1 %v15439_v29  ;;  %11224 = vmatmul.mubr.msk.bf16.vlgmr.msra.gmra.mxu0 %vm5178_vm0, %v15484_v10  ;;  %v10104_v14 = vpop.f32.mrf.mxu1 }
 0x444   :  { %17383 = vst [vmem:[#allocation91_spill] sm:$0xff] %v15760_v45  ;;  %v5663_v23 = vadd.f32 %v10103_v38, %v15568_v9  ;;  %10327 = vmatpush3.bf16.msra.mxu1 %v17299_v49  ;;  %11232 = vmatpush3.bf16.msra.mxu0 %v17374_v28  ;;  %v5749_v51 = vmax.f32 %v5725_v34, 0.0  ;;  %v17388_v34 = vld [vmem:[#allocation25_spill] sm:$0xff] }
 0x445   :  { %10328 = vmatprep.subr.bf16.mxu1 %v17384_v18  ;;  %11233 = vmatprep.subr.bf16.mxu0 %v17385_v35  ;;  %v10105_v52 = vpop.f32.mrf.mxu1 }
 0x446   :  { %v5728_v57 = vadd.f32 %v11154_v61, %v5663_v23  ;;  %v10106_v15 = vadd.f32 %v10105_v52, %v10104_v14  ;;  %6525 = vmatprep.mubr.bf16.mxu1 %v15451_v12  ;;  %11227 = vmatprep.mubr.msk.bf16.mxu0 %vm5178_vm0, %v15506_v46 }
 0x447   :  { %v10107_v29 = vpop.f32.mrf.mxu1 }
 0x448   :  { %10329 = vmatpush3.bf16.msra.mxu1 %v17302_v21  ;;  %11234 = vmatpush3.bf16.msra.mxu0 %v17385_v35  ;;  %v5668_v49 = vadd.f32 %v10106_v15, %v15540_v53  ;;  %v5750_v39 = vmax.f32 %v5728_v57, 0.0 }
 0x449   :  { %10330 = vmatprep.subr.bf16.mxu1 %v17386_v54  ;;  %10364 = vmatprep.subr.bf16.mxu0 %v17387_v13  ;;  %v10108_v61 = vpop.f32.mrf.mxu1 }
 0x44a   :  { %v10109_v30 = vadd.f32 %v10108_v61, %v10107_v29  ;;  %v5733_v12 = vadd.f32 %v5732_v22, %v5668_v49  ;;  %v15778_v44 = vpack.c.bf16 %v5750_v39, %v5749_v51  ;;  %v17391_v61 = vld [vmem:[#allocation114_spill] sm:$0xff] }
 0x44b   :  { %6526 = vmatmul.mubr.bf16.gmra.mxu1 %v15478_v2  ;;  %11228 = vmatmul.mubr.msk.bf16.gmra.mxu0 %vm5178_vm0, %v15525_v20  ;;  %v10110_v21 = vpop.f32.mrf.mxu1 }
 0x44c   :  { %10331 = vmatpush3.bf16.msra.mxu1 %v17289_v32  ;;  %v5671_v8 = vadd.f32 %v10109_v30, %v15549_v43  ;;  %6643 = vmatprep.mubr.bf16.mxu1 %v15500_v37  ;;  %v5751_v52 = vmax.f32 %v5733_v12, 0.0  ;;  %v17389_v32 = vld [vmem:[#allocation57_spill] sm:$0xff] }
 0x44d   :  { %10332 = vmatprep.subr.bf16.mxu1 %v17388_v34  ;;  %v10111_v38 = vpop.f32.mrf.mxu1  ;;  %11235 = vmatprep.mubr.msk.bf16.mxu0 %vm5178_vm0, %v15458_v63  ;;  %v15797_v63 = vld [vmem:[%s16766_s3] ss:$12 sps:$4 sm:$0xff]   ;;  %v15812_v12 = vld [vmem:[%s16766_s3 + $0x1c] ss:$12 sps:$4 sm:$0xff]  }
 0x44e   :  { %v10112_v14 = vadd.f32 %v10111_v38, %v10110_v21  ;;  %v5736_v22 = vadd.f32 %v5735_v58, %v5671_v8  ;;  %17392 = vst [vmem:[#allocation15_spill] sm:$0xff] %v15812_v12  ;;  %v15826_v58 = vld [vmem:[%s16766_s3 + $0x18] ss:$12 sps:$4 sm:$0xff]  }
 0x44f   :  { %v10113_v23 = vpop.f32.mrf.mxu1  ;;  %17393 = vst [vmem:[#allocation90_spill] sm:$0xff] %v15826_v58  ;;  %v17394_v34 = vld [vmem:[#allocation102_spill] sm:$0xff] }
 0x450   :  { %v5676_v57 = vadd.f32 %v10112_v14, %v15512_v24  ;;  %v5752_v15 = vmax.f32 %v5736_v22, 0.0  ;;  %10333 = vmatpush3.bf16.msra.mxu1 %v17295_v31  ;;  %v17396_v22 = vld [vmem:[#allocation112_spill] sm:$0xff] }
 0x451   :  { %11243 = vmatprep.subr.bf16.mxu1 %v17389_v32  ;;  %v10114_v29 = vpop.f32.mrf.mxu1 }
 0x452   :  { %v5741_v51 = vadd.f32 %v11157_v3, %v5676_v57  ;;  %v10115_v49 = vadd.f32 %v10114_v29, %v10113_v23  ;;  %v15792_v39 = vpack.c.bf16 %v5752_v15, %v5751_v52  ;;  %v17390_v3 = vld [vmem:[#allocation103_spill] sm:$0xff] }
 0x453   :  { %6644 = vmatmul.mubr.bf16.vlgmr.msra.gmra.mxu1 %v15797_v63  ;;  %11236 = vmatmul.mubr.msk.bf16.vlgmr.msra.gmra.mxu0 %vm5178_vm0, %v15484_v10  ;;  %v15802_v54 = vpop.f32.mrf.mxu1  ;;  %v15872_v57 = vld [vmem:[%s16766_s3 + $0x8] ss:$12 sps:$4 sm:$0xff]  }
 0x454   :  { %v5679_v31 = vadd.f32 %v10115_v49, %v15531_v4  ;;  %10365 = vmatpush3.bf16.msra.mxu0 %v17382_v1  ;;  %11244 = vmatpush3.bf16.msra.mxu1 %v17389_v32  ;;  %v5753_v21 = vmax.f32 %v5741_v51, 0.0 }
 0x455   :  { %10366 = vmatprep.subr.bf16.mxu0 %v17390_v3  ;;  %11245 = vmatprep.subr.bf16.mxu1 %v17391_v61  ;;  %v5858_v10 = vpop.f32.mrf.mxu1 }
 0x456   :  { %v5744_v30 = vadd.f32 %v11158_v56, %v5679_v31  ;;  %6651 = vmatprep.mubr.bf16.mxu1 %v15812_v12  ;;  %11239 = vmatprep.mubr.msk.bf16.mxu0 %vm5178_vm0, %v15506_v46 }
 0x457   :  { %v15831_v46 = vpop.f32.mrf.mxu1 }
 0x458   :  { %10367 = vmatpush3.bf16.msra.mxu0 %v17384_v18  ;;  %11246 = vmatpush3.bf16.msra.mxu1 %v17391_v61  ;;  %v5754_v1 = vmax.f32 %v5744_v30, 0.0  ;;  %v15837_v18 = vld [vmem:[%s16766_s3 + $0x34] ss:$12 sps:$4 sm:$0xff]  }
 0x459   :  { %10368 = vmatprep.subr.bf16.mxu0 %v17374_v28  ;;  %11255 = vmatprep.subr.bf16.mxu1 %v15381_v7  ;;  %v5861_v8 = vpop.f32.mrf.mxu1  ;;  %v15884_v30 = vld [vmem:[%s16766_s3 + $0x20] ss:$12 sps:$4 sm:$0xff]  }
 0x45a   :  { %v15821_v56 = vpack.c.bf16 %v5754_v1, %v5753_v21 }
 0x45b   :  { %6652 = vmatmul.mubr.bf16.gmra.mxu1 %v15826_v58  ;;  %11240 = vmatmul.mubr.msk.bf16.gmra.mxu0 %vm5178_vm0, %v15525_v20  ;;  %v15850_v38 = vpop.f32.mrf.mxu1 }
 0x45c   :  { %10369 = vmatpush3.bf16.msra.mxu0 %v17324_v60  ;;  %6659 = vmatprep.mubr.bf16.mxu1 %v15837_v18  ;;  %v15847_v60 = vld [vmem:[%s16766_s3 + $0x30] ss:$12 sps:$4 sm:$0xff]  }
 0x45d   :  { %10370 = vmatprep.subr.bf16.mxu0 %v17385_v35  ;;  %6785 = vmatprep.mubr.bf16.mxu0 %v15500_v37  ;;  %v15856_v37 = vld [vmem:[%s16766_s3 + $0x4c] ss:$12 sps:$4 sm:$0xff]   ;;  %v15860_v14 = vpop.f32.mrf.mxu1 }
 0x45f   :  { %v15865_v52 = vpop.f32.mrf.mxu1 }
 0x460   :  { %10371 = vmatpush3.bf16.msra.mxu0 %v17332_v48  ;;  %v17395_v48 = vld [vmem:[#allocation113_spill] sm:$0xff] }
 0x461   :  { %10372 = vmatprep.subr.bf16.mxu0 %v17394_v34  ;;  %v5877_v51 = vpop.f32.mrf.mxu1 }
 0x463   :  { %6660 = vmatmul.mubr.bf16.gmra.mxu1 %v15847_v60 }
 0x464   :  { %10373 = vmatpush3.bf16.msra.mxu0 %v17323_v19  ;;  %6667 = vmatprep.mubr.bf16.mxu1 %v15856_v37 }
 0x465   :  { %10374 = vmatprep.subr.bf16.mxu0 %v17395_v48 }
 0x468   :  { %10375 = vmatpush3.bf16.msra.mxu0 %v17327_v6  ;;  %v17397_v6 = vld [vmem:[#allocation111_spill] sm:$0xff] }
 0x469   :  { %10376 = vmatprep.subr.bf16.mxu0 %v17396_v22 }
 0x46b   :  { %6668 = vmatmul.mubr.bf16.gmra.mxu1 %v15478_v2  ;;  %v5793_v23 = vpop.f32.mrf.mxu0 }
 0x46c   :  { %10377 = vmatpush3.bf16.msra.mxu0 %v17300_v17  ;;  %v5794_v19 = vadd.f32 %v5793_v23, %v15576_v47  ;;  %11247 = vmatprep.mubr.msk.bf16.mxu1 %vm5178_vm0, %v15872_v57 }
 0x46d   :  { %10378 = vmatprep.subr.bf16.mxu0 %v17397_v6  ;;  %v5795_v15 = vpop.f32.mrf.mxu0  ;;  %v15902_v6 = vld [vmem:[%s16766_s3 + $0x38] ss:$12 sps:$4 sm:$0xff]  }
 0x46e   :  { %v5859_v29 = vadd.f32 %v5858_v10, %v5794_v19 }
 0x46f   :  { %v5796_v2 = vpop.f32.mrf.mxu0 }
 0x470   :  { %10379 = vmatpush3.bf16.msra.mxu0 %v17319_v25  ;;  %v5797_v17 = vadd.f32 %v5796_v2, %v15588_v36  ;;  %v5889_v1 = vmax.f32 %v5859_v29, 0.0  ;;  %v17399_v2 = vld [vmem:[#allocation39_spill] sm:$0xff] }
 0x471   :  { %v5798_v49 = vpop.f32.mrf.mxu0  ;;  %6899 = vmatprep.subr.bf16.mxu0 %v17170_v62 }
 0x472   :  { %v5862_v31 = vadd.f32 %v5861_v8, %v5797_v17 }
 0x473   :  { %6786 = vmatmul.mubr.bf16.vlgmr.msra.gmra.mxu0 %v15797_v63  ;;  %11248 = vmatmul.mubr.msk.bf16.vlgmr.msra.gmra.mxu1 %vm5178_vm0, %v15884_v30  ;;  %v10144_v10 = vpop.f32.mrf.mxu1  ;;  %v5801_v21 = vpop.f32.mrf.mxu0 }
 0x474   :  { %v5890_v25 = vmax.f32 %v5862_v31, 0.0  ;;  %11256 = vmatpush3.bf16.msra.mxu1 %v15381_v7  ;;  %6900 = vmatpush1.bf16.msra.mxu0 %v17349_v5  ;;  %v5802_v8 = vadd.f32 %v5801_v21, %v15554_v26 }
 0x475   :  { %11257 = vmatprep.subr.bf16.mxu1 %v15396_v11  ;;  %v10145_v34 = vpop.f32.mrf.mxu1  ;;  %v5803_v48 = vpop.f32.mrf.mxu0  ;;  %6901 = vmatprep.subr.bf16.mxu0 %v17170_v62 }
 0x476   :  { %v15893_v22 = vpack.c.bf16 %v5890_v25, %v5889_v1  ;;  %v5867_v23 = vadd.f32 %v15802_v54, %v5802_v8  ;;  %v15896_v19 = vadd.f32 %v10145_v34, %v10144_v10  ;;  %6793 = vmatprep.mubr.bf16.mxu0 %v15812_v12  ;;  %11251 = vmatprep.mubr.msk.bf16.mxu1 %vm5178_vm0, %v15902_v6  ;;  %v17400_v34 = vld [vmem:[#allocation106_spill] sm:$0xff] }
 0x477   :  { %v10147_v15 = vpop.f32.mrf.mxu1  ;;  %v5804_v29 = vpop.f32.mrf.mxu0 }
 0x478   :  { %17398 = vst [vmem:[#allocation16_spill] sm:$0xff] %v15893_v22  ;;  %11258 = vmatpush3.bf16.msra.mxu1 %v15396_v11  ;;  %6902 = vmatpush1.bf16.msra.mxu0 %v17351_v55  ;;  %v5805_v54 = vadd.f32 %v5804_v29, %v15568_v9  ;;  %v5891_v25 = vmax.f32 %v5867_v23, 0.0 }
 0x479   :  { %10416 = vmatprep.subr.bf16.mxu1 %v17399_v2  ;;  %v10148_v17 = vpop.f32.mrf.mxu1  ;;  %v5806_v49 = vpop.f32.mrf.mxu0  ;;  %6903 = vmatprep.subr.bf16.mxu0 %v17170_v62 }
 0x47a   :  { %v5870_v31 = vadd.f32 %v15831_v46, %v5805_v54  ;;  %v15912_v10 = vadd.f32 %v10148_v17, %v10147_v15  ;;  %v17402_v17 = vld [vmem:[#allocation104_spill] sm:$0xff] }
 0x47b   :  { %6794 = vmatmul.mubr.bf16.gmra.mxu0 %v15826_v58  ;;  %11252 = vmatmul.mubr.msk.bf16.gmra.mxu1 %vm5178_vm0, %v15525_v20  ;;  %v10150_v21 = vpop.f32.mrf.mxu1  ;;  %v5809_v1 = vpop.f32.mrf.mxu0 }
 0x47c   :  { %v5892_v8 = vmax.f32 %v5870_v31, 0.0  ;;  %6904 = vmatpush1.bf16.msra.mxu0 %v17400_v34  ;;  %v5810_v48 = vadd.f32 %v5809_v1, %v15540_v53  ;;  %6801 = vmatprep.mubr.bf16.mxu0 %v15837_v18 }
 0x47d   :  { %v10151_v29 = vpop.f32.mrf.mxu1  ;;  %v5811_v2 = vpop.f32.mrf.mxu0  ;;  %6905 = vmatprep.subr.bf16.mxu0 %v17170_v62  ;;  %11259 = vmatprep.mubr.msk.bf16.mxu1 %vm5178_vm0, %v15872_v57 }
 0x47e   :  { %v15923_v46 = vpack.c.bf16 %v5892_v8, %v5891_v25  ;;  %v5875_v20 = vadd.f32 %v15860_v14, %v5810_v48  ;;  %v10152_v15 = vadd.f32 %v10151_v29, %v10150_v21  ;;  %v17403_v48 = vld [vmem:[#allocation23_spill] sm:$0xff] }
 0x47f   :  { %v10153_v23 = vpop.f32.mrf.mxu1  ;;  %v5812_v54 = vpop.f32.mrf.mxu0 }
 0x480   :  { %17401 = vst [vmem:[#allocation61_spill] sm:$0xff] %v15923_v46  ;;  %6906 = vmatpush1.bf16.msra.mxu0 %v17402_v17  ;;  %v5813_v49 = vadd.f32 %v5812_v54, %v15549_v43  ;;  %v5893_v21 = vmax.f32 %v5875_v20, 0.0  ;;  %v17404_v54 = vld [vmem:[#allocation67_spill] sm:$0xff] }
 0x481   :  { %v10154_v31 = vpop.f32.mrf.mxu1  ;;  %v5814_v1 = vpop.f32.mrf.mxu0  ;;  %6907 = vmatprep.subr.bf16.mxu0 %v17170_v62 }
 0x482   :  { %v5878_v34 = vadd.f32 %v5877_v51, %v5813_v49  ;;  %v10155_v2 = vadd.f32 %v10154_v31, %v10153_v23 }
 0x483   :  { %6802 = vmatmul.mubr.bf16.gmra.mxu0 %v15847_v60  ;;  %11260 = vmatmul.mubr.msk.bf16.vlgmr.msra.gmra.mxu1 %vm5178_vm0, %v15884_v30  ;;  %v10156_v25 = vpop.f32.mrf.mxu1  ;;  %v5817_v14 = vpop.f32.mrf.mxu0 }
 0x484   :  { %v5894_v8 = vmax.f32 %v5878_v34, 0.0  ;;  %10417 = vmatpush3.bf16.msra.mxu1 %v17403_v48  ;;  %6908 = vmatpush1.bf16.msra.mxu0 %v17170_v62  ;;  %v5818_v29 = vadd.f32 %v5817_v14, %v15512_v24  ;;  %v17406_v34 = vld [vmem:[#allocation28_spill] sm:$0xff]  ;;  %v5947_v22 = vadd.f32 %v10155_v2, %v15568_v9 }
 0x485   :  { %10418 = vmatprep.subr.bf16.mxu1 %v17404_v54  ;;  %v10157_v17 = vpop.f32.mrf.mxu1  ;;  %v5819_v51 = vpop.f32.mrf.mxu0  ;;  %6909 = vmatprep.subr.bf16.mxu0 %v17170_v62 }
 0x486   :  { %v15937_v23 = vpack.c.bf16 %v5894_v8, %v5893_v21  ;;  %v5883_v49 = vadd.f32 %v15850_v38, %v5818_v29  ;;  %v10158_v31 = vadd.f32 %v10157_v17, %v10156_v25  ;;  %6809 = vmatprep.mubr.bf16.mxu0 %v15856_v37  ;;  %11263 = vmatprep.mubr.msk.bf16.mxu1 %vm5178_vm0, %v15902_v6  ;;  %v15952_v29 = vld [vmem:[%s16766_s3 + $0x48] ss:$12 sps:$4 sm:$0xff]  }
 0x487   :  { %v10159_v20 = vpop.f32.mrf.mxu1  ;;  %v5820_v1 = vpop.f32.mrf.mxu0 }
 0x488   :  { %17405 = vst [vmem:[#allocation22_spill] sm:$0xff] %v15937_v23  ;;  %10419 = vmatpush3.bf16.msra.mxu1 %v17406_v34  ;;  %6910 = vmatpush1.bf16.msra.mxu0 %v17170_v62  ;;  %v5821_v14 = vadd.f32 %v5820_v1, %v15531_v4  ;;  %v5895_v51 = vmax.f32 %v5883_v49, 0.0  ;;  %v5944_v1 = vadd.f32 %v10152_v15, %v15554_v26  ;;  %v17409_v23 = vld [vmem:[#allocation68_spill] sm:$0xff] }
 0x489   :  { %10420 = vmatprep.subr.bf16.mxu1 %v15381_v7  ;;  %v10160_v21 = vpop.f32.mrf.mxu1  ;;  %v5822_v8 = vpop.f32.mrf.mxu0  ;;  %6911 = vmatprep.subr.bf16.mxu0 %v17170_v62  ;;  %v15958_v7 = vld [vmem:[%s16766_s3 + $0x50] ss:$12 sps:$4 sm:$0xff]  }
 0x48a   :  { %v5886_v38 = vadd.f32 %v15865_v52, %v5821_v14  ;;  %v10161_v25 = vadd.f32 %v10160_v21, %v10159_v20  ;;  %v17407_v20 = vld [vmem:[#allocation45_spill] sm:$0xff]  ;;  %v5936_v21 = vadd.f32 %v15896_v19, %v15576_v47 }
 0x48b   :  { %6810 = vmatmul.mubr.bf16.gmra.mxu0 %v15952_v29  ;;  %v10162_v54 = vpop.f32.mrf.mxu1  ;;  %v11177_v17 = vpop.f32.mrf.mxu0  ;;  %11264 = vmatmul.mubr.msk.bf16.gmra.mxu1 %vm5178_vm0, %v15958_v7 }
 0x48c   :  { %v5896_v52 = vmax.f32 %v5886_v38, 0.0  ;;  %10421 = vmatpush3.bf16.msra.mxu1 %v17367_v33  ;;  %6912 = vmatpush2.bf16.msra.mxu0 %v17407_v20  ;;  %v6009_v49 = vadd.f32 %v11177_v17, %v5944_v1  ;;  %v15975_v20 = vld [vmem:[%s16766_s3 + $0x4] ss:$12 sps:$4 sm:$0xff]  }
 0x48d   :  { %10422 = vmatprep.subr.bf16.mxu1 %v15396_v11  ;;  %v10163_v14 = vpop.f32.mrf.mxu1  ;;  %v6000_v8 = vpop.f32.mrf.mxu0  ;;  %6913 = vmatprep.subr.bf16.mxu0 %v17170_v62  ;;  %v17410_v17 = vld [vmem:[#allocation46_spill] sm:$0xff] }
 0x48e   :  { %v15970_v46 = vpack.c.bf16 %v5896_v52, %v5895_v51  ;;  %v10164_v38 = vadd.f32 %v10163_v14, %v10162_v54  ;;  %7069 = vmatprep.mubr.bf16.mxu1 %v15975_v20  ;;  %6927 = vmatprep.mubr.bf16.mxu0 %v15975_v20  ;;  %v6001_v15 = vadd.f32 %v6000_v8, %v5936_v21  ;;  %v6033_v1 = vmax.f32 %v6009_v49, 0.0 }
 0x48f   :  { %v10165_v11 = vpop.f32.mrf.mxu1  ;;  %v11178_v19 = vpop.f32.mrf.mxu0  ;;  %v5939_v54 = vadd.f32 %v15912_v10, %v15588_v36  ;;  %v5952_v49 = vadd.f32 %v10158_v31, %v15540_v53  ;;  %v17416_v31 = vld [vmem:[#allocation50_spill] sm:$0xff] }
 0x490   :  { %17408 = vst [vmem:[#allocation79_spill] sm:$0xff] %v15970_v46  ;;  %10423 = vmatpush3.bf16.msra.mxu1 %v17371_v42  ;;  %6914 = vmatpush2.bf16.msra.mxu0 %v17409_v23  ;;  %v6012_v2 = vadd.f32 %v11178_v19, %v5947_v22  ;;  %v6031_v8 = vmax.f32 %v6001_v15, 0.0  ;;  %v17412_v22 = vld [vmem:[#allocation13_spill] sm:$0xff]  ;;  %v5960_v10 = vadd.f32 %v10164_v38, %v15512_v24  ;;  %v17413_v19 = vld [vmem:[#allocation60_spill] sm:$0xff] }
 0x491   :  { %10424 = vmatprep.subr.bf16.mxu1 %v17410_v17  ;;  %v10166_v51 = vpop.f32.mrf.mxu1  ;;  %v6003_v52 = vpop.f32.mrf.mxu0  ;;  %6915 = vmatprep.subr.bf16.mxu0 %v17170_v62 }
 0x492   :  { %v6034_v14 = vmax.f32 %v6012_v2, 0.0  ;;  %v10167_v59 = vadd.f32 %v10166_v51, %v10165_v11  ;;  %v6004_v46 = vadd.f32 %v6003_v52, %v5939_v54 }
 0x493   :  { %v10190_v0 = vpop.f32.mrf.mxu1  ;;  %v11181_v21 = vpop.f32.mrf.mxu0 }
 0x494   :  { %v15985_v40 = vpack.c.bf16 %v6034_v14, %v6033_v1  ;;  %v6032_v23 = vmax.f32 %v6004_v46, 0.0  ;;  %10425 = vmatpush3.bf16.msra.mxu1 %v17412_v22  ;;  %6916 = vmatpush2.bf16.msra.mxu0 %v17170_v62  ;;  %v6025_v15 = vadd.f32 %v11181_v21, %v5960_v10  ;;  %v5963_v46 = vadd.f32 %v10167_v59, %v15531_v4  ;;  %v17415_v14 = vld [vmem:[#allocation17_spill] sm:$0xff] }
 0x495   :  { %10426 = vmatprep.subr.bf16.mxu1 %v17413_v19  ;;  %v10191_v27 = vpop.f32.mrf.mxu1  ;;  %v6016_v2 = vpop.f32.mrf.mxu0  ;;  %6917 = vmatprep.subr.bf16.mxu0 %v17170_v62  ;;  %v5955_v22 = vadd.f32 %v10161_v25, %v15549_v43  ;;  %v17417_v25 = vld [vmem:[#allocation20_spill] sm:$0xff] }
 0x496   :  { %17411 = vst [vmem:[#allocation27_spill] sm:$0xff] %v15985_v40  ;;  %v15993_v11 = vpack.c.bf16 %v6032_v23, %v6031_v8  ;;  %v10192_v54 = vadd.f32 %v10191_v27, %v10190_v0  ;;  %v6017_v1 = vadd.f32 %v6016_v2, %v5952_v49  ;;  %v6037_v21 = vmax.f32 %v6025_v15, 0.0 }
 0x497   :  { %v10193_v51 = vpop.f32.mrf.mxu1  ;;  %v11182_v52 = vpop.f32.mrf.mxu0 }
 0x498   :  { %17414 = vst [vmem:[#allocation30_spill] sm:$0xff] %v15993_v11  ;;  %10427 = vmatpush3.bf16.msra.mxu1 %v17415_v14  ;;  %6918 = vmatpush2.bf16.msra.mxu0 %v17170_v62  ;;  %v6028_v38 = vadd.f32 %v11182_v52, %v5963_v46  ;;  %v6035_v10 = vmax.f32 %v6017_v1, 0.0 }
 0x499   :  { %10428 = vmatprep.subr.bf16.mxu1 %v17416_v31  ;;  %v10194_v40 = vpop.f32.mrf.mxu1  ;;  %v6019_v45 = vpop.f32.mrf.mxu0  ;;  %6919 = vmatprep.subr.bf16.mxu0 %v17170_v62 }
 0x49a   :  { %v6038_v0 = vmax.f32 %v6028_v38, 0.0  ;;  %v10195_v27 = vadd.f32 %v10194_v40, %v10193_v51  ;;  %v6020_v59 = vadd.f32 %v6019_v45, %v5955_v22  ;;  %v6078_v45 = vadd.f32 %v10192_v54, %v15576_v47 }
 0x49b   :  { %v10196_v8 = vpop.f32.mrf.mxu1  ;;  %v11189_v23 = vpop.f32.mrf.mxu0 }
 0x49c   :  { %v16001_v49 = vpack.c.bf16 %v6038_v0, %v6037_v21  ;;  %v6036_v2 = vmax.f32 %v6020_v59, 0.0  ;;  %10429 = vmatpush3.bf16.msra.mxu1 %v17349_v5  ;;  %6920 = vmatpush2.bf16.msra.mxu0 %v17403_v48  ;;  %v6081_v5 = vadd.f32 %v10195_v27, %v15588_v36  ;;  %v17419_v48 = vld [vmem:[#allocation58_spill] sm:$0xff]  ;;  %v17421_v27 = vld [vmem:[#allocation48_spill] sm:$0xff] }
 0x49d   :  { %10430 = vmatprep.subr.bf16.mxu1 %v17417_v25  ;;  %v10197_v46 = vpop.f32.mrf.mxu1  ;;  %v6142_v52 = vpop.f32.mrf.mxu0  ;;  %6921 = vmatprep.subr.bf16.mxu0 %v17170_v62 }
 0x49e   :  { %v16007_v15 = vpack.c.bf16 %v6036_v2, %v6035_v10  ;;  %v10198_v40 = vadd.f32 %v10197_v46, %v10196_v8  ;;  %v6143_v38 = vadd.f32 %v6142_v52, %v6078_v45  ;;  %v17424_v45 = vld [vmem:[#allocation37_spill] sm:$0xff] }
 0x49f   :  { %v10199_v51 = vpop.f32.mrf.mxu1  ;;  %v11190_v1 = vpop.f32.mrf.mxu0 }
 0x4a0   :  { %17418 = vst [vmem:[#allocation78_spill] sm:$0xff] %v16007_v15  ;;  %v6086_v14 = vadd.f32 %v10198_v40, %v15554_v26  ;;  %10431 = vmatpush3.bf16.msra.mxu1 %v17351_v55  ;;  %6922 = vmatpush2.bf16.msra.mxu0 %v17406_v34  ;;  %v6173_v8 = vmax.f32 %v6143_v38, 0.0  ;;  %v17420_v34 = vld [vmem:[#allocation32_spill] sm:$0xff]  ;;  %v17426_v38 = vld [vmem:[#allocation75_spill] sm:$0xff] }
 0x4a1   :  { %11267 = vmatprep.subr.bf16.mxu1 %v17419_v48  ;;  %v10200_v22 = vpop.f32.mrf.mxu1  ;;  %v6145_v31 = vpop.f32.mrf.mxu0  ;;  %6923 = vmatprep.subr.bf16.mxu0 %v17170_v62 }
 0x4a2   :  { %v10201_v21 = vadd.f32 %v10200_v22, %v10199_v51  ;;  %v6146_v0 = vadd.f32 %v6145_v31, %v6081_v5  ;;  %v6151_v59 = vadd.f32 %v11189_v23, %v6086_v14  ;;  %v17425_v14 = vld [vmem:[#allocation2_spill] sm:$0xff]  ;;  %v17428_v22 = vld [vmem:[#allocation3_spill] sm:$0xff] }
 0x4a3   :  { %7070 = vmatmul.mubr.bf16.vlgmr.msra.gmra.mxu1 %v15797_v63  ;;  %v10202_v54 = vpop.f32.mrf.mxu1 }
 0x4a4   :  { %v6089_v10 = vadd.f32 %v10201_v21, %v15568_v9  ;;  %v6174_v55 = vmax.f32 %v6146_v0, 0.0  ;;  %11268 = vmatpush3.bf16.msra.mxu1 %v17419_v48  ;;  %6924 = vmatpush2.bf16.msra.mxu0 %v17420_v34  ;;  %v6175_v40 = vmax.f32 %v6151_v59, 0.0  ;;  %v17430_v59 = vld [vmem:[#allocation53_spill] sm:$0xff]  ;;  %v17432_v34 = vld [vmem:[#allocation54_spill] sm:$0xff] }
 0x4a5   :  { %11269 = vmatprep.subr.bf16.mxu1 %v17421_v27  ;;  %v10203_v2 = vpop.f32.mrf.mxu1  ;;  %6925 = vmatprep.subr.bf16.mxu0 %v17170_v62 }
 0x4a6   :  { %v6154_v25 = vadd.f32 %v11190_v1, %v6089_v10  ;;  %v16022_v46 = vadd.f32 %v10203_v2, %v10202_v54  ;;  %7077 = vmatprep.mubr.bf16.mxu1 %v15812_v12  ;;  %v16025_v52 = vpack.c.bf16 %v6174_v55, %v6173_v8 }
 0x4a7   :  { %v16027_v23 = vpop.f32.mrf.mxu1 }
 0x4a8   :  { %17422 = vst [vmem:[#allocation59_spill] sm:$0xff] %v16022_v46  ;;  %17423 = vst [vmem:[#allocation29_spill] sm:$0xff] %v16025_v52  ;;  %11270 = vmatpush3.bf16.msra.mxu1 %v17421_v27  ;;  %6926 = vmatpush2.bf16.msra.mxu0 %v17424_v45  ;;  %v6176_v51 = vmax.f32 %v6154_v25, 0.0 }
 0x4a9   :  { %11279 = vmatprep.subr.bf16.mxu1 %v17425_v14  ;;  %10462 = vmatprep.subr.bf16.mxu0 %v17426_v38  ;;  %v16033_v62 = vpop.f32.mrf.mxu1  ;;  %v17436_v38 = vld [vmem:[#allocation41_spill] sm:$0xff] }
 0x4aa   :  { %v16035_v1 = vpack.c.bf16 %v6176_v51, %v6175_v40  ;;  %v17434_v40 = vld [vmem:[#allocation36_spill] sm:$0xff] }
 0x4ab   :  { %7078 = vmatmul.mubr.bf16.gmra.mxu1 %v15826_v58  ;;  %6928 = vmatmul.mubr.bf16.vlgmr.msra.gmra.mxu0 %v15797_v63  ;;  %v16039_v5 = vpop.f32.mrf.mxu1 }
 0x4ac   :  { %17427 = vst [vmem:[#allocation77_spill] sm:$0xff] %v16035_v1  ;;  %10463 = vmatpush3.bf16.msra.mxu0 %v17410_v17  ;;  %7085 = vmatprep.mubr.bf16.mxu1 %v15837_v18  ;;  %v17438_v1 = vld [vmem:[#allocation42_spill] sm:$0xff] }
 0x4ad   :  { %10464 = vmatprep.subr.bf16.mxu0 %v17428_v22  ;;  %v16044_v31 = vpop.f32.mrf.mxu1  ;;  %6935 = vmatprep.mubr.bf16.mxu0 %v15812_v12  ;;  %v17437_v22 = vld [vmem:[#allocation40_spill] sm:$0xff] }
 0x4af   :  { %v16047_v21 = vpop.f32.mrf.mxu1 }
 0x4b0   :  { %10465 = vmatpush3.bf16.msra.mxu0 %v17413_v19  ;;  %v16063_v19 = vpop.f32.mrf.mxu0 }
 0x4b1   :  { %10466 = vmatprep.subr.bf16.mxu0 %v17419_v48  ;;  %v16051_v0 = vpop.f32.mrf.mxu1  ;;  %17429 = vst [vmem:[#allocation76_spill] sm:$0xff] %v16063_v19 }
 0x4b2   :  { %v16071_v10 = vpop.f32.mrf.mxu0 }
 0x4b3   :  { %7086 = vmatmul.mubr.bf16.gmra.mxu1 %v15847_v60  ;;  %6936 = vmatmul.mubr.bf16.gmra.mxu0 %v15826_v58  ;;  %v16055_v17 = vpop.f32.mrf.mxu1  ;;  %17431 = vst [vmem:[#allocation92_spill] sm:$0xff] %v16071_v10 }
 0x4b4   :  { %10467 = vmatpush3.bf16.msra.mxu0 %v17374_v28  ;;  %7093 = vmatprep.mubr.bf16.mxu1 %v15856_v37  ;;  %v16084_v2 = vpop.f32.mrf.mxu0 }
 0x4b5   :  { %10468 = vmatprep.subr.bf16.mxu0 %v17421_v27  ;;  %v16060_v54 = vpop.f32.mrf.mxu1  ;;  %6943 = vmatprep.mubr.bf16.mxu0 %v15837_v18  ;;  %17433 = vst [vmem:[#allocation31_spill] sm:$0xff] %v16084_v2  ;;  %v17441_v2 = vld [vmem:[#allocation5_spill] sm:$0xff] }
 0x4b7   :  { %v16065_v48 = vpop.f32.mrf.mxu1 }
 0x4b8   :  { %10469 = vmatpush3.bf16.msra.mxu0 %v17385_v35 }
 0x4b9   :  { %10470 = vmatprep.subr.bf16.mxu0 %v17430_v59  ;;  %v16069_v8 = vpop.f32.mrf.mxu1 }
 0x4bb   :  { %7094 = vmatmul.mubr.bf16.gmra.mxu1 %v15952_v29  ;;  %6944 = vmatmul.mubr.bf16.gmra.mxu0 %v15847_v60  ;;  %v16075_v55 = vpop.f32.mrf.mxu1 }
 0x4bc   :  { %10471 = vmatpush3.bf16.msra.mxu0 %v17378_v16  ;;  %11271 = vmatprep.mubr.msk.bf16.mxu1 %vm5178_vm0, %v15872_v57  ;;  %v16092_v16 = vpop.f32.mrf.mxu0 }
 0x4bd   :  { %10472 = vmatprep.subr.bf16.mxu0 %v17432_v34  ;;  %v16081_v27 = vpop.f32.mrf.mxu1  ;;  %6951 = vmatprep.mubr.bf16.mxu0 %v15856_v37  ;;  %17435 = vst [vmem:[#allocation34_spill] sm:$0xff] %v16092_v16  ;;  %v17440_v16 = vld [vmem:[#allocation74_spill] sm:$0xff] }
 0x4bf   :  { %v16086_v25 = vpop.f32.mrf.mxu1 }
 0x4c0   :  { %10473 = vmatpush3.bf16.msra.mxu0 %v17379_v41 }
 0x4c1   :  { %10474 = vmatprep.subr.bf16.mxu0 %v17434_v40  ;;  %v16090_v45 = vpop.f32.mrf.mxu1  ;;  %v16101_v40 = vpop.f32.mrf.mxu0 }
 0x4c3   :  { %11272 = vmatmul.mubr.msk.bf16.vlgmr.msra.gmra.mxu1 %vm5178_vm0, %v15884_v30  ;;  %6952 = vmatmul.mubr.bf16.gmra.mxu0 %v15952_v29  ;;  %v10248_v51 = vpop.f32.mrf.mxu1  ;;  %v16110_v10 = vpop.f32.mrf.mxu0 }
 0x4c4   :  { %11280 = vmatpush3.bf16.msra.mxu1 %v17425_v14  ;;  %10475 = vmatpush3.bf16.msra.mxu0 %v17367_v33  ;;  %v17439_v33 = vld [vmem:[#allocation66_spill] sm:$0xff] }
 0x4c5   :  { %11281 = vmatprep.subr.bf16.mxu1 %v17436_v38  ;;  %10476 = vmatprep.subr.bf16.mxu0 %v17437_v22  ;;  %v10249_v41 = vpop.f32.mrf.mxu1 }
 0x4c6   :  { %11275 = vmatprep.mubr.msk.bf16.mxu1 %vm5178_vm0, %v15902_v6  ;;  %7211 = vmatprep.mubr.bf16.mxu0 %v15975_v20 }
 0x4c7   :  { %v10251_v52 = vpop.f32.mrf.mxu1 }
 0x4c8   :  { %11282 = vmatpush3.bf16.msra.mxu1 %v17436_v38  ;;  %10477 = vmatpush3.bf16.msra.mxu0 %v17371_v42 }
 0x4c9   :  { %11291 = vmatprep.subr.bf16.mxu1 %v17438_v1  ;;  %10508 = vmatprep.subr.bf16.mxu0 %v17439_v33  ;;  %v10252_v11 = vpop.f32.mrf.mxu1  ;;  %v16120_v33 = vpop.f32.mrf.mxu0 }
 0x4cb   :  { %11276 = vmatmul.mubr.msk.bf16.gmra.mxu1 %vm5178_vm0, %v15958_v7  ;;  %7212 = vmatmul.mubr.bf16.vlgmr.msra.gmra.mxu0 %v15797_v63  ;;  %v10254_v22 = vpop.f32.mrf.mxu1  ;;  %v16124_v15 = vpop.f32.mrf.mxu0 }
 0x4cc   :  { %10509 = vmatpush3.bf16.msra.mxu0 %v17430_v59  ;;  %11283 = vmatprep.mubr.msk.bf16.mxu1 %vm5178_vm0, %v15872_v57 }
 0x4cd   :  { %10510 = vmatprep.subr.bf16.mxu0 %v17440_v16  ;;  %v10255_v42 = vpop.f32.mrf.mxu1  ;;  %7219 = vmatprep.mubr.bf16.mxu0 %v15812_v12  ;;  %v11205_v16 = vpop.f32.mrf.mxu0 }
 0x4cf   :  { %v10257_v19 = vpop.f32.mrf.mxu1  ;;  %v6300_v12 = vpop.f32.mrf.mxu0 }
 0x4d0   :  { %10511 = vmatpush3.bf16.msra.mxu0 %v17432_v34 }
 0x4d1   :  { %10512 = vmatprep.subr.bf16.mxu0 %v17425_v14  ;;  %v10258_v46 = vpop.f32.mrf.mxu1 }
 0x4d2   :  { %v10259_v14 = vadd.f32 %v10258_v46, %v10257_v19  ;;  %v11206_v19 = vpop.f32.mrf.mxu0 }
 0x4d3   :  { %11284 = vmatmul.mubr.msk.bf16.vlgmr.msra.gmra.mxu1 %vm5178_vm0, %v15884_v30  ;;  %7220 = vmatmul.mubr.bf16.gmra.mxu0 %v15826_v58  ;;  %v16129_v59 = vpop.f32.mrf.mxu1  ;;  %v10256_v58 = vadd.f32 %v10255_v42, %v10254_v22 }
 0x4d4   :  { %11292 = vmatpush3.bf16.msra.mxu1 %v17438_v1  ;;  %10513 = vmatpush3.bf16.msra.mxu0 %v17389_v32  ;;  %v17442_v32 = vld [vmem:[#allocation44_spill] sm:$0xff]  ;;  %v10253_v1 = vadd.f32 %v10252_v11, %v10251_v52  ;;  %v10247_v11 = vadd.f32 %v16090_v45, %v16086_v25 }
 0x4d5   :  { %11293 = vmatprep.subr.bf16.mxu1 %v17441_v2  ;;  %10514 = vmatprep.subr.bf16.mxu0 %v17436_v38  ;;  %v6426_v34 = vpop.f32.mrf.mxu1  ;;  %v6247_v38 = vadd.f32 %v10259_v14, %v15531_v4  ;;  %v6303_v14 = vpop.f32.mrf.mxu0 }
 0x4d6   :  { %11287 = vmatprep.mubr.msk.bf16.mxu1 %vm5178_vm0, %v15902_v6  ;;  %7227 = vmatprep.mubr.bf16.mxu0 %v15837_v18  ;;  %v6239_v52 = vadd.f32 %v10253_v1, %v15549_v43  ;;  %v6231_v25 = vadd.f32 %v10247_v11, %v15568_v9 }
 0x4d7   :  { %v16146_v46 = vpop.f32.mrf.mxu1  ;;  %v6312_v22 = vadd.f32 %v11206_v19, %v6247_v38  ;;  %v10213_v19 = vadd.f32 %v16051_v0, %v16047_v21  ;;  %v10210_v0 = vadd.f32 %v16044_v31, %v16039_v5 }
 0x4d8   :  { %11294 = vmatpush3.bf16.msra.mxu1 %v17441_v2  ;;  %10515 = vmatpush3.bf16.msra.mxu0 %v17391_v61  ;;  %v10250_v61 = vadd.f32 %v10249_v41, %v10248_v51  ;;  %v17443_v2 = vld [vmem:[#allocation56_spill] sm:$0xff]  ;;  %v17444_v51 = vld [vmem:[#allocation51_spill] sm:$0xff]  ;;  %v10241_v41 = vadd.f32 %v16069_v8, %v16065_v48  ;;  %v6304_v45 = vadd.f32 %v6303_v14, %v6239_v52 }
 0x4d9   :  { %10554 = vmatprep.subr.bf16.mxu1 %v15821_v56  ;;  %10516 = vmatprep.subr.bf16.mxu0 %v17442_v32  ;;  %v6244_v56 = vadd.f32 %v10256_v58, %v15512_v24  ;;  %v6429_v42 = vpop.f32.mrf.mxu1  ;;  %v6322_v32 = vmax.f32 %v6312_v22, 0.0  ;;  %v10238_v48 = vadd.f32 %v16060_v54, %v16055_v17  ;;  %v6296_v17 = vadd.f32 %v16120_v33, %v6231_v25 }
 0x4da   :  { %v10207_v52 = vadd.f32 %v16033_v62, %v16027_v23  ;;  %v17447_v62 = vld [vmem:[#allocation9_spill] sm:$0xff] }
 0x4db   :  { %11288 = vmatmul.mubr.msk.bf16.gmra.mxu1 %vm5178_vm0, %v15958_v7  ;;  %7228 = vmatmul.mubr.bf16.gmra.mxu0 %v15847_v60  ;;  %v6309_v58 = vadd.f32 %v11205_v16, %v6244_v56  ;;  %v16168_v1 = vpop.f32.mrf.mxu1  ;;  %v16190_v56 = vld [vmem:[%s16767_s5] sm:$0xff]  ;;  %v6220_v33 = vadd.f32 %v10238_v48, %v15576_v47 }
 0x4dc   :  { %10517 = vmatpush3.bf16.msra.mxu0 %v17387_v13  ;;  %11295 = vmatprep.mubr.msk.bf16.mxu1 %vm5178_vm0, %v15872_v57  ;;  %v10244_v13 = vadd.f32 %v16081_v27, %v16075_v55  ;;  %v6236_v57 = vadd.f32 %v10250_v61, %v15540_v53 }
 0x4dd   :  { %10518 = vmatprep.subr.bf16.mxu0 %v17443_v2  ;;  %7235 = vmatprep.mubr.bf16.mxu0 %v15856_v37  ;;  %v6321_v16 = vmax.f32 %v6309_v58, 0.0 }
 0x4de   :  { %v6228_v8 = vadd.f32 %v10244_v13, %v15554_v26  ;;  %v6301_v27 = vadd.f32 %v6300_v12, %v6236_v57  ;;  %v6320_v12 = vmax.f32 %v6304_v45, 0.0  ;;  %v17450_v45 = vld [vmem:[#allocation15_spill] sm:$0xff] }
 0x4df   :  { %v6326_v61 = vpack.c.bf16 %v6322_v32, %v6321_v16  ;;  %v17451_v32 = vld [vmem:[#allocation31_spill] sm:$0xff] }
 0x4e0   :  { %10519 = vmatpush3.bf16.msra.mxu0 %v17390_v3  ;;  %v6319_v2 = vmax.f32 %v6301_v27, 0.0  ;;  %v17452_v27 = vld [vmem:[#allocation6_spill] sm:$0xff] }
 0x4e1   :  { %10520 = vmatprep.subr.bf16.mxu0 %v17444_v51  ;;  %v17448_v51 = vld [vmem:[#allocation91_spill] sm:$0xff] }
 0x4e3   :  { %11296 = vmatmul.mubr.msk.bf16.vlgmr.msra.gmra.mxu1 %vm5178_vm0, %v15884_v30  ;;  %7236 = vmatmul.mubr.bf16.gmra.mxu0 %v15952_v29  ;;  %v6361_v3 = vpop.f32.mrf.mxu0  ;;  %v17445_v30 = vld [vmem:[#allocation52_spill] sm:$0xff] }
 0x4e4   :  { %10555 = vmatpush3.bf16.msra.mxu1 %v15720_v50  ;;  %v6362_v55 = vadd.f32 %v6361_v3, %v15576_v47  ;;  %10521 = vmatpush3.bf16.msra.mxu0 %v17374_v28  ;;  %v6223_v28 = vadd.f32 %v10241_v41, %v15588_v36  ;;  %v6097_v3 = vadd.f32 %v10207_v52, %v15549_v43 }
 0x4e5   :  { %10556 = vmatprep.subr.bf16.mxu1 %v15792_v39  ;;  %10522 = vmatprep.subr.bf16.mxu0 %v17445_v30  ;;  %v6363_v38 = vpop.f32.mrf.mxu0  ;;  %v16185_v39 = vpop.f32.mrf.mxu1  ;;  %v17453_v30 = vld [vmem:[#allocation78_spill] sm:$0xff] }
 0x4e6   :  { %v6427_v50 = vadd.f32 %v6426_v34, %v6362_v55  ;;  %7353 = vmatprep.mubr.bf16.mxu0 %v15975_v20  ;;  %11299 = vmatprep.mubr.msk.bf16.mxu1 %vm5178_vm0, %v15902_v6  ;;  %v16195_v20 = vld [vmem:[%s16767_s5 + $0x20] sm:$0xff]  ;;  %v17446_v6 = vld [vmem:[#allocation69_spill] sm:$0xff]  ;;  %v6293_v34 = vadd.f32 %v16101_v40, %v6228_v8  ;;  %v6288_v5 = vadd.f32 %v16124_v15, %v6223_v28  ;;  %v17454_v38 = vld [vmem:[#allocation59_spill] sm:$0xff] }
 0x4e7   :  { %v6364_v54 = vpop.f32.mrf.mxu0  ;;  %v8850_v14 = vcombine.high %v16190_v56, %v16195_v20  ;;  %v6325_v40 = vpack.c.bf16 %v6320_v12, %v6319_v2  ;;  %v16212_v13 = vpop.f32.mrf.mxu1  ;;  %v6102_v15 = vadd.f32 %v10210_v0, %v15512_v24  ;;  %v17458_v0 = vld [vmem:[#allocation90_spill] sm:$0xff] }
 0x4e8   :  { %10557 = vmatpush3.bf16.msra.mxu1 %v17446_v6  ;;  %v6365_v21 = vadd.f32 %v6364_v54, %v15588_v36  ;;  %10523 = vmatpush3.bf16.msra.mxu0 %v17385_v35  ;;  %v6105_v35 = vadd.f32 %v10213_v19, %v15531_v4  ;;  %v6457_v57 = vmax.f32 %v6427_v50, 0.0  ;;  %v6317_v58 = vmax.f32 %v6293_v34, 0.0  ;;  %v17455_v19 = vld [vmem:[#allocation76_spill] sm:$0xff] }
 0x4e9   :  { %10558 = vmatprep.subr.bf16.mxu1 %v15778_v44  ;;  %10594 = vmatprep.subr.bf16.mxu0 %v6326_v61  ;;  %v6366_v11 = vpop.f32.mrf.mxu0  ;;  %v6318_v44 = vmax.f32 %v6296_v17, 0.0  ;;  %v6445_v48 = vpop.f32.mrf.mxu1  ;;  %v6167_v50 = vadd.f32 %v17455_v19, %v6102_v15  ;;  %v17456_v17 = vld [vmem:[#allocation33_spill] sm:$0xff]  ;;  %v17457_v61 = vld [vmem:[#allocation34_spill] sm:$0xff]  ;;  %v17470_v19 = vld [vmem:[#allocation79_spill] sm:$0xff] }
 0x4ea   :  { %v6430_v22 = vadd.f32 %v6429_v42, %v6365_v21  ;;  %v6162_v6 = vadd.f32 %v17457_v61, %v6097_v3 }
 0x4eb   :  { %7354 = vmatmul.mubr.bf16.vlgmr.msra.gmra.mxu0 %v15797_v63  ;;  %v6369_v31 = vpop.f32.mrf.mxu0  ;;  %11300 = vmatmul.mubr.msk.bf16.gmra.mxu1 %vm5178_vm0, %v15958_v7  ;;  %v6285_v63 = vadd.f32 %v16110_v10, %v6220_v33  ;;  %v6324_v8 = vpack.c.bf16 %v6318_v44, %v6317_v58  ;;  %v6316_v10 = vmax.f32 %v6288_v5, 0.0  ;;  %v17461_v5 = vld [vmem:[#allocation92_spill] sm:$0xff] }
 0x4ec   :  { %v6458_v23 = vmax.f32 %v6430_v22, 0.0  ;;  %10559 = vmatpush3.bf16.msra.mxu1 %v17447_v62  ;;  %v6370_v42 = vadd.f32 %v6369_v31, %v15554_v26  ;;  %10595 = vmatpush3.bf16.msra.mxu0 %v16001_v49  ;;  %v6170_v49 = vadd.f32 %v17451_v32, %v6105_v35  ;;  %v17459_v22 = vld [vmem:[#allocation88_spill] sm:$0xff]  ;;  %v17460_v35 = vld [vmem:[#allocation27_spill] sm:$0xff]  ;;  %v6178_v15 = vmax.f32 %v6162_v6, 0.0  ;;  %v17466_v32 = vld [vmem:[#allocation89_spill] sm:$0xff] }
 0x4ed   :  { %10560 = vmatprep.subr.bf16.mxu1 %v17448_v51  ;;  %10596 = vmatprep.subr.bf16.mxu0 %v6325_v40  ;;  %v6371_v41 = vpop.f32.mrf.mxu0  ;;  %v6315_v28 = vmax.f32 %v6285_v63, 0.0  ;;  %v6179_v40 = vmax.f32 %v6167_v50, 0.0 }
 0x4ee   :  { %v16222_v25 = vpack.c.bf16 %v6458_v23, %v6457_v57  ;;  %v6435_v7 = vadd.f32 %v16129_v59, %v6370_v42  ;;  %7361 = vmatprep.mubr.bf16.mxu0 %v17450_v45  ;;  %7735 = vmatprep.mubr.bf16.mxu1 %v8850_v14  ;;  %v6094_v59 = vadd.f32 %v17454_v38, %v15540_v53  ;;  %v6180_v2 = vmax.f32 %v6170_v49, 0.0  ;;  %v17464_v41 = vld [vmem:[#allocation70_spill] sm:$0xff] }
 0x4ef   :  { %v6372_v55 = vpop.f32.mrf.mxu0  ;;  %v6323_v34 = vpack.c.bf16 %v6316_v10, %v6315_v28  ;;  %v17465_v45 = vld [vmem:[#allocation30_spill] sm:$0xff]  ;;  %v17471_v28 = vld [vmem:[#allocation7_spill] sm:$0xff] }
 0x4f0   :  { %17449 = vst [vmem:[#allocation72_spill] sm:$0xff] %v16222_v25  ;;  %10561 = vmatpush3.bf16.msra.mxu1 %v17452_v27  ;;  %v6373_v16 = vadd.f32 %v6372_v55, %v15568_v9  ;;  %10597 = vmatpush3.bf16.msra.mxu0 %v17453_v30  ;;  %v6459_v11 = vmax.f32 %v6435_v7, 0.0  ;;  %v6159_v31 = vadd.f32 %v17461_v5, %v6094_v59  ;;  %v17469_v59 = vld [vmem:[#allocation4_spill] sm:$0xff] }
 0x4f1   :  { %10562 = vmatprep.subr.bf16.mxu1 %v17456_v17  ;;  %10598 = vmatprep.subr.bf16.mxu0 %v6324_v8  ;;  %v6374_v12 = vpop.f32.mrf.mxu0  ;;  %v6184_v51 = vpack.c.bf16 %v6180_v2, %v6179_v40  ;;  %v16259_v8 = vld [vmem:[%s16767_s5 + $0x30] sm:$0xff] }
 0x4f2   :  { %v6438_v54 = vadd.f32 %v16146_v46, %v6373_v16  ;;  %v17462_v46 = vld [vmem:[#allocation10_spill] sm:$0xff]  ;;  %v6177_v3 = vmax.f32 %v6159_v31, 0.0  ;;  %17468 = vst [vmem:[#allocation93_spill] sm:$0xff] %v16259_v8 }
 0x4f3   :  { %v10288_v21 = vpop.f32.mrf.mxu1  ;;  %7362 = vmatmul.mubr.bf16.gmra.mxu0 %v17458_v0  ;;  %v6377_v33 = vpop.f32.mrf.mxu0  ;;  %v7464_v0 = vld [vmem:[%s16767_s5 + $0x8] sm:$0xff] }
 0x4f4   :  { %v6460_v52 = vmax.f32 %v6438_v54, 0.0  ;;  %10563 = vmatpush3.bf16.msra.mxu1 %v17459_v22  ;;  %v6378_v14 = vadd.f32 %v6377_v33, %v15540_v53  ;;  %10599 = vmatpush3.bf16.msra.mxu0 %v17460_v35  ;;  %v6183_v16 = vpack.c.bf16 %v6178_v15, %v6177_v3  ;;  %v7475_v54 = vld [vmem:[%s16767_s5 + $0x60] sm:$0xff]  ;;  %v7468_v33 = vld [vmem:[%s16767_s5 + $0x28] sm:$0xff]  ;;  %v17475_v35 = vld [vmem:[#allocation77_spill] sm:$0xff] }
 0x4f5   :  { %10564 = vmatprep.subr.bf16.mxu1 %v17462_v46  ;;  %v10289_v44 = vpop.f32.mrf.mxu1  ;;  %10600 = vmatprep.subr.bf16.mxu0 %v6323_v34  ;;  %v6379_v57 = vpop.f32.mrf.mxu0  ;;  %v17474_v22 = vld [vmem:[#allocation22_spill] sm:$0xff]  ;;  %v8852_v31 = vcombine.high %v7464_v0, %v7468_v33 }
 0x4f6   :  { %v16243_v23 = vpack.c.bf16 %v6460_v52, %v6459_v11  ;;  %v6443_v62 = vadd.f32 %v16185_v39, %v6378_v14  ;;  %v10290_v42 = vadd.f32 %v10289_v44, %v10288_v21  ;;  %7369 = vmatprep.mubr.bf16.mxu0 %v15837_v18  ;;  %v16254_v18 = vld [vmem:[%s16767_s5 + $0x10] sm:$0xff]  ;;  %v8849_v11 = vcombine.low %v16190_v56, %v16195_v20  ;;  %v17473_v52 = vld [vmem:[#allocation65_spill] sm:$0xff] }
 0x4f7   :  { %v10291_v63 = vpop.f32.mrf.mxu1  ;;  %v6380_v58 = vpop.f32.mrf.mxu0  ;;  %17467 = vst [vmem:[#allocation47_spill] sm:$0xff] %v16254_v18 }
 0x4f8   :  { %17463 = vst [vmem:[#allocation95_spill] sm:$0xff] %v16243_v23  ;;  %10565 = vmatpush3.bf16.msra.mxu1 %v17464_v41  ;;  %v6381_v7 = vadd.f32 %v6380_v58, %v15549_v43  ;;  %10601 = vmatpush3.bf16.msra.mxu0 %v17465_v45  ;;  %v6461_v30 = vmax.f32 %v6443_v62, 0.0  ;;  %v6504_v20 = vadd.f32 %v10290_v42, %v15576_v47  ;;  %v17476_v41 = vld [vmem:[#allocation61_spill] sm:$0xff]  ;;  %v7472_v42 = vld [vmem:[%s16767_s5 + $0x48] sm:$0xff] }
 0x4f9   :  { %10566 = vmatprep.subr.bf16.mxu1 %v17466_v32  ;;  %v10292_v49 = vpop.f32.mrf.mxu1  ;;  %10602 = vmatprep.subr.bf16.mxu0 %v6184_v51  ;;  %v6382_v55 = vpop.f32.mrf.mxu0  ;;  %v17477_v45 = vld [vmem:[#allocation29_spill] sm:$0xff] }
 0x4fa   :  { %v6446_v39 = vadd.f32 %v6445_v48, %v6381_v7  ;;  %v10293_v62 = vadd.f32 %v10292_v49, %v10291_v63  ;;  %v7476_v63 = vld [vmem:[%s16767_s5 + $0x68] sm:$0xff] }
 0x4fb   :  { %v10294_v10 = vpop.f32.mrf.mxu1  ;;  %7370 = vmatmul.mubr.bf16.gmra.mxu0 %v15847_v60  ;;  %v6385_v27 = vpop.f32.mrf.mxu0  ;;  %v7471_v60 = vld [vmem:[%s16767_s5 + $0x40] sm:$0xff] }
 0x4fc   :  { %v6462_v38 = vmax.f32 %v6446_v39, 0.0  ;;  %10567 = vmatpush3.bf16.msra.mxu1 %v17469_v59  ;;  %v6386_v48 = vadd.f32 %v6385_v27, %v15512_v24  ;;  %10603 = vmatpush3.bf16.msra.mxu0 %v17470_v19  ;;  %v8857_v27 = vcombine.low %v7471_v60, %v7475_v54  ;;  %v6507_v59 = vadd.f32 %v10293_v62, %v15588_v36 }
 0x4fd   :  { %10568 = vmatprep.subr.bf16.mxu1 %v17471_v28  ;;  %v10295_v17 = vpop.f32.mrf.mxu1  ;;  %10604 = vmatprep.subr.bf16.mxu0 %v6183_v16  ;;  %v6387_v12 = vpop.f32.mrf.mxu0  ;;  %v8851_v16 = vcombine.low %v7464_v0, %v7468_v33  ;;  %v8860_v19 = vcombine.high %v7472_v42, %v7476_v63  ;;  %v7487_v33 = vld [vmem:[%s16767_s5 + $0xc0] sm:$0xff] }
 0x4fe   :  { %v16274_v61 = vpack.c.bf16 %v6462_v38, %v6461_v30  ;;  %v6451_v6 = vadd.f32 %v16168_v1, %v6386_v48  ;;  %v10296_v21 = vadd.f32 %v10295_v17, %v10294_v10  ;;  %7377 = vmatprep.mubr.bf16.mxu0 %v15856_v37  ;;  %v8858_v37 = vcombine.high %v7471_v60, %v7475_v54  ;;  %v17479_v38 = vld [vmem:[#allocation16_spill] sm:$0xff] }
 0x4ff   :  { %v10297_v34 = vpop.f32.mrf.mxu1  ;;  %v6388_v2 = vpop.f32.mrf.mxu0 }
 0x500   :  { %17472 = vst [vmem:[#allocation49_spill] sm:$0xff] %v16274_v61  ;;  %10569 = vmatpush3.bf16.msra.mxu1 %v17473_v52  ;;  %v6389_v1 = vadd.f32 %v6388_v2, %v15531_v4  ;;  %10605 = vmatpush3.bf16.msra.mxu0 %v17474_v22  ;;  %v6512_v44 = vadd.f32 %v10296_v21, %v15554_v26  ;;  %v6463_v15 = vmax.f32 %v6451_v6, 0.0  ;;  %v7480_v22 = vld [vmem:[%s16767_s5 + $0x88] sm:$0xff] }
 0x501   :  { %v10298_v14 = vpop.f32.mrf.mxu1  ;;  %10606 = vmatprep.subr.bf16.mxu0 %v17475_v35  ;;  %v6390_v5 = vpop.f32.mrf.mxu0 }
 0x502   :  { %v6454_v40 = vadd.f32 %v16212_v13, %v6389_v1  ;;  %v10299_v46 = vadd.f32 %v10298_v14, %v10297_v34  ;;  %v7479_v13 = vld [vmem:[%s16767_s5 + $0x80] sm:$0xff] }
 0x503   :  { %7736 = vmatmul.mubr.bf16.vlgmr.msra.gmra.mxu1 %v8849_v11  ;;  %v16292_v57 = vpop.f32.mrf.mxu1  ;;  %7378 = vmatmul.mubr.bf16.gmra.mxu0 %v15952_v29  ;;  %v11225_v56 = vpop.f32.mrf.mxu0  ;;  %v7483_v29 = vld [vmem:[%s16767_s5 + $0xa0] sm:$0xff] }
 0x504   :  { %v6464_v58 = vmax.f32 %v6454_v40, 0.0  ;;  %v6577_v51 = vadd.f32 %v11225_v56, %v6512_v44  ;;  %10607 = vmatpush3.bf16.msra.mxu0 %v17476_v41  ;;  %7743 = vmatprep.mubr.bf16.mxu1 %v8858_v37  ;;  %v6515_v55 = vadd.f32 %v10299_v46, %v15568_v9  ;;  %v8866_v48 = vcombine.high %v7479_v13, %v7483_v29  ;;  %v7491_v1 = vld [vmem:[%s16767_s5 + $0xe0] sm:$0xff]  ;;  %v7484_v37 = vld [vmem:[%s16767_s5 + $0xa8] sm:$0xff] }
 0x505   :  { %v16300_v7 = vpop.f32.mrf.mxu1  ;;  %10608 = vmatprep.subr.bf16.mxu0 %v17477_v45  ;;  %v6568_v3 = vpop.f32.mrf.mxu0  ;;  %7800 = vmatprep.mubr.bf16.mxu0 %v8852_v31  ;;  %v8865_v31 = vcombine.low %v7479_v13, %v7483_v29  ;;  %v8859_v40 = vcombine.low %v7472_v42, %v7476_v63  ;;  %v8874_v46 = vcombine.high %v7487_v33, %v7491_v1  ;;  %v7488_v41 = vld [vmem:[%s16767_s5 + $0xc8] sm:$0xff] }
 0x506   :  { %v16312_v32 = vpack.c.bf16 %v6464_v58, %v6463_v15  ;;  %v6569_v49 = vadd.f32 %v6568_v3, %v6504_v20  ;;  %v6601_v12 = vmax.f32 %v6577_v51, 0.0  ;;  %v8868_v44 = vcombine.high %v7480_v22, %v7484_v37  ;;  %v7492_v13 = vld [vmem:[%s16767_s5 + $0xe8] sm:$0xff] }
 0x507   :  { %v16315_v39 = vpop.f32.mrf.mxu1  ;;  %v11226_v10 = vpop.f32.mrf.mxu0  ;;  %v8873_v29 = vcombine.low %v7487_v33, %v7491_v1  ;;  %v8867_v42 = vcombine.low %v7480_v22, %v7484_v37 }
 0x508   :  { %17478 = vst [vmem:[#allocation64_spill] sm:$0xff] %v16312_v32  ;;  %v6580_v30 = vadd.f32 %v11226_v10, %v6515_v55  ;;  %10609 = vmatpush3.bf16.msra.mxu0 %v17479_v38  ;;  %v6599_v60 = vmax.f32 %v6569_v49, 0.0  ;;  %v8876_v49 = vcombine.high %v7488_v41, %v7492_v13  ;;  %v8854_v55 = vcombine.high %v16254_v18, %v16259_v8 }
 0x509   :  { %v16319_v28 = vpop.f32.mrf.mxu1  ;;  %v6571_v17 = vpop.f32.mrf.mxu0 }
 0x50a   :  { %v6602_v6 = vmax.f32 %v6580_v30, 0.0  ;;  %v6572_v21 = vadd.f32 %v6571_v17, %v6507_v59 }
 0x50b   :  { %7744 = vmatmul.mubr.bf16.gmra.mxu1 %v8857_v27  ;;  %v16321_v34 = vpop.f32.mrf.mxu1  ;;  %7801 = vmatmul.mubr.bf16.vlgmr.msra.gmra.mxu0 %v8851_v16  ;;  %v16323_v2 = vpop.f32.mrf.mxu0 }
 0x50c   :  { %v16325_v54 = vpack.c.bf16 %v6602_v6, %v6601_v12  ;;  %v6600_v0 = vmax.f32 %v6572_v21, 0.0  ;;  %7751 = vmatprep.mubr.bf16.mxu1 %v8866_v48  ;;  %7808 = vmatprep.mubr.bf16.mxu0 %v8860_v19  ;;  %v8875_v21 = vcombine.low %v7488_v41, %v7492_v13 }
 0x50d   :  { %v16330_v11 = vpop.f32.mrf.mxu1  ;;  %v16332_v52 = vpop.f32.mrf.mxu0 }
 0x50e   :  { %17480 = vst [vmem:[#allocation94_spill] sm:$0xff] %v16325_v54  ;;  %v16343_v14 = vpack.c.bf16 %v6600_v0, %v6599_v60  ;;  %v10308_v23 = vadd.f32 %v16330_v11, %v16321_v34 }
 0x50f   :  { %v16345_v35 = vpop.f32.mrf.mxu1  ;;  %v16347_v5 = vpop.f32.mrf.mxu0 }
 0x510   :  { %17481 = vst [vmem:[#allocation35_spill] sm:$0xff] %v16343_v14  ;;  %v6528_v34 = vadd.f32 %v10308_v23, %v15512_v24 }
 0x511   :  { %v16349_v56 = vpop.f32.mrf.mxu1  ;;  %v16351_v20 = vpop.f32.mrf.mxu0 }
 0x512   :  { %v10311_v8 = vadd.f32 %v16349_v56, %v16345_v35  ;;  %v10302_v56 = vadd.f32 %v16300_v7, %v16292_v57  ;;  %v6593_v7 = vadd.f32 %v16323_v2, %v6528_v34 }
 0x513   :  { %7752 = vmatmul.mubr.bf16.gmra.mxu1 %v8865_v31  ;;  %v10334_v62 = vpop.f32.mrf.mxu1  ;;  %7809 = vmatmul.mubr.bf16.gmra.mxu0 %v8859_v40  ;;  %v11237_v15 = vpop.f32.mrf.mxu0 }
 0x514   :  { %7759 = vmatprep.mubr.bf16.mxu1 %v8874_v46  ;;  %7816 = vmatprep.mubr.bf16.mxu0 %v8868_v44  ;;  %v6520_v23 = vadd.f32 %v10302_v56, %v15540_v53 }
 0x515   :  { %v10335_v58 = vpop.f32.mrf.mxu1  ;;  %v6710_v51 = vpop.f32.mrf.mxu0 }
 0x516   :  { %v10336_v45 = vadd.f32 %v10335_v58, %v10334_v62 }
 0x517   :  { %v10337_v3 = vpop.f32.mrf.mxu1  ;;  %v11238_v10 = vpop.f32.mrf.mxu0 }
 0x518   :  { %v6646_v63 = vadd.f32 %v10336_v45, %v15576_v47 }
 0x519   :  { %v10338_v27 = vpop.f32.mrf.mxu1  ;;  %v6713_v48 = vpop.f32.mrf.mxu0 }
 0x51a   :  { %v6711_v16 = vadd.f32 %v6710_v51, %v6646_v63  ;;  %v10339_v30 = vadd.f32 %v10338_v27, %v10337_v3 }
 0x51b   :  { %7760 = vmatmul.mubr.bf16.gmra.mxu1 %v8873_v29  ;;  %v10340_v38 = vpop.f32.mrf.mxu1  ;;  %7817 = vmatmul.mubr.bf16.gmra.mxu0 %v8867_v42  ;;  %v16371_v62 = vpop.f32.mrf.mxu0 }
 0x51c   :  { %v6649_v59 = vadd.f32 %v10339_v30, %v15588_v36  ;;  %7824 = vmatprep.mubr.bf16.mxu0 %v8876_v49  ;;  %7865 = vmatprep.mubr.bf16.mxu1 %v8854_v55  ;;  %v6741_v60 = vmax.f32 %v6711_v16, 0.0 }
 0x51d   :  { %v10341_v19 = vpop.f32.mrf.mxu1  ;;  %v16375_v45 = vpop.f32.mrf.mxu0 }
 0x51e   :  { %v6714_v17 = vadd.f32 %v6713_v48, %v6649_v59  ;;  %v10342_v12 = vadd.f32 %v10341_v19, %v10340_v38  ;;  %17483 = vst [vmem:[#allocation43_spill] sm:$0xff] %v16375_v45 }
 0x51f   :  { %v10343_v6 = vpop.f32.mrf.mxu1 }
 0x520   :  { %v6742_v0 = vmax.f32 %v6714_v17, 0.0  ;;  %v6654_v33 = vadd.f32 %v10342_v12, %v15554_v26 }
 0x521   :  { %v10344_v1 = vpop.f32.mrf.mxu1 }
 0x522   :  { %v16364_v22 = vpack.c.bf16 %v6742_v0, %v6741_v60  ;;  %v10345_v37 = vadd.f32 %v10344_v1, %v10343_v6  ;;  %v6719_v40 = vadd.f32 %v11237_v15, %v6654_v33  ;;  %v16383_v15 = vpop.f32.mrf.mxu0 }
 0x523   :  { %v16366_v31 = vpop.f32.mrf.mxu1  ;;  %7825 = vmatmul.mubr.bf16.gmra.mxu0 %v8875_v21 }
 0x524   :  { %17482 = vst [vmem:[#allocation63_spill] sm:$0xff] %v16364_v22  ;;  %v6657_v46 = vadd.f32 %v10345_v37, %v15568_v9  ;;  %v6743_v41 = vmax.f32 %v6719_v40, 0.0  ;;  %v16387_v55 = vpop.f32.mrf.mxu0 }
 0x525   :  { %v16369_v44 = vpop.f32.mrf.mxu1 }
 0x526   :  { %v6722_v58 = vadd.f32 %v11238_v10, %v6657_v46 }
 0x527   :  { %v16373_v51 = vpop.f32.mrf.mxu1 }
 0x528   :  { %v6744_v13 = vmax.f32 %v6722_v58, 0.0 }
 0x529   :  { %v16377_v3 = vpop.f32.mrf.mxu1 }
 0x52a   :  { %v16379_v29 = vpack.c.bf16 %v6744_v13, %v6743_v41 }
 0x52b   :  { %v16381_v42 = vpop.f32.mrf.mxu1 }
 0x52c   :  { %17484 = vst [vmem:[#allocation71_spill] sm:$0xff] %v16379_v29 }
 0x52d   :  { %v16385_v63 = vpop.f32.mrf.mxu1 }
 0x52f   :  { %v10355_v49 = vpop.f32.mrf.mxu1 }
 0x531   :  { %v10356_v10 = vpop.f32.mrf.mxu1 }
 0x533   :  { %v10380_v27 = vpop.f32.mrf.mxu0  ;;  %v16389_v16 = vpop.f32.mrf.mxu1 }
 0x535   :  { %v10381_v30 = vpop.f32.mrf.mxu0  ;;  %v16391_v38 = vpop.f32.mrf.mxu1 }
 0x537   :  { %v10383_v59 = vpop.f32.mrf.mxu0  ;;  %v11250_v48 = vpop.f32.mrf.mxu1 }
 0x539   :  { %v10384_v19 = vpop.f32.mrf.mxu0  ;;  %v16393_v17 = vpop.f32.mrf.mxu1 }
 0x53b   :  { %v10386_v12 = vpop.f32.mrf.mxu0  ;;  %v11253_v6 = vpop.f32.mrf.mxu1 }
 0x53d   :  { %v10387_v21 = vpop.f32.mrf.mxu0  ;;  %v6868_v60 = vpop.f32.mrf.mxu1 }
 0x53f   :  { %v10389_v0 = vpop.f32.mrf.mxu0  ;;  %v11254_v33 = vpop.f32.mrf.mxu1 }
 0x541   :  { %v10390_v1 = vpop.f32.mrf.mxu0  ;;  %v6871_v37 = vpop.f32.mrf.mxu1 }
 0x543   :  { %v10392_v40 = vpop.f32.mrf.mxu0  ;;  %v16395_v46 = vpop.f32.mrf.mxu1 }
 0x544   :  { %17485 = vst [vmem:[#allocation38_spill] sm:$0xff] %v16395_v46  ;;  %v6531_v46 = vadd.f32 %v10311_v8, %v15531_v4 }
 0x545   :  { %v10393_v58 = vpop.f32.mrf.mxu0  ;;  %v16397_v13 = vpop.f32.mrf.mxu1 }
 0x546   :  { %17486 = vst [vmem:[#allocation24_spill] sm:$0xff] %v16397_v13  ;;  %v10394_v61 = vadd.f32 %v10393_v58, %v10392_v40  ;;  %v10391_v13 = vadd.f32 %v10390_v1, %v10389_v0  ;;  %v6596_v40 = vadd.f32 %v16347_v5, %v6531_v46  ;;  %v10385_v0 = vadd.f32 %v10384_v19, %v10383_v59 }
 0x547   :  { %v10395_v41 = vpop.f32.mrf.mxu0  ;;  %v16401_v25 = vpop.f32.mrf.mxu1 }
 0x548   :  { %v6804_v8 = vadd.f32 %v10394_v61, %v15540_v53  ;;  %v6606_v59 = vmax.f32 %v6596_v40, 0.0 }
 0x549   :  { %v10396_v50 = vpop.f32.mrf.mxu0  ;;  %v16406_v45 = vpop.f32.mrf.mxu1 }
 0x54a   :  { %v10397_v22 = vadd.f32 %v10396_v50, %v10395_v41  ;;  %v10305_v50 = vadd.f32 %v16319_v28, %v16315_v39  ;;  %v10382_v28 = vadd.f32 %v10381_v30, %v10380_v27  ;;  %v6605_v41 = vmax.f32 %v6593_v7, 0.0  ;;  %v17487_v7 = vld [vmem:[#allocation94_spill] sm:$0xff] }
 0x54b   :  { %v10398_v18 = vpop.f32.mrf.mxu0  ;;  %v16417_v1 = vpop.f32.mrf.mxu1  ;;  %v10354_v27 = vadd.f32 %v16385_v63, %v16381_v42  ;;  %v10348_v63 = vadd.f32 %v16369_v44, %v16366_v31 }
 0x54c   :  { %v6807_v35 = vadd.f32 %v10397_v22, %v15549_v43  ;;  %v6523_v39 = vadd.f32 %v10305_v50, %v15549_v43  ;;  %v6788_v30 = vadd.f32 %v10382_v28, %v15576_v47 }
 0x54d   :  { %v10399_v29 = vpop.f32.mrf.mxu0 }
 0x54e   :  { %v10400_v32 = vadd.f32 %v10399_v29, %v10398_v18  ;;  %v10388_v18 = vadd.f32 %v10387_v21, %v10386_v12  ;;  %v6872_v58 = vadd.f32 %v6871_v37, %v6807_v35  ;;  %v6588_v19 = vadd.f32 %v16351_v20, %v6523_v39 }
 0x54f   :  { %v10401_v14 = vpop.f32.mrf.mxu0  ;;  %v10357_v12 = vadd.f32 %v10356_v10, %v10355_v49 }
 0x550   :  { %v6812_v54 = vadd.f32 %v10400_v32, %v15512_v24  ;;  %v6799_v32 = vadd.f32 %v10391_v13, %v15568_v9  ;;  %v6796_v61 = vadd.f32 %v10388_v18, %v15554_v26  ;;  %v6888_v2 = vmax.f32 %v6872_v58, 0.0 }
 0x551   :  { %v10402_v11 = vpop.f32.mrf.mxu0  ;;  %v6585_v13 = vadd.f32 %v16332_v52, %v6520_v23  ;;  %v6604_v10 = vmax.f32 %v6588_v19, 0.0  ;;  %v6673_v56 = vadd.f32 %v10357_v12, %v15531_v4  ;;  %v17488_v23 = vld [vmem:[#allocation43_spill] sm:$0xff] }
 0x552   :  { %v10403_v29 = vadd.f32 %v10402_v11, %v10401_v14  ;;  %v6877_v22 = vadd.f32 %v11253_v6, %v6812_v54  ;;  %v6869_v14 = vadd.f32 %v6868_v60, %v6804_v8  ;;  %v6791_v54 = vadd.f32 %v10385_v0, %v15588_v36  ;;  %v16427_v6 = vpop.f32.mrf.mxu1 }
 0x553   :  { %v6864_v21 = vadd.f32 %v11250_v48, %v6799_v32  ;;  %v6861_v60 = vadd.f32 %v16389_v16, %v6796_v61  ;;  %v6610_v48 = vpack.c.bf16 %v6606_v59, %v6605_v41  ;;  %v6603_v42 = vmax.f32 %v6585_v13, 0.0  ;;  %v17489_v59 = vld [vmem:[#allocation35_spill] sm:$0xff]  ;;  %v17490_v41 = vld [vmem:[#allocation64_spill] sm:$0xff] }
 0x554   :  { %v6815_v57 = vadd.f32 %v10403_v29, %v15531_v4  ;;  %v6889_v37 = vmax.f32 %v6877_v22, 0.0  ;;  %v6887_v20 = vmax.f32 %v6869_v14, 0.0  ;;  %v16436_v35 = vpop.f32.mrf.mxu1  ;;  %v6856_v52 = vadd.f32 %v16393_v17, %v6791_v54  ;;  %v17491_v13 = vld [vmem:[#allocation24_spill] sm:$0xff] }
 0x555   :  { %v6886_v50 = vmax.f32 %v6864_v21, 0.0  ;;  %v6670_v16 = vadd.f32 %v10354_v27, %v15512_v24  ;;  %v6853_v11 = vadd.f32 %v16391_v38, %v6788_v30  ;;  %v6738_v17 = vadd.f32 %v16383_v15, %v6673_v56  ;;  %v16466_v56 = vld [vmem:[%s16767_s5 + $0x18] sm:$0xff] }
 0x556   :  { %v6880_v5 = vadd.f32 %v11254_v33, %v6815_v57  ;;  %v10351_v33 = vadd.f32 %v16377_v3, %v16373_v51  ;;  %v6893_v34 = vpack.c.bf16 %v6888_v2, %v6887_v20  ;;  %v6885_v51 = vmax.f32 %v6861_v60, 0.0  ;;  %v16444_v18 = vpop.f32.mrf.mxu1  ;;  %17493 = vst [vmem:[#allocation82_spill] sm:$0xff] %v16466_v56 }
 0x557   :  { %v6609_v3 = vpack.c.bf16 %v6604_v10, %v6603_v42  ;;  %v6884_v29 = vmax.f32 %v6856_v52, 0.0  ;;  %v6662_v0 = vadd.f32 %v10348_v63, %v15540_v53  ;;  %v6735_v31 = vadd.f32 %v16371_v62, %v6670_v16  ;;  %v16471_v52 = vld [vmem:[%s16767_s5 + $0x38] sm:$0xff]  ;;  %v17495_v42 = vld [vmem:[#allocation71_spill] sm:$0xff] }
 0x558   :  { %v6890_v46 = vmax.f32 %v6880_v5, 0.0  ;;  %v6665_v8 = vadd.f32 %v10351_v33, %v15549_v43  ;;  %v6892_v40 = vpack.c.bf16 %v6886_v50, %v6885_v51  ;;  %v6883_v44 = vmax.f32 %v6853_v11, 0.0  ;;  %17494 = vst [vmem:[#allocation62_spill] sm:$0xff] %v16471_v52 }
 0x559   :  { %v6748_v22 = vmax.f32 %v6738_v17, 0.0  ;;  %v6727_v39 = vadd.f32 %v17488_v23, %v6662_v0  ;;  %v6747_v15 = vmax.f32 %v6735_v31, 0.0  ;;  %v8856_v16 = vcombine.high %v16466_v56, %v16471_v52  ;;  %v17498_v31 = vld [vmem:[#allocation38_spill] sm:$0xff] }
 0x55a   :  { %v6894_v49 = vpack.c.bf16 %v6890_v46, %v6889_v37  ;;  %v6730_v38 = vadd.f32 %v16387_v55, %v6665_v8  ;;  %v6891_v58 = vpack.c.bf16 %v6884_v29, %v6883_v44 }
 0x55b   :  { %v6752_v5 = vpack.c.bf16 %v6748_v22, %v6747_v15  ;;  %v6745_v19 = vmax.f32 %v6727_v39, 0.0  ;;  %7930 = vmatprep.mubr.bf16.mxu0 %v8856_v16  ;;  %v7477_v22 = vld [vmem:[%s16767_s5 + $0x70] sm:$0xff] }
 0x55c   :  { %10634 = vmatprep.subr.bf16.mxu1 %v6894_v49  ;;  %v6746_v14 = vmax.f32 %v6730_v38, 0.0  ;;  %v7473_v38 = vld [vmem:[%s16767_s5 + $0x50] sm:$0xff] }
 0x55d   :  { %10635 = vmatpush3.bf16.msra.mxu1 %v6610_v48  ;;  %v17492_v48 = vld [vmem:[#allocation49_spill] sm:$0xff]  ;;  %v17500_v15 = vld [vmem:[#allocation72_spill] sm:$0xff] }
 0x55e   :  { %10636 = vmatprep.subr.bf16.mxu1 %v6893_v34  ;;  %v6751_v21 = vpack.c.bf16 %v6746_v14, %v6745_v19 }
 0x561   :  { %10637 = vmatpush3.bf16.msra.mxu1 %v6609_v3 }
 0x562   :  { %10638 = vmatprep.subr.bf16.mxu1 %v6892_v40  ;;  %v17496_v40 = vld [vmem:[#allocation95_spill] sm:$0xff] }
 0x563   :  { %v10432_v32 = vpop.f32.mrf.mxu1 }
 0x565   :  { %v10433_v57 = vpop.f32.mrf.mxu1  ;;  %10639 = vmatpush3.bf16.msra.mxu1 %v17487_v7 }
 0x566   :  { %v16453_v28 = vadd.f32 %v10433_v57, %v10432_v32  ;;  %10640 = vmatprep.subr.bf16.mxu1 %v6891_v58  ;;  %v17499_v32 = vld [vmem:[#allocation63_spill] sm:$0xff] }
 0x567   :  { %v10435_v61 = vpop.f32.mrf.mxu1 }
 0x569   :  { %v10436_v62 = vpop.f32.mrf.mxu1  ;;  %10641 = vmatpush3.bf16.msra.mxu1 %v17489_v59 }
 0x56a   :  { %v16456_v12 = vadd.f32 %v10436_v62, %v10435_v61  ;;  %10642 = vmatprep.subr.bf16.mxu1 %v6752_v5  ;;  %v8862_v61 = vcombine.high %v7473_v38, %v7477_v22 }
 0x56b   :  { %v10438_v55 = vpop.f32.mrf.mxu1  ;;  %v6929_v54 = vpop.f32.mrf.mxu0 }
 0x56c   :  { %v6930_v37 = vadd.f32 %v6929_v54, %v15576_v47  ;;  %v17501_v54 = vld [vmem:[#allocation47_spill] sm:$0xff] }
 0x56d   :  { %v10439_v2 = vpop.f32.mrf.mxu1  ;;  %v6931_v46 = vpop.f32.mrf.mxu0  ;;  %10643 = vmatpush3.bf16.msra.mxu1 %v17490_v41 }
 0x56e   :  { %v6995_v27 = vadd.f32 %v17491_v13, %v6930_v37  ;;  %v10440_v30 = vadd.f32 %v10439_v2, %v10438_v55  ;;  %10644 = vmatprep.subr.bf16.mxu1 %v6751_v21  ;;  %v17502_v21 = vld [vmem:[#allocation93_spill] sm:$0xff] }
 0x56f   :  { %v10441_v60 = vpop.f32.mrf.mxu1  ;;  %v6932_v20 = vpop.f32.mrf.mxu0  ;;  %v17503_v37 = vcombine.low %v17501_v54, %v17502_v21 }
 0x570   :  { %v6933_v49 = vadd.f32 %v6932_v20, %v15588_v36  ;;  %v7025_v3 = vmax.f32 %v6995_v27, 0.0  ;;  %v7485_v27 = vld [vmem:[%s16767_s5 + $0xb0] sm:$0xff] }
 0x571   :  { %v10442_v10 = vpop.f32.mrf.mxu1  ;;  %v6934_v33 = vpop.f32.mrf.mxu0  ;;  %10645 = vmatpush3.bf16.msra.mxu1 %v17492_v48 }
 0x572   :  { %v6998_v50 = vadd.f32 %v16406_v45, %v6933_v49  ;;  %v10443_v34 = vadd.f32 %v10442_v10, %v10441_v60  ;;  %10646 = vmatprep.subr.bf16.mxu1 %v17495_v42  ;;  %v8861_v10 = vcombine.low %v7473_v38, %v7477_v22  ;;  %v7493_v22 = vld [vmem:[%s16767_s5 + $0xf0] sm:$0xff] }
 0x573   :  { %v16479_v11 = vpop.f32.mrf.mxu1  ;;  %v6937_v51 = vpop.f32.mrf.mxu0 }
 0x574   :  { %v7026_v8 = vmax.f32 %v6998_v50, 0.0  ;;  %v6938_v17 = vadd.f32 %v6937_v51, %v15554_v26  ;;  %v7083_v38 = vadd.f32 %v10443_v34, %v15568_v9 }
 0x575   :  { %v16482_v29 = vpop.f32.mrf.mxu1  ;;  %v6939_v45 = vpop.f32.mrf.mxu0  ;;  %10647 = vmatpush3.bf16.msra.mxu1 %v17496_v40 }
 0x576   :  { %v16485_v0 = vpack.c.bf16 %v7026_v8, %v7025_v3  ;;  %v7003_v44 = vadd.f32 %v17498_v31, %v6938_v17  ;;  %10648 = vmatprep.subr.bf16.mxu1 %v17499_v32  ;;  %v7080_v8 = vadd.f32 %v10440_v30, %v15554_v26  ;;  %v7072_v45 = vadd.f32 %v16453_v28, %v15576_v47  ;;  %v7489_v30 = vld [vmem:[%s16767_s5 + $0xd0] sm:$0xff] }
 0x577   :  { %v16495_v58 = vpop.f32.mrf.mxu1  ;;  %v6940_v57 = vpop.f32.mrf.mxu0 }
 0x578   :  { %17497 = vst [vmem:[#allocation81_spill] sm:$0xff] %v16485_v0  ;;  %v6941_v7 = vadd.f32 %v6940_v57, %v15568_v9  ;;  %v7027_v59 = vmax.f32 %v7003_v44, 0.0 }
 0x579   :  { %v16498_v23 = vpop.f32.mrf.mxu1  ;;  %v6942_v39 = vpop.f32.mrf.mxu0  ;;  %10649 = vmatpush3.bf16.msra.mxu1 %v17500_v15 }
 0x57a   :  { %v7006_v14 = vadd.f32 %v16401_v25, %v6941_v7  ;;  %v7481_v25 = vld [vmem:[%s16767_s5 + $0x90] sm:$0xff] }
 0x57b   :  { %v16502_v5 = vpop.f32.mrf.mxu1  ;;  %v6945_v62 = vpop.f32.mrf.mxu0  ;;  %v8870_v50 = vcombine.high %v7481_v25, %v7485_v27  ;;  %v8869_v7 = vcombine.low %v7481_v25, %v7485_v27 }
 0x57c   :  { %v7028_v19 = vmax.f32 %v7006_v14, 0.0  ;;  %v6946_v55 = vadd.f32 %v6945_v62, %v15540_v53  ;;  %7866 = vmatmul.mubr.bf16.vlgmr.msra.gmra.mxu1 %v17503_v37  ;;  %v8878_v62 = vcombine.high %v7489_v30, %v7493_v22 }
 0x57d   :  { %v16508_v2 = vpop.f32.mrf.mxu1  ;;  %v6947_v46 = vpop.f32.mrf.mxu0  ;;  %7873 = vmatprep.mubr.bf16.mxu1 %v8862_v61 }
 0x57e   :  { %v16510_v41 = vpack.c.bf16 %v7028_v19, %v7027_v59  ;;  %v7011_v13 = vadd.f32 %v16427_v6, %v6946_v55  ;;  %v10452_v56 = vadd.f32 %v16508_v2, %v16502_v5  ;;  %v10446_v5 = vadd.f32 %v16482_v29, %v16479_v11 }
 0x57f   :  { %v16519_v60 = vpop.f32.mrf.mxu1  ;;  %v6948_v20 = vpop.f32.mrf.mxu0  ;;  %v10449_v2 = vadd.f32 %v16498_v23, %v16495_v58 }
 0x580   :  { %17504 = vst [vmem:[#allocation84_spill] sm:$0xff] %v16510_v41  ;;  %v6949_v49 = vadd.f32 %v6948_v20, %v15549_v43  ;;  %v7029_v51 = vmax.f32 %v7011_v13, 0.0 }
 0x581   :  { %v16522_v33 = vpop.f32.mrf.mxu1  ;;  %v6950_v48 = vpop.f32.mrf.mxu0  ;;  %v7091_v23 = vadd.f32 %v10449_v2, %v15549_v43 }
 0x582   :  { %v7014_v6 = vadd.f32 %v16444_v18, %v6949_v49  ;;  %v10455_v0 = vadd.f32 %v16522_v33, %v16519_v60 }
 0x583   :  { %v11273_v42 = vpop.f32.mrf.mxu1  ;;  %v6953_v16 = vpop.f32.mrf.mxu0 }
 0x584   :  { %v7030_v3 = vmax.f32 %v7014_v6, 0.0  ;;  %v6954_v17 = vadd.f32 %v6953_v16, %v15512_v24  ;;  %7874 = vmatmul.mubr.bf16.gmra.mxu1 %v8861_v10  ;;  %v7145_v32 = vadd.f32 %v11273_v42, %v7080_v8  ;;  %v8877_v42 = vcombine.low %v7489_v30, %v7493_v22 }
 0x585   :  { %v7136_v40 = vpop.f32.mrf.mxu1  ;;  %v6955_v31 = vpop.f32.mrf.mxu0  ;;  %7881 = vmatprep.mubr.bf16.mxu1 %v8870_v50  ;;  %v7099_v60 = vadd.f32 %v10455_v0, %v15531_v4  ;;  %v7088_v0 = vadd.f32 %v10446_v5, %v15540_v53 }
 0x586   :  { %v16529_v44 = vpack.c.bf16 %v7030_v3, %v7029_v51  ;;  %v7019_v18 = vadd.f32 %v16417_v1, %v6954_v17  ;;  %v7137_v39 = vadd.f32 %v7136_v40, %v7072_v45  ;;  %v7075_v1 = vadd.f32 %v16456_v12, %v15588_v36 }
 0x587   :  { %v11274_v57 = vpop.f32.mrf.mxu1  ;;  %v6956_v28 = vpop.f32.mrf.mxu0  ;;  %v7169_v59 = vmax.f32 %v7145_v32, 0.0 }
 0x588   :  { %17505 = vst [vmem:[#allocation80_spill] sm:$0xff] %v16529_v44  ;;  %v7148_v15 = vadd.f32 %v11274_v57, %v7083_v38  ;;  %v6957_v61 = vadd.f32 %v6956_v28, %v15531_v4  ;;  %v7031_v21 = vmax.f32 %v7019_v18, 0.0  ;;  %v7167_v13 = vmax.f32 %v7137_v39, 0.0 }
 0x589   :  { %v7139_v14 = vpop.f32.mrf.mxu1  ;;  %v6958_v34 = vpop.f32.mrf.mxu0 }
 0x58a   :  { %v7170_v19 = vmax.f32 %v7148_v15, 0.0  ;;  %v7022_v55 = vadd.f32 %v16436_v35, %v6957_v61  ;;  %v7140_v54 = vadd.f32 %v7139_v14, %v7075_v1 }
 0x58b   :  { %v16543_v37 = vpop.f32.mrf.mxu1  ;;  %v10478_v46 = vpop.f32.mrf.mxu0 }
 0x58c   :  { %v16545_v25 = vpack.c.bf16 %v7170_v19, %v7169_v59  ;;  %v7032_v27 = vmax.f32 %v7022_v55, 0.0  ;;  %v7168_v20 = vmax.f32 %v7140_v54, 0.0  ;;  %7882 = vmatmul.mubr.bf16.gmra.mxu1 %v8869_v7 }
 0x58d   :  { %v16547_v49 = vpop.f32.mrf.mxu1  ;;  %v10479_v12 = vpop.f32.mrf.mxu0  ;;  %7889 = vmatprep.mubr.bf16.mxu1 %v8878_v62 }
 0x58e   :  { %17506 = vst [vmem:[#allocation85_spill] sm:$0xff] %v16545_v25  ;;  %v16549_v10 = vpack.c.bf16 %v7032_v27, %v7031_v21  ;;  %v16551_v48 = vpack.c.bf16 %v7168_v20, %v7167_v13  ;;  %v10480_v35 = vadd.f32 %v10479_v12, %v10478_v46 }
 0x58f   :  { %v16553_v50 = vpop.f32.mrf.mxu1  ;;  %v10481_v6 = vpop.f32.mrf.mxu0 }
 0x590   :  { %17507 = vst [vmem:[#allocation55_spill] sm:$0xff] %v16549_v10  ;;  %17508 = vst [vmem:[#allocation73_spill] sm:$0xff] %v16551_v48  ;;  %v7214_v31 = vadd.f32 %v10480_v35, %v15576_v47 }
 0x591   :  { %v16555_v16 = vpop.f32.mrf.mxu1  ;;  %v10482_v51 = vpop.f32.mrf.mxu0 }
 0x592   :  { %v10483_v3 = vadd.f32 %v10482_v51, %v10481_v6 }
 0x593   :  { %v11285_v8 = vpop.f32.mrf.mxu1  ;;  %v10484_v17 = vpop.f32.mrf.mxu0 }
 0x594   :  { %7890 = vmatmul.mubr.bf16.gmra.mxu1 %v8877_v42  ;;  %v7217_v7 = vadd.f32 %v10483_v3, %v15588_v36 }
 0x595   :  { %v7278_v45 = vpop.f32.mrf.mxu1  ;;  %v10485_v40 = vpop.f32.mrf.mxu0 }
 0x596   :  { %v10486_v32 = vadd.f32 %v10485_v40, %v10484_v17  ;;  %v7279_v57 = vadd.f32 %v7278_v45, %v7214_v31 }
 0x597   :  { %v11286_v18 = vpop.f32.mrf.mxu1  ;;  %v10487_v38 = vpop.f32.mrf.mxu0 }
 0x598   :  { %v7222_v28 = vadd.f32 %v10486_v32, %v15554_v26  ;;  %v7309_v14 = vmax.f32 %v7279_v57, 0.0 }
 0x599   :  { %v7281_v30 = vpop.f32.mrf.mxu1  ;;  %v10488_v22 = vpop.f32.mrf.mxu0 }
 0x59a   :  { %v7282_v39 = vadd.f32 %v7281_v30, %v7217_v7  ;;  %v10489_v15 = vadd.f32 %v10488_v22, %v10487_v38  ;;  %v7287_v34 = vadd.f32 %v11285_v8, %v7222_v28 }
 0x59b   :  { %v16560_v61 = vpop.f32.mrf.mxu0  ;;  %v16562_v1 = vpop.f32.mrf.mxu1 }
 0x59c   :  { %v7310_v62 = vmax.f32 %v7282_v39, 0.0  ;;  %v7225_v59 = vadd.f32 %v10489_v15, %v15568_v9  ;;  %v7311_v27 = vmax.f32 %v7287_v34, 0.0 }
 0x59d   :  { %v16565_v19 = vpop.f32.mrf.mxu0  ;;  %v16567_v55 = vpop.f32.mrf.mxu1 }
 0x59e   :  { %17509 = vst [vmem:[#allocation12_spill] sm:$0xff] %v16567_v55  ;;  %v16569_v54 = vpack.c.bf16 %v7310_v62, %v7309_v14  ;;  %v7290_v21 = vadd.f32 %v11286_v18, %v7225_v59  ;;  %v16597_v14 = vpop.permute.xlu0 %7535  ;;  %v7096_v55 = vadd.f32 %v10452_v56, %v15512_v24  ;;  %v7164_v56 = vadd.f32 %v16553_v50, %v7099_v60 }
 0x59f   :  { %v16571_v46 = vpop.f32.mrf.mxu0  ;;  %v16573_v13 = vpop.f32.mrf.mxu1  ;;  %17512 = vst [vmem:[#allocation98_spill] sm:$0xff] %v16597_v14 }
 0x5a0   :  { %17510 = vst [vmem:[#allocation83_spill] sm:$0xff] %v16569_v54  ;;  %v7312_v20 = vmax.f32 %v7290_v21, 0.0  ;;  %v16599_v21 = vpop.permute.xlu1 %7540 }
 0x5a1   :  { %v16575_v12 = vpop.f32.mrf.mxu0  ;;  %v16581_v42 = vpop.f32.mrf.mxu1  ;;  %17513 = vst [vmem:[#allocation97_spill] sm:$0xff] %v16599_v21 }
 0x5a2   :  { %v16577_v35 = vpack.c.bf16 %v7312_v20, %v7311_v27  ;;  %v16601_v63 = vpop.permute.xlu0 %7525 }
 0x5a3   :  { %v16579_v6 = vpop.f32.mrf.mxu0  ;;  %v16585_v3 = vpop.f32.mrf.mxu1  ;;  %17514 = vst [vmem:[#allocation96_spill] sm:$0xff] %v16601_v63 }
 0x5a4   :  { %17511 = vst [vmem:[#allocation99_spill] sm:$0xff] %v16577_v35  ;;  %v16607_v35 = vpop.permute.xlu1 %7530 }
 0x5a5   :  { %v16583_v51 = vpop.f32.mrf.mxu0  ;;  %v16591_v45 = vpop.f32.mrf.mxu1  ;;  %17515 = vst [vmem:[#allocation107_spill] sm:$0xff] %v16607_v35 }
 0x5a6   :  { %v16609_v21 = vpop.permute.xlu0 %7515 }
 0x5a7   :  { %v16587_v8 = vpop.f32.mrf.mxu0  ;;  %v16593_v32 = vpop.f32.mrf.mxu1 }
 0x5a8   :  { %v16622_v29 = vpop.permute.xlu1 %7520 }
 0x5a9   :  { %v16589_v17 = vpop.f32.mrf.mxu0  ;;  %v16595_v57 = vpop.f32.mrf.mxu1 }
 0x5ab   :  { %v10524_v40 = vpop.f32.mrf.mxu0  ;;  %v11301_v7 = vpop.f32.mrf.mxu1 }
 0x5ad   :  { %v10525_v31 = vpop.f32.mrf.mxu0  ;;  %v7436_v39 = vpop.f32.mrf.mxu1 }
 0x5af   :  { %v10527_v18 = vpop.f32.mrf.mxu0  ;;  %v11302_v62 = vpop.f32.mrf.mxu1 }
 0x5b1   :  { %v10528_v38 = vpop.f32.mrf.mxu0  ;;  %v7439_v20 = vpop.f32.mrf.mxu1 }
 0x5b3   :  { %v10530_v28 = vpop.f32.mrf.mxu0 }
 0x5b5   :  { %v10531_v30 = vpop.f32.mrf.mxu0 }
 0x5b7   :  { %v10533_v22 = vpop.f32.mrf.mxu0 }
 0x5b9   :  { %v10534_v15 = vpop.f32.mrf.mxu0 }
 0x5ba   :  { %v10535_v33 = vadd.f32 %v10534_v15, %v10533_v22 }
 0x5bb   :  { %v10536_v34 = vpop.f32.mrf.mxu0 }
 0x5bd   :  { %v10537_v59 = vpop.f32.mrf.mxu0 }
 0x5be   :  { %v10538_v44 = vadd.f32 %v10537_v59, %v10536_v34  ;;  %v7161_v34 = vadd.f32 %v16543_v37, %v7096_v55  ;;  %v7367_v37 = vadd.f32 %v10535_v33, %v15568_v9  ;;  %v7156_v9 = vadd.f32 %v16555_v16, %v7091_v23 }
 0x5bf   :  { %v10539_v27 = vpop.f32.mrf.mxu0 }
 0x5c0   :  { %v7173_v22 = vmax.f32 %v7161_v34, 0.0 }
 0x5c1   :  { %v10540_v52 = vpop.f32.mrf.mxu0 }
 0x5c2   :  { %v10541_v14 = vadd.f32 %v10540_v52, %v10539_v27 }
 0x5c3   :  { %v10570_v54 = vpop.f32.mrf.mxu1  ;;  %v10542_v41 = vpop.f32.mrf.mxu0 }
 0x5c4   :  { %v7375_v59 = vadd.f32 %v10541_v14, %v15549_v43 }
 0x5c5   :  { %v10571_v10 = vpop.f32.mrf.mxu1  ;;  %v10543_v48 = vpop.f32.mrf.mxu0 }
 0x5c6   :  { %v10572_v63 = vadd.f32 %v10571_v10, %v10570_v54  ;;  %v10544_v25 = vadd.f32 %v10543_v48, %v10542_v41  ;;  %v10532_v41 = vadd.f32 %v10531_v30, %v10530_v28  ;;  %v7372_v10 = vadd.f32 %v10538_v44, %v15540_v53  ;;  %v7506_v28 = vpop.permute.xlu0 %7505 }
 0x5c7   :  { %v10573_v35 = vpop.f32.mrf.mxu1  ;;  %v10545_v52 = vpop.f32.mrf.mxu0  ;;  %v10529_v48 = vadd.f32 %v10528_v38, %v10527_v18  ;;  %v7174_v44 = vmax.f32 %v7164_v56, 0.0  ;;  %v10526_v30 = vadd.f32 %v10525_v31, %v10524_v40  ;;  %v10501_v38 = vadd.f32 %v16589_v17, %v16587_v8 }
 0x5c8   :  { %v7380_v27 = vadd.f32 %v10544_v25, %v15512_v24  ;;  %v7440_v25 = vadd.f32 %v7439_v20, %v7375_v59  ;;  %v7364_v14 = vadd.f32 %v10532_v41, %v15554_v26  ;;  %v7437_v60 = vadd.f32 %v7436_v39, %v7372_v10  ;;  %v7511_v39 = vpop.permute.xlu1 %7510 }
 0x5c9   :  { %v10546_v11 = vpop.f32.mrf.mxu0  ;;  %v10574_v55 = vpop.f32.mrf.mxu1  ;;  %v7738_v5 = vadd.f32 %v10572_v63, %v7506_v28  ;;  %v7432_v20 = vadd.f32 %v16593_v32, %v7367_v37  ;;  %v7153_v63 = vadd.f32 %v16547_v49, %v7088_v0  ;;  %v7356_v16 = vadd.f32 %v10526_v30, %v15576_v47  ;;  %v17518_v28 = vld [vmem:[#allocation73_spill] sm:$0xff]  ;;  %v17520_v30 = vld [vmem:[#allocation80_spill] sm:$0xff] }
 0x5ca   :  { %v10547_v58 = vadd.f32 %v10546_v11, %v10545_v52  ;;  %v7445_v15 = vadd.f32 %v11301_v7, %v7380_v27  ;;  %v10575_v11 = vadd.f32 %v10574_v55, %v10573_v35  ;;  %v7359_v7 = vadd.f32 %v10529_v48, %v15588_v36 }
 0x5cb   :  { %v10610_v54 = vpop.f32.mrf.mxu0  ;;  %v7456_v34 = vmax.f32 %v7440_v25, 0.0  ;;  %v10498_v35 = vadd.f32 %v16583_v51, %v16579_v6  ;;  %v7429_v8 = vadd.f32 %v16585_v3, %v7364_v14  ;;  %v7455_v36 = vmax.f32 %v7437_v60, 0.0  ;;  %v17517_v25 = vld [vmem:[#allocation12_spill] sm:$0xff]  ;;  %v17523_v60 = vld [vmem:[#allocation83_spill] sm:$0xff] }
 0x5cc   :  { %v7383_v50 = vadd.f32 %v10547_v58, %v15531_v4  ;;  %v7457_v40 = vmax.f32 %v7445_v15, 0.0  ;;  %v7178_v27 = vpack.c.bf16 %v7174_v44, %v7173_v22  ;;  %v7172_v56 = vmax.f32 %v7156_v9, 0.0  ;;  %v17522_v14 = vld [vmem:[#allocation84_spill] sm:$0xff]  ;;  %v17526_v9 = vld [vmem:[#allocation62_spill] sm:$0xff] }
 0x5cd   :  { %v10611_v52 = vpop.f32.mrf.mxu0  ;;  %v10495_v41 = vadd.f32 %v16575_v12, %v16571_v46  ;;  %v7241_v10 = vadd.f32 %v10501_v38, %v15531_v4  ;;  %v7424_v49 = vadd.f32 %v16595_v57, %v7359_v7  ;;  %v7454_v58 = vmax.f32 %v7432_v20, 0.0  ;;  %v7482_v7 = vld [vmem:[%s16767_s5 + $0x98] sm:$0xff] }
 0x5ce   :  { %v7448_v2 = vadd.f32 %v11302_v62, %v7383_v50  ;;  %v10612_v18 = vadd.f32 %v10611_v52, %v10610_v54  ;;  %v7741_v62 = vadd.f32 %v10575_v11, %v7511_v39  ;;  %v7461_v47 = vpack.c.bf16 %v7456_v34, %v7455_v36  ;;  %v7474_v52 = vld [vmem:[%s16767_s5 + $0x58] sm:$0xff] }
 0x5cf   :  { %v10613_v33 = vpop.f32.mrf.mxu0  ;;  %v7171_v51 = vmax.f32 %v7153_v63, 0.0  ;;  %v10492_v3 = vadd.f32 %v16565_v19, %v16560_v61  ;;  %v7238_v0 = vadd.f32 %v10498_v35, %v15512_v24  ;;  %v7421_v23 = vadd.f32 %v16591_v45, %v7356_v16  ;;  %v17516_v45 = vld [vmem:[#allocation85_spill] sm:$0xff]  ;;  %v16686_v16 = vpop.f32.mrf.mxu1 }
 0x5d0   :  { %v7458_v31 = vmax.f32 %v7448_v2, 0.0  ;;  %v16634_v26 = vadd.f32 %v10612_v18, %v7738_v5  ;;  %v7453_v48 = vmax.f32 %v7429_v8, 0.0  ;;  %v7233_v4 = vadd.f32 %v10495_v41, %v15549_v43  ;;  %v7478_v5 = vld [vmem:[%s16767_s5 + $0x78] sm:$0xff]  ;;  %v17525_v18 = vld [vmem:[#allocation82_spill] sm:$0xff] }
 0x5d1   :  { %v10614_v17 = vpop.f32.mrf.mxu0  ;;  %v7177_v46 = vpack.c.bf16 %v7172_v56, %v7171_v51  ;;  %v7306_v12 = vadd.f32 %v16573_v13, %v7241_v10  ;;  %v7452_v57 = vmax.f32 %v7424_v49, 0.0  ;;  %v7230_v55 = vadd.f32 %v10492_v3, %v15540_v53  ;;  %v17524_v11 = vld [vmem:[#allocation81_spill] sm:$0xff]  ;;  %v16688_v8 = vpop.f32.mrf.mxu1 }
 0x5d2   :  { %v10615_v32 = vadd.f32 %v10614_v17, %v10613_v33  ;;  %v7462_v59 = vpack.c.bf16 %v7458_v31, %v7457_v40  ;;  %v7460_v37 = vpack.c.bf16 %v7454_v58, %v7453_v48  ;;  %v7303_v54 = vadd.f32 %v16562_v1, %v7238_v0  ;;  %v17519_v1 = vld [vmem:[#allocation55_spill] sm:$0xff]  ;;  %v7486_v20 = vld [vmem:[%s16767_s5 + $0xb8] sm:$0xff] }
 0x5d3   :  { %v7451_v22 = vmax.f32 %v7421_v23, 0.0  ;;  %v7298_v24 = vadd.f32 %v16581_v42, %v7233_v4  ;;  %v7316_v61 = vmax.f32 %v7306_v12, 0.0  ;;  %v7295_v15 = vadd.f32 %v17517_v25, %v7230_v55  ;;  %v17521_v42 = vld [vmem:[#allocation99_spill] sm:$0xff]  ;;  %v7490_v40 = vld [vmem:[%s16767_s5 + $0xd8] sm:$0xff]  ;;  %v16690_v17 = vpop.f32.mrf.mxu1  ;;  %v16700_v10 = vpop.f32.mrf.mxu0 }
 0x5d4   :  { %v16645_v6 = vadd.f32 %v10615_v32, %v7741_v62  ;;  %10674 = vmatprep.subr.bf16.mxu0 %v7462_v59  ;;  %v7315_v43 = vmax.f32 %v7303_v54, 0.0  ;;  %v8864_v2 = vcombine.high %v7474_v52, %v7478_v5  ;;  %v17527_v38 = vcombine.low %v17525_v18, %v17526_v9  ;;  %v7494_v31 = vld [vmem:[%s16767_s5 + $0xf8] sm:$0xff]  ;;  %v11608_v32 = vld [vmem:[%s16768_s7] sm:$0xff]  }
 0x5d5   :  { %10675 = vmatpush3.bf16.msra.mxu0 %v7178_v27  ;;  %v7459_v19 = vpack.c.bf16 %v7452_v57, %v7451_v22  ;;  %v7314_v13 = vmax.f32 %v7298_v24, 0.0  ;;  %v7313_v44 = vmax.f32 %v7295_v15, 0.0  ;;  %v8863_v33 = vcombine.low %v7474_v52, %v7478_v5  ;;  %v16692_v36 = vpop.f32.mrf.mxu1  ;;  %11311 = vmatprep.mubr.msk.bf16.mxu1 %vm8051_vm1, %v11608_v32  ;;  %v16702_v58 = vpop.f32.mrf.mxu0 }
 0x5d6   :  { %10676 = vmatprep.subr.bf16.mxu0 %v7461_v47  ;;  %v7320_v50 = vpack.c.bf16 %v7316_v61, %v7315_v43  ;;  %v8872_v34 = vcombine.high %v7482_v7, %v7486_v20  ;;  %v8871_v39 = vcombine.low %v7482_v7, %v7486_v20  ;;  %v8880_v63 = vcombine.high %v7490_v40, %v7494_v31 }
 0x5d7   :  { %v7319_v53 = vpack.c.bf16 %v7314_v13, %v7313_v44  ;;  %v8879_v35 = vcombine.low %v7490_v40, %v7494_v31  ;;  %v16694_v62 = vpop.f32.mrf.mxu1  ;;  %v16704_v51 = vpop.f32.mrf.mxu0 }
 0x5d9   :  { %10677 = vmatpush3.bf16.msra.mxu0 %v7177_v46  ;;  %v10583_v59 = vpop.f32.mrf.mxu1  ;;  %v16706_v23 = vpop.f32.mrf.mxu0 }
 0x5da   :  { %10678 = vmatprep.subr.bf16.mxu0 %v7460_v37 }
 0x5db   :  { %v10585_v27 = vpop.f32.mrf.mxu1  ;;  %v10622_v46 = vpop.f32.mrf.mxu0 }
 0x5dd   :  { %10679 = vmatpush3.bf16.msra.mxu0 %v17516_v45  ;;  %v10586_v56 = vpop.f32.mrf.mxu1  ;;  %v10623_v12 = vpop.f32.mrf.mxu0 }
 0x5de   :  { %10680 = vmatprep.subr.bf16.mxu0 %v7459_v19  ;;  %v10587_v31 = vadd.f32 %v10586_v56, %v10585_v27  ;;  %v10581_v27 = vadd.f32 %v16692_v36, %v16690_v17  ;;  %v17529_v56 = vld [vmem:[#allocation98_spill] sm:$0xff] }
 0x5df   :  { %v10588_v41 = vpop.f32.mrf.mxu1  ;;  %v10625_v37 = vpop.f32.mrf.mxu0 }
 0x5e1   :  { %10681 = vmatpush3.bf16.msra.mxu0 %v17518_v28  ;;  %v10589_v49 = vpop.f32.mrf.mxu1  ;;  %v10626_v54 = vpop.f32.mrf.mxu0 }
 0x5e2   :  { %10682 = vmatprep.subr.bf16.mxu0 %v7320_v50  ;;  %v10627_v32 = vadd.f32 %v10626_v54, %v10625_v37 }
 0x5e3   :  { %v10591_v47 = vpop.f32.mrf.mxu1  ;;  %v10628_v24 = vpop.f32.mrf.mxu0 }
 0x5e5   :  { %10683 = vmatpush3.bf16.msra.mxu0 %v17519_v1  ;;  %v10592_v3 = vpop.f32.mrf.mxu1  ;;  %v10629_v19 = vpop.f32.mrf.mxu0 }
 0x5e6   :  { %10684 = vmatprep.subr.bf16.mxu0 %v7319_v53 }
 0x5e7   :  { %v10631_v25 = vpop.f32.mrf.mxu0 }
 0x5e9   :  { %10685 = vmatpush3.bf16.msra.mxu0 %v17520_v30  ;;  %v10632_v43 = vpop.f32.mrf.mxu0 }
 0x5ea   :  { %10686 = vmatprep.subr.bf16.mxu0 %v17521_v42 }
 0x5ed   :  { %10687 = vmatpush3.bf16.msra.mxu0 %v17522_v14 }
 0x5ee   :  { %10688 = vmatprep.subr.bf16.mxu0 %v17523_v60 }
 0x5f1   :  { %10689 = vmatpush3.bf16.msra.mxu0 %v17524_v11 }
 0x5f4   :  { %7931 = vmatmul.mubr.bf16.vlgmr.msra.gmra.mxu0 %v17527_v38 }
 0x5f5   :  { %7938 = vmatprep.mubr.bf16.mxu0 %v8864_v2 }
 0x5fc   :  { %7939 = vmatmul.mubr.bf16.gmra.mxu0 %v8863_v33 }
 0x5fd   :  { %7946 = vmatprep.mubr.bf16.mxu0 %v8872_v34 }
 0x604   :  { %7947 = vmatmul.mubr.bf16.gmra.mxu0 %v8871_v39  ;;  %v10590_v39 = vadd.f32 %v10589_v49, %v10588_v41  ;;  %v10624_v49 = vadd.f32 %v10623_v12, %v10622_v46  ;;  %v7749_v12 = vadd.f32 %v10581_v27, %v16622_v29  ;;  %v8024_v27 = vpop.permute.xlu0 %8023 }
 0x605   :  { %7954 = vmatprep.mubr.bf16.mxu0 %v8880_v63 }
 0x606   :  { %v7762_v41 = vadd.f32 %v10590_v39, %v17529_v56 }
 0x60c   :  { %7955 = vmatmul.mubr.bf16.gmra.mxu0 %v8879_v35 }
 0x63c   :  { %v10650_v0 = vpop.f32.mrf.mxu1 }
 0x63e   :  { %v10651_v48 = vpop.f32.mrf.mxu1 }
 0x63f   :  { %v10652_v13 = vadd.f32 %v10651_v48, %v10650_v0  ;;  %v10593_v0 = vadd.f32 %v10592_v3, %v10591_v47  ;;  %v10630_v48 = vadd.f32 %v10629_v19, %v10628_v24  ;;  %v10633_v47 = vadd.f32 %v10632_v43, %v10631_v25  ;;  %v17530_v19 = vld [vmem:[#allocation96_spill] sm:$0xff] }
 0x640   :  { %v10653_v4 = vpop.f32.mrf.mxu1  ;;  %v10618_v25 = vadd.f32 %v16702_v58, %v16700_v10 }
 0x641   :  { %v7868_v30 = vadd.f32 %v10652_v13, %v16634_v26  ;;  %v10578_v13 = vadd.f32 %v16688_v8, %v16686_v16  ;;  %v10621_v16 = vadd.f32 %v16706_v23, %v16704_v51  ;;  %v17531_v8 = vld [vmem:[#allocation97_spill] sm:$0xff] }
 0x642   :  { %v10654_v57 = vpop.f32.mrf.mxu1 }
 0x643   :  { %v10655_v53 = vadd.f32 %v10654_v57, %v10653_v4 }
 0x644   :  { %v16708_v55 = vpop.f32.mrf.mxu1 }
 0x645   :  { %v7871_v5 = vadd.f32 %v10655_v53, %v16645_v6  ;;  %v10584_v6 = vadd.f32 %v10583_v59, %v16694_v62 }
 0x646   :  { %v16710_v22 = vpop.f32.mrf.mxu1 }
 0x648   :  { %v16712_v61 = vpop.f32.mrf.mxu1 }
 0x64a   :  { %v16714_v45 = vpop.f32.mrf.mxu1 }
 0x64b   :  { %v10661_v43 = vadd.f32 %v16714_v45, %v16712_v61 }
 0x64c   :  { %v10662_v15 = vpop.f32.mrf.mxu1 }
 0x64e   :  { %v10663_v50 = vpop.f32.mrf.mxu1 }
 0x64f   :  { %v10664_v17 = vadd.f32 %v10663_v50, %v10662_v15  ;;  %v7814_v15 = vadd.f32 %v10621_v16, %v7749_v12  ;;  %v10658_v50 = vadd.f32 %v16710_v22, %v16708_v55 }
 0x650   :  { %v10665_v42 = vpop.f32.mrf.mxu1 }
 0x651   :  { %v7879_v61 = vadd.f32 %v10661_v43, %v7814_v15 }
 0x652   :  { %v10666_v2 = vpop.f32.mrf.mxu1 }
 0x653   :  { %v10667_v53 = vadd.f32 %v10666_v2, %v10665_v42  ;;  %v7765_v42 = vadd.f32 %v10593_v0, %v17531_v8 }
 0x654   :  { %v10668_v7 = vpop.f32.mrf.mxu1 }
 0x655   :  { %v7830_v51 = vadd.f32 %v10633_v47, %v7765_v42 }
 0x656   :  { %v10669_v34 = vpop.f32.mrf.mxu1 }
 0x657   :  { %v10670_v37 = vadd.f32 %v10669_v34, %v10668_v7  ;;  %v7746_v7 = vadd.f32 %v10578_v13, %v16609_v21  ;;  %v11611_v13 = vld [vmem:[%s16768_s7 + $0x18] sm:$0xff]  }
 0x658   :  { %v10671_v63 = vpop.f32.mrf.mxu1 }
 0x65a   :  { %v10672_v54 = vpop.f32.mrf.mxu1 }
 0x6b4   :  { %v10690_v28 = vpop.f32.mrf.mxu0 }
 0x6b6   :  { %v10691_v44 = vpop.f32.mrf.mxu0 }
 0x6b7   :  { %v10692_v1 = vadd.f32 %v10691_v44, %v10690_v28  ;;  %v17528_v28 = vld [vmem:[#allocation107_spill] sm:$0xff] }
 0x6b8   :  { %v10693_v14 = vpop.f32.mrf.mxu0  ;;  %v7757_v44 = vadd.f32 %v10587_v31, %v17528_v28  ;;  %v11830_v28 = vmov 0.0  }
 0x6b9   :  { %v7933_v60 = vadd.f32 %v10692_v1, %v7868_v30  ;;  %v7754_v30 = vadd.f32 %v10584_v6, %v17530_v19  ;;  %11319 = vmatprep.subr.bf16.mxu0 %v11830_v28  ;;  %11327 = vmatprep.mubr.msk.bf16.mxu0 %vm11831_vm2, %v11830_v28 }
 0x6ba   :  { %v10694_v52 = vpop.f32.mrf.mxu0  ;;  %v7822_v59 = vadd.f32 %v10627_v32, %v7757_v44 }
 0x6bb   :  { %v10695_v11 = vadd.f32 %v10694_v52, %v10693_v14  ;;  %11612 = vtanh.f32 %v7933_v60  ;;  %v7827_v14 = vadd.f32 %v10630_v48, %v7762_v41  ;;  %v10673_v52 = vadd.f32 %v10672_v54, %v10671_v63  ;;  %v8014_v54 = vpop.permute.xlu0 %8013 }
 0x6bc   :  { %v16718_v18 = vpop.f32.mrf.mxu0  ;;  %v7887_v36 = vadd.f32 %v10667_v53, %v7822_v59  ;;  %v7819_v2 = vadd.f32 %v10624_v49, %v7754_v30  ;;  %v7811_v63 = vadd.f32 %v10618_v25, %v7746_v7  ;;  %v8029_v53 = vpop.permute.xlu1 %8028 }
 0x6bd   :  { %v7936_v9 = vadd.f32 %v10695_v11, %v7871_v5  ;;  %v7892_v5 = vadd.f32 %v10670_v37, %v7827_v14  ;;  %v7895_v39 = vadd.f32 %v10673_v52, %v7830_v51 }
 0x6be   :  { %v10697_v38 = vpop.f32.mrf.mxu0  ;;  %v7884_v31 = vadd.f32 %v10664_v17, %v7819_v2 }
 0x6bf   :  { %11614 = vtanh.f32 %v7936_v9  ;;  %v10698_v45 = vadd.f32 %v10697_v38, %v16718_v18  ;;  %v8004_v8 = vpop.permute.xlu0 %8003 }
 0x6c0   :  { %v10699_v20 = vpop.f32.mrf.mxu0  ;;  %v8019_v49 = vpop.permute.xlu1 %8018 }
 0x6c2   :  { %v10700_v33 = vpop.f32.mrf.mxu0 }
 0x6c3   :  { %v10701_v10 = vadd.f32 %v10700_v33, %v10699_v20 }
 0x6c4   :  { %v10702_v40 = vpop.f32.mrf.mxu0 }
 0x6c5   :  { %v7944_v21 = vadd.f32 %v10701_v10, %v7879_v61 }
 0x6c6   :  { %v10703_v26 = vpop.f32.mrf.mxu0 }
 0x6c7   :  { %v10704_v23 = vadd.f32 %v10703_v26, %v10702_v40  ;;  %v7876_v26 = vadd.f32 %v10658_v50, %v7811_v63  ;;  %v8137_v50 = vld [vmem:[%s16769_s9] sm:$0xf] }
 0x6c8   :  { %v10705_v35 = vpop.f32.mrf.mxu0  ;;  %v11613_v57 = vpop.eup %11612 }
 0x6c9   :  { %v7941_v32 = vadd.f32 %v10698_v45, %v7876_v26 }
 0x6ca   :  { %v10706_v4 = vpop.f32.mrf.mxu0 }
 0x6cb   :  { %v10707_v3 = vadd.f32 %v10706_v4, %v10705_v35  ;;  %v7949_v35 = vadd.f32 %v10704_v23, %v7884_v31  ;;  %v11609_v4 = vld [vmem:[%s16768_s7 + $0x8] sm:$0xff]  }
 0x6cc   :  { %v11615_v1 = vpop.eup %11614  ;;  %v10708_v62 = vpop.f32.mrf.mxu0 }
 0x6cd   :  { %v7979_v24 = vpack.c.bf16 %v11615_v1, %v11613_v57  ;;  %v7952_v9 = vadd.f32 %v10707_v3, %v7887_v36  ;;  %v11610_v57 = vld [vmem:[%s16768_s7 + $0x10] sm:$0xff]   ;;  %v7994_v36 = vpop.permute.xlu0 %7993 }
 0x6ce   :  { %v10709_v60 = vpop.f32.mrf.mxu0 }
 0x6cf   :  { %v10710_v46 = vadd.f32 %v10709_v60, %v10708_v62  ;;  %11616 = vtanh.f32 %v7952_v9 }
 0x6d0   :  { %v10711_v11 = vpop.f32.mrf.mxu0 }
 0x6d1   :  { %v7957_v34 = vadd.f32 %v10710_v46, %v7892_v5 }
 0x6d2   :  { %v10712_v29 = vpop.f32.mrf.mxu0 }
 0x6d3   :  { %v10713_v58 = vadd.f32 %v10712_v29, %v10711_v11  ;;  %11618 = vtanh.f32 %v7957_v34  ;;  %v8146_v34 = vpop.permute.xlu0 %8145 }
 0x6d5   :  { %v7960_v40 = vadd.f32 %v10713_v58, %v7895_v39 }
 0x6d7   :  { %11620 = vtanh.f32 %v7960_v40 }
 0x6d8   :  { %11622 = vtanh.f32 %v7949_v35 }
 0x6d9   :  { %11624 = vtanh.f32 %v7944_v21 }
 0x6da   :  { %11626 = vtanh.f32 %v7941_v32 }
 0x6dc   :  { %v11617_v55 = vpop.eup %11616 }
 0x6e0   :  { %v11619_v22 = vpop.eup %11618 }
 0x6e4   :  { %v11621_v6 = vpop.eup %11620 }
 0x6e5   :  { %v7982_v20 = vpack.c.bf16 %v11621_v6, %v11619_v22  ;;  %v11623_v33 = vpop.eup %11622 }
 0x6e6   :  { %v7981_v0 = vpack.c.bf16 %v11617_v55, %v11623_v33  ;;  %v11625_v48 = vpop.eup %11624 }
 0x6e7   :  { %11303 = vmatprep.subr.bf16.mxu1 %v7982_v20  ;;  %v11627_v18 = vpop.eup %11626 }
 0x6e8   :  { %11304 = vmatpush3.bf16.msra.mxu1 %v7982_v20  ;;  %v7980_v38 = vpack.c.bf16 %v11625_v48, %v11627_v18 }
 0x6e9   :  { %11305 = vmatprep.subr.bf16.mxu1 %v7981_v0 }
 0x6ec   :  { %11306 = vmatpush3.bf16.msra.mxu1 %v7981_v0 }
 0x6ed   :  { %11307 = vmatprep.subr.bf16.mxu1 %v7980_v38 }
 0x6f0   :  { %11308 = vmatpush3.bf16.msra.mxu1 %v7980_v38 }
 0x6f1   :  { %11309 = vmatprep.subr.bf16.mxu1 %v7979_v24 }
 0x6f4   :  { %11310 = vmatpush3.bf16.msra.mxu1 %v7979_v24  ;;  %v8009_v24 = vpop.permute.xlu1 %8008 }
 0x6f7   :  { %11312 = vmatmul.mubr.msk.bf16.vlgmr.msra.gmra.mxu1 %vm8051_vm1, %v11609_v4 }
 0x6f8   :  { %11315 = vmatprep.mubr.msk.bf16.mxu1 %vm8051_vm1, %v11610_v57  ;;  %v7999_v60 = vpop.permute.xlu1 %7998 }
 0x6ff   :  { %11316 = vmatmul.mubr.msk.bf16.gmra.mxu1 %vm8051_vm1, %v11611_v13 }
 0x7b7   :  { %v11313_v44 = vpop.f32.mrf.mxu1 }
 0x7b8   :  { %v8107_v14 = vadd.f32 %v11313_v44, %v8004_v8 }
 0x7b9   :  { %v8098_v1 = vpop.f32.mrf.mxu1 }
 0x7ba   :  { %v8099_v52 = vadd.f32 %v8098_v1, %v7994_v36 }
 0x7bb   :  { %v11314_v56 = vpop.f32.mrf.mxu1 }
 0x7bc   :  { %v8110_v42 = vadd.f32 %v11314_v56, %v8009_v24 }
 0x7bd   :  { %v8101_v41 = vpop.f32.mrf.mxu1 }
 0x7be   :  { %v8102_v17 = vadd.f32 %v8101_v41, %v7999_v60 }
 0x7bf   :  { %v11317_v37 = vpop.f32.mrf.mxu1 }
 0x7c0   :  { %v8123_v62 = vadd.f32 %v11317_v37, %v8024_v27 }
 0x7c1   :  { %v8114_v59 = vpop.f32.mrf.mxu1 }
 0x7c2   :  { %11628 = vtanh.f32 %v8123_v62  ;;  %v8115_v30 = vadd.f32 %v8114_v59, %v8014_v54 }
 0x7c3   :  { %v11318_v47 = vpop.f32.mrf.mxu1 }
 0x7c4   :  { %v8126_v3 = vadd.f32 %v11318_v47, %v8029_v53 }
 0x7c5   :  { %v8117_v19 = vpop.f32.mrf.mxu1 }
 0x7c6   :  { %11630 = vtanh.f32 %v8126_v3  ;;  %v8118_v16 = vadd.f32 %v8117_v19, %v8019_v49 }
 0x7c8   :  { %11632 = vtanh.f32 %v8118_v16 }
 0x7c9   :  { %11634 = vtanh.f32 %v8115_v30 }
 0x7ca   :  { %11636 = vtanh.f32 %v8110_v42 }
 0x7cb   :  { %11638 = vtanh.f32 %v8107_v14 }
 0x7cc   :  { %11640 = vtanh.f32 %v8102_v17 }
 0x7cd   :  { %11642 = vtanh.f32 %v8099_v52 }
 0x7cf   :  { %v11629_v46 = vpop.eup %11628 }
 0x7d3   :  { %v11631_v12 = vpop.eup %11630 }
 0x7d4   :  { %v8141_v25 = vpack.c.bf16 %v11631_v12, %v11629_v46 }
 0x7d5   :  { %v11633_v43 = vpop.eup %11632 }
 0x7d6   :  { %11320 = vmatpush3.bf16.msra.mxu0 %v8141_v25  ;;  %v11635_v5 = vpop.eup %11634 }
 0x7d7   :  { %11321 = vmatprep.subr.bf16.mxu0 %v11830_v28  ;;  %v8140_v11 = vpack.c.bf16 %v11633_v43, %v11635_v5  ;;  %v11637_v2 = vpop.eup %11636 }
 0x7d8   :  { %v11639_v51 = vpop.eup %11638 }
 0x7d9   :  { %v8139_v23 = vpack.c.bf16 %v11637_v2, %v11639_v51  ;;  %v11641_v9 = vpop.eup %11640 }
 0x7da   :  { %11322 = vmatpush3.bf16.msra.mxu0 %v8140_v11  ;;  %v11643_v7 = vpop.eup %11642 }
 0x7db   :  { %11323 = vmatprep.subr.bf16.mxu0 %v11830_v28  ;;  %v8138_v15 = vpack.c.bf16 %v11641_v9, %v11643_v7 }
 0x7de   :  { %11324 = vmatpush3.bf16.msra.mxu0 %v8139_v23 }
 0x7df   :  { %11325 = vmatprep.subr.bf16.mxu0 %v11830_v28 }
 0x7e2   :  { %11326 = vmatpush3.bf16.msra.mxu0 %v8138_v15 }
 0x7e5   :  { %11328 = vmatmul.mubr.msk.bf16.vlgmr.msra.gmra.mxu0 %vm8051_vm1, %v8137_v50 }
 0x8a5   :  { %v8185_v29 = vpop.f32.mrf.mxu0 }
 0x8a6   :  { %v8186_v31 = vadd.f32 %v8185_v29, %v8146_v34 }
 0x8a7   :  { %v11329_v39 = vpop.f32.mrf.mxu0 }
 0x8a8   :  { %11644 = vtanh.f32 %v8186_v31 }
 0x8a9   :  { %v8188_v10 = vpop.f32.mrf.mxu0 }
 0x8ab   :  { %v11330_v58 = vpop.f32.mrf.mxu0 }
 0x8b5   :  { %v11645_v63 = vpop.eup %11644 }
 0x8b6   :  { %8192 = vst [vmem:[%s16770_s11] sm:$0xff] %v11645_v63 }

</bundles_post_ra>
